<compile_context>
chip_gen: v6e
topology: v6e:2x2x1
jax: 0.10.0
libtpu: 0.0.40
codegen_flags: <defaults>
</compile_context>

<pallas_src>
import jax
import jax.numpy as jnp
from jax.experimental import pallas as pl
from jax.experimental.pallas import tpu as pltpu

HEADS = 9          # FeaStConv heads
HPAD = 16          # heads padded to 16 lanes for clean layouts (pad heads are inert)
LEAKY_SLOPE = 0.1
_F32 = jnp.float32
_BF16 = jnp.bfloat16


# ----------------------------------------------------------------------------
# In-kernel helpers
# ----------------------------------------------------------------------------
def _leaky(x):
    return jnp.where(x >= 0.0, x, LEAKY_SLOPE * x)


def _feast(parts, c_ref, b_ref, a, rep_ref, sum_ref, leaky):
    """FeaStConv (mean aggregation, self loops) on a dense row-normalized adjacency.

    parts: list of (x_k, w_k, u_k) with x_k (N, Cin_k) f32, w_k (Cin_k, H*Cout) bf16,
           u_k (Cin_k, HPAD) bf16.  Multiple parts implement channel-concatenated
           inputs via split weights (no lane concat needed).

    Factored head softmax:
        q_h(i,j) = Etgt[i,h] * Esrc[j,h] / Z[i,j],   Z = Etgt @ Esrc^T
    so the whole message passing is a single (N,N)@(N,H*Cout) matmul.
    """
    t = None
    xw = None
    for xk, wk, uk in parts:
        xb = xk.astype(_BF16)
        tk = jnp.dot(xb, uk, preferred_element_type=_F32)      # (N, HPAD)
        xwk = jnp.dot(xb, wk, preferred_element_type=_F32)     # (N, H*Cout)
        t = tk if t is None else t + tk
        xw = xwk if xw is None else xw + xwk

    s = t + c_ref[...]                                          # source logits x_j.u + c
    # padded head lanes of c are -1e30 -> e_s exactly 0 there (inert).
    e_s = jnp.exp(s - jnp.max(s, axis=1, keepdims=True))        # (N, HPAD), in (0, 1]
    e_t = jnp.exp(jnp.min(t, axis=1, keepdims=True) - t)        # (N, HPAD), in (0, 1]

    # per-pair softmax denominator over heads (rank-HPAD): one small NT matmul.
    z = jnp.dot(e_t, e_s.T, preferred_element_type=_F32)        # (N, N)
    bmat = a * pl.reciprocal(jnp.maximum(z, 1e-30), approx=True)  # 0 off-edge (a==0)

    rep = rep_ref[...]                                          # (HPAD, H*Cout) 0/1
    # scale each head block of XW by Esrc, aggregate with one matmul, then scale
    # by Etgt and sum head blocks with the 0/1 "sum" matrix.
    g = xw * jnp.dot(e_s.astype(_BF16), rep, preferred_element_type=_F32)
    p = jnp.dot(bmat.astype(_BF16), g.astype(_BF16), preferred_element_type=_F32)
    q = p * jnp.dot(e_t.astype(_BF16), rep, preferred_element_type=_F32)
    out = jnp.dot(q.astype(_BF16), sum_ref[...], preferred_element_type=_F32) + b_ref[...]
    return _leaky(out) if leaky else out


# ----------------------------------------------------------------------------
# The single fused kernel: whole FGCNet forward
# ----------------------------------------------------------------------------
def _fgcnet_kernel(
        x1_ref, a1_ref, a2_ref, a3_ref,
        p21_ref, p32_ref, up23_ref, up12_ref,
        rep32_ref, rep64_ref, rep128_ref,
        sum32_ref, sum64_ref, sum128_ref,
        lw1, lu1, lc1, lb1,
        lw2, lu2, lc2, lb2,
        lw3, lu3, lc3, lb3,
        lw4, lu4, lc4, lb4,
        rw1, ru1, rc1, rb1,
        rw2, ru2, rc2, rb2,
        rw3, ru3, rc3, rb3,
        rw4, ru4, rc4, rb4,
        fc1w_ref, fc1b_ref, fc2w_ref, fc2b_ref,
        o_ref):
    a1 = a1_ref[...]
    a2 = a2_ref[...]
    a3 = a3_ref[...]

    def down_or_up(m_ref, x):   # pooling / unpooling as a tiny MXU matmul
        return jnp.dot(m_ref[...], x.astype(_BF16), preferred_element_type=_F32)

    # -------- encoder -------------------------------------------------------
    x1a = _feast([(x1_ref[...], lw1[...], lu1[...])], lc1, lb1, a1,
                 rep32_ref, sum32_ref, leaky=True)                      # (N1, 32)
    x2 = down_or_up(p21_ref, x1a)                                       # (N2, 32)
    x2a = _feast([(x2, lw2[...], lu2[...])], lc2, lb2, a2,
                 rep64_ref, sum64_ref, leaky=True)                      # (N2, 64)
    x3 = down_or_up(p32_ref, x2a)                                       # (N3, 64)
    x3a = _feast([(x3, lw3[...], lu3[...])], lc3, lb3, a3,
                 rep128_ref, sum128_ref, leaky=True)                    # (N3, 128)
    x3b = _feast([(x3a, lw4[...], lu4[...])], lc4, lb4, a3,
                 rep128_ref, sum128_ref, leaky=True)                    # (N3, 128)

    # -------- decoder -------------------------------------------------------
    f2 = down_or_up(up23_ref, x3b)                                      # (N2, 128) unpool
    f2 = _feast([(f2, rw1[...], ru1[...])], rc1, rb1, a2,
                rep64_ref, sum64_ref, leaky=False)                      # (N2, 64)
    # r_conv2 on concat([x2a, f2], axis=1)  ==  split-weight sum (no lane concat)
    x2b = _feast([(x2a, rw2[0:64, :], ru2[0:64, :]),
                  (f2, rw2[64:128, :], ru2[64:128, :])],
                 rc2, rb2, a2, rep64_ref, sum64_ref, leaky=True)        # (N2, 64)

    f1 = down_or_up(up12_ref, x2b)                                      # (N1, 64) unpool
    f1 = _feast([(f1, rw3[...], ru3[...])], rc3, rb3, a1,
                rep32_ref, sum32_ref, leaky=False)                      # (N1, 32)
    feat = _feast([(x1a, rw4[0:32, :], ru4[0:32, :]),
                   (f1, rw4[32:64, :], ru4[32:64, :])],
                  rc4, rb4, a1, rep32_ref, sum32_ref, leaky=True)       # (N1, 32)

    # -------- fc1 -> leaky -> fc2 (lane-padded to 128) -> L2 normalize ------
    h = jnp.dot(feat.astype(_BF16), fc1w_ref[...], preferred_element_type=_F32)
    h = _leaky(h + fc1b_ref[...])
    y = jnp.dot(h.astype(_BF16), fc2w_ref[...], preferred_element_type=_F32) + fc2b_ref[...]
    # F.normalize(y, dim=1); padded fc2 columns are exactly zero, so they do not
    # affect the norm.  y * rsqrt(max(ss, 1e-24)) == y / max(||y||, 1e-12).
    inv = jax.lax.rsqrt(jnp.maximum(jnp.sum(y * y, axis=1, keepdims=True), 1e-24))
    o_ref[...] = y * inv


# ----------------------------------------------------------------------------
# Host-side (per-graph, hoisted) preprocessing helpers -- plain JAX
# ----------------------------------------------------------------------------
def _normalize_adj(a01):
    n = a01.shape[0]
    a = jnp.maximum(a01, jnp.eye(n, dtype=_F32))         # add self loops
    return a / jnp.sum(a, axis=1, keepdims=True)          # mean aggregation weights


def _coarsen_adj(a01):
    n = a01.shape[0]
    m = n // 2
    c = a01.reshape(m, 2, m, 2).sum(axis=(1, 3))
    c = (c > 0).astype(_F32)
    return c * (1.0 - jnp.eye(m, dtype=_F32))             # drop intra-cluster self edges


def _pool_matrix(n):          # (n//2, n): mean of node pairs (cluster i -> i//2)
    m = n // 2
    return 0.5 * (jnp.arange(n)[None, :] // 2 == jnp.arange(m)[:, None]).astype(_F32)


def _unpool_matrix(n):        # (n, n//2): row i gets coarse row i//2
    m = n // 2
    return (jnp.arange(n)[:, None] // 2 == jnp.arange(m)[None, :]).astype(_F32)


def _head_repeat(cout):       # (HPAD, HEADS*cout): R[h, k] = (k // cout == h)
    k = jnp.arange(HEADS * cout)
    h = jnp.arange(HPAD)
    return (k[None, :] // cout == h[:, None]).astype(_F32)


def _head_sum(cout):          # (HEADS*cout, cout): S[k, c] = (k % cout == c)
    k = jnp.arange(HEADS * cout)
    return (k[:, None] % cout == jnp.arange(cout)[None, :]).astype(_F32)


def _pad_heads(u, c):
    cin = u.shape[0]
    u_p = jnp.zeros((cin, HPAD), _F32).at[:, :HEADS].set(u)
    c_p = jnp.full((1, HPAD), -1e30, _F32).at[:, :HEADS].set(c)   # pad heads -> exp()=0
    return u_p, c_p


# ----------------------------------------------------------------------------
# Parameter construction (deterministic, in-script)
# ----------------------------------------------------------------------------
def init_feast(key, cin, cout, heads=HEADS):
    k1, k2, k3 = jax.random.split(key, 3)
    return {
        "w": 0.1 * jax.random.normal(k1, (cin, heads * cout), _F32),
        "u": 0.1 * jax.random.normal(k2, (cin, heads), _F32),
        "c": 0.1 * jax.random.normal(k3, (1, heads), _F32),
        "b": jnp.zeros((1, cout), _F32),
    }


def init_linear(key, cin, cout):
    k1, k2 = jax.random.split(key)
    bound = 1.0 / float(cin) ** 0.5
    return {"w": jax.random.uniform(k1, (cin, cout), _F32, -bound, bound),
            "b": jax.random.uniform(k2, (1, cout), _F32, -bound, bound)}


# ----------------------------------------------------------------------------
# FGCNet forward: one fused pallas_call
# ----------------------------------------------------------------------------
def fgcnet_forward(params, x1, adj1):
    n1 = x1.shape[0]
    n2 = n1 // 2

    # per-graph preprocessing, hoisted out of the kernel and done once per level
    adj1_01 = (adj1 > 0).astype(_F32)
    adj2_01 = _coarsen_adj(adj1_01)
    adj3_01 = _coarsen_adj(adj2_01)
    a1 = _normalize_adj(adj1_01)
    a2 = _normalize_adj(adj2_01)
    a3 = _normalize_adj(adj3_01)

    p21 = _pool_matrix(n1).astype(_BF16)
    p32 = _pool_matrix(n2).astype(_BF16)
    up23 = _unpool_matrix(n2).astype(_BF16)
    up12 = _unpool_matrix(n1).astype(_BF16)

    rep = {co: _head_repeat(co).astype(_BF16) for co in (32, 64, 128)}
    ssum = {co: _head_sum(co).astype(_BF16) for co in (32, 64, 128)}

    def feast_args(name):
        p = params[name]
        u_p, c_p = _pad_heads(p["u"], p["c"])
        return [p["w"].astype(_BF16), u_p.astype(_BF16), c_p, p["b"]]

    nout = params["fc2"]["w"].shape[1]
    pad = 128                                              # lane-dense kernel output
    fc2w = jnp.zeros((params["fc2"]["w"].shape[0], pad), _F32)
    fc2w = fc2w.at[:, :nout].set(params["fc2"]["w"]).astype(_BF16)
    fc2b = jnp.zeros((1, pad), _F32).at[:, :nout].set(params["fc2"]["b"])

    flat = ([x1, a1, a2, a3, p21, p32, up23, up12,
             rep[32], rep[64], rep[128], ssum[32], ssum[64], ssum[128]]
            + feast_args("l_conv1") + feast_args("l_conv2")
            + feast_args("l_conv3") + feast_args("l_conv4")
            + feast_args("r_conv1") + feast_args("r_conv2")
            + feast_args("r_conv3") + feast_args("r_conv4")
            + [params["fc1"]["w"].astype(_BF16), params["fc1"]["b"], fc2w, fc2b])

    vmem = pl.BlockSpec(memory_space=pltpu.MemorySpace.VMEM)
    out = pl.pallas_call(
        _fgcnet_kernel,
        out_shape=jax.ShapeDtypeStruct((n1, pad), _F32),
        in_specs=[vmem] * len(flat),
        out_specs=vmem,
    )(*flat)
    return out[:, :nout]                                   # (N1, 3), L2-normalized rows


# ----------------------------------------------------------------------------
if __name__ == "__main__":
    key = jax.random.PRNGKey(0)
    kx, kp = jax.random.split(key)

    N1 = 64
    # deterministic symmetric graph: ring-like neighborhoods, no self loops
    idx = jnp.arange(N1)
    adj = jnp.zeros((N1, N1), _F32)
    for off in (1, 2, 5):
        adj = adj.at[idx, (idx + off) % N1].set(1.0)
        adj = adj.at[(idx + off) % N1, idx].set(1.0)

    x = jax.random.normal(kx, (N1, 6), _F32)

    keys = jax.random.split(kp, 10)
    params = {
        "l_conv1": init_feast(keys[0], 6, 32),
        "l_conv2": init_feast(keys[1], 32, 64),
        "l_conv3": init_feast(keys[2], 64, 128),
        "l_conv4": init_feast(keys[3], 128, 128),
        "r_conv1": init_feast(keys[4], 128, 64),
        "r_conv2": init_feast(keys[5], 128, 64),
        "r_conv3": init_feast(keys[6], 64, 32),
        "r_conv4": init_feast(keys[7], 64, 32),
        "fc1": init_linear(keys[8], 32, 1024),
        "fc2": init_linear(keys[9], 1024, 3),
    }

    out = jax.jit(fgcnet_forward)(params, x, adj)
    out = jax.block_until_ready(out)
    assert out.shape == (N1, 3)
    assert bool(jnp.all(jnp.isfinite(out)))
    print("KERNEL_OK")
</pallas_src>

<mosaic_0001>
module attributes {stable_mosaic.version = 11 : i64} {
  func.func @_fgcnet_kernel(%arg0: memref<64x6xf32, #tpu.memory_space<vmem>>, %arg1: memref<64x64xf32, #tpu.memory_space<vmem>>, %arg2: memref<32x32xf32, #tpu.memory_space<vmem>>, %arg3: memref<16x16xf32, #tpu.memory_space<vmem>>, %arg4: memref<32x64xbf16, #tpu.memory_space<vmem>>, %arg5: memref<16x32xbf16, #tpu.memory_space<vmem>>, %arg6: memref<32x16xbf16, #tpu.memory_space<vmem>>, %arg7: memref<64x32xbf16, #tpu.memory_space<vmem>>, %arg8: memref<16x288xbf16, #tpu.memory_space<vmem>>, %arg9: memref<16x576xbf16, #tpu.memory_space<vmem>>, %arg10: memref<16x1152xbf16, #tpu.memory_space<vmem>>, %arg11: memref<288x32xbf16, #tpu.memory_space<vmem>>, %arg12: memref<576x64xbf16, #tpu.memory_space<vmem>>, %arg13: memref<1152x128xbf16, #tpu.memory_space<vmem>>, %arg14: memref<6x288xbf16, #tpu.memory_space<vmem>>, %arg15: memref<6x16xbf16, #tpu.memory_space<vmem>>, %arg16: memref<1x16xf32, #tpu.memory_space<vmem>>, %arg17: memref<1x32xf32, #tpu.memory_space<vmem>>, %arg18: memref<32x576xbf16, #tpu.memory_space<vmem>>, %arg19: memref<32x16xbf16, #tpu.memory_space<vmem>>, %arg20: memref<1x16xf32, #tpu.memory_space<vmem>>, %arg21: memref<1x64xf32, #tpu.memory_space<vmem>>, %arg22: memref<64x1152xbf16, #tpu.memory_space<vmem>>, %arg23: memref<64x16xbf16, #tpu.memory_space<vmem>>, %arg24: memref<1x16xf32, #tpu.memory_space<vmem>>, %arg25: memref<1x128xf32, #tpu.memory_space<vmem>>, %arg26: memref<128x1152xbf16, #tpu.memory_space<vmem>>, %arg27: memref<128x16xbf16, #tpu.memory_space<vmem>>, %arg28: memref<1x16xf32, #tpu.memory_space<vmem>>, %arg29: memref<1x128xf32, #tpu.memory_space<vmem>>, %arg30: memref<128x576xbf16, #tpu.memory_space<vmem>>, %arg31: memref<128x16xbf16, #tpu.memory_space<vmem>>, %arg32: memref<1x16xf32, #tpu.memory_space<vmem>>, %arg33: memref<1x64xf32, #tpu.memory_space<vmem>>, %arg34: memref<128x576xbf16, #tpu.memory_space<vmem>>, %arg35: memref<128x16xbf16, #tpu.memory_space<vmem>>, %arg36: memref<1x16xf32, #tpu.memory_space<vmem>>, %arg37: memref<1x64xf32, #tpu.memory_space<vmem>>, %arg38: memref<64x288xbf16, #tpu.memory_space<vmem>>, %arg39: memref<64x16xbf16, #tpu.memory_space<vmem>>, %arg40: memref<1x16xf32, #tpu.memory_space<vmem>>, %arg41: memref<1x32xf32, #tpu.memory_space<vmem>>, %arg42: memref<64x288xbf16, #tpu.memory_space<vmem>>, %arg43: memref<64x16xbf16, #tpu.memory_space<vmem>>, %arg44: memref<1x16xf32, #tpu.memory_space<vmem>>, %arg45: memref<1x32xf32, #tpu.memory_space<vmem>>, %arg46: memref<32x1024xbf16, #tpu.memory_space<vmem>>, %arg47: memref<1x1024xf32, #tpu.memory_space<vmem>>, %arg48: memref<1024x128xbf16, #tpu.memory_space<vmem>>, %arg49: memref<1x128xf32, #tpu.memory_space<vmem>>, %arg50: memref<64x128xf32, #tpu.memory_space<vmem>>) attributes {dimension_semantics = [], scalar_prefetch = 0 : i64, scratch_operands = 0 : i64, tpu.core_type = #tpu.core_type<tc>} {
    %c0 = arith.constant 0 : index
    %c0_0 = arith.constant 0 : index
    %0 = vector.load %arg1[%c0, %c0_0] : memref<64x64xf32, #tpu.memory_space<vmem>>, vector<64x64xf32>
    %c0_1 = arith.constant 0 : index
    %c0_2 = arith.constant 0 : index
    %1 = vector.load %arg2[%c0_1, %c0_2] : memref<32x32xf32, #tpu.memory_space<vmem>>, vector<32x32xf32>
    %c0_3 = arith.constant 0 : index
    %c0_4 = arith.constant 0 : index
    %2 = vector.load %arg3[%c0_3, %c0_4] : memref<16x16xf32, #tpu.memory_space<vmem>>, vector<16x16xf32>
    %c0_5 = arith.constant 0 : index
    %c0_6 = arith.constant 0 : index
    %3 = vector.load %arg0[%c0_5, %c0_6] : memref<64x6xf32, #tpu.memory_space<vmem>>, vector<64x6xf32>
    %c0_7 = arith.constant 0 : index
    %c0_8 = arith.constant 0 : index
    %4 = vector.load %arg14[%c0_7, %c0_8] : memref<6x288xbf16, #tpu.memory_space<vmem>>, vector<6x288xbf16>
    %c0_9 = arith.constant 0 : index
    %c0_10 = arith.constant 0 : index
    %5 = vector.load %arg15[%c0_9, %c0_10] : memref<6x16xbf16, #tpu.memory_space<vmem>>, vector<6x16xbf16>
    %6 = arith.truncf %3 : vector<64x6xf32> to vector<64x6xbf16>
    %cst = arith.constant dense<0.000000e+00> : vector<64x16xf32>
    %7 = tpu.matmul %6, %5, %cst {dimension_numbers = #tpu.dot_dimension_numbers<[1], [0], [0], [1], [0, 0, 1, 1], [], []>} : vector<64x6xbf16>, vector<6x16xbf16>, vector<64x16xf32> -> vector<64x16xf32>
    %cst_11 = arith.constant dense<0.000000e+00> : vector<64x288xf32>
    %8 = tpu.matmul %6, %4, %cst_11 {dimension_numbers = #tpu.dot_dimension_numbers<[1], [0], [0], [1], [0, 0, 1, 1], [], []>} : vector<64x6xbf16>, vector<6x288xbf16>, vector<64x288xf32> -> vector<64x288xf32>
    %c0_12 = arith.constant 0 : index
    %c0_13 = arith.constant 0 : index
    %9 = vector.load %arg16[%c0_12, %c0_13] : memref<1x16xf32, #tpu.memory_space<vmem>>, vector<1x16xf32>
    %10 = vector.broadcast %9 : vector<1x16xf32> to vector<64x16xf32>
    %11 = arith.addf %7, %10 : vector<64x16xf32>
    %cst_14 = arith.constant dense<0xFF800000> : vector<64xf32>
    %12 = vector.multi_reduction <maximumf>, %11, %cst_14 [1] : vector<64x16xf32> to vector<64xf32>
    %13 = vector.shape_cast %12 : vector<64xf32> to vector<64x1xf32>
    %14 = vector.broadcast %13 : vector<64x1xf32> to vector<64x16xf32>
    %15 = arith.subf %11, %14 : vector<64x16xf32>
    %16 = math.exp %15 : vector<64x16xf32>
    %cst_15 = arith.constant dense<0x7F800000> : vector<64xf32>
    %17 = vector.multi_reduction <minimumf>, %7, %cst_15 [1] : vector<64x16xf32> to vector<64xf32>
    %18 = vector.shape_cast %17 : vector<64xf32> to vector<64x1xf32>
    %19 = vector.broadcast %18 : vector<64x1xf32> to vector<64x16xf32>
    %20 = arith.subf %19, %7 : vector<64x16xf32>
    %21 = math.exp %20 : vector<64x16xf32>
    %22 = tpu.transpose %16, [1, 0] : vector<64x16xf32> -> vector<16x64xf32>
    %cst_16 = arith.constant dense<0.000000e+00> : vector<64x64xf32>
    %23 = tpu.matmul %21, %22, %cst_16 {dimension_numbers = #tpu.dot_dimension_numbers<[1], [0], [0], [1], [0, 0, 1, 1], [], []>} : vector<64x16xf32>, vector<16x64xf32>, vector<64x64xf32> -> vector<64x64xf32>
    %cst_17 = arith.constant 1.000000e-30 : f32
    %24 = vector.broadcast %cst_17 : f32 to vector<64x64xf32>
    %25 = arith.maximumf %23, %24 : vector<64x64xf32>
    %26 = tpu.reciprocal %25 {approx = true} : vector<64x64xf32> -> vector<64x64xf32>
    %27 = arith.mulf %0, %26 : vector<64x64xf32>
    %c0_18 = arith.constant 0 : index
    %c0_19 = arith.constant 0 : index
    %28 = vector.load %arg8[%c0_18, %c0_19] : memref<16x288xbf16, #tpu.memory_space<vmem>>, vector<16x288xbf16>
    %29 = arith.truncf %16 : vector<64x16xf32> to vector<64x16xbf16>
    %cst_20 = arith.constant dense<0.000000e+00> : vector<64x288xf32>
    %30 = tpu.matmul %29, %28, %cst_20 {dimension_numbers = #tpu.dot_dimension_numbers<[1], [0], [0], [1], [0, 0, 1, 1], [], []>} : vector<64x16xbf16>, vector<16x288xbf16>, vector<64x288xf32> -> vector<64x288xf32>
    %31 = arith.mulf %8, %30 : vector<64x288xf32>
    %32 = arith.truncf %27 : vector<64x64xf32> to vector<64x64xbf16>
    %33 = arith.truncf %31 : vector<64x288xf32> to vector<64x288xbf16>
    %cst_21 = arith.constant dense<0.000000e+00> : vector<64x288xf32>
    %34 = tpu.matmul %32, %33, %cst_21 {dimension_numbers = #tpu.dot_dimension_numbers<[1], [0], [0], [1], [0, 0, 1, 1], [], []>} : vector<64x64xbf16>, vector<64x288xbf16>, vector<64x288xf32> -> vector<64x288xf32>
    %35 = arith.truncf %21 : vector<64x16xf32> to vector<64x16xbf16>
    %cst_22 = arith.constant dense<0.000000e+00> : vector<64x288xf32>
    %36 = tpu.matmul %35, %28, %cst_22 {dimension_numbers = #tpu.dot_dimension_numbers<[1], [0], [0], [1], [0, 0, 1, 1], [], []>} : vector<64x16xbf16>, vector<16x288xbf16>, vector<64x288xf32> -> vector<64x288xf32>
    %37 = arith.mulf %34, %36 : vector<64x288xf32>
    %38 = arith.truncf %37 : vector<64x288xf32> to vector<64x288xbf16>
    %c0_23 = arith.constant 0 : index
    %c0_24 = arith.constant 0 : index
    %39 = vector.load %arg11[%c0_23, %c0_24] : memref<288x32xbf16, #tpu.memory_space<vmem>>, vector<288x32xbf16>
    %cst_25 = arith.constant dense<0.000000e+00> : vector<64x32xf32>
    %40 = tpu.matmul %38, %39, %cst_25 {dimension_numbers = #tpu.dot_dimension_numbers<[1], [0], [0], [1], [0, 0, 1, 1], [], []>} : vector<64x288xbf16>, vector<288x32xbf16>, vector<64x32xf32> -> vector<64x32xf32>
    %c0_26 = arith.constant 0 : index
    %c0_27 = arith.constant 0 : index
    %41 = vector.load %arg17[%c0_26, %c0_27] : memref<1x32xf32, #tpu.memory_space<vmem>>, vector<1x32xf32>
    %42 = vector.broadcast %41 : vector<1x32xf32> to vector<64x32xf32>
    %43 = arith.addf %40, %42 : vector<64x32xf32>
    %cst_28 = arith.constant 0.000000e+00 : f32
    %44 = vector.broadcast %cst_28 : f32 to vector<64x32xf32>
    %45 = arith.cmpf oge, %43, %44 : vector<64x32xf32>
    %cst_29 = arith.constant 1.000000e-01 : f32
    %46 = vector.broadcast %cst_29 : f32 to vector<64x32xf32>
    %47 = arith.mulf %46, %43 : vector<64x32xf32>
    %48 = arith.select %45, %43, %47 : vector<64x32xi1>, vector<64x32xf32>
    %c0_30 = arith.constant 0 : index
    %c0_31 = arith.constant 0 : index
    %49 = vector.load %arg4[%c0_30, %c0_31] : memref<32x64xbf16, #tpu.memory_space<vmem>>, vector<32x64xbf16>
    %50 = arith.truncf %48 : vector<64x32xf32> to vector<64x32xbf16>
    %cst_32 = arith.constant dense<0.000000e+00> : vector<32x32xf32>
    %51 = tpu.matmul %49, %50, %cst_32 {dimension_numbers = #tpu.dot_dimension_numbers<[1], [0], [0], [1], [0, 0, 1, 1], [], []>} : vector<32x64xbf16>, vector<64x32xbf16>, vector<32x32xf32> -> vector<32x32xf32>
    %c0_33 = arith.constant 0 : index
    %c0_34 = arith.constant 0 : index
    %52 = vector.load %arg18[%c0_33, %c0_34] : memref<32x576xbf16, #tpu.memory_space<vmem>>, vector<32x576xbf16>
    %c0_35 = arith.constant 0 : index
    %c0_36 = arith.constant 0 : index
    %53 = vector.load %arg19[%c0_35, %c0_36] : memref<32x16xbf16, #tpu.memory_space<vmem>>, vector<32x16xbf16>
    %54 = arith.truncf %51 : vector<32x32xf32> to vector<32x32xbf16>
    %cst_37 = arith.constant dense<0.000000e+00> : vector<32x16xf32>
    %55 = tpu.matmul %54, %53, %cst_37 {dimension_numbers = #tpu.dot_dimension_numbers<[1], [0], [0], [1], [0, 0, 1, 1], [], []>} : vector<32x32xbf16>, vector<32x16xbf16>, vector<32x16xf32> -> vector<32x16xf32>
    %cst_38 = arith.constant dense<0.000000e+00> : vector<32x576xf32>
    %56 = tpu.matmul %54, %52, %cst_38 {dimension_numbers = #tpu.dot_dimension_numbers<[1], [0], [0], [1], [0, 0, 1, 1], [], []>} : vector<32x32xbf16>, vector<32x576xbf16>, vector<32x576xf32> -> vector<32x576xf32>
    %c0_39 = arith.constant 0 : index
    %c0_40 = arith.constant 0 : index
    %57 = vector.load %arg20[%c0_39, %c0_40] : memref<1x16xf32, #tpu.memory_space<vmem>>, vector<1x16xf32>
    %58 = vector.broadcast %57 : vector<1x16xf32> to vector<32x16xf32>
    %59 = arith.addf %55, %58 : vector<32x16xf32>
    %cst_41 = arith.constant dense<0xFF800000> : vector<32xf32>
    %60 = vector.multi_reduction <maximumf>, %59, %cst_41 [1] : vector<32x16xf32> to vector<32xf32>
    %61 = vector.shape_cast %60 : vector<32xf32> to vector<32x1xf32>
    %62 = vector.broadcast %61 : vector<32x1xf32> to vector<32x16xf32>
    %63 = arith.subf %59, %62 : vector<32x16xf32>
    %64 = math.exp %63 : vector<32x16xf32>
    %cst_42 = arith.constant dense<0x7F800000> : vector<32xf32>
    %65 = vector.multi_reduction <minimumf>, %55, %cst_42 [1] : vector<32x16xf32> to vector<32xf32>
    %66 = vector.shape_cast %65 : vector<32xf32> to vector<32x1xf32>
    %67 = vector.broadcast %66 : vector<32x1xf32> to vector<32x16xf32>
    %68 = arith.subf %67, %55 : vector<32x16xf32>
    %69 = math.exp %68 : vector<32x16xf32>
    %70 = tpu.transpose %64, [1, 0] : vector<32x16xf32> -> vector<16x32xf32>
    %cst_43 = arith.constant dense<0.000000e+00> : vector<32x32xf32>
    %71 = tpu.matmul %69, %70, %cst_43 {dimension_numbers = #tpu.dot_dimension_numbers<[1], [0], [0], [1], [0, 0, 1, 1], [], []>} : vector<32x16xf32>, vector<16x32xf32>, vector<32x32xf32> -> vector<32x32xf32>
    %cst_44 = arith.constant 1.000000e-30 : f32
    %72 = vector.broadcast %cst_44 : f32 to vector<32x32xf32>
    %73 = arith.maximumf %71, %72 : vector<32x32xf32>
    %74 = tpu.reciprocal %73 {approx = true} : vector<32x32xf32> -> vector<32x32xf32>
    %75 = arith.mulf %1, %74 : vector<32x32xf32>
    %c0_45 = arith.constant 0 : index
    %c0_46 = arith.constant 0 : index
    %76 = vector.load %arg9[%c0_45, %c0_46] : memref<16x576xbf16, #tpu.memory_space<vmem>>, vector<16x576xbf16>
    %77 = arith.truncf %64 : vector<32x16xf32> to vector<32x16xbf16>
    %cst_47 = arith.constant dense<0.000000e+00> : vector<32x576xf32>
    %78 = tpu.matmul %77, %76, %cst_47 {dimension_numbers = #tpu.dot_dimension_numbers<[1], [0], [0], [1], [0, 0, 1, 1], [], []>} : vector<32x16xbf16>, vector<16x576xbf16>, vector<32x576xf32> -> vector<32x576xf32>
    %79 = arith.mulf %56, %78 : vector<32x576xf32>
    %80 = arith.truncf %75 : vector<32x32xf32> to vector<32x32xbf16>
    %81 = arith.truncf %79 : vector<32x576xf32> to vector<32x576xbf16>
    %cst_48 = arith.constant dense<0.000000e+00> : vector<32x576xf32>
    %82 = tpu.matmul %80, %81, %cst_48 {dimension_numbers = #tpu.dot_dimension_numbers<[1], [0], [0], [1], [0, 0, 1, 1], [], []>} : vector<32x32xbf16>, vector<32x576xbf16>, vector<32x576xf32> -> vector<32x576xf32>
    %83 = arith.truncf %69 : vector<32x16xf32> to vector<32x16xbf16>
    %cst_49 = arith.constant dense<0.000000e+00> : vector<32x576xf32>
    %84 = tpu.matmul %83, %76, %cst_49 {dimension_numbers = #tpu.dot_dimension_numbers<[1], [0], [0], [1], [0, 0, 1, 1], [], []>} : vector<32x16xbf16>, vector<16x576xbf16>, vector<32x576xf32> -> vector<32x576xf32>
    %85 = arith.mulf %82, %84 : vector<32x576xf32>
    %86 = arith.truncf %85 : vector<32x576xf32> to vector<32x576xbf16>
    %c0_50 = arith.constant 0 : index
    %c0_51 = arith.constant 0 : index
    %87 = vector.load %arg12[%c0_50, %c0_51] : memref<576x64xbf16, #tpu.memory_space<vmem>>, vector<576x64xbf16>
    %cst_52 = arith.constant dense<0.000000e+00> : vector<32x64xf32>
    %88 = tpu.matmul %86, %87, %cst_52 {dimension_numbers = #tpu.dot_dimension_numbers<[1], [0], [0], [1], [0, 0, 1, 1], [], []>} : vector<32x576xbf16>, vector<576x64xbf16>, vector<32x64xf32> -> vector<32x64xf32>
    %c0_53 = arith.constant 0 : index
    %c0_54 = arith.constant 0 : index
    %89 = vector.load %arg21[%c0_53, %c0_54] : memref<1x64xf32, #tpu.memory_space<vmem>>, vector<1x64xf32>
    %90 = vector.broadcast %89 : vector<1x64xf32> to vector<32x64xf32>
    %91 = arith.addf %88, %90 : vector<32x64xf32>
    %cst_55 = arith.constant 0.000000e+00 : f32
    %92 = vector.broadcast %cst_55 : f32 to vector<32x64xf32>
    %93 = arith.cmpf oge, %91, %92 : vector<32x64xf32>
    %cst_56 = arith.constant 1.000000e-01 : f32
    %94 = vector.broadcast %cst_56 : f32 to vector<32x64xf32>
    %95 = arith.mulf %94, %91 : vector<32x64xf32>
    %96 = arith.select %93, %91, %95 : vector<32x64xi1>, vector<32x64xf32>
    %c0_57 = arith.constant 0 : index
    %c0_58 = arith.constant 0 : index
    %97 = vector.load %arg5[%c0_57, %c0_58] : memref<16x32xbf16, #tpu.memory_space<vmem>>, vector<16x32xbf16>
    %98 = arith.truncf %96 : vector<32x64xf32> to vector<32x64xbf16>
    %cst_59 = arith.constant dense<0.000000e+00> : vector<16x64xf32>
    %99 = tpu.matmul %97, %98, %cst_59 {dimension_numbers = #tpu.dot_dimension_numbers<[1], [0], [0], [1], [0, 0, 1, 1], [], []>} : vector<16x32xbf16>, vector<32x64xbf16>, vector<16x64xf32> -> vector<16x64xf32>
    %c0_60 = arith.constant 0 : index
    %c0_61 = arith.constant 0 : index
    %100 = vector.load %arg22[%c0_60, %c0_61] : memref<64x1152xbf16, #tpu.memory_space<vmem>>, vector<64x1152xbf16>
    %c0_62 = arith.constant 0 : index
    %c0_63 = arith.constant 0 : index
    %101 = vector.load %arg23[%c0_62, %c0_63] : memref<64x16xbf16, #tpu.memory_space<vmem>>, vector<64x16xbf16>
    %102 = arith.truncf %99 : vector<16x64xf32> to vector<16x64xbf16>
    %cst_64 = arith.constant dense<0.000000e+00> : vector<16x16xf32>
    %103 = tpu.matmul %102, %101, %cst_64 {dimension_numbers = #tpu.dot_dimension_numbers<[1], [0], [0], [1], [0, 0, 1, 1], [], []>} : vector<16x64xbf16>, vector<64x16xbf16>, vector<16x16xf32> -> vector<16x16xf32>
    %cst_65 = arith.constant dense<0.000000e+00> : vector<16x1152xf32>
    %104 = tpu.matmul %102, %100, %cst_65 {dimension_numbers = #tpu.dot_dimension_numbers<[1], [0], [0], [1], [0, 0, 1, 1], [], []>} : vector<16x64xbf16>, vector<64x1152xbf16>, vector<16x1152xf32> -> vector<16x1152xf32>
    %c0_66 = arith.constant 0 : index
    %c0_67 = arith.constant 0 : index
    %105 = vector.load %arg24[%c0_66, %c0_67] : memref<1x16xf32, #tpu.memory_space<vmem>>, vector<1x16xf32>
    %106 = vector.broadcast %105 : vector<1x16xf32> to vector<16x16xf32>
    %107 = arith.addf %103, %106 : vector<16x16xf32>
    %cst_68 = arith.constant dense<0xFF800000> : vector<16xf32>
    %108 = vector.multi_reduction <maximumf>, %107, %cst_68 [1] : vector<16x16xf32> to vector<16xf32>
    %109 = vector.shape_cast %108 : vector<16xf32> to vector<16x1xf32>
    %110 = vector.broadcast %109 : vector<16x1xf32> to vector<16x16xf32>
    %111 = arith.subf %107, %110 : vector<16x16xf32>
    %112 = math.exp %111 : vector<16x16xf32>
    %cst_69 = arith.constant dense<0x7F800000> : vector<16xf32>
    %113 = vector.multi_reduction <minimumf>, %103, %cst_69 [1] : vector<16x16xf32> to vector<16xf32>
    %114 = vector.shape_cast %113 : vector<16xf32> to vector<16x1xf32>
    %115 = vector.broadcast %114 : vector<16x1xf32> to vector<16x16xf32>
    %116 = arith.subf %115, %103 : vector<16x16xf32>
    %117 = math.exp %116 : vector<16x16xf32>
    %118 = tpu.transpose %112, [1, 0] : vector<16x16xf32> -> vector<16x16xf32>
    %cst_70 = arith.constant dense<0.000000e+00> : vector<16x16xf32>
    %119 = tpu.matmul %117, %118, %cst_70 {dimension_numbers = #tpu.dot_dimension_numbers<[1], [0], [0], [1], [0, 0, 1, 1], [], []>} : vector<16x16xf32>, vector<16x16xf32>, vector<16x16xf32> -> vector<16x16xf32>
    %cst_71 = arith.constant 1.000000e-30 : f32
    %120 = vector.broadcast %cst_71 : f32 to vector<16x16xf32>
    %121 = arith.maximumf %119, %120 : vector<16x16xf32>
    %122 = tpu.reciprocal %121 {approx = true} : vector<16x16xf32> -> vector<16x16xf32>
    %123 = arith.mulf %2, %122 : vector<16x16xf32>
    %c0_72 = arith.constant 0 : index
    %c0_73 = arith.constant 0 : index
    %124 = vector.load %arg10[%c0_72, %c0_73] : memref<16x1152xbf16, #tpu.memory_space<vmem>>, vector<16x1152xbf16>
    %125 = arith.truncf %112 : vector<16x16xf32> to vector<16x16xbf16>
    %cst_74 = arith.constant dense<0.000000e+00> : vector<16x1152xf32>
    %126 = tpu.matmul %125, %124, %cst_74 {dimension_numbers = #tpu.dot_dimension_numbers<[1], [0], [0], [1], [0, 0, 1, 1], [], []>} : vector<16x16xbf16>, vector<16x1152xbf16>, vector<16x1152xf32> -> vector<16x1152xf32>
    %127 = arith.mulf %104, %126 : vector<16x1152xf32>
    %128 = arith.truncf %123 : vector<16x16xf32> to vector<16x16xbf16>
    %129 = arith.truncf %127 : vector<16x1152xf32> to vector<16x1152xbf16>
    %cst_75 = arith.constant dense<0.000000e+00> : vector<16x1152xf32>
    %130 = tpu.matmul %128, %129, %cst_75 {dimension_numbers = #tpu.dot_dimension_numbers<[1], [0], [0], [1], [0, 0, 1, 1], [], []>} : vector<16x16xbf16>, vector<16x1152xbf16>, vector<16x1152xf32> -> vector<16x1152xf32>
    %131 = arith.truncf %117 : vector<16x16xf32> to vector<16x16xbf16>
    %cst_76 = arith.constant dense<0.000000e+00> : vector<16x1152xf32>
    %132 = tpu.matmul %131, %124, %cst_76 {dimension_numbers = #tpu.dot_dimension_numbers<[1], [0], [0], [1], [0, 0, 1, 1], [], []>} : vector<16x16xbf16>, vector<16x1152xbf16>, vector<16x1152xf32> -> vector<16x1152xf32>
    %133 = arith.mulf %130, %132 : vector<16x1152xf32>
    %134 = arith.truncf %133 : vector<16x1152xf32> to vector<16x1152xbf16>
    %c0_77 = arith.constant 0 : index
    %c0_78 = arith.constant 0 : index
    %135 = vector.load %arg13[%c0_77, %c0_78] : memref<1152x128xbf16, #tpu.memory_space<vmem>>, vector<1152x128xbf16>
    %cst_79 = arith.constant dense<0.000000e+00> : vector<16x128xf32>
    %136 = tpu.matmul %134, %135, %cst_79 {dimension_numbers = #tpu.dot_dimension_numbers<[1], [0], [0], [1], [0, 0, 1, 1], [], []>} : vector<16x1152xbf16>, vector<1152x128xbf16>, vector<16x128xf32> -> vector<16x128xf32>
    %c0_80 = arith.constant 0 : index
    %c0_81 = arith.constant 0 : index
    %137 = vector.load %arg25[%c0_80, %c0_81] : memref<1x128xf32, #tpu.memory_space<vmem>>, vector<1x128xf32>
    %138 = vector.broadcast %137 : vector<1x128xf32> to vector<16x128xf32>
    %139 = arith.addf %136, %138 : vector<16x128xf32>
    %cst_82 = arith.constant 0.000000e+00 : f32
    %140 = vector.broadcast %cst_82 : f32 to vector<16x128xf32>
    %141 = arith.cmpf oge, %139, %140 : vector<16x128xf32>
    %cst_83 = arith.constant 1.000000e-01 : f32
    %142 = vector.broadcast %cst_83 : f32 to vector<16x128xf32>
    %143 = arith.mulf %142, %139 : vector<16x128xf32>
    %144 = arith.select %141, %139, %143 : vector<16x128xi1>, vector<16x128xf32>
    %c0_84 = arith.constant 0 : index
    %c0_85 = arith.constant 0 : index
    %145 = vector.load %arg26[%c0_84, %c0_85] : memref<128x1152xbf16, #tpu.memory_space<vmem>>, vector<128x1152xbf16>
    %c0_86 = arith.constant 0 : index
    %c0_87 = arith.constant 0 : index
    %146 = vector.load %arg27[%c0_86, %c0_87] : memref<128x16xbf16, #tpu.memory_space<vmem>>, vector<128x16xbf16>
    %147 = arith.truncf %144 : vector<16x128xf32> to vector<16x128xbf16>
    %cst_88 = arith.constant dense<0.000000e+00> : vector<16x16xf32>
    %148 = tpu.matmul %147, %146, %cst_88 {dimension_numbers = #tpu.dot_dimension_numbers<[1], [0], [0], [1], [0, 0, 1, 1], [], []>} : vector<16x128xbf16>, vector<128x16xbf16>, vector<16x16xf32> -> vector<16x16xf32>
    %cst_89 = arith.constant dense<0.000000e+00> : vector<16x1152xf32>
    %149 = tpu.matmul %147, %145, %cst_89 {dimension_numbers = #tpu.dot_dimension_numbers<[1], [0], [0], [1], [0, 0, 1, 1], [], []>} : vector<16x128xbf16>, vector<128x1152xbf16>, vector<16x1152xf32> -> vector<16x1152xf32>
    %c0_90 = arith.constant 0 : index
    %c0_91 = arith.constant 0 : index
    %150 = vector.load %arg28[%c0_90, %c0_91] : memref<1x16xf32, #tpu.memory_space<vmem>>, vector<1x16xf32>
    %151 = vector.broadcast %150 : vector<1x16xf32> to vector<16x16xf32>
    %152 = arith.addf %148, %151 : vector<16x16xf32>
    %cst_92 = arith.constant dense<0xFF800000> : vector<16xf32>
    %153 = vector.multi_reduction <maximumf>, %152, %cst_92 [1] : vector<16x16xf32> to vector<16xf32>
    %154 = vector.shape_cast %153 : vector<16xf32> to vector<16x1xf32>
    %155 = vector.broadcast %154 : vector<16x1xf32> to vector<16x16xf32>
    %156 = arith.subf %152, %155 : vector<16x16xf32>
    %157 = math.exp %156 : vector<16x16xf32>
    %cst_93 = arith.constant dense<0x7F800000> : vector<16xf32>
    %158 = vector.multi_reduction <minimumf>, %148, %cst_93 [1] : vector<16x16xf32> to vector<16xf32>
    %159 = vector.shape_cast %158 : vector<16xf32> to vector<16x1xf32>
    %160 = vector.broadcast %159 : vector<16x1xf32> to vector<16x16xf32>
    %161 = arith.subf %160, %148 : vector<16x16xf32>
    %162 = math.exp %161 : vector<16x16xf32>
    %163 = tpu.transpose %157, [1, 0] : vector<16x16xf32> -> vector<16x16xf32>
    %cst_94 = arith.constant dense<0.000000e+00> : vector<16x16xf32>
    %164 = tpu.matmul %162, %163, %cst_94 {dimension_numbers = #tpu.dot_dimension_numbers<[1], [0], [0], [1], [0, 0, 1, 1], [], []>} : vector<16x16xf32>, vector<16x16xf32>, vector<16x16xf32> -> vector<16x16xf32>
    %cst_95 = arith.constant 1.000000e-30 : f32
    %165 = vector.broadcast %cst_95 : f32 to vector<16x16xf32>
    %166 = arith.maximumf %164, %165 : vector<16x16xf32>
    %167 = tpu.reciprocal %166 {approx = true} : vector<16x16xf32> -> vector<16x16xf32>
    %168 = arith.mulf %2, %167 : vector<16x16xf32>
    %c0_96 = arith.constant 0 : index
    %c0_97 = arith.constant 0 : index
    %169 = vector.load %arg10[%c0_96, %c0_97] : memref<16x1152xbf16, #tpu.memory_space<vmem>>, vector<16x1152xbf16>
    %170 = arith.truncf %157 : vector<16x16xf32> to vector<16x16xbf16>
    %cst_98 = arith.constant dense<0.000000e+00> : vector<16x1152xf32>
    %171 = tpu.matmul %170, %169, %cst_98 {dimension_numbers = #tpu.dot_dimension_numbers<[1], [0], [0], [1], [0, 0, 1, 1], [], []>} : vector<16x16xbf16>, vector<16x1152xbf16>, vector<16x1152xf32> -> vector<16x1152xf32>
    %172 = arith.mulf %149, %171 : vector<16x1152xf32>
    %173 = arith.truncf %168 : vector<16x16xf32> to vector<16x16xbf16>
    %174 = arith.truncf %172 : vector<16x1152xf32> to vector<16x1152xbf16>
    %cst_99 = arith.constant dense<0.000000e+00> : vector<16x1152xf32>
    %175 = tpu.matmul %173, %174, %cst_99 {dimension_numbers = #tpu.dot_dimension_numbers<[1], [0], [0], [1], [0, 0, 1, 1], [], []>} : vector<16x16xbf16>, vector<16x1152xbf16>, vector<16x1152xf32> -> vector<16x1152xf32>
    %176 = arith.truncf %162 : vector<16x16xf32> to vector<16x16xbf16>
    %cst_100 = arith.constant dense<0.000000e+00> : vector<16x1152xf32>
    %177 = tpu.matmul %176, %169, %cst_100 {dimension_numbers = #tpu.dot_dimension_numbers<[1], [0], [0], [1], [0, 0, 1, 1], [], []>} : vector<16x16xbf16>, vector<16x1152xbf16>, vector<16x1152xf32> -> vector<16x1152xf32>
    %178 = arith.mulf %175, %177 : vector<16x1152xf32>
    %179 = arith.truncf %178 : vector<16x1152xf32> to vector<16x1152xbf16>
    %c0_101 = arith.constant 0 : index
    %c0_102 = arith.constant 0 : index
    %180 = vector.load %arg13[%c0_101, %c0_102] : memref<1152x128xbf16, #tpu.memory_space<vmem>>, vector<1152x128xbf16>
    %cst_103 = arith.constant dense<0.000000e+00> : vector<16x128xf32>
    %181 = tpu.matmul %179, %180, %cst_103 {dimension_numbers = #tpu.dot_dimension_numbers<[1], [0], [0], [1], [0, 0, 1, 1], [], []>} : vector<16x1152xbf16>, vector<1152x128xbf16>, vector<16x128xf32> -> vector<16x128xf32>
    %c0_104 = arith.constant 0 : index
    %c0_105 = arith.constant 0 : index
    %182 = vector.load %arg29[%c0_104, %c0_105] : memref<1x128xf32, #tpu.memory_space<vmem>>, vector<1x128xf32>
    %183 = vector.broadcast %182 : vector<1x128xf32> to vector<16x128xf32>
    %184 = arith.addf %181, %183 : vector<16x128xf32>
    %cst_106 = arith.constant 0.000000e+00 : f32
    %185 = vector.broadcast %cst_106 : f32 to vector<16x128xf32>
    %186 = arith.cmpf oge, %184, %185 : vector<16x128xf32>
    %cst_107 = arith.constant 1.000000e-01 : f32
    %187 = vector.broadcast %cst_107 : f32 to vector<16x128xf32>
    %188 = arith.mulf %187, %184 : vector<16x128xf32>
    %189 = arith.select %186, %184, %188 : vector<16x128xi1>, vector<16x128xf32>
    %c0_108 = arith.constant 0 : index
    %c0_109 = arith.constant 0 : index
    %190 = vector.load %arg6[%c0_108, %c0_109] : memref<32x16xbf16, #tpu.memory_space<vmem>>, vector<32x16xbf16>
    %191 = arith.truncf %189 : vector<16x128xf32> to vector<16x128xbf16>
    %cst_110 = arith.constant dense<0.000000e+00> : vector<32x128xf32>
    %192 = tpu.matmul %190, %191, %cst_110 {dimension_numbers = #tpu.dot_dimension_numbers<[1], [0], [0], [1], [0, 0, 1, 1], [], []>} : vector<32x16xbf16>, vector<16x128xbf16>, vector<32x128xf32> -> vector<32x128xf32>
    %c0_111 = arith.constant 0 : index
    %c0_112 = arith.constant 0 : index
    %193 = vector.load %arg30[%c0_111, %c0_112] : memref<128x576xbf16, #tpu.memory_space<vmem>>, vector<128x576xbf16>
    %c0_113 = arith.constant 0 : index
    %c0_114 = arith.constant 0 : index
    %194 = vector.load %arg31[%c0_113, %c0_114] : memref<128x16xbf16, #tpu.memory_space<vmem>>, vector<128x16xbf16>
    %195 = arith.truncf %192 : vector<32x128xf32> to vector<32x128xbf16>
    %cst_115 = arith.constant dense<0.000000e+00> : vector<32x16xf32>
    %196 = tpu.matmul %195, %194, %cst_115 {dimension_numbers = #tpu.dot_dimension_numbers<[1], [0], [0], [1], [0, 0, 1, 1], [], []>} : vector<32x128xbf16>, vector<128x16xbf16>, vector<32x16xf32> -> vector<32x16xf32>
    %cst_116 = arith.constant dense<0.000000e+00> : vector<32x576xf32>
    %197 = tpu.matmul %195, %193, %cst_116 {dimension_numbers = #tpu.dot_dimension_numbers<[1], [0], [0], [1], [0, 0, 1, 1], [], []>} : vector<32x128xbf16>, vector<128x576xbf16>, vector<32x576xf32> -> vector<32x576xf32>
    %c0_117 = arith.constant 0 : index
    %c0_118 = arith.constant 0 : index
    %198 = vector.load %arg32[%c0_117, %c0_118] : memref<1x16xf32, #tpu.memory_space<vmem>>, vector<1x16xf32>
    %199 = vector.broadcast %198 : vector<1x16xf32> to vector<32x16xf32>
    %200 = arith.addf %196, %199 : vector<32x16xf32>
    %cst_119 = arith.constant dense<0xFF800000> : vector<32xf32>
    %201 = vector.multi_reduction <maximumf>, %200, %cst_119 [1] : vector<32x16xf32> to vector<32xf32>
    %202 = vector.shape_cast %201 : vector<32xf32> to vector<32x1xf32>
    %203 = vector.broadcast %202 : vector<32x1xf32> to vector<32x16xf32>
    %204 = arith.subf %200, %203 : vector<32x16xf32>
    %205 = math.exp %204 : vector<32x16xf32>
    %cst_120 = arith.constant dense<0x7F800000> : vector<32xf32>
    %206 = vector.multi_reduction <minimumf>, %196, %cst_120 [1] : vector<32x16xf32> to vector<32xf32>
    %207 = vector.shape_cast %206 : vector<32xf32> to vector<32x1xf32>
    %208 = vector.broadcast %207 : vector<32x1xf32> to vector<32x16xf32>
    %209 = arith.subf %208, %196 : vector<32x16xf32>
    %210 = math.exp %209 : vector<32x16xf32>
    %211 = tpu.transpose %205, [1, 0] : vector<32x16xf32> -> vector<16x32xf32>
    %cst_121 = arith.constant dense<0.000000e+00> : vector<32x32xf32>
    %212 = tpu.matmul %210, %211, %cst_121 {dimension_numbers = #tpu.dot_dimension_numbers<[1], [0], [0], [1], [0, 0, 1, 1], [], []>} : vector<32x16xf32>, vector<16x32xf32>, vector<32x32xf32> -> vector<32x32xf32>
    %cst_122 = arith.constant 1.000000e-30 : f32
    %213 = vector.broadcast %cst_122 : f32 to vector<32x32xf32>
    %214 = arith.maximumf %212, %213 : vector<32x32xf32>
    %215 = tpu.reciprocal %214 {approx = true} : vector<32x32xf32> -> vector<32x32xf32>
    %216 = arith.mulf %1, %215 : vector<32x32xf32>
    %c0_123 = arith.constant 0 : index
    %c0_124 = arith.constant 0 : index
    %217 = vector.load %arg9[%c0_123, %c0_124] : memref<16x576xbf16, #tpu.memory_space<vmem>>, vector<16x576xbf16>
    %218 = arith.truncf %205 : vector<32x16xf32> to vector<32x16xbf16>
    %cst_125 = arith.constant dense<0.000000e+00> : vector<32x576xf32>
    %219 = tpu.matmul %218, %217, %cst_125 {dimension_numbers = #tpu.dot_dimension_numbers<[1], [0], [0], [1], [0, 0, 1, 1], [], []>} : vector<32x16xbf16>, vector<16x576xbf16>, vector<32x576xf32> -> vector<32x576xf32>
    %220 = arith.mulf %197, %219 : vector<32x576xf32>
    %221 = arith.truncf %216 : vector<32x32xf32> to vector<32x32xbf16>
    %222 = arith.truncf %220 : vector<32x576xf32> to vector<32x576xbf16>
    %cst_126 = arith.constant dense<0.000000e+00> : vector<32x576xf32>
    %223 = tpu.matmul %221, %222, %cst_126 {dimension_numbers = #tpu.dot_dimension_numbers<[1], [0], [0], [1], [0, 0, 1, 1], [], []>} : vector<32x32xbf16>, vector<32x576xbf16>, vector<32x576xf32> -> vector<32x576xf32>
    %224 = arith.truncf %210 : vector<32x16xf32> to vector<32x16xbf16>
    %cst_127 = arith.constant dense<0.000000e+00> : vector<32x576xf32>
    %225 = tpu.matmul %224, %217, %cst_127 {dimension_numbers = #tpu.dot_dimension_numbers<[1], [0], [0], [1], [0, 0, 1, 1], [], []>} : vector<32x16xbf16>, vector<16x576xbf16>, vector<32x576xf32> -> vector<32x576xf32>
    %226 = arith.mulf %223, %225 : vector<32x576xf32>
    %227 = arith.truncf %226 : vector<32x576xf32> to vector<32x576xbf16>
    %c0_128 = arith.constant 0 : index
    %c0_129 = arith.constant 0 : index
    %228 = vector.load %arg12[%c0_128, %c0_129] : memref<576x64xbf16, #tpu.memory_space<vmem>>, vector<576x64xbf16>
    %cst_130 = arith.constant dense<0.000000e+00> : vector<32x64xf32>
    %229 = tpu.matmul %227, %228, %cst_130 {dimension_numbers = #tpu.dot_dimension_numbers<[1], [0], [0], [1], [0, 0, 1, 1], [], []>} : vector<32x576xbf16>, vector<576x64xbf16>, vector<32x64xf32> -> vector<32x64xf32>
    %c0_131 = arith.constant 0 : index
    %c0_132 = arith.constant 0 : index
    %230 = vector.load %arg33[%c0_131, %c0_132] : memref<1x64xf32, #tpu.memory_space<vmem>>, vector<1x64xf32>
    %231 = vector.broadcast %230 : vector<1x64xf32> to vector<32x64xf32>
    %232 = arith.addf %229, %231 : vector<32x64xf32>
    %c0_133 = arith.constant 0 : index
    %c0_134 = arith.constant 0 : index
    %233 = vector.load %arg34[%c0_133, %c0_134] : memref<128x576xbf16, #tpu.memory_space<vmem>>, vector<64x576xbf16>
    %c0_135 = arith.constant 0 : index
    %c0_136 = arith.constant 0 : index
    %234 = vector.load %arg35[%c0_135, %c0_136] : memref<128x16xbf16, #tpu.memory_space<vmem>>, vector<64x16xbf16>
    %c64 = arith.constant 64 : index
    %c0_137 = arith.constant 0 : index
    %235 = vector.load %arg34[%c64, %c0_137] : memref<128x576xbf16, #tpu.memory_space<vmem>>, vector<64x576xbf16>
    %c64_138 = arith.constant 64 : index
    %c0_139 = arith.constant 0 : index
    %236 = vector.load %arg35[%c64_138, %c0_139] : memref<128x16xbf16, #tpu.memory_space<vmem>>, vector<64x16xbf16>
    %237 = arith.truncf %96 : vector<32x64xf32> to vector<32x64xbf16>
    %cst_140 = arith.constant dense<0.000000e+00> : vector<32x16xf32>
    %238 = tpu.matmul %237, %234, %cst_140 {dimension_numbers = #tpu.dot_dimension_numbers<[1], [0], [0], [1], [0, 0, 1, 1], [], []>} : vector<32x64xbf16>, vector<64x16xbf16>, vector<32x16xf32> -> vector<32x16xf32>
    %cst_141 = arith.constant dense<0.000000e+00> : vector<32x576xf32>
    %239 = tpu.matmul %237, %233, %cst_141 {dimension_numbers = #tpu.dot_dimension_numbers<[1], [0], [0], [1], [0, 0, 1, 1], [], []>} : vector<32x64xbf16>, vector<64x576xbf16>, vector<32x576xf32> -> vector<32x576xf32>
    %240 = arith.truncf %232 : vector<32x64xf32> to vector<32x64xbf16>
    %cst_142 = arith.constant dense<0.000000e+00> : vector<32x16xf32>
    %241 = tpu.matmul %240, %236, %cst_142 {dimension_numbers = #tpu.dot_dimension_numbers<[1], [0], [0], [1], [0, 0, 1, 1], [], []>} : vector<32x64xbf16>, vector<64x16xbf16>, vector<32x16xf32> -> vector<32x16xf32>
    %cst_143 = arith.constant dense<0.000000e+00> : vector<32x576xf32>
    %242 = tpu.matmul %240, %235, %cst_143 {dimension_numbers = #tpu.dot_dimension_numbers<[1], [0], [0], [1], [0, 0, 1, 1], [], []>} : vector<32x64xbf16>, vector<64x576xbf16>, vector<32x576xf32> -> vector<32x576xf32>
    %243 = arith.addf %238, %241 : vector<32x16xf32>
    %244 = arith.addf %239, %242 : vector<32x576xf32>
    %c0_144 = arith.constant 0 : index
    %c0_145 = arith.constant 0 : index
    %245 = vector.load %arg36[%c0_144, %c0_145] : memref<1x16xf32, #tpu.memory_space<vmem>>, vector<1x16xf32>
    %246 = vector.broadcast %245 : vector<1x16xf32> to vector<32x16xf32>
    %247 = arith.addf %243, %246 : vector<32x16xf32>
    %cst_146 = arith.constant dense<0xFF800000> : vector<32xf32>
    %248 = vector.multi_reduction <maximumf>, %247, %cst_146 [1] : vector<32x16xf32> to vector<32xf32>
    %249 = vector.shape_cast %248 : vector<32xf32> to vector<32x1xf32>
    %250 = vector.broadcast %249 : vector<32x1xf32> to vector<32x16xf32>
    %251 = arith.subf %247, %250 : vector<32x16xf32>
    %252 = math.exp %251 : vector<32x16xf32>
    %cst_147 = arith.constant dense<0x7F800000> : vector<32xf32>
    %253 = vector.multi_reduction <minimumf>, %243, %cst_147 [1] : vector<32x16xf32> to vector<32xf32>
    %254 = vector.shape_cast %253 : vector<32xf32> to vector<32x1xf32>
    %255 = vector.broadcast %254 : vector<32x1xf32> to vector<32x16xf32>
    %256 = arith.subf %255, %243 : vector<32x16xf32>
    %257 = math.exp %256 : vector<32x16xf32>
    %258 = tpu.transpose %252, [1, 0] : vector<32x16xf32> -> vector<16x32xf32>
    %cst_148 = arith.constant dense<0.000000e+00> : vector<32x32xf32>
    %259 = tpu.matmul %257, %258, %cst_148 {dimension_numbers = #tpu.dot_dimension_numbers<[1], [0], [0], [1], [0, 0, 1, 1], [], []>} : vector<32x16xf32>, vector<16x32xf32>, vector<32x32xf32> -> vector<32x32xf32>
    %cst_149 = arith.constant 1.000000e-30 : f32
    %260 = vector.broadcast %cst_149 : f32 to vector<32x32xf32>
    %261 = arith.maximumf %259, %260 : vector<32x32xf32>
    %262 = tpu.reciprocal %261 {approx = true} : vector<32x32xf32> -> vector<32x32xf32>
    %263 = arith.mulf %1, %262 : vector<32x32xf32>
    %c0_150 = arith.constant 0 : index
    %c0_151 = arith.constant 0 : index
    %264 = vector.load %arg9[%c0_150, %c0_151] : memref<16x576xbf16, #tpu.memory_space<vmem>>, vector<16x576xbf16>
    %265 = arith.truncf %252 : vector<32x16xf32> to vector<32x16xbf16>
    %cst_152 = arith.constant dense<0.000000e+00> : vector<32x576xf32>
    %266 = tpu.matmul %265, %264, %cst_152 {dimension_numbers = #tpu.dot_dimension_numbers<[1], [0], [0], [1], [0, 0, 1, 1], [], []>} : vector<32x16xbf16>, vector<16x576xbf16>, vector<32x576xf32> -> vector<32x576xf32>
    %267 = arith.mulf %244, %266 : vector<32x576xf32>
    %268 = arith.truncf %263 : vector<32x32xf32> to vector<32x32xbf16>
    %269 = arith.truncf %267 : vector<32x576xf32> to vector<32x576xbf16>
    %cst_153 = arith.constant dense<0.000000e+00> : vector<32x576xf32>
    %270 = tpu.matmul %268, %269, %cst_153 {dimension_numbers = #tpu.dot_dimension_numbers<[1], [0], [0], [1], [0, 0, 1, 1], [], []>} : vector<32x32xbf16>, vector<32x576xbf16>, vector<32x576xf32> -> vector<32x576xf32>
    %271 = arith.truncf %257 : vector<32x16xf32> to vector<32x16xbf16>
    %cst_154 = arith.constant dense<0.000000e+00> : vector<32x576xf32>
    %272 = tpu.matmul %271, %264, %cst_154 {dimension_numbers = #tpu.dot_dimension_numbers<[1], [0], [0], [1], [0, 0, 1, 1], [], []>} : vector<32x16xbf16>, vector<16x576xbf16>, vector<32x576xf32> -> vector<32x576xf32>
    %273 = arith.mulf %270, %272 : vector<32x576xf32>
    %274 = arith.truncf %273 : vector<32x576xf32> to vector<32x576xbf16>
    %c0_155 = arith.constant 0 : index
    %c0_156 = arith.constant 0 : index
    %275 = vector.load %arg12[%c0_155, %c0_156] : memref<576x64xbf16, #tpu.memory_space<vmem>>, vector<576x64xbf16>
    %cst_157 = arith.constant dense<0.000000e+00> : vector<32x64xf32>
    %276 = tpu.matmul %274, %275, %cst_157 {dimension_numbers = #tpu.dot_dimension_numbers<[1], [0], [0], [1], [0, 0, 1, 1], [], []>} : vector<32x576xbf16>, vector<576x64xbf16>, vector<32x64xf32> -> vector<32x64xf32>
    %c0_158 = arith.constant 0 : index
    %c0_159 = arith.constant 0 : index
    %277 = vector.load %arg37[%c0_158, %c0_159] : memref<1x64xf32, #tpu.memory_space<vmem>>, vector<1x64xf32>
    %278 = vector.broadcast %277 : vector<1x64xf32> to vector<32x64xf32>
    %279 = arith.addf %276, %278 : vector<32x64xf32>
    %cst_160 = arith.constant 0.000000e+00 : f32
    %280 = vector.broadcast %cst_160 : f32 to vector<32x64xf32>
    %281 = arith.cmpf oge, %279, %280 : vector<32x64xf32>
    %cst_161 = arith.constant 1.000000e-01 : f32
    %282 = vector.broadcast %cst_161 : f32 to vector<32x64xf32>
    %283 = arith.mulf %282, %279 : vector<32x64xf32>
    %284 = arith.select %281, %279, %283 : vector<32x64xi1>, vector<32x64xf32>
    %c0_162 = arith.constant 0 : index
    %c0_163 = arith.constant 0 : index
    %285 = vector.load %arg7[%c0_162, %c0_163] : memref<64x32xbf16, #tpu.memory_space<vmem>>, vector<64x32xbf16>
    %286 = arith.truncf %284 : vector<32x64xf32> to vector<32x64xbf16>
    %cst_164 = arith.constant dense<0.000000e+00> : vector<64x64xf32>
    %287 = tpu.matmul %285, %286, %cst_164 {dimension_numbers = #tpu.dot_dimension_numbers<[1], [0], [0], [1], [0, 0, 1, 1], [], []>} : vector<64x32xbf16>, vector<32x64xbf16>, vector<64x64xf32> -> vector<64x64xf32>
    %c0_165 = arith.constant 0 : index
    %c0_166 = arith.constant 0 : index
    %288 = vector.load %arg38[%c0_165, %c0_166] : memref<64x288xbf16, #tpu.memory_space<vmem>>, vector<64x288xbf16>
    %c0_167 = arith.constant 0 : index
    %c0_168 = arith.constant 0 : index
    %289 = vector.load %arg39[%c0_167, %c0_168] : memref<64x16xbf16, #tpu.memory_space<vmem>>, vector<64x16xbf16>
    %290 = arith.truncf %287 : vector<64x64xf32> to vector<64x64xbf16>
    %cst_169 = arith.constant dense<0.000000e+00> : vector<64x16xf32>
    %291 = tpu.matmul %290, %289, %cst_169 {dimension_numbers = #tpu.dot_dimension_numbers<[1], [0], [0], [1], [0, 0, 1, 1], [], []>} : vector<64x64xbf16>, vector<64x16xbf16>, vector<64x16xf32> -> vector<64x16xf32>
    %cst_170 = arith.constant dense<0.000000e+00> : vector<64x288xf32>
    %292 = tpu.matmul %290, %288, %cst_170 {dimension_numbers = #tpu.dot_dimension_numbers<[1], [0], [0], [1], [0, 0, 1, 1], [], []>} : vector<64x64xbf16>, vector<64x288xbf16>, vector<64x288xf32> -> vector<64x288xf32>
    %c0_171 = arith.constant 0 : index
    %c0_172 = arith.constant 0 : index
    %293 = vector.load %arg40[%c0_171, %c0_172] : memref<1x16xf32, #tpu.memory_space<vmem>>, vector<1x16xf32>
    %294 = vector.broadcast %293 : vector<1x16xf32> to vector<64x16xf32>
    %295 = arith.addf %291, %294 : vector<64x16xf32>
    %cst_173 = arith.constant dense<0xFF800000> : vector<64xf32>
    %296 = vector.multi_reduction <maximumf>, %295, %cst_173 [1] : vector<64x16xf32> to vector<64xf32>
    %297 = vector.shape_cast %296 : vector<64xf32> to vector<64x1xf32>
    %298 = vector.broadcast %297 : vector<64x1xf32> to vector<64x16xf32>
    %299 = arith.subf %295, %298 : vector<64x16xf32>
    %300 = math.exp %299 : vector<64x16xf32>
    %cst_174 = arith.constant dense<0x7F800000> : vector<64xf32>
    %301 = vector.multi_reduction <minimumf>, %291, %cst_174 [1] : vector<64x16xf32> to vector<64xf32>
    %302 = vector.shape_cast %301 : vector<64xf32> to vector<64x1xf32>
    %303 = vector.broadcast %302 : vector<64x1xf32> to vector<64x16xf32>
    %304 = arith.subf %303, %291 : vector<64x16xf32>
    %305 = math.exp %304 : vector<64x16xf32>
    %306 = tpu.transpose %300, [1, 0] : vector<64x16xf32> -> vector<16x64xf32>
    %cst_175 = arith.constant dense<0.000000e+00> : vector<64x64xf32>
    %307 = tpu.matmul %305, %306, %cst_175 {dimension_numbers = #tpu.dot_dimension_numbers<[1], [0], [0], [1], [0, 0, 1, 1], [], []>} : vector<64x16xf32>, vector<16x64xf32>, vector<64x64xf32> -> vector<64x64xf32>
    %cst_176 = arith.constant 1.000000e-30 : f32
    %308 = vector.broadcast %cst_176 : f32 to vector<64x64xf32>
    %309 = arith.maximumf %307, %308 : vector<64x64xf32>
    %310 = tpu.reciprocal %309 {approx = true} : vector<64x64xf32> -> vector<64x64xf32>
    %311 = arith.mulf %0, %310 : vector<64x64xf32>
    %c0_177 = arith.constant 0 : index
    %c0_178 = arith.constant 0 : index
    %312 = vector.load %arg8[%c0_177, %c0_178] : memref<16x288xbf16, #tpu.memory_space<vmem>>, vector<16x288xbf16>
    %313 = arith.truncf %300 : vector<64x16xf32> to vector<64x16xbf16>
    %cst_179 = arith.constant dense<0.000000e+00> : vector<64x288xf32>
    %314 = tpu.matmul %313, %312, %cst_179 {dimension_numbers = #tpu.dot_dimension_numbers<[1], [0], [0], [1], [0, 0, 1, 1], [], []>} : vector<64x16xbf16>, vector<16x288xbf16>, vector<64x288xf32> -> vector<64x288xf32>
    %315 = arith.mulf %292, %314 : vector<64x288xf32>
    %316 = arith.truncf %311 : vector<64x64xf32> to vector<64x64xbf16>
    %317 = arith.truncf %315 : vector<64x288xf32> to vector<64x288xbf16>
    %cst_180 = arith.constant dense<0.000000e+00> : vector<64x288xf32>
    %318 = tpu.matmul %316, %317, %cst_180 {dimension_numbers = #tpu.dot_dimension_numbers<[1], [0], [0], [1], [0, 0, 1, 1], [], []>} : vector<64x64xbf16>, vector<64x288xbf16>, vector<64x288xf32> -> vector<64x288xf32>
    %319 = arith.truncf %305 : vector<64x16xf32> to vector<64x16xbf16>
    %cst_181 = arith.constant dense<0.000000e+00> : vector<64x288xf32>
    %320 = tpu.matmul %319, %312, %cst_181 {dimension_numbers = #tpu.dot_dimension_numbers<[1], [0], [0], [1], [0, 0, 1, 1], [], []>} : vector<64x16xbf16>, vector<16x288xbf16>, vector<64x288xf32> -> vector<64x288xf32>
    %321 = arith.mulf %318, %320 : vector<64x288xf32>
    %322 = arith.truncf %321 : vector<64x288xf32> to vector<64x288xbf16>
    %c0_182 = arith.constant 0 : index
    %c0_183 = arith.constant 0 : index
    %323 = vector.load %arg11[%c0_182, %c0_183] : memref<288x32xbf16, #tpu.memory_space<vmem>>, vector<288x32xbf16>
    %cst_184 = arith.constant dense<0.000000e+00> : vector<64x32xf32>
    %324 = tpu.matmul %322, %323, %cst_184 {dimension_numbers = #tpu.dot_dimension_numbers<[1], [0], [0], [1], [0, 0, 1, 1], [], []>} : vector<64x288xbf16>, vector<288x32xbf16>, vector<64x32xf32> -> vector<64x32xf32>
    %c0_185 = arith.constant 0 : index
    %c0_186 = arith.constant 0 : index
    %325 = vector.load %arg41[%c0_185, %c0_186] : memref<1x32xf32, #tpu.memory_space<vmem>>, vector<1x32xf32>
    %326 = vector.broadcast %325 : vector<1x32xf32> to vector<64x32xf32>
    %327 = arith.addf %324, %326 : vector<64x32xf32>
    %c0_187 = arith.constant 0 : index
    %c0_188 = arith.constant 0 : index
    %328 = vector.load %arg42[%c0_187, %c0_188] : memref<64x288xbf16, #tpu.memory_space<vmem>>, vector<32x288xbf16>
    %c0_189 = arith.constant 0 : index
    %c0_190 = arith.constant 0 : index
    %329 = vector.load %arg43[%c0_189, %c0_190] : memref<64x16xbf16, #tpu.memory_space<vmem>>, vector<32x16xbf16>
    %c32 = arith.constant 32 : index
    %c0_191 = arith.constant 0 : index
    %330 = vector.load %arg42[%c32, %c0_191] : memref<64x288xbf16, #tpu.memory_space<vmem>>, vector<32x288xbf16>
    %c32_192 = arith.constant 32 : index
    %c0_193 = arith.constant 0 : index
    %331 = vector.load %arg43[%c32_192, %c0_193] : memref<64x16xbf16, #tpu.memory_space<vmem>>, vector<32x16xbf16>
    %332 = arith.truncf %48 : vector<64x32xf32> to vector<64x32xbf16>
    %cst_194 = arith.constant dense<0.000000e+00> : vector<64x16xf32>
    %333 = tpu.matmul %332, %329, %cst_194 {dimension_numbers = #tpu.dot_dimension_numbers<[1], [0], [0], [1], [0, 0, 1, 1], [], []>} : vector<64x32xbf16>, vector<32x16xbf16>, vector<64x16xf32> -> vector<64x16xf32>
    %cst_195 = arith.constant dense<0.000000e+00> : vector<64x288xf32>
    %334 = tpu.matmul %332, %328, %cst_195 {dimension_numbers = #tpu.dot_dimension_numbers<[1], [0], [0], [1], [0, 0, 1, 1], [], []>} : vector<64x32xbf16>, vector<32x288xbf16>, vector<64x288xf32> -> vector<64x288xf32>
    %335 = arith.truncf %327 : vector<64x32xf32> to vector<64x32xbf16>
    %cst_196 = arith.constant dense<0.000000e+00> : vector<64x16xf32>
    %336 = tpu.matmul %335, %331, %cst_196 {dimension_numbers = #tpu.dot_dimension_numbers<[1], [0], [0], [1], [0, 0, 1, 1], [], []>} : vector<64x32xbf16>, vector<32x16xbf16>, vector<64x16xf32> -> vector<64x16xf32>
    %cst_197 = arith.constant dense<0.000000e+00> : vector<64x288xf32>
    %337 = tpu.matmul %335, %330, %cst_197 {dimension_numbers = #tpu.dot_dimension_numbers<[1], [0], [0], [1], [0, 0, 1, 1], [], []>} : vector<64x32xbf16>, vector<32x288xbf16>, vector<64x288xf32> -> vector<64x288xf32>
    %338 = arith.addf %333, %336 : vector<64x16xf32>
    %339 = arith.addf %334, %337 : vector<64x288xf32>
    %c0_198 = arith.constant 0 : index
    %c0_199 = arith.constant 0 : index
    %340 = vector.load %arg44[%c0_198, %c0_199] : memref<1x16xf32, #tpu.memory_space<vmem>>, vector<1x16xf32>
    %341 = vector.broadcast %340 : vector<1x16xf32> to vector<64x16xf32>
    %342 = arith.addf %338, %341 : vector<64x16xf32>
    %cst_200 = arith.constant dense<0xFF800000> : vector<64xf32>
    %343 = vector.multi_reduction <maximumf>, %342, %cst_200 [1] : vector<64x16xf32> to vector<64xf32>
    %344 = vector.shape_cast %343 : vector<64xf32> to vector<64x1xf32>
    %345 = vector.broadcast %344 : vector<64x1xf32> to vector<64x16xf32>
    %346 = arith.subf %342, %345 : vector<64x16xf32>
    %347 = math.exp %346 : vector<64x16xf32>
    %cst_201 = arith.constant dense<0x7F800000> : vector<64xf32>
    %348 = vector.multi_reduction <minimumf>, %338, %cst_201 [1] : vector<64x16xf32> to vector<64xf32>
    %349 = vector.shape_cast %348 : vector<64xf32> to vector<64x1xf32>
    %350 = vector.broadcast %349 : vector<64x1xf32> to vector<64x16xf32>
    %351 = arith.subf %350, %338 : vector<64x16xf32>
    %352 = math.exp %351 : vector<64x16xf32>
    %353 = tpu.transpose %347, [1, 0] : vector<64x16xf32> -> vector<16x64xf32>
    %cst_202 = arith.constant dense<0.000000e+00> : vector<64x64xf32>
    %354 = tpu.matmul %352, %353, %cst_202 {dimension_numbers = #tpu.dot_dimension_numbers<[1], [0], [0], [1], [0, 0, 1, 1], [], []>} : vector<64x16xf32>, vector<16x64xf32>, vector<64x64xf32> -> vector<64x64xf32>
    %cst_203 = arith.constant 1.000000e-30 : f32
    %355 = vector.broadcast %cst_203 : f32 to vector<64x64xf32>
    %356 = arith.maximumf %354, %355 : vector<64x64xf32>
    %357 = tpu.reciprocal %356 {approx = true} : vector<64x64xf32> -> vector<64x64xf32>
    %358 = arith.mulf %0, %357 : vector<64x64xf32>
    %c0_204 = arith.constant 0 : index
    %c0_205 = arith.constant 0 : index
    %359 = vector.load %arg8[%c0_204, %c0_205] : memref<16x288xbf16, #tpu.memory_space<vmem>>, vector<16x288xbf16>
    %360 = arith.truncf %347 : vector<64x16xf32> to vector<64x16xbf16>
    %cst_206 = arith.constant dense<0.000000e+00> : vector<64x288xf32>
    %361 = tpu.matmul %360, %359, %cst_206 {dimension_numbers = #tpu.dot_dimension_numbers<[1], [0], [0], [1], [0, 0, 1, 1], [], []>} : vector<64x16xbf16>, vector<16x288xbf16>, vector<64x288xf32> -> vector<64x288xf32>
    %362 = arith.mulf %339, %361 : vector<64x288xf32>
    %363 = arith.truncf %358 : vector<64x64xf32> to vector<64x64xbf16>
    %364 = arith.truncf %362 : vector<64x288xf32> to vector<64x288xbf16>
    %cst_207 = arith.constant dense<0.000000e+00> : vector<64x288xf32>
    %365 = tpu.matmul %363, %364, %cst_207 {dimension_numbers = #tpu.dot_dimension_numbers<[1], [0], [0], [1], [0, 0, 1, 1], [], []>} : vector<64x64xbf16>, vector<64x288xbf16>, vector<64x288xf32> -> vector<64x288xf32>
    %366 = arith.truncf %352 : vector<64x16xf32> to vector<64x16xbf16>
    %cst_208 = arith.constant dense<0.000000e+00> : vector<64x288xf32>
    %367 = tpu.matmul %366, %359, %cst_208 {dimension_numbers = #tpu.dot_dimension_numbers<[1], [0], [0], [1], [0, 0, 1, 1], [], []>} : vector<64x16xbf16>, vector<16x288xbf16>, vector<64x288xf32> -> vector<64x288xf32>
    %368 = arith.mulf %365, %367 : vector<64x288xf32>
    %369 = arith.truncf %368 : vector<64x288xf32> to vector<64x288xbf16>
    %c0_209 = arith.constant 0 : index
    %c0_210 = arith.constant 0 : index
    %370 = vector.load %arg11[%c0_209, %c0_210] : memref<288x32xbf16, #tpu.memory_space<vmem>>, vector<288x32xbf16>
    %cst_211 = arith.constant dense<0.000000e+00> : vector<64x32xf32>
    %371 = tpu.matmul %369, %370, %cst_211 {dimension_numbers = #tpu.dot_dimension_numbers<[1], [0], [0], [1], [0, 0, 1, 1], [], []>} : vector<64x288xbf16>, vector<288x32xbf16>, vector<64x32xf32> -> vector<64x32xf32>
    %c0_212 = arith.constant 0 : index
    %c0_213 = arith.constant 0 : index
    %372 = vector.load %arg45[%c0_212, %c0_213] : memref<1x32xf32, #tpu.memory_space<vmem>>, vector<1x32xf32>
    %373 = vector.broadcast %372 : vector<1x32xf32> to vector<64x32xf32>
    %374 = arith.addf %371, %373 : vector<64x32xf32>
    %cst_214 = arith.constant 0.000000e+00 : f32
    %375 = vector.broadcast %cst_214 : f32 to vector<64x32xf32>
    %376 = arith.cmpf oge, %374, %375 : vector<64x32xf32>
    %cst_215 = arith.constant 1.000000e-01 : f32
    %377 = vector.broadcast %cst_215 : f32 to vector<64x32xf32>
    %378 = arith.mulf %377, %374 : vector<64x32xf32>
    %379 = arith.select %376, %374, %378 : vector<64x32xi1>, vector<64x32xf32>
    %380 = arith.truncf %379 : vector<64x32xf32> to vector<64x32xbf16>
    %c0_216 = arith.constant 0 : index
    %c0_217 = arith.constant 0 : index
    %381 = vector.load %arg46[%c0_216, %c0_217] : memref<32x1024xbf16, #tpu.memory_space<vmem>>, vector<32x1024xbf16>
    %cst_218 = arith.constant dense<0.000000e+00> : vector<64x1024xf32>
    %382 = tpu.matmul %380, %381, %cst_218 {dimension_numbers = #tpu.dot_dimension_numbers<[1], [0], [0], [1], [0, 0, 1, 1], [], []>} : vector<64x32xbf16>, vector<32x1024xbf16>, vector<64x1024xf32> -> vector<64x1024xf32>
    %c0_219 = arith.constant 0 : index
    %c0_220 = arith.constant 0 : index
    %383 = vector.load %arg47[%c0_219, %c0_220] : memref<1x1024xf32, #tpu.memory_space<vmem>>, vector<1x1024xf32>
    %384 = vector.broadcast %383 : vector<1x1024xf32> to vector<64x1024xf32>
    %385 = arith.addf %382, %384 : vector<64x1024xf32>
    %cst_221 = arith.constant 0.000000e+00 : f32
    %386 = vector.broadcast %cst_221 : f32 to vector<64x1024xf32>
    %387 = arith.cmpf oge, %385, %386 : vector<64x1024xf32>
    %cst_222 = arith.constant 1.000000e-01 : f32
    %388 = vector.broadcast %cst_222 : f32 to vector<64x1024xf32>
    %389 = arith.mulf %388, %385 : vector<64x1024xf32>
    %390 = arith.select %387, %385, %389 : vector<64x1024xi1>, vector<64x1024xf32>
    %391 = arith.truncf %390 : vector<64x1024xf32> to vector<64x1024xbf16>
    %c0_223 = arith.constant 0 : index
    %c0_224 = arith.constant 0 : index
    %392 = vector.load %arg48[%c0_223, %c0_224] : memref<1024x128xbf16, #tpu.memory_space<vmem>>, vector<1024x128xbf16>
    %cst_225 = arith.constant dense<0.000000e+00> : vector<64x128xf32>
    %393 = tpu.matmul %391, %392, %cst_225 {dimension_numbers = #tpu.dot_dimension_numbers<[1], [0], [0], [1], [0, 0, 1, 1], [], []>} : vector<64x1024xbf16>, vector<1024x128xbf16>, vector<64x128xf32> -> vector<64x128xf32>
    %c0_226 = arith.constant 0 : index
    %c0_227 = arith.constant 0 : index
    %394 = vector.load %arg49[%c0_226, %c0_227] : memref<1x128xf32, #tpu.memory_space<vmem>>, vector<1x128xf32>
    %395 = vector.broadcast %394 : vector<1x128xf32> to vector<64x128xf32>
    %396 = arith.addf %393, %395 : vector<64x128xf32>
    %397 = arith.mulf %396, %396 : vector<64x128xf32>
    %cst_228 = arith.constant dense<0.000000e+00> : vector<64xf32>
    %398 = vector.multi_reduction <add>, %397, %cst_228 [1] : vector<64x128xf32> to vector<64xf32>
    %399 = vector.shape_cast %398 : vector<64xf32> to vector<64x1xf32>
    %cst_229 = arith.constant 1.000000e-24 : f32
    %400 = vector.broadcast %cst_229 : f32 to vector<64x1xf32>
    %401 = arith.maximumf %399, %400 : vector<64x1xf32>
    %402 = math.rsqrt %401 : vector<64x1xf32>
    %403 = vector.broadcast %402 : vector<64x1xf32> to vector<64x128xf32>
    %404 = arith.mulf %396, %403 : vector<64x128xf32>
    %c0_230 = arith.constant 0 : index
    %c0_231 = arith.constant 0 : index
    %405 = vector.load %arg50[%c0_230, %c0_231] : memref<64x128xf32, #tpu.memory_space<vmem>>, vector<64x128xf32>
    tpu.vector_store %arg50[%c0_230, %c0_231], %404 {strides = array<i32>} : memref<64x128xf32, #tpu.memory_space<vmem>>, vector<64x128xf32>,
    return
  }
}

</mosaic_0001>

<bundles_post_ra>
// kernel: fgcnet_forward.1
= control target key start
LH: loop header
LB: loop body
LE: loop exit
PB: predicated region body
PF: predicated region fallthrough
CT: control target
= control target key end

     0   :  { %s18684_s3 = smov 15   ;;  %vm249_vm0 = vcmask 1042432   ;;  %vm236_vm1 = vcmask 48128   ;;  %s18685_s10 = smov 16   ;;  %vm488_vm2 = vcmask 130048   ;;  %v21940_v45 = vmov 0   ;;  %s21939_s0 = inlined_call_operand.smem [shape: u32[51], index: -1, kind: input, shape index: {}] }
   0x1   :  { %s14886_s6 = sld [smem:[%s21939_s0 + %s18684_s3]]   ;;  %s18686_s14 = smov 14   ;;  %367 = vmatprep.mubr.bf16.mxu1 %v21940_v45  ;;  %vm976_vm3 = vcmask 523264   ;;  %vm1468_vm4 = vcmask 261120   ;;  %vm18701_vm13 = vmmov 0  }
   0x2   :  { %s1_s9 = sld [smem:[%s21939_s0]]   ;;  %s18688_s18 = smov 8  }
   0x3   :  { %s14887_s13 = sld [smem:[%s21939_s0 + %s18685_s10]]   ;;  %s18689_s22 = smov 1  }
   0x4   :  { %s14885_s17 = sld [smem:[%s21939_s0 + %s18686_s14]]   ;;  %s18690_s26 = smov 11  }
   0x5   :  { %s18864_s21 = sld [smem:[%s21939_s0 + %s18688_s18]]   ;;  %s18691_s30 = smov 4  }
   0x6   :  { %s19000_s25 = sld [smem:[%s21939_s0 + %s18689_s22]]   ;;  %s18692_s4 = smov 17  }
   0x7   :  { %v231_v0 = vld [vmem:[%s14886_s6] sm:$0x7]  ;;  %s19071_s29 = sld [smem:[%s21939_s0 + %s18690_s26]]   ;;  %s18693_s8 = smov 18  }
   0x8   :  { %17564 = vmatprep.subr.msk.bf16.mxu0 %vm249_vm0, %v231_v0  ;;  %v251_v1 = vsel %vm249_vm0, %v231_v0, 0  ;;  %v221_v2 = vld [vmem:[%s1_s9] sm:$0xff]  ;;  %v222_v3 = vld [vmem:[%s1_s9 + $0x8] sm:$0xff]  ;;  %v223_v4 = vld [vmem:[%s1_s9 + $0x10] sm:$0xff]  ;;  %s19120_s3 = sld [smem:[%s21939_s0 + %s18691_s30]]   ;;  %s18694_s12 = smov 19  }
   0x9   :  { %16795 = vmatpush3.bf16.msra.mxu0 %v251_v1  ;;  %v18750_v5 = vpack.c.bf16 %v222_v3, %v221_v2  ;;  %v224_v6 = vld [vmem:[%s1_s9 + $0x18] sm:$0xff]  ;;  %v225_v7 = vld [vmem:[%s1_s9 + $0x20] sm:$0xff]  ;;  %v226_v8 = vld [vmem:[%s1_s9 + $0x28] sm:$0xff]  ;;  %s14888_s7 = sld [smem:[%s21939_s0 + %s18692_s4]]   ;;  %s18695_s16 = smov 20  }
   0xa   :  { %v18752_v9 = vpack.c.bf16 %v224_v6, %v223_v4  ;;  %v18754_v10 = vpack.c.bf16 %v226_v8, %v225_v7  ;;  %v227_v11 = vld [vmem:[%s1_s9 + $0x30] sm:$0xff]  ;;  %v228_v12 = vld [vmem:[%s1_s9 + $0x38] sm:$0xff]  ;;  %v14938_v21 = vld [vmem:[%s14887_s13] ss:$0 sm:$0xff]  ;;  %s19148_s11 = sld [smem:[%s21939_s0 + %s18693_s8]]   ;;  %s18696_s20 = smov 9  }
   0xb   :  { %16796 = vmatprep.mubr.msk.bf16.mxu0 %vm236_vm1, %v18750_v5  ;;  %v18762_v13 = vpack.c.bf16 %v228_v12, %v227_v11  ;;  %v229_v38 = vld [vmem:[%s14885_s17] sm:$0x77]  ;;  %v17621_v47 = vld [vmem:[%s14885_s17 + $0x8] ss:$0 sps:$4 sm:$0x77]   ;;  %s14890_s15 = sld [smem:[%s21939_s0 + %s18694_s12]]   ;;  %s18697_s26 = smov 2  }
   0xc   :  { %16797 = vmatmul.mubr.msk.bf16.vlgmr.msra.gmra.mxu0 %vm236_vm1, %v18752_v9  ;;  %v14927_v40 = vcombine.high %v229_v38, %v229_v38  ;;  %v14926_v41 = vcombine.low %v229_v38, %v229_v38  ;;  %17565 = vmatprep.subr.msk.bf16.mxu0 %vm249_vm0, %v17621_v47  ;;  %v333_v49 = vsel %vm249_vm0, %v17621_v47, 0  ;;  %v18873_v54 = vld [vmem:[%s18864_s21 + $0x4] ss:$12 sps:$4 sm:$0xff]   ;;  %v18876_v55 = vld [vmem:[%s18864_s21] ss:$12 sps:$4 sm:$0xff]   ;;  %s14891_s19 = sld [smem:[%s21939_s0 + %s18695_s16]]   ;;  %s18698_s1 = smov 12  }
   0xd   :  { %16800 = vmatprep.mubr.msk.bf16.mxu0 %vm236_vm1, %v18754_v10  ;;  %16805 = vmatpush3.bf16.msra.mxu0 %v333_v49  ;;  %s19189_s24 = sld [smem:[%s21939_s0 + %s18696_s20]]   ;;  %s18700_s5 = smov 5  }
   0xe   :  { %14929 = vmatprep.subr.msk.bf16.mxu1 %vm249_vm0, %v14927_v40  ;;  %v327_v43 = vsel %vm249_vm0, %v14926_v41, 0  ;;  %812 = vmatprep.subr.bf16.mxu0 %v18873_v54  ;;  %s19260_s30 = sld [smem:[%s21939_s0 + %s18697_s26]]   ;;  %s18702_s9 = smov 22  }
   0xf   :  { %350 = vmatpush1.bf16.msra.mxu1 %v327_v43  ;;  %s19308_s4 = sld [smem:[%s21939_s0 + %s18698_s1]]   ;;  %s18703_s13 = smov 23  }
  0x10   :  { %s19364_s8 = sld [smem:[%s21939_s0 + %s18700_s5]]   ;;  %s18704_s17 = smov 21  }
  0x11   :  { %s19374_s12 = sld [smem:[%s21939_s0 + %s18702_s9]]   ;;  %s18705_s22 = smov 24  }
  0x12   :  { %14930 = vmatmul.mubr.msk.bf16.vlgmr.msra.gmra.mxu1 %vm236_vm1, %v18750_v5  ;;  %s19379_s16 = sld [smem:[%s21939_s0 + %s18703_s13]]   ;;  %s18706_s28 = smov 10  }
  0x13   :  { %377 = vmatprep.mubr.bf16.mxu1 %v21940_v45  ;;  %s14892_s20 = sld [smem:[%s21939_s0 + %s18704_s17]]   ;;  %s18707_s5 = smov 13  }
  0x14   :  { %16801 = vmatmul.mubr.msk.bf16.gmra.mxu0 %vm236_vm1, %v18762_v13  ;;  %s14895_s27 = sld [smem:[%s21939_s0 + %s18705_s22]]   ;;  %s18708_s9 = smov 3  }
  0x15   :  { %16806 = vmatprep.mubr.msk.bf16.mxu0 %vm236_vm1, %v18750_v5  ;;  %s18709_s13 = smov 26   ;;  %s18710_s17 = smov 27  }
  0x16   :  { %s18711_s22 = smov 25   ;;  %s18714_s10 = smov 30  }
  0x17   :  { %s18724_s23 = smov 39   ;;  %s18725_s1 = smov 37  }
  0x18   :  { %s18726_s6 = smov 40   ;;  %s18728_s14 = smov 43  }
  0x1a   :  { %14931 = vmatmul.mubr.msk.bf16.gmra.mxu1 %vm236_vm1, %v18752_v9 }
  0x1b   :  { %387 = vmatprep.mubr.bf16.mxu1 %v21940_v45 }
  0x1c   :  { %16807 = vmatmul.mubr.msk.bf16.vlgmr.msra.gmra.mxu0 %vm236_vm1, %v18752_v9 }
  0x1d   :  { %16810 = vmatprep.mubr.msk.bf16.mxu0 %vm236_vm1, %v18754_v10  ;;  %813 = vmatpush1.bf16.msra.mxu0 %v18876_v55 }
  0x22   :  { %14932 = vmatmul.mubr.msk.bf16.gmra.mxu1 %vm236_vm1, %v18754_v10 }
  0x23   :  { %397 = vmatprep.mubr.bf16.mxu1 %v21940_v45 }
  0x24   :  { %16811 = vmatmul.mubr.msk.bf16.gmra.mxu0 %vm236_vm1, %v18762_v13 }
  0x25   :  { %830 = vmatprep.mubr.bf16.mxu0 %v21940_v45 }
  0x2a   :  { %14933 = vmatmul.mubr.msk.bf16.gmra.mxu1 %vm236_vm1, %v18762_v13 }
  0xcc   :  { %v18768_v14 = vpop.f32.mrf.mxu0 }
  0xcd   :  { %v18824_v36 = vadd.f32 %v18768_v14, %v14938_v21  ;;  %v543_v46 = vsel %vm488_vm2, %v18768_v14, inf }
  0xce   :  { %v18770_v15 = vpop.f32.mrf.mxu0 }
  0xcf   :  { %v18811_v32 = vadd.f32 %v14938_v21, %v18770_v15  ;;  %v495_v39 = vsel %vm488_vm2, %v18824_v36, -inf  ;;  %v537_v42 = vsel %vm488_vm2, %v18770_v15, inf }
  0xd0   :  { %v18772_v16 = vpop.f32.mrf.mxu0 }
  0xd1   :  { %v18806_v30 = vadd.f32 %v18772_v16, %v14938_v21  ;;  %v489_v35 = vsel %vm488_vm2, %v18811_v32, -inf  ;;  %v546_v48 = vsel %vm488_vm2, %v18772_v16, inf }
  0xd2   :  { %v18777_v17 = vpop.f32.mrf.mxu0 }
  0xd3   :  { %v498_v33 = vsel %vm488_vm2, %v18806_v30, -inf  ;;  %v18819_v34 = vadd.f32 %v14938_v21, %v18777_v17  ;;  %v540_v44 = vsel %vm488_vm2, %v18777_v17, inf }
  0xd4   :  { %v18779_v18 = vpop.f32.mrf.mxu0 }
  0xd5   :  { %v18796_v26 = vadd.f32 %v18779_v18, %v14938_v21  ;;  %v492_v37 = vsel %vm488_vm2, %v18819_v34, -inf  ;;  %v555_v52 = vsel %vm488_vm2, %v18779_v18, inf }
  0xd6   :  { %v18781_v19 = vpop.f32.mrf.mxu0 }
  0xd7   :  { %v18801_v28 = vadd.f32 %v14938_v21, %v18781_v19  ;;  %v507_v29 = vsel %vm488_vm2, %v18796_v26, -inf  ;;  %v549_v50 = vsel %vm488_vm2, %v18781_v19, inf }
  0xd8   :  { %v18783_v20 = vpop.f32.mrf.mxu0 }
  0xd9   :  { %v18786_v22 = vadd.f32 %v18783_v20, %v14938_v21  ;;  %v501_v31 = vsel %vm488_vm2, %v18801_v28, -inf  ;;  %v558_v53 = vsel %vm488_vm2, %v18783_v20, inf }
  0xda   :  { %v18788_v23 = vpop.f32.mrf.mxu0 }
  0xdb   :  { %v510_v24 = vsel %vm488_vm2, %v18786_v22, -inf  ;;  %v18793_v25 = vadd.f32 %v14938_v21, %v18788_v23  ;;  %v552_v51 = vsel %vm488_vm2, %v18788_v23, inf }
  0xdc   :  { %511 = vmax.xlane.f32.xlu0 %v510_v24 }
  0xdd   :  { %v504_v27 = vsel %vm488_vm2, %v18793_v25, -inf }
  0xde   :  { %505 = vmax.xlane.f32.xlu1 %v504_v27 }
  0xe0   :  { %508 = vmax.xlane.f32.xlu0 %v507_v29 }
  0xe2   :  { %502 = vmax.xlane.f32.xlu1 %v501_v31 }
  0xe4   :  { %499 = vmax.xlane.f32.xlu0 %v498_v33 }
  0xe6   :  { %490 = vmax.xlane.f32.xlu1 %v489_v35 }
  0xe8   :  { %493 = vmax.xlane.f32.xlu0 %v492_v37 }
  0xea   :  { %496 = vmax.xlane.f32.xlu1 %v495_v39 }
  0xec   :  { %538 = vmin.xlane.f32.xlu0 %v537_v42 }
  0xee   :  { %541 = vmin.xlane.f32.xlu1 %v540_v44 }
  0xf0   :  { %544 = vmin.xlane.f32.xlu0 %v543_v46 }
  0xf2   :  { %547 = vmin.xlane.f32.xlu1 %v546_v48 }
  0xf4   :  { %550 = vmin.xlane.f32.xlu0 %v549_v50 }
  0xf6   :  { %553 = vmin.xlane.f32.xlu1 %v552_v51 }
  0xf8   :  { %556 = vmin.xlane.f32.xlu0 %v555_v52 }
  0xfa   :  { %559 = vmin.xlane.f32.xlu1 %v558_v53 }
 0x165   :  { %v512_v56 = vpop.xlane.xlu0 %511 }
 0x166   :  { %v520_v57 = vsub.f32 %v18786_v22, %v512_v56 }
 0x167   :  { %v506_v58 = vpop.xlane.xlu1 %505 }
 0x168   :  { %v535_v59 = vmul.f32 1.442695, %v520_v57  ;;  %v518_v60 = vsub.f32 %v18793_v25, %v506_v58 }
 0x169   :  { %v509_v61 = vpop.xlane.xlu0 %508 }
 0x16a   :  { %18197 = vpow2.f32 %v535_v59  ;;  %v519_v62 = vsub.f32 %v18796_v26, %v509_v61  ;;  %v531_v0 = vmul.f32 1.442695, %v518_v60  ;;  %v18930_v61 = vld [vmem:[%s18864_s21 + $0x8] ss:$12 sps:$4 sm:$0xff]  }
 0x16b   :  { %v503_v63 = vpop.xlane.xlu1 %502 }
 0x16c   :  { %v533_v1 = vmul.f32 1.442695, %v519_v62  ;;  %v517_v2 = vsub.f32 %v18801_v28, %v503_v63 }
 0x16d   :  { %v500_v3 = vpop.xlane.xlu0 %499 }
 0x16e   :  { %18199 = vpow2.f32 %v533_v1  ;;  %v529_v5 = vmul.f32 1.442695, %v517_v2  ;;  %v516_v6 = vsub.f32 %v18806_v30, %v500_v3 }
 0x16f   :  { %v491_v4 = vpop.xlane.xlu1 %490  ;;  %18201 = vpow2.f32 %v531_v0 }
 0x170   :  { %v513_v7 = vsub.f32 %v18811_v32, %v491_v4  ;;  %18203 = vpow2.f32 %v529_v5  ;;  %v527_v12 = vmul.f32 1.442695, %v516_v6  ;;  %v18957_v4 = vpop.f32.mrf.mxu1 }
 0x171   :  { %v494_v8 = vpop.xlane.xlu0 %493 }
 0x172   :  { %v521_v9 = vmul.f32 1.442695, %v513_v7  ;;  %v514_v10 = vsub.f32 %v18819_v34, %v494_v8  ;;  %v18959_v5 = vpop.f32.mrf.mxu1  ;;  %v18963_v7 = vpop.f32.mrf.mxu0 }
 0x173   :  { %v497_v11 = vpop.xlane.xlu1 %496 }
 0x174   :  { %v523_v13 = vmul.f32 1.442695, %v514_v10  ;;  %v515_v21 = vsub.f32 %v18824_v36, %v497_v11  ;;  %18205 = vpow2.f32 %v521_v9  ;;  %v18961_v6 = vpop.f32.mrf.mxu1  ;;  %v18967_v9 = vpop.f32.mrf.mxu0 }
 0x175   :  { %v539_v22 = vpop.xlane.xlu0 %538 }
 0x176   :  { %18207 = vpow2.f32 %v523_v13  ;;  %v561_v24 = vsub.f32 %v539_v22, %v18770_v15  ;;  %v525_v26 = vmul.f32 1.442695, %v515_v21  ;;  %v18965_v8 = vpop.f32.mrf.mxu1  ;;  %v18971_v11 = vpop.f32.mrf.mxu0 }
 0x177   :  { %v18891_v25 = vpop.eup %18197  ;;  %v542_v27 = vpop.xlane.xlu1 %541  ;;  %18209 = vpow2.f32 %v527_v12 }
 0x178   :  { %v569_v28 = vmul.f32 1.442695, %v561_v24  ;;  %v562_v29 = vsub.f32 %v542_v27, %v18777_v17  ;;  %16814 = vmatprep.subr.msk.mxu1 %vm488_vm2, %v18891_v25  ;;  %v18969_v10 = vpop.f32.mrf.mxu1  ;;  %v18975_v13 = vpop.f32.mrf.mxu0 }
 0x179   :  { %16815 = vmatpush3.xpose.msk.msra.mxu1 %vm488_vm2, %v18891_v25  ;;  %v545_v30 = vpop.xlane.xlu0 %544 }
 0x17a   :  { %18211 = vpow2.f32 %v569_v28  ;;  %v571_v31 = vmul.f32 1.442695, %v562_v29  ;;  %v563_v32 = vsub.f32 %v545_v30, %v18768_v14  ;;  %v18973_v12 = vpop.f32.mrf.mxu1  ;;  %v18979_v22 = vpop.f32.mrf.mxu0 }
 0x17b   :  { %v18899_v15 = vpop.eup %18199  ;;  %18213 = vpow2.f32 %v525_v26  ;;  %v548_v33 = vpop.xlane.xlu1 %547 }
 0x17c   :  { %18215 = vpow2.f32 %v571_v31  ;;  %v573_v34 = vmul.f32 1.442695, %v563_v32  ;;  %v564_v35 = vsub.f32 %v548_v33, %v18772_v16  ;;  %16816 = vmatprep.subr.msk.mxu1 %vm488_vm2, %v18899_v15  ;;  %v18202_v17 = vpop.eup %18201  ;;  %v769_v3 = vpack.c.bf16 %v18891_v25, %v18899_v15  ;;  %v18977_v21 = vpop.f32.mrf.mxu1 }
 0x17d   :  { %16817 = vmatpush3.xpose.msk.msra.mxu1 %vm488_vm2, %v18899_v15  ;;  %v551_v36 = vpop.xlane.xlu0 %550  ;;  %v18204_v16 = vpop.eup %18203 }
 0x17e   :  { %v575_v37 = vmul.f32 1.442695, %v564_v35  ;;  %v565_v38 = vsub.f32 %v551_v36, %v18781_v19  ;;  %16818 = vmatprep.subr.msk.mxu1 %vm488_vm2, %v18202_v17  ;;  %18217 = vpow2.f32 %v573_v34  ;;  %v768_v0 = vpack.c.bf16 %v18202_v17, %v18204_v16  ;;  %v385_v24 = vpop.f32.mrf.mxu1  ;;  %v18981_v25 = vpop.f32.mrf.mxu0 }
 0x17f   :  { %v554_v14 = vpop.xlane.xlu1 %553 }
 0x180   :  { %18219 = vpow2.f32 %v575_v37  ;;  %v577_v39 = vmul.f32 1.442695, %v565_v38  ;;  %v566_v40 = vsub.f32 %v554_v14, %v18788_v23  ;;  %v389_v26 = vpop.f32.mrf.mxu1  ;;  %v18983_v27 = vpop.f32.mrf.mxu0 }
 0x181   :  { %v557_v41 = vpop.xlane.xlu0 %556  ;;  %16819 = vmatpush3.xpose.msk.msra.mxu1 %vm488_vm2, %v18202_v17  ;;  %v18206_v42 = vpop.eup %18205 }
 0x182   :  { %v579_v43 = vmul.f32 1.442695, %v566_v40  ;;  %v567_v44 = vsub.f32 %v557_v41, %v18779_v18  ;;  %16820 = vmatprep.subr.msk.mxu1 %vm488_vm2, %v18204_v16  ;;  %18221 = vpow2.f32 %v577_v39  ;;  %v391_v28 = vpop.f32.mrf.mxu1  ;;  %v18985_v29 = vpop.f32.mrf.mxu0 }
 0x183   :  { %v18208_v46 = vpop.eup %18207  ;;  %v560_v19 = vpop.xlane.xlu1 %559 }
 0x184   :  { %18223 = vpow2.f32 %v579_v43  ;;  %v581_v47 = vmul.f32 1.442695, %v567_v44  ;;  %v568_v48 = vsub.f32 %v560_v19, %v18783_v20  ;;  %v766_v49 = vpack.c.bf16 %v18208_v46, %v18206_v42  ;;  %v18210_v50 = vpop.eup %18209  ;;  %v393_v30 = vpop.f32.mrf.mxu1 }
 0x185   :  { %16821 = vmatpush3.xpose.msk.msra.mxu1 %vm488_vm2, %v18204_v16 }
 0x186   :  { %v583_v23 = vmul.f32 1.442695, %v568_v48  ;;  %16822 = vmatprep.subr.msk.mxu1 %vm488_vm2, %v18210_v50  ;;  %14958 = vmatmul.mubr.msk.bf16.vlgmr.msra.gmra.mxu0 %vm488_vm2, %v766_v49  ;;  %18225 = vpow2.f32 %v581_v47  ;;  %v395_v32 = vpop.f32.mrf.mxu1 }
 0x187   :  { %v18212_v51 = vpop.eup %18211  ;;  %840 = vmatprep.mubr.bf16.mxu0 %v21940_v45 }
 0x188   :  { %v18214_v18 = vpop.eup %18213  ;;  %18227 = vpow2.f32 %v583_v23  ;;  %16830 = vmatprep.mubr.msk.f32.mxu1 %vm488_vm2, %v18212_v51  ;;  %v399_v34 = vpop.f32.mrf.mxu1 }
 0x189   :  { %v18216_v52 = vpop.eup %18215  ;;  %16823 = vmatpush3.xpose.msk.msra.mxu1 %vm488_vm2, %v18210_v50  ;;  %v767_v56 = vpack.c.bf16 %v18210_v50, %v18214_v18 }
 0x18a   :  { %16824 = vmatprep.subr.msk.mxu1 %vm488_vm2, %v18214_v18  ;;  %v18920_v20 = vpack.c.bf16 %v18216_v52, %v18212_v51  ;;  %v401_v17 = vpop.f32.mrf.mxu1 }
 0x18b   :  { %v18218_v53 = vpop.eup %18217 }
 0x18c   :  { %v403_v38 = vpop.f32.mrf.mxu1 }
 0x18d   :  { %v18220_v57 = vpop.eup %18219  ;;  %16825 = vmatpush3.xpose.msk.msra.mxu1 %vm488_vm2, %v18214_v18 }
 0x18e   :  { %16826 = vmatprep.subr.msk.mxu1 %vm488_vm2, %v18208_v46  ;;  %14959 = vmatmul.mubr.msk.bf16.gmra.mxu0 %vm488_vm2, %v767_v56  ;;  %v18925_v58 = vpack.c.bf16 %v18220_v57, %v18218_v53  ;;  %v405_v40 = vpop.f32.mrf.mxu1 }
 0x18f   :  { %850 = vmatprep.mubr.bf16.mxu0 %v21940_v45  ;;  %v18222_v59 = vpop.eup %18221 }
 0x191   :  { %v18224_v60 = vpop.eup %18223  ;;  %16827 = vmatpush3.xpose.msk.msra.mxu1 %vm488_vm2, %v18208_v46 }
 0x192   :  { %16828 = vmatprep.subr.msk.mxu1 %vm488_vm2, %v18206_v42  ;;  %v18933_v62 = vpack.c.bf16 %v18224_v60, %v18222_v59 }
 0x193   :  { %v18226_v63 = vpop.eup %18225 }
 0x194   :  { %21970 = vst [vmem:[#allocation2_spill] sm:$0xff] %v18933_v62 }
 0x195   :  { %v18228_v1 = vpop.eup %18227  ;;  %16829 = vmatpush3.xpose.msk.msra.mxu1 %vm488_vm2, %v18206_v42 }
 0x196   :  { %14960 = vmatmul.mubr.msk.bf16.gmra.mxu0 %vm488_vm2, %v768_v0  ;;  %16842 = vmatprep.subr.bf16.mxu1 %v18930_v61  ;;  %v18938_v2 = vpack.c.bf16 %v18228_v1, %v18226_v63 }
 0x197   :  { %860 = vmatprep.mubr.bf16.mxu0 %v21940_v45 }
 0x198   :  { %21971 = vst [vmem:[#allocation3_spill] sm:$0xff] %v18938_v2  ;;  %16831 = vmatmul.mubr.msk.f32.vlgmr.msra.gmra.mxu1 %vm488_vm2, %v18216_v52 }
 0x199   :  { %16833 = vmatprep.mubr.msk.f32.mxu1 %vm488_vm2, %v18218_v53  ;;  %16843 = vmatpush3.bf16.msra.mxu1 %v18930_v61 }
 0x19c   :  { %16834 = vmatmul.mubr.msk.f32.gmra.mxu1 %vm488_vm2, %v18220_v57 }
 0x19d   :  { %16836 = vmatprep.mubr.msk.f32.mxu1 %vm488_vm2, %v18222_v59 }
 0x19e   :  { %14961 = vmatmul.mubr.msk.bf16.gmra.mxu0 %vm488_vm2, %v769_v3 }
 0x19f   :  { %1021 = vmatprep.mubr.bf16.mxu0 %v21940_v45 }
 0x1a0   :  { %16837 = vmatmul.mubr.msk.f32.gmra.mxu1 %vm488_vm2, %v18224_v60 }
 0x1a1   :  { %16839 = vmatprep.mubr.msk.f32.mxu1 %vm488_vm2, %v18226_v63 }
 0x1a4   :  { %16840 = vmatmul.mubr.msk.f32.gmra.mxu1 %vm488_vm2, %v18228_v1 }
 0x1a5   :  { %16844 = vmatprep.mubr.msk.bf16.mxu1 %vm488_vm2, %v766_v49 }
 0x1a8   :  { %16845 = vmatmul.mubr.msk.bf16.vlgmr.msra.gmra.mxu1 %vm488_vm2, %v767_v56 }
 0x1a9   :  { %16848 = vmatprep.mubr.msk.bf16.mxu1 %vm488_vm2, %v768_v0 }
 0x1b0   :  { %16849 = vmatmul.mubr.msk.bf16.gmra.mxu1 %vm488_vm2, %v769_v3 }
 0x246   :  { %v18987_v31 = vpop.f32.mrf.mxu0 }
 0x248   :  { %v18989_v15 = vpop.f32.mrf.mxu0 }
 0x24a   :  { %v18991_v33 = vpop.f32.mrf.mxu0 }
 0x24c   :  { %v838_v35 = vpop.f32.mrf.mxu0 }
 0x24e   :  { %v842_v36 = vpop.f32.mrf.mxu0 }
 0x250   :  { %v844_v37 = vpop.f32.mrf.mxu0 }
 0x252   :  { %v846_v14 = vpop.f32.mrf.mxu0 }
 0x254   :  { %v848_v39 = vpop.f32.mrf.mxu0 }
 0x256   :  { %v852_v16 = vpop.f32.mrf.mxu0 }
 0x258   :  { %v16832_v41 = vpop.f32.mrf.mxu1  ;;  %v854_v42 = vpop.f32.mrf.mxu0 }
 0x259   :  { %v739_v50 = vmax.f32 %v16832_v41, 1e-30  ;;  %v949_v41 = vmul.f32 %v854_v42, %v391_v28  ;;  %v943_v28 = vmul.f32 %v844_v37, %v18973_v12  ;;  %v212_v42 = vld [vmem:[%s19000_s25 + $0x28] sm:$0xff] }
 0x25a   :  { %v699_v43 = vpop.f32.mrf.mxu1  ;;  %v856_v44 = vpop.f32.mrf.mxu0 }
 0x25b   :  { %v738_v47 = vmax.f32 %v699_v43, 1e-30 }
 0x25c   :  { %v16835_v46 = vpop.f32.mrf.mxu1  ;;  %v858_v19 = vpop.f32.mrf.mxu0 }
 0x25d   :  { %18229 = vrcp.f32 %v738_v47  ;;  %v952_v63 = vmul.f32 %v858_v19, %v395_v32  ;;  %v208_v19 = vld [vmem:[%s19000_s25 + $0x8] sm:$0xff] }
 0x25e   :  { %v709_v48 = vpop.f32.mrf.mxu1  ;;  %v862_v49 = vpop.f32.mrf.mxu0 }
 0x25f   :  { %v954_v3 = vmul.f32 %v862_v49, %v399_v34  ;;  %v740_v45 = vmax.f32 %v709_v48, 1e-30 }
 0x260   :  { %v16838_v23 = vpop.f32.mrf.mxu1  ;;  %v864_v51 = vpop.f32.mrf.mxu0 }
 0x261   :  { %v743_v18 = vmax.f32 %v16838_v23, 1e-30  ;;  %v955_v0 = vmul.f32 %v864_v51, %v401_v17  ;;  %v951_v23 = vmul.f32 %v856_v44, %v393_v30  ;;  %v942_v17 = vmul.f32 %v842_v36, %v18969_v10 }
 0x262   :  { %v719_v52 = vpop.f32.mrf.mxu1  ;;  %v866_v53 = vpop.f32.mrf.mxu0 }
 0x263   :  { %18231 = vrcp.f32 %v743_v18  ;;  %v742_v56 = vmax.f32 %v719_v52, 1e-30  ;;  %v957_v57 = vmul.f32 %v866_v53, %v403_v38  ;;  %v946_v18 = vmul.f32 %v848_v39, %v385_v24 }
 0x264   :  { %18233 = vrcp.f32 %v739_v50  ;;  %v18993_v59 = vpop.f32.mrf.mxu1  ;;  %v868_v60 = vpop.f32.mrf.mxu0  ;;  %v741_v52 = vmax.f32 %v16835_v46, 1e-30  ;;  %v971_v50 = vpack.c.bf16 %v952_v63, %v949_v41  ;;  %v948_v38 = vmul.f32 %v852_v16, %v389_v26  ;;  %v211_v16 = vld [vmem:[%s19000_s25 + $0x20] sm:$0xff]  ;;  %v210_v41 = vld [vmem:[%s19000_s25 + $0x18] sm:$0xff] }
 0x265   :  { %18235 = vrcp.f32 %v742_v56  ;;  %v958_v1 = vmul.f32 %v868_v60, %v405_v40  ;;  %v973_v47 = vpack.c.bf16 %v957_v57, %v954_v3  ;;  %v945_v24 = vmul.f32 %v846_v14, %v18977_v21  ;;  %v207_v14 = vld [vmem:[%s19000_s25] sm:$0xff]  ;;  %v209_v3 = vld [vmem:[%s19000_s25 + $0x10] sm:$0xff] }
 0x266   :  { %v729_v43 = vpop.f32.mrf.mxu1  ;;  %18237 = vrcp.f32 %v740_v45  ;;  %v970_v30 = vpack.c.bf16 %v951_v23, %v948_v38  ;;  %v968_v26 = vpack.c.bf16 %v946_v18, %v943_v28  ;;  %v937_v45 = vmul.f32 %v18989_v15, %v18959_v5 }
 0x267   :  { %v974_v2 = vpack.c.bf16 %v958_v1, %v955_v0  ;;  %18239 = vrcp.f32 %v741_v52  ;;  %v939_v21 = vmul.f32 %v18991_v33, %v18961_v6  ;;  %v967_v37 = vpack.c.bf16 %v945_v24, %v942_v17  ;;  %v214_v24 = vld [vmem:[%s19000_s25 + $0x38] sm:$0xff]  ;;  %v17633_v17 = vld [vmem:[%s19071_s29 + $0x20] sm:$0xff]  }
 0x268   :  { %v18995_v62 = vpop.f32.mrf.mxu1  ;;  %v936_v46 = vmul.f32 %v18987_v31, %v18957_v4  ;;  %v745_v5 = vmax.f32 %v18993_v59, 1e-30  ;;  %v21972_v23 = vmov 0  }
 0x269   :  { %997 = vmatprep.subr.bf16.mxu0 %v974_v2  ;;  %v940_v2 = vmul.f32 %v838_v35, %v18965_v8  ;;  %v744_v8 = vmax.f32 %v729_v43, 1e-30 }
 0x26a   :  { %v19002_v32 = vpop.f32.mrf.mxu1  ;;  %998 = vmatpush1.bf16.msra.mxu0 %v973_v47  ;;  %v18230_v40 = vpop.eup %18229  ;;  %v964_v49 = vpack.c.bf16 %v939_v21, %v936_v46  ;;  %v17638_v21 = vld [vmem:[%s19071_s29 + $0x48] sm:$0xff]  }
 0x26b   :  { %999 = vmatprep.subr.bf16.mxu0 %v971_v50  ;;  %v965_v10 = vpack.c.bf16 %v940_v2, %v937_v45  ;;  %v754_v48 = vmul.f32 %v18230_v40, %v207_v14  ;;  %18241 = vrcp.f32 %v744_v8  ;;  %v938_v52 = vmul.f32 %v19002_v32, %v18967_v9  ;;  %v17629_v32 = vld [vmem:[%s19071_s29 + $0x30] sm:$0xff]   ;;  %v17631_v2 = vld [vmem:[%s19071_s29 + $0x28] sm:$0xff]   ;;  %v17635_v40 = vld [vmem:[%s19071_s29 + $0x18] sm:$0xff]  }
 0x26c   :  { %v16847_v34 = vpop.f32.mrf.mxu1  ;;  %18243 = vrcp.f32 %v745_v5  ;;  %v17636_v45 = vld [vmem:[%s19071_s29 + $0x50] sm:$0xff]   ;;  %v17640_v14 = vld [vmem:[%s19071_s29 + $0x40] sm:$0xff]  }
 0x26d   :  { %v947_v43 = vmul.f32 %v16847_v34, %v18971_v11  ;;  %v17630_v34 = vld [vmem:[%s19071_s29 + $0x68] sm:$0xff]   ;;  %v17641_v8 = vld [vmem:[%s19071_s29] sm:$0xff]  }
 0x26e   :  { %v908_v39 = vpop.f32.mrf.mxu1  ;;  %1000 = vmatpush1.bf16.msra.mxu0 %v970_v30 }
 0x26f   :  { %1001 = vmatprep.subr.bf16.mxu0 %v968_v26  ;;  %v941_v11 = vmul.f32 %v908_v39, %v18975_v13  ;;  %v17632_v26 = vld [vmem:[%s19071_s29 + $0x60] sm:$0xff]   ;;  %v17634_v39 = vld [vmem:[%s19071_s29 + $0x58] sm:$0xff]  }
 0x270   :  { %v18232_v12 = vpop.eup %18231  ;;  %v16850_v35 = vpop.f32.mrf.mxu1 }
 0x271   :  { %v18234_v44 = vpop.eup %18233  ;;  %v759_v33 = vmul.f32 %v18232_v12, %v212_v42  ;;  %v956_v56 = vmul.f32 %v16850_v35, %v18979_v22  ;;  %v966_v38 = vpack.c.bf16 %v941_v11, %v938_v52  ;;  %v17637_v12 = vld [vmem:[%s19071_s29 + $0x10] sm:$0xff]   ;;  %v17642_v35 = vld [vmem:[%s19071_s29 + $0x88] sm:$0xff]  }
 0x272   :  { %v18236_v36 = vpop.eup %18235  ;;  %v921_v15 = vpop.f32.mrf.mxu1  ;;  %1002 = vmatpush1.bf16.msra.mxu0 %v967_v37  ;;  %v755_v53 = vmul.f32 %v18234_v44, %v208_v19  ;;  %v17639_v37 = vld [vmem:[%s19071_s29 + $0x8] sm:$0xff]  }
 0x273   :  { %1003 = vmatprep.subr.bf16.mxu0 %v965_v10  ;;  %v758_v6 = vmul.f32 %v18236_v36, %v211_v16  ;;  %v950_v60 = vmul.f32 %v921_v15, %v18981_v25  ;;  %v18238_v1 = vpop.eup %18237  ;;  %v944_v25 = vmul.f32 %v18995_v62, %v18963_v7  ;;  %v213_v7 = vld [vmem:[%s19000_s25 + $0x30] sm:$0xff]  ;;  %v17643_v16 = vld [vmem:[%s19071_s29 + $0x80] sm:$0xff]  }
 0x274   :  { %v16851_v51 = vpop.f32.mrf.mxu1  ;;  %v960_v59 = vpack.c.bf16 %v755_v53, %v754_v48 }
 0x275   :  { %v959_v57 = vmul.f32 %v16851_v51, %v18983_v27  ;;  %v962_v4 = vpack.c.bf16 %v759_v33, %v758_v6  ;;  %v18240_v27 = vpop.eup %18239  ;;  %v969_v47 = vpack.c.bf16 %v947_v43, %v944_v25 }
 0x276   :  { %v924_v31 = vpop.f32.mrf.mxu1  ;;  %1004 = vmatpush1.bf16.msra.mxu0 %v964_v49  ;;  %v757_v18 = vmul.f32 %v18240_v27, %v210_v41 }
 0x277   :  { %v975_v63 = vpack.c.bf16 %v959_v57, %v956_v56  ;;  %v953_v0 = vmul.f32 %v924_v31, %v18985_v29  ;;  %16864 = vmatprep.mubr.msk.bf16.mxu1 %vm976_vm3, %v962_v4  ;;  %v756_v29 = vmul.f32 %v18238_v1, %v209_v3 }
 0x278   :  { %v18242_v62 = vpop.eup %18241 }
 0x279   :  { %v972_v22 = vpack.c.bf16 %v953_v0, %v950_v60  ;;  %14966 = vmatmul.mubr.msk.bf16.vlgmr.msra.gmra.mxu0 %vm976_vm3, %v960_v59  ;;  %16852 = vmatprep.subr.bf16.mxu0 %v975_v63  ;;  %v961_v50 = vpack.c.bf16 %v757_v18, %v756_v29  ;;  %v18244_v28 = vpop.eup %18243  ;;  %v760_v13 = vmul.f32 %v18242_v62, %v213_v7 }
 0x27a   :  { %17556 = vmatprep.subr.bf16.mxu1 %v975_v63  ;;  %16853 = vmatpush3.bf16.msra.mxu0 %v975_v63  ;;  %v761_v30 = vmul.f32 %v18244_v28, %v214_v24 }
 0x27b   :  { %17560 = vmatpush3.bf16.msra.mxu1 %v975_v63  ;;  %16854 = vmatprep.subr.bf16.mxu0 %v972_v22 }
 0x27c   :  { %17557 = vmatprep.subr.bf16.mxu1 %v972_v22  ;;  %1031 = vmatprep.mubr.bf16.mxu0 %v21972_v23  ;;  %v963_v9 = vpack.c.bf16 %v761_v30, %v760_v13 }
 0x27e   :  { %16855 = vmatpush3.bf16.msra.mxu0 %v972_v22 }
 0x27f   :  { %17561 = vmatpush3.bf16.msra.mxu1 %v972_v22  ;;  %16856 = vmatprep.subr.bf16.mxu0 %v969_v47 }
 0x280   :  { %17558 = vmatprep.subr.bf16.mxu1 %v969_v47 }
 0x281   :  { %14967 = vmatmul.mubr.msk.bf16.gmra.mxu0 %vm976_vm3, %v961_v50 }
 0x282   :  { %16857 = vmatpush3.bf16.msra.mxu0 %v969_v47  ;;  %1041 = vmatprep.mubr.bf16.mxu0 %v21972_v23 }
 0x283   :  { %17562 = vmatpush3.bf16.msra.mxu1 %v969_v47  ;;  %16858 = vmatprep.subr.bf16.mxu0 %v966_v38 }
 0x284   :  { %17559 = vmatprep.subr.bf16.mxu1 %v966_v38 }
 0x286   :  { %16859 = vmatpush3.bf16.msra.mxu0 %v966_v38 }
 0x287   :  { %17563 = vmatpush3.bf16.msra.mxu1 %v966_v38  ;;  %16868 = vmatprep.subr.bf16.mxu0 %v18930_v61 }
 0x288   :  { %1157 = vmatprep.subr.bf16.mxu1 %v18873_v54  ;;  %v21973_v54 = vld [vmem:[#allocation2_spill] sm:$0xff] }
 0x289   :  { %14968 = vmatmul.mubr.msk.bf16.gmra.mxu0 %vm976_vm3, %v962_v4 }
 0x28a   :  { %16865 = vmatmul.mubr.msk.bf16.vlgmr.msra.gmra.mxu1 %vm976_vm3, %v963_v9  ;;  %1051 = vmatprep.mubr.bf16.mxu0 %v21972_v23 }
 0x28b   :  { %1158 = vmatpush1.bf16.msra.mxu1 %v18876_v55  ;;  %1175 = vmatprep.mubr.bf16.mxu1 %v21972_v23  ;;  %v21974_v55 = vld [vmem:[#allocation3_spill] sm:$0xff] }
 0x291   :  { %14969 = vmatmul.mubr.msk.bf16.gmra.mxu0 %vm976_vm3, %v963_v9 }
 0x292   :  { %14974 = vmatmul.mubr.msk.bf16.vlgmr.msra.gmra.mxu1 %vm488_vm2, %v18920_v20  ;;  %16860 = vmatprep.mubr.msk.bf16.mxu0 %vm976_vm3, %v960_v59 }
 0x293   :  { %1185 = vmatprep.mubr.bf16.mxu1 %v21972_v23 }
 0x299   :  { %16861 = vmatmul.mubr.msk.bf16.vlgmr.msra.gmra.mxu0 %vm976_vm3, %v961_v50 }
 0x29a   :  { %14975 = vmatmul.mubr.msk.bf16.gmra.mxu1 %vm488_vm2, %v18925_v58  ;;  %16870 = vmatprep.mubr.msk.bf16.mxu0 %vm488_vm2, %v18920_v20  ;;  %v17626_v20 = vld [vmem:[%s19071_s29 + $0x78] sm:$0xff]  }
 0x29b   :  { %16869 = vmatpush3.bf16.msra.mxu0 %v18930_v61  ;;  %1195 = vmatprep.mubr.bf16.mxu1 %v21972_v23  ;;  %v17628_v61 = vld [vmem:[%s19071_s29 + $0x70] sm:$0xff]  }
 0x29c   :  { %15836 = vmatprep.subr.bf16.mxu1 %v17626_v20  ;;  %16878 = vmatprep.subr.bf16.mxu0 %v17642_v35 }
 0x2a1   :  { %16871 = vmatmul.mubr.msk.bf16.vlgmr.msra.gmra.mxu0 %vm488_vm2, %v18925_v58  ;;  %v17627_v58 = vld [vmem:[%s19071_s29 + $0x38] sm:$0xff]  }
 0x2a2   :  { %14976 = vmatmul.mubr.msk.bf16.gmra.mxu1 %vm488_vm2, %v21973_v54  ;;  %16874 = vmatprep.mubr.msk.bf16.mxu0 %vm488_vm2, %v21973_v54 }
 0x2a3   :  { %1205 = vmatprep.mubr.bf16.mxu1 %v21972_v23  ;;  %15837 = vmatpush3.bf16.msra.mxu1 %v17627_v58 }
 0x2a4   :  { %15838 = vmatprep.subr.bf16.mxu1 %v17628_v61  ;;  %16879 = vmatpush3.bf16.msra.mxu0 %v17642_v35 }
 0x2a5   :  { %16880 = vmatprep.subr.bf16.mxu0 %v17643_v16 }
 0x2a7   :  { %15839 = vmatpush3.bf16.msra.mxu1 %v17629_v32 }
 0x2a8   :  { %15840 = vmatprep.subr.bf16.mxu1 %v17630_v34  ;;  %16881 = vmatpush3.bf16.msra.mxu0 %v17643_v16 }
 0x2a9   :  { %16875 = vmatmul.mubr.msk.bf16.gmra.mxu0 %vm488_vm2, %v21974_v55 }
 0x2aa   :  { %14977 = vmatmul.mubr.msk.bf16.gmra.mxu1 %vm488_vm2, %v21974_v55 }
 0x2ab   :  { %15841 = vmatpush3.bf16.msra.mxu1 %v17631_v2 }
 0x2ac   :  { %15842 = vmatprep.subr.bf16.mxu1 %v17632_v26 }
 0x2af   :  { %15843 = vmatpush3.bf16.msra.mxu1 %v17633_v17 }
 0x2b0   :  { %15844 = vmatprep.subr.bf16.mxu1 %v17634_v39 }
 0x2b3   :  { %15845 = vmatpush3.bf16.msra.mxu1 %v17635_v40 }
 0x2b4   :  { %15846 = vmatprep.subr.bf16.mxu1 %v17636_v45 }
 0x2b7   :  { %15847 = vmatpush3.bf16.msra.mxu1 %v17637_v12 }
 0x2b8   :  { %15848 = vmatprep.subr.bf16.mxu1 %v17638_v21 }
 0x2bb   :  { %15849 = vmatpush3.bf16.msra.mxu1 %v17639_v37 }
 0x2bc   :  { %15850 = vmatprep.subr.bf16.mxu1 %v17640_v14 }
 0x2bf   :  { %15851 = vmatpush3.bf16.msra.mxu1 %v17641_v8 }
 0x339   :  { %v1023_v42 = vpop.f32.mrf.mxu0 }
 0x33b   :  { %v1025_v44 = vpop.f32.mrf.mxu0 }
 0x33d   :  { %v1027_v10 = vpop.f32.mrf.mxu0 }
 0x33f   :  { %v1029_v36 = vpop.f32.mrf.mxu0 }
 0x341   :  { %v1033_v46 = vpop.f32.mrf.mxu0 }
 0x343   :  { %v1035_v19 = vpop.f32.mrf.mxu0 }
 0x345   :  { %v1037_v5 = vpop.f32.mrf.mxu0 }
 0x347   :  { %v1039_v15 = vpop.f32.mrf.mxu0 }
 0x349   :  { %v1043_v48 = vpop.f32.mrf.mxu0 }
 0x34a   :  { %v19091_v6 = vpop.f32.mrf.mxu1 }
 0x34b   :  { %v1045_v33 = vpop.f32.mrf.mxu0 }
 0x34c   :  { %v19093_v49 = vpop.f32.mrf.mxu1 }
 0x34d   :  { %v1047_v51 = vpop.f32.mrf.mxu0 }
 0x34e   :  { %v19095_v53 = vpop.f32.mrf.mxu1 }
 0x34f   :  { %v1049_v56 = vpop.f32.mrf.mxu0 }
 0x350   :  { %v19097_v57 = vpop.f32.mrf.mxu1 }
 0x351   :  { %v19099_v4 = vpop.f32.mrf.mxu0 }
 0x352   :  { %v1177_v31 = vpop.f32.mrf.mxu1 }
 0x353   :  { %v19101_v59 = vpop.f32.mrf.mxu0  ;;  %v1281_v25 = vmul.f32 %v1177_v31, %v1023_v42 }
 0x354   :  { %v1179_v60 = vpop.f32.mrf.mxu1 }
 0x355   :  { %v1057_v63 = vpop.f32.mrf.mxu0  ;;  %v1282_v22 = vmul.f32 %v1179_v60, %v1025_v44 }
 0x356   :  { %v1181_v0 = vpop.f32.mrf.mxu1 }
 0x357   :  { %v19103_v1 = vpop.f32.mrf.mxu0  ;;  %v1284_v3 = vmul.f32 %v1181_v0, %v1027_v10 }
 0x358   :  { %v1183_v43 = vpop.f32.mrf.mxu1 }
 0x359   :  { %v1285_v27 = vmul.f32 %v1183_v43, %v1029_v36  ;;  %v16862_v41 = vpop.f32.mrf.mxu0  ;;  %v1305_v18 = vpack.c.bf16 %v1284_v3, %v1281_v25 }
 0x35a   :  { %v1187_v29 = vpop.f32.mrf.mxu1 }
 0x35b   :  { %v1306_v47 = vpack.c.bf16 %v1285_v27, %v1282_v22  ;;  %v1096_v11 = vpop.f32.mrf.mxu0  ;;  %v1287_v9 = vmul.f32 %v1187_v29, %v1033_v46 }
 0x35c   :  { %v1189_v52 = vpop.f32.mrf.mxu1 }
 0x35d   :  { %1513 = vmatprep.mubr.bf16.mxu1 %v1306_v47  ;;  %v16863_v50 = vpop.f32.mrf.mxu0  ;;  %v1288_v24 = vmul.f32 %v1189_v52, %v1035_v19 }
 0x35e   :  { %v1191_v62 = vpop.f32.mrf.mxu1  ;;  %1514 = vmatmul.mubr.bf16.vlgmr.msra.gmra.mxu1 %v1305_v18 }
 0x35f   :  { %v1099_v7 = vpop.f32.mrf.mxu0  ;;  %v1290_v38 = vmul.f32 %v1191_v62, %v1037_v5 }
 0x360   :  { %v1193_v28 = vpop.f32.mrf.mxu1 }
 0x361   :  { %v1291_v13 = vmul.f32 %v1193_v28, %v1039_v15  ;;  %v16872_v30 = vpop.f32.mrf.mxu0  ;;  %v1308_v58 = vpack.c.bf16 %v1290_v38, %v1287_v9 }
 0x362   :  { %v1197_v54 = vpop.f32.mrf.mxu1  ;;  %v1289_v12 = vmul.f32 %v16872_v30, %v16862_v41 }
 0x363   :  { %v1309_v55 = vpack.c.bf16 %v1291_v13, %v1288_v24  ;;  %v1250_v20 = vpop.f32.mrf.mxu0  ;;  %v1293_v8 = vmul.f32 %v1197_v54, %v1043_v48 }
 0x364   :  { %v1199_v61 = vpop.f32.mrf.mxu1  ;;  %v1283_v17 = vmul.f32 %v1250_v20, %v1096_v11 }
 0x365   :  { %1521 = vmatprep.mubr.bf16.mxu1 %v1309_v55  ;;  %v16873_v32 = vpop.f32.mrf.mxu0  ;;  %v1294_v21 = vmul.f32 %v1199_v61, %v1045_v33 }
 0x366   :  { %v1201_v34 = vpop.f32.mrf.mxu1  ;;  %1522 = vmatmul.mubr.bf16.gmra.mxu1 %v1308_v58  ;;  %v1292_v2 = vmul.f32 %v16873_v32, %v16863_v50  ;;  %v14982_v58 = vld [vmem:[%s14888_s7] ss:$0 sm:$0xff] }
 0x367   :  { %v1253_v26 = vpop.f32.mrf.mxu0  ;;  %v1296_v39 = vmul.f32 %v1201_v34, %v1047_v51 }
 0x368   :  { %v1203_v40 = vpop.f32.mrf.mxu1  ;;  %v1286_v45 = vmul.f32 %v1253_v26, %v1099_v7  ;;  %v1310_v42 = vpack.c.bf16 %v1292_v2, %v1289_v12 }
 0x369   :  { %v1297_v37 = vmul.f32 %v1203_v40, %v1049_v56  ;;  %v16876_v14 = vpop.f32.mrf.mxu0  ;;  %v1311_v36 = vpack.c.bf16 %v1296_v39, %v1293_v8 }
 0x36a   :  { %v1307_v35 = vpack.c.bf16 %v1286_v45, %v1283_v17  ;;  %v1207_v16 = vpop.f32.mrf.mxu1  ;;  %v1301_v60 = vmul.f32 %v16876_v14, %v19091_v6  ;;  %v17644_v6 = vld [vmem:[%s19120_s3] sm:$0xff]  }
 0x36b   :  { %v1312_v44 = vpack.c.bf16 %v1297_v37, %v1294_v21  ;;  %v1266_v10 = vpop.f32.mrf.mxu0  ;;  %v1299_v43 = vmul.f32 %v1207_v16, %v19099_v4 }
 0x36c   :  { %v1209_v46 = vpop.f32.mrf.mxu1  ;;  %16882 = vmatprep.mubr.msk.bf16.mxu0 %vm1468_vm4, %v1307_v35  ;;  %v1295_v48 = vmul.f32 %v1266_v10, %v19093_v49 }
 0x36d   :  { %1529 = vmatprep.mubr.bf16.mxu1 %v1312_v44  ;;  %v16877_v19 = vpop.f32.mrf.mxu0  ;;  %16883 = vmatmul.mubr.msk.bf16.vlgmr.msra.gmra.mxu0 %vm1468_vm4, %v1310_v42  ;;  %v1300_v0 = vmul.f32 %v1209_v46, %v19101_v59 }
 0x36e   :  { %v1211_v5 = vpop.f32.mrf.mxu1  ;;  %1530 = vmatmul.mubr.bf16.gmra.mxu1 %v1311_v36  ;;  %v1304_v15 = vmul.f32 %v16877_v19, %v19095_v53 }
 0x36f   :  { %v1269_v33 = vpop.f32.mrf.mxu0  ;;  %v1302_v51 = vmul.f32 %v1211_v5, %v1057_v63 }
 0x370   :  { %v1213_v56 = vpop.f32.mrf.mxu1  ;;  %v1298_v31 = vmul.f32 %v1269_v33, %v19097_v57  ;;  %v1316_v27 = vpack.c.bf16 %v1304_v15, %v1301_v60 }
 0x371   :  { %v1303_v3 = vmul.f32 %v1213_v56, %v19103_v1  ;;  %v1314_v25 = vpack.c.bf16 %v1302_v51, %v1299_v43 }
 0x372   :  { %v1313_v22 = vpack.c.bf16 %v1298_v31, %v1295_v48 }
 0x373   :  { %v1315_v41 = vpack.c.bf16 %v1303_v3, %v1300_v0 }
 0x374   :  { %16886 = vmatprep.mubr.msk.bf16.mxu0 %vm1468_vm4, %v1313_v22 }
 0x375   :  { %1537 = vmatprep.mubr.bf16.mxu1 %v1315_v41  ;;  %16887 = vmatmul.mubr.msk.bf16.gmra.mxu0 %vm1468_vm4, %v1316_v27 }
 0x376   :  { %1538 = vmatmul.mubr.bf16.gmra.mxu1 %v1314_v25  ;;  %16898 = vmatprep.mubr.msk.bf16.mxu0 %vm976_vm3, %v17644_v6 }
 0x377   :  { %1930 = vmatprep.mubr.bf16.mxu1 %v21972_v23 }
 0x41e   :  { %v15852_v49 = vpop.f32.mrf.mxu1 }
 0x420   :  { %v15853_v53 = vpop.f32.mrf.mxu1 }
 0x421   :  { %v15854_v16 = vadd.f32 %v15853_v53, %v15852_v49 }
 0x422   :  { %v15855_v57 = vpop.f32.mrf.mxu1 }
 0x423   :  { %v1516_v48 = vadd.f32 %v15854_v16, %v14982_v58 }
 0x424   :  { %v15856_v4 = vpop.f32.mrf.mxu1 }
 0x425   :  { %v15857_v37 = vadd.f32 %v15856_v4, %v15855_v57 }
 0x426   :  { %v15858_v59 = vpop.f32.mrf.mxu1 }
 0x427   :  { %v1519_v19 = vadd.f32 %v15857_v37, %v14982_v58 }
 0x428   :  { %v15859_v63 = vpop.f32.mrf.mxu1 }
 0x429   :  { %v15860_v17 = vadd.f32 %v15859_v63, %v15858_v59 }
 0x42a   :  { %v15861_v1 = vpop.f32.mrf.mxu1 }
 0x42b   :  { %v1524_v44 = vadd.f32 %v15860_v17, %v14982_v58 }
 0x42c   :  { %v15862_v29 = vpop.f32.mrf.mxu1 }
 0x42d   :  { %v16884_v47 = vpop.f32.mrf.mxu0  ;;  %v15863_v61 = vadd.f32 %v15862_v29, %v15861_v1  ;;  %v17645_v1 = vld [vmem:[%s19120_s3 + $0x8] sm:$0xff]   ;;  %s19485_s3 = sld [smem:[%s21939_s0 + %s18706_s28]]   ;;  %s18712_s28 = smov 28  }
 0x42e   :  { %v15864_v11 = vpop.f32.mrf.mxu1  ;;  %v1589_v5 = vadd.f32 %v16884_v47, %v1524_v44  ;;  %v17648_v29 = vld [vmem:[%s19148_s11 + $0x34] ss:$20 sps:$4 sm:$0xff]   ;;  %v17646_v47 = vld [vmem:[%s19148_s11 + $0x30] ss:$20 sps:$4 sm:$0xff]  }
 0x42f   :  { %v1580_v18 = vpop.f32.mrf.mxu0  ;;  %v1527_v14 = vadd.f32 %v15863_v61, %v14982_v58  ;;  %1910 = vmatprep.subr.bf16.mxu1 %v17648_v29  ;;  %v15029_v61 = vld [vmem:[%s14891_s19] ss:$0 sm:$0xff]  ;;  %v19192_v44 = vld [vmem:[%s19189_s24 + $0x4] ss:$20 sps:$4 sm:$0xff]   ;;  %s18730_s19 = smov 44  }
 0x430   :  { %v15865_v52 = vpop.f32.mrf.mxu1  ;;  %v1621_v43 = vmul.f32 0.1, %v1589_v5  ;;  %v1581_v22 = vadd.f32 %v1580_v18, %v1516_v48  ;;  %vm1613_vm10 = vcmp.ge.f32.partialorder %v1589_v5, 0.0  ;;  %1911 = vmatpush1.bf16.msra.mxu1 %v17646_v47  ;;  %v17652_v18 = vld [vmem:[%s19148_s11 + $0xc] ss:$20 sps:$4 sm:$0xff]  }
 0x431   :  { %v16885_v50 = vpop.f32.mrf.mxu0  ;;  %v15866_v54 = vadd.f32 %v15865_v52, %v15864_v11  ;;  %v17649_v11 = vld [vmem:[%s14890_s15 + $0x8] sm:$0xff]   ;;  %1912 = vmatprep.subr.bf16.mxu1 %v17652_v18 }
 0x432   :  { %v15867_v62 = vpop.f32.mrf.mxu1  ;;  %v1592_v42 = vadd.f32 %v16885_v50, %v1527_v14  ;;  %v1629_v49 = vsel %vm1613_vm10, %v1589_v5, %v1621_v43  ;;  %v1619_v53 = vmul.f32 0.1, %v1581_v22  ;;  %vm1611_vm12 = vcmp.ge.f32.partialorder %v1581_v22, 0.0  ;;  %v17650_v52 = vld [vmem:[%s19148_s11 + $0x8] ss:$20 sps:$4 sm:$0xff]   ;;  %v17653_v50 = vld [vmem:[%s14890_s15] sm:$0xff]  }
 0x433   :  { %v1583_v7 = vpop.f32.mrf.mxu0  ;;  %v1532_v40 = vadd.f32 %v15866_v54, %v14982_v58  ;;  %v17659_v54 = vld [vmem:[%s19148_s11 + $0x4] ss:$20 sps:$4 sm:$0xff]  }
 0x434   :  { %v15868_v38 = vpop.f32.mrf.mxu1  ;;  %v1622_v51 = vmul.f32 0.1, %v1592_v42  ;;  %v1584_v56 = vadd.f32 %v1583_v7, %v1519_v19  ;;  %vm1614_vm9 = vcmp.ge.f32.partialorder %v1592_v42, 0.0  ;;  %v1627_v59 = vsel %vm1611_vm12, %v1581_v22, %v1619_v53  ;;  %1913 = vmatpush1.bf16.msra.mxu1 %v17650_v52 }
 0x435   :  { %v16888_v28 = vpop.f32.mrf.mxu0  ;;  %v15869_v13 = vadd.f32 %v15868_v38, %v15867_v62  ;;  %v17656_v62 = vld [vmem:[%s19148_s11 + $0x2c] ss:$20 sps:$4 sm:$0xff]  }
 0x436   :  { %v15870_v24 = vpop.f32.mrf.mxu1  ;;  %v1630_v25 = vsel %vm1614_vm9, %v1592_v42, %v1622_v51  ;;  %v1620_v6 = vmul.f32 0.1, %v1584_v56  ;;  %vm1612_vm11 = vcmp.ge.f32.partialorder %v1584_v56, 0.0 }
 0x437   :  { %v1596_v30 = vpop.f32.mrf.mxu0  ;;  %v1535_v2 = vadd.f32 %v15869_v13, %v14982_v58  ;;  %v19134_v57 = vpack.c.bf16 %v1630_v25, %v1629_v49 }
 0x438   :  { %v15871_v9 = vpop.f32.mrf.mxu1  ;;  %v1597_v8 = vadd.f32 %v1596_v30, %v1532_v40  ;;  %v1628_v4 = vsel %vm1612_vm11, %v1584_v56, %v1620_v6  ;;  %v17654_v30 = vld [vmem:[%s19148_s11 + $0x28] ss:$20 sps:$4 sm:$0xff]  }
 0x439   :  { %v15872_v55 = vadd.f32 %v15871_v9, %v15870_v24  ;;  %v16889_v20 = vpop.f32.mrf.mxu0  ;;  %21977 = vst [vmem:[#allocation4_spill] sm:$0xff] %v19134_v57  ;;  %v19138_v63 = vpack.c.bf16 %v1628_v4, %v1627_v59 }
 0x43a   :  { %v15873_v32 = vpop.f32.mrf.mxu1  ;;  %v1623_v15 = vmul.f32 0.1, %v1597_v8  ;;  %vm1615_vm8 = vcmp.ge.f32.partialorder %v1597_v8, 0.0 }
 0x43b   :  { %v1540_v34 = vadd.f32 %v15872_v55, %v14982_v58  ;;  %v1599_v26 = vpop.f32.mrf.mxu0  ;;  %21978 = vst [vmem:[#allocation5_spill] sm:$0xff] %v19138_v63  ;;  %v17657_v55 = vld [vmem:[%s19148_s11] ss:$20 sps:$4 sm:$0xff]  }
 0x43c   :  { %v15874_v39 = vpop.f32.mrf.mxu1  ;;  %v1600_v21 = vadd.f32 %v1599_v26, %v1535_v2  ;;  %v1631_v27 = vsel %vm1615_vm8, %v1597_v8, %v1623_v15 }
 0x43d   :  { %v1605_v45 = vadd.f32 %v16888_v28, %v1540_v34  ;;  %v15875_v12 = vadd.f32 %v15874_v39, %v15873_v32 }
 0x43e   :  { %v1624_v46 = vmul.f32 0.1, %v1600_v21  ;;  %vm1616_vm6 = vcmp.ge.f32.partialorder %v1600_v21, 0.0 }
 0x43f   :  { %v1543_v35 = vadd.f32 %v15875_v12, %v14982_v58  ;;  %v1625_v10 = vmul.f32 0.1, %v1605_v45  ;;  %vm1617_vm5 = vcmp.ge.f32.partialorder %v1605_v45, 0.0  ;;  %v17661_v58 = vld [vmem:[%s19148_s11 + $0x10] ss:$20 sps:$4 sm:$0xff]  }
 0x440   :  { %v1632_v0 = vsel %vm1616_vm6, %v1600_v21, %v1624_v46 }
 0x441   :  { %v1608_v36 = vadd.f32 %v16889_v20, %v1543_v35  ;;  %v1633_v31 = vsel %vm1617_vm5, %v1605_v45, %v1625_v10  ;;  %v19129_v41 = vpack.c.bf16 %v1632_v0, %v1631_v27  ;;  %v17660_v20 = vld [vmem:[%s19148_s11 + $0x38] ss:$20 sps:$4 sm:$0xff]   ;;  %v19195_v10 = vld [vmem:[%s19189_s24] ss:$20 sps:$4 sm:$0xff]   ;;  %s18727_s11 = smov 42  }
 0x443   :  { %vm1618_vm7 = vcmp.ge.f32.partialorder %v1608_v36, 0.0  ;;  %v1626_v33 = vmul.f32 0.1, %v1608_v36  ;;  %21976 = vst [vmem:[#allocation3_spill] sm:$0xff] %v19129_v41 }
 0x445   :  { %v1634_v60 = vsel %vm1618_vm7, %v1608_v36, %v1626_v33  ;;  %v19200_v36 = vld [vmem:[%s19189_s24 + $0x10] ss:$20 sps:$4 sm:$0xff]  }
 0x446   :  { %v19127_v3 = vpack.c.bf16 %v1634_v60, %v1633_v31 }
 0x448   :  { %21975 = vst [vmem:[#allocation2_spill] sm:$0xff] %v19127_v3  ;;  %16890 = vmatprep.subr.bf16.mxu0 %v19127_v3 }
 0x449   :  { %16891 = vmatpush3.bf16.msra.mxu0 %v19127_v3 }
 0x44a   :  { %16892 = vmatprep.subr.bf16.mxu0 %v19129_v41 }
 0x44d   :  { %16893 = vmatpush3.bf16.msra.mxu0 %v19129_v41 }
 0x44e   :  { %16894 = vmatprep.subr.bf16.mxu0 %v19134_v57 }
 0x451   :  { %16895 = vmatpush3.bf16.msra.mxu0 %v19134_v57 }
 0x452   :  { %16896 = vmatprep.subr.bf16.mxu0 %v19138_v63 }
 0x455   :  { %16897 = vmatpush3.bf16.msra.mxu0 %v19138_v63 }
 0x456   :  { %16902 = vmatprep.subr.bf16.mxu0 %v17649_v11 }
 0x458   :  { %16899 = vmatmul.mubr.msk.bf16.vlgmr.msra.gmra.mxu0 %vm976_vm3, %v17645_v1 }
 0x459   :  { %16903 = vmatpush3.bf16.msra.mxu0 %v17649_v11 }
 0x45a   :  { %16904 = vmatprep.subr.bf16.mxu0 %v17653_v50 }
 0x45d   :  { %16905 = vmatpush3.bf16.msra.mxu0 %v17653_v50 }
 0x45e   :  { %1857 = vmatprep.subr.bf16.mxu0 %v17656_v62 }
 0x518   :  { %v16900_v7 = vpop.f32.mrf.mxu0 }
 0x51a   :  { %v1693_v38 = vpop.f32.mrf.mxu0 }
 0x51c   :  { %v16901_v28 = vpop.f32.mrf.mxu0 }
 0x51d   :  { %v1725_v9 = vpack.c.bf16 %v16901_v28, %v16900_v7 }
 0x51e   :  { %v1696_v24 = vpop.f32.mrf.mxu0 }
 0x51f   :  { %v1724_v13 = vpack.c.bf16 %v1696_v24, %v1693_v38 }
 0x521   :  { %16906 = vmatprep.mubr.msk.bf16.mxu0 %vm1468_vm4, %v1724_v13  ;;  %15025 = vmatmul.mubr.msk.bf16.vlgmr.msra.gmra.mxu1 %vm1468_vm4, %v1724_v13 }
 0x522   :  { %16907 = vmatmul.mubr.msk.bf16.vlgmr.msra.gmra.mxu0 %vm1468_vm4, %v1725_v9  ;;  %1940 = vmatprep.mubr.bf16.mxu1 %v21972_v23 }
 0x523   :  { %1858 = vmatpush1.bf16.msra.mxu0 %v17654_v30  ;;  %1877 = vmatprep.mubr.bf16.mxu0 %v21972_v23 }
 0x524   :  { %1859 = vmatprep.subr.bf16.mxu0 %v17659_v54 }
 0x527   :  { %1860 = vmatpush1.bf16.msra.mxu0 %v17657_v55 }
 0x528   :  { %16910 = vmatprep.subr.bf16.mxu0 %v17660_v20 }
 0x529   :  { %15026 = vmatmul.mubr.msk.bf16.gmra.mxu1 %vm1468_vm4, %v1725_v9 }
 0x52a   :  { %15023 = vmatmul.mubr.msk.bf16.vlgmr.msra.gmra.mxu0 %vm1468_vm4, %v1724_v13 }
 0x52b   :  { %1887 = vmatprep.mubr.bf16.mxu0 %v21972_v23  ;;  %16911 = vmatpush3.bf16.msra.mxu0 %v17660_v20  ;;  %v19223_v20 = vld [vmem:[%s19189_s24 + $0x8] ss:$20 sps:$4 sm:$0xff]  }
 0x52c   :  { %16912 = vmatprep.subr.bf16.mxu0 %v17661_v58 }
 0x52f   :  { %16913 = vmatpush3.bf16.msra.mxu0 %v17661_v58 }
 0x530   :  { %2234 = vmatprep.subr.bf16.mxu0 %v19192_v44 }
 0x532   :  { %15024 = vmatmul.mubr.msk.bf16.gmra.mxu0 %vm1468_vm4, %v1725_v9 }
 0x533   :  { %16914 = vmatprep.mubr.msk.bf16.mxu0 %vm1468_vm4, %v1724_v13 }
 0x53a   :  { %16915 = vmatmul.mubr.msk.bf16.vlgmr.msra.gmra.mxu0 %vm1468_vm4, %v1725_v9  ;;  %v19217_v9 = vld [vmem:[%s19189_s24 + $0xc] ss:$20 sps:$4 sm:$0xff]  }
 0x53b   :  { %2252 = vmatprep.mubr.bf16.mxu0 %v21972_v23  ;;  %2235 = vmatpush1.bf16.msra.mxu0 %v19195_v10 }
 0x53c   :  { %16932 = vmatprep.subr.bf16.mxu0 %v19200_v36 }
 0x5e2   :  { %v16908_v32 = vpop.f32.mrf.mxu0 }
 0x5e3   :  { %v2009_v34 = vadd.f32 %v16908_v32, %v15029_v61  ;;  %v2041_v42 = vsel %vm488_vm2, %v16908_v32, inf }
 0x5e4   :  { %v1778_v2 = vpop.f32.mrf.mxu0 }
 0x5e5   :  { %v2017_v26 = vsel %vm488_vm2, %v2009_v34, -inf  ;;  %v2007_v17 = vadd.f32 %v15029_v61, %v1778_v2  ;;  %v2035_v16 = vsel %vm488_vm2, %v1778_v2, inf }
 0x5e6   :  { %2018 = vmax.xlane.f32.xlu1 %v2017_v26  ;;  %v16909_v39 = vpop.f32.mrf.mxu0 }
 0x5e7   :  { %v2010_v40 = vadd.f32 %v16909_v39, %v15029_v61  ;;  %v2011_v12 = vsel %vm488_vm2, %v2007_v17, -inf  ;;  %v2044_v35 = vsel %vm488_vm2, %v16909_v39, inf }
 0x5e8   :  { %v1781_v45 = vpop.f32.mrf.mxu0 }
 0x5e9   :  { %v2020_v21 = vsel %vm488_vm2, %v2010_v40, -inf  ;;  %v2008_v37 = vadd.f32 %v15029_v61, %v1781_v45  ;;  %v2038_v14 = vsel %vm488_vm2, %v1781_v45, inf }
 0x5ea   :  { %2012 = vmax.xlane.f32.xlu1 %v2011_v12  ;;  %2021 = vmax.xlane.f32.xlu0 %v2020_v21  ;;  %v1879_v58 = vpop.f32.mrf.mxu0 }
 0x5eb   :  { %v2014_v8 = vsel %vm488_vm2, %v2008_v37, -inf }
 0x5ec   :  { %v1881_v61 = vpop.f32.mrf.mxu0 }
 0x5ee   :  { %2039 = vmin.xlane.f32.xlu1 %v2038_v14  ;;  %2015 = vmax.xlane.f32.xlu0 %v2014_v8 }
 0x5f2   :  { %2045 = vmin.xlane.f32.xlu1 %v2044_v35  ;;  %2036 = vmin.xlane.f32.xlu0 %v2035_v16 }
 0x5f6   :  { %2042 = vmin.xlane.f32.xlu0 %v2041_v42 }
 0x66f   :  { %v2019_v46 = vpop.xlane.xlu1 %2018 }
 0x670   :  { %v2025_v19 = vsub.f32 %v2009_v34, %v2019_v46 }
 0x672   :  { %v2031_v56 = vmul.f32 1.442695, %v2025_v19 }
 0x673   :  { %v2013_v5 = vpop.xlane.xlu1 %2012  ;;  %v2022_v15 = vpop.xlane.xlu0 %2021 }
 0x674   :  { %v2023_v33 = vsub.f32 %v2007_v17, %v2013_v5  ;;  %v2026_v48 = vsub.f32 %v2010_v40, %v2022_v15 }
 0x676   :  { %v2033_v51 = vmul.f32 1.442695, %v2026_v48  ;;  %v2027_v0 = vmul.f32 1.442695, %v2023_v33 }
 0x677   :  { %v2040_v31 = vpop.xlane.xlu1 %2039  ;;  %v2016_v60 = vpop.xlane.xlu0 %2015 }
 0x678   :  { %v2048_v43 = vsub.f32 %v2040_v31, %v1781_v45  ;;  %v2024_v22 = vsub.f32 %v2008_v37, %v2016_v60  ;;  %18245 = vpow2.f32 %v2033_v51 }
 0x679   :  { %18247 = vpow2.f32 %v2031_v56 }
 0x67a   :  { %v2029_v27 = vmul.f32 1.442695, %v2024_v22  ;;  %18249 = vpow2.f32 %v2027_v0  ;;  %v2053_v49 = vmul.f32 1.442695, %v2048_v43 }
 0x67b   :  { %v2046_v25 = vpop.xlane.xlu1 %2045  ;;  %v2037_v6 = vpop.xlane.xlu0 %2036 }
 0x67c   :  { %v2050_v53 = vsub.f32 %v2046_v25, %v16909_v39  ;;  %v2047_v4 = vsub.f32 %v2037_v6, %v1778_v2  ;;  %18251 = vpow2.f32 %v2029_v27  ;;  %v19239_v39 = vpop.f32.mrf.mxu1 }
 0x67d   :  { %18253 = vpow2.f32 %v2053_v49 }
 0x67e   :  { %v2051_v59 = vmul.f32 1.442695, %v2047_v4  ;;  %v2057_v1 = vmul.f32 1.442695, %v2050_v53  ;;  %v19241_v45 = vpop.f32.mrf.mxu1 }
 0x67f   :  { %v2043_v29 = vpop.xlane.xlu0 %2042 }
 0x680   :  { %v2049_v47 = vsub.f32 %v2043_v29, %v16908_v32  ;;  %18255 = vpow2.f32 %v2051_v59  ;;  %v1883_v32 = vpop.f32.mrf.mxu0  ;;  %v19243_v21 = vpop.f32.mrf.mxu1 }
 0x681   :  { %18257 = vpow2.f32 %v2057_v1 }
 0x682   :  { %v2055_v11 = vmul.f32 1.442695, %v2049_v47  ;;  %v1885_v34 = vpop.f32.mrf.mxu0  ;;  %v19247_v14 = vpop.f32.mrf.mxu1 }
 0x684   :  { %18259 = vpow2.f32 %v2055_v11  ;;  %v1889_v2 = vpop.f32.mrf.mxu0  ;;  %v19249_v35 = vpop.f32.mrf.mxu1 }
 0x685   :  { %v18246_v18 = vpop.eup %18245 }
 0x686   :  { %16918 = vmatprep.subr.msk.mxu1 %vm488_vm2, %v18246_v18  ;;  %v18248_v52 = vpop.eup %18247  ;;  %v1891_v26 = vpop.f32.mrf.mxu0 }
 0x687   :  { %16919 = vmatpush3.xpose.msk.msra.mxu1 %vm488_vm2, %v18246_v18  ;;  %v18250_v50 = vpop.eup %18249  ;;  %v2187_v55 = vpack.c.bf16 %v18246_v18, %v18248_v52  ;;  %v19251_v42 = vpop.f32.mrf.mxu1 }
 0x688   :  { %16920 = vmatprep.subr.msk.mxu1 %vm488_vm2, %v18248_v52  ;;  %v1893_v17 = vpop.f32.mrf.mxu0 }
 0x689   :  { %v18252_v62 = vpop.eup %18251  ;;  %v19253_v5 = vpop.f32.mrf.mxu1 }
 0x68a   :  { %v2186_v7 = vpack.c.bf16 %v18252_v62, %v18250_v50  ;;  %v18254_v38 = vpop.eup %18253  ;;  %v1895_v40 = vpop.f32.mrf.mxu0 }
 0x68b   :  { %16921 = vmatpush3.xpose.msk.msra.mxu1 %vm488_vm2, %v18248_v52  ;;  %v19255_v48 = vpop.f32.mrf.mxu1 }
 0x68c   :  { %16922 = vmatprep.subr.msk.mxu1 %vm488_vm2, %v18252_v62  ;;  %15043 = vmatmul.mubr.msk.bf16.vlgmr.msra.gmra.mxu0 %vm488_vm2, %v2186_v7  ;;  %v16916_v12 = vpop.f32.mrf.mxu0 }
 0x68d   :  { %v18256_v28 = vpop.eup %18255  ;;  %2262 = vmatprep.mubr.bf16.mxu0 %v21972_v23  ;;  %16933 = vmatpush3.bf16.msra.mxu0 %v19200_v36 }
 0x68e   :  { %16926 = vmatprep.mubr.msk.f32.mxu1 %vm488_vm2, %v18256_v28  ;;  %v19212_v24 = vpack.c.bf16 %v18254_v38, %v18256_v28  ;;  %v18258_v13 = vpop.eup %18257  ;;  %v19245_v37 = vpop.f32.mrf.mxu0 }
 0x68f   :  { %16923 = vmatpush3.xpose.msk.msra.mxu1 %vm488_vm2, %v18252_v62 }
 0x690   :  { %16924 = vmatprep.subr.msk.mxu1 %vm488_vm2, %v18250_v50  ;;  %v16917_v8 = vpop.f32.mrf.mxu0 }
 0x691   :  { %v18260_v30 = vpop.eup %18259 }
 0x692   :  { %v19219_v54 = vpack.c.bf16 %v18258_v13, %v18260_v30  ;;  %v1988_v16 = vpop.f32.mrf.mxu0 }
 0x693   :  { %16925 = vmatpush3.xpose.msk.msra.mxu1 %vm488_vm2, %v18250_v50 }
 0x694   :  { %15044 = vmatmul.mubr.msk.bf16.gmra.mxu0 %vm488_vm2, %v2187_v55  ;;  %2287 = vmatprep.subr.bf16.mxu1 %v19217_v9 }
 0x695   :  { %16934 = vmatprep.mubr.msk.bf16.mxu0 %vm488_vm2, %v2186_v7 }
 0x696   :  { %16927 = vmatmul.mubr.msk.f32.vlgmr.msra.gmra.mxu1 %vm488_vm2, %v18254_v38 }
 0x697   :  { %16929 = vmatprep.mubr.msk.f32.mxu1 %vm488_vm2, %v18260_v30  ;;  %2288 = vmatpush1.bf16.msra.mxu1 %v19223_v20 }
 0x69a   :  { %16930 = vmatmul.mubr.msk.f32.gmra.mxu1 %vm488_vm2, %v18258_v13 }
 0x69b   :  { %2305 = vmatprep.mubr.bf16.mxu1 %v21972_v23 }
 0x69c   :  { %16935 = vmatmul.mubr.msk.bf16.vlgmr.msra.gmra.mxu0 %vm488_vm2, %v2187_v55 }
 0x69d   :  { %2498 = vmatprep.mubr.bf16.mxu0 %v21972_v23 }
 0x69e   :  { %15045 = vmatmul.mubr.msk.bf16.vlgmr.msra.gmra.mxu1 %vm488_vm2, %v2186_v7 }
 0x69f   :  { %2315 = vmatprep.mubr.bf16.mxu1 %v21972_v23 }
 0x6a6   :  { %15046 = vmatmul.mubr.msk.bf16.gmra.mxu1 %vm488_vm2, %v2187_v55 }
 0x6a7   :  { %2445 = vmatprep.mubr.bf16.mxu1 %v21972_v23 }
 0x74c   :  { %v2254_v46 = vpop.f32.mrf.mxu0 }
 0x74d   :  { %v2375_v13 = vmul.f32 %v2254_v46, %v1879_v58 }
 0x74e   :  { %v2256_v19 = vpop.f32.mrf.mxu0 }
 0x74f   :  { %v2376_v47 = vmul.f32 %v2256_v19, %v1881_v61  ;;  %v216_v19 = vld [vmem:[%s19260_s30 + $0x8] sm:$0xff] }
 0x750   :  { %v2258_v15 = vpop.f32.mrf.mxu0 }
 0x751   :  { %v2380_v50 = vmul.f32 %v2258_v15, %v1883_v32  ;;  %v215_v15 = vld [vmem:[%s19260_s30] sm:$0xff] }
 0x752   :  { %v2260_v33 = vpop.f32.mrf.mxu0 }
 0x753   :  { %v2381_v49 = vmul.f32 %v2260_v33, %v1885_v34  ;;  %v2397_v34 = vpack.c.bf16 %v2380_v50, %v2375_v13  ;;  %v17680_v50 = vld [vmem:[%s19308_s4 + $0xe0] sm:$0xff]  }
 0x754   :  { %v2264_v51 = vpop.f32.mrf.mxu0  ;;  %v17685_v13 = vld [vmem:[%s19308_s4 + $0x20] sm:$0xff]  }
 0x755   :  { %v2385_v59 = vmul.f32 %v2264_v51, %v1889_v2  ;;  %v2398_v28 = vpack.c.bf16 %v2381_v49, %v2376_v47 }
 0x756   :  { %v16928_v56 = vpop.f32.mrf.mxu1  ;;  %v2266_v31 = vpop.f32.mrf.mxu0 }
 0x757   :  { %v2169_v60 = vmax.f32 %v16928_v56, 1e-30  ;;  %v2386_v53 = vmul.f32 %v2266_v31, %v1891_v26 }
 0x758   :  { %v2149_v0 = vpop.f32.mrf.mxu1  ;;  %v2268_v43 = vpop.f32.mrf.mxu0 }
 0x759   :  { %18261 = vrcp.f32 %v2169_v60  ;;  %v2168_v22 = vmax.f32 %v2149_v0, 1e-30  ;;  %v2390_v27 = vmul.f32 %v2268_v43, %v1893_v17 }
 0x75a   :  { %v16931_v25 = vpop.f32.mrf.mxu1  ;;  %v2270_v6 = vpop.f32.mrf.mxu0 }
 0x75b   :  { %18263 = vrcp.f32 %v2168_v22  ;;  %v2391_v4 = vmul.f32 %v2270_v6, %v1895_v40  ;;  %v2171_v11 = vmax.f32 %v16931_v25, 1e-30  ;;  %v2402_v62 = vpack.c.bf16 %v2390_v27, %v2385_v59  ;;  %v217_v25 = vld [vmem:[%s19260_s30 + $0x10] sm:$0xff] }
 0x75c   :  { %v2159_v1 = vpop.f32.mrf.mxu1  ;;  %v16936_v29 = vpop.f32.mrf.mxu0 }
 0x75d   :  { %v2403_v18 = vpack.c.bf16 %v2391_v4, %v2386_v53  ;;  %v2170_v52 = vmax.f32 %v2159_v1, 1e-30  ;;  %v2389_v61 = vmul.f32 %v16936_v29, %v16916_v12 }
 0x75e   :  { %v2307_v7 = vpop.f32.mrf.mxu1  ;;  %v2360_v38 = vpop.f32.mrf.mxu0 }
 0x75f   :  { %18265 = vrcp.f32 %v2170_v52  ;;  %2425 = vmatprep.subr.bf16.mxu1 %v2403_v18  ;;  %v2379_v0 = vmul.f32 %v2360_v38, %v19245_v37  ;;  %v218_v37 = vld [vmem:[%s19260_s30 + $0x18] sm:$0xff]  ;;  %v17679_v52 = vld [vmem:[%s19308_s4 + $0x68] sm:$0xff]   ;;  %v17683_v38 = vld [vmem:[%s19308_s4 + $0x60] sm:$0xff]  }
 0x760   :  { %v2309_v30 = vpop.f32.mrf.mxu1  ;;  %v16937_v55 = vpop.f32.mrf.mxu0  ;;  %2426 = vmatpush1.bf16.msra.mxu1 %v2402_v62  ;;  %18267 = vrcp.f32 %v2171_v11  ;;  %v2377_v11 = vmul.f32 %v2307_v7, %v19239_v39  ;;  %v17676_v39 = vld [vmem:[%s19308_s4 + $0xe8] sm:$0xff]   ;;  %v17682_v7 = vld [vmem:[%s19308_s4 + $0xa0] sm:$0xff]  }
 0x761   :  { %v2394_v32 = vmul.f32 %v16937_v55, %v16917_v8  ;;  %2427 = vmatprep.subr.bf16.mxu1 %v2398_v28  ;;  %v17681_v62 = vld [vmem:[%s19308_s4 + $0x28] sm:$0xff]   ;;  %v17684_v28 = vld [vmem:[%s19308_s4 + $0xd8] sm:$0xff]  }
 0x762   :  { %v2311_v2 = vpop.f32.mrf.mxu1  ;;  %v2363_v33 = vpop.f32.mrf.mxu0  ;;  %v17687_v55 = vld [vmem:[%s19308_s4 + $0x58] sm:$0xff]  }
 0x763   :  { %v2406_v26 = vpack.c.bf16 %v2394_v32, %v2389_v61  ;;  %v2384_v60 = vmul.f32 %v2363_v33, %v1988_v16  ;;  %v17688_v61 = vld [vmem:[%s19308_s4 + $0xd0] sm:$0xff]   ;;  %v17689_v32 = vld [vmem:[%s19308_s4 + $0x18] sm:$0xff]   ;;  %v17697_v33 = vld [vmem:[%s19308_s4 + $0x8] sm:$0xff]  }
 0x764   :  { %v2313_v17 = vpop.f32.mrf.mxu1  ;;  %2428 = vmatpush1.bf16.msra.mxu1 %v2397_v34  ;;  %v17690_v34 = vld [vmem:[%s19308_s4 + $0x90] sm:$0xff]  }
 0x765   :  { %16938 = vmatprep.subr.bf16.mxu1 %v2406_v26  ;;  %v2401_v6 = vpack.c.bf16 %v2384_v60, %v2379_v0  ;;  %v2383_v49 = vmul.f32 %v2313_v17, %v19247_v14  ;;  %v2382_v14 = vmul.f32 %v2311_v2, %v19243_v21  ;;  %v17678_v21 = vld [vmem:[%s19308_s4 + $0xa8] sm:$0xff]   ;;  %v17691_v2 = vld [vmem:[%s19308_s4 + $0x50] sm:$0xff]  }
 0x766   :  { %v18262_v40 = vpop.eup %18261  ;;  %v2317_v58 = vpop.f32.mrf.mxu1  ;;  %v17693_v17 = vld [vmem:[%s19308_s4 + $0x10] sm:$0xff]  }
 0x767   :  { %v2177_v56 = vmul.f32 %v18262_v40, %v216_v19  ;;  %v2387_v59 = vmul.f32 %v2317_v58, %v19249_v35  ;;  %v2399_v18 = vpack.c.bf16 %v2382_v14, %v2377_v11  ;;  %v17694_v40 = vld [vmem:[%s19308_s4 + $0x88] sm:$0xff]   ;;  %v17698_v58 = vld [vmem:[%s19308_s4 + $0x80] sm:$0xff]  }
 0x768   :  { %v18264_v46 = vpop.eup %18263  ;;  %v2319_v51 = vpop.f32.mrf.mxu1  ;;  %v17695_v19 = vld [vmem:[%s19308_s4 + $0x48] sm:$0xff]  }
 0x769   :  { %v2176_v31 = vmul.f32 %v18264_v46, %v215_v15  ;;  %v2388_v53 = vmul.f32 %v2319_v51, %v19251_v42  ;;  %v17696_v15 = vld [vmem:[%s19308_s4 + $0xc0] sm:$0xff]  }
 0x76a   :  { %v2321_v12 = vpop.f32.mrf.mxu1  ;;  %v17699_v46 = vld [vmem:[%s19308_s4 + $0x40] sm:$0xff]  }
 0x76b   :  { %v2395_v8 = vpack.c.bf16 %v2177_v56, %v2176_v31  ;;  %v2392_v22 = vmul.f32 %v2321_v12, %v19253_v5  ;;  %v2378_v5 = vmul.f32 %v2309_v30, %v19241_v45  ;;  %v17677_v45 = vld [vmem:[%s19308_s4 + $0x30] sm:$0xff]   ;;  %v17686_v30 = vld [vmem:[%s19308_s4 + $0x98] sm:$0xff]   ;;  %v17700_v51 = vld [vmem:[%s19308_s4] sm:$0xff]  }
 0x76c   :  { %v18266_v43 = vpop.eup %18265  ;;  %v2323_v27 = vpop.f32.mrf.mxu1  ;;  %v17701_v56 = vld [vmem:[%s19308_s4 + $0x118] sm:$0xff]  }
 0x76d   :  { %v2393_v4 = vmul.f32 %v2323_v27, %v19255_v48  ;;  %15049 = vmatmul.mubr.msk.bf16.vlgmr.msra.gmra.mxu1 %vm1468_vm4, %v2395_v8  ;;  %v18268_v16 = vpop.eup %18267  ;;  %v2178_v29 = vmul.f32 %v18266_v43, %v217_v25  ;;  %v2404_v47 = vpack.c.bf16 %v2392_v22, %v2387_v59  ;;  %v2400_v42 = vpack.c.bf16 %v2383_v49, %v2378_v5 }
 0x76e   :  { %16939 = vmatpush3.bf16.msra.mxu1 %v2406_v26  ;;  %2455 = vmatprep.mubr.bf16.mxu1 %v21972_v23  ;;  %v2179_v48 = vmul.f32 %v18268_v16, %v218_v37  ;;  %v17692_v26 = vld [vmem:[%s19308_s4 + $0xc8] sm:$0xff]  }
 0x76f   :  { %v2405_v1 = vpack.c.bf16 %v2393_v4, %v2388_v53  ;;  %16940 = vmatprep.subr.bf16.mxu1 %v2401_v6 }
 0x770   :  { %v2396_v35 = vpack.c.bf16 %v2179_v48, %v2178_v29 }
 0x771   :  { %2478 = vmatprep.subr.bf16.mxu0 %v2405_v1 }
 0x772   :  { %16941 = vmatpush3.bf16.msra.mxu1 %v2401_v6  ;;  %2479 = vmatpush1.bf16.msra.mxu0 %v2404_v47 }
 0x773   :  { %2480 = vmatprep.subr.bf16.mxu0 %v2400_v42  ;;  %2643 = vmatprep.subr.bf16.mxu1 %v19217_v9  ;;  %v17673_v9 = vld [vmem:[%s19308_s4 + $0x38] sm:$0xff]  }
 0x775   :  { %15050 = vmatmul.mubr.msk.bf16.gmra.mxu1 %vm1468_vm4, %v2396_v35 }
 0x776   :  { %2481 = vmatpush1.bf16.msra.mxu0 %v2399_v18  ;;  %16942 = vmatprep.mubr.msk.bf16.mxu1 %vm1468_vm4, %v2395_v8 }
 0x777   :  { %2590 = vmatprep.subr.bf16.mxu0 %v19192_v44  ;;  %v17669_v44 = vld [vmem:[%s19308_s4 + $0xf8] sm:$0xff]  }
 0x779   :  { %15051 = vmatmul.mubr.msk.bf16.vlgmr.msra.gmra.mxu0 %vm1468_vm4, %v2395_v8 }
 0x77a   :  { %2508 = vmatprep.mubr.bf16.mxu0 %v21972_v23  ;;  %2591 = vmatpush1.bf16.msra.mxu0 %v19195_v10  ;;  %v17670_v10 = vld [vmem:[%s19308_s4 + $0xb8] sm:$0xff]  }
 0x77b   :  { %16946 = vmatprep.subr.bf16.mxu0 %v19200_v36 }
 0x77d   :  { %16943 = vmatmul.mubr.msk.bf16.vlgmr.msra.gmra.mxu1 %vm1468_vm4, %v2396_v35 }
 0x77e   :  { %2644 = vmatpush1.bf16.msra.mxu1 %v19223_v20  ;;  %2661 = vmatprep.mubr.bf16.mxu1 %v21972_v23  ;;  %v17675_v20 = vld [vmem:[%s19308_s4 + $0x70] sm:$0xff]  }
 0x781   :  { %15052 = vmatmul.mubr.msk.bf16.gmra.mxu0 %vm1468_vm4, %v2396_v35 }
 0x782   :  { %2608 = vmatprep.mubr.bf16.mxu0 %v21972_v23 }
 0x785   :  { %15057 = vmatmul.mubr.msk.bf16.vlgmr.msra.gmra.mxu1 %vm488_vm2, %v19212_v24 }
 0x786   :  { %2671 = vmatprep.mubr.bf16.mxu1 %v21972_v23 }
 0x789   :  { %15055 = vmatmul.mubr.msk.bf16.vlgmr.msra.gmra.mxu0 %vm488_vm2, %v19212_v24 }
 0x78a   :  { %2618 = vmatprep.mubr.bf16.mxu0 %v21972_v23  ;;  %16947 = vmatpush3.bf16.msra.mxu0 %v19200_v36  ;;  %v17671_v36 = vld [vmem:[%s19308_s4 + $0x78] sm:$0xff]  }
 0x78b   :  { %15942 = vmatprep.subr.bf16.mxu0 %v17669_v44  ;;  %15914 = vmatprep.subr.bf16.mxu1 %v17671_v36 }
 0x78c   :  { %15915 = vmatpush3.bf16.msra.mxu1 %v17673_v9 }
 0x78d   :  { %15058 = vmatmul.mubr.msk.bf16.gmra.mxu1 %vm488_vm2, %v19219_v54  ;;  %15916 = vmatprep.subr.bf16.mxu1 %v17675_v20 }
 0x790   :  { %15917 = vmatpush3.bf16.msra.mxu1 %v17677_v45 }
 0x791   :  { %15056 = vmatmul.mubr.msk.bf16.gmra.mxu0 %vm488_vm2, %v19219_v54  ;;  %15918 = vmatprep.subr.bf16.mxu1 %v17679_v52 }
 0x792   :  { %16948 = vmatprep.mubr.msk.bf16.mxu0 %vm488_vm2, %v19212_v24  ;;  %v17672_v24 = vld [vmem:[%s19308_s4 + $0xf0] sm:$0xff]  }
 0x794   :  { %15919 = vmatpush3.bf16.msra.mxu1 %v17681_v62 }
 0x795   :  { %15920 = vmatprep.subr.bf16.mxu1 %v17683_v38 }
 0x798   :  { %15921 = vmatpush3.bf16.msra.mxu1 %v17685_v13 }
 0x799   :  { %16949 = vmatmul.mubr.msk.bf16.vlgmr.msra.gmra.mxu0 %vm488_vm2, %v19219_v54  ;;  %v17674_v54 = vld [vmem:[%s19308_s4 + $0xb0] sm:$0xff]   ;;  %15922 = vmatprep.subr.bf16.mxu1 %v17687_v55 }
 0x79a   :  { %15943 = vmatpush3.bf16.msra.mxu0 %v17670_v10 }
 0x79b   :  { %15944 = vmatprep.subr.bf16.mxu0 %v17672_v24 }
 0x79c   :  { %15923 = vmatpush3.bf16.msra.mxu1 %v17689_v32 }
 0x79d   :  { %15924 = vmatprep.subr.bf16.mxu1 %v17691_v2 }
 0x79e   :  { %15945 = vmatpush3.bf16.msra.mxu0 %v17674_v54 }
 0x79f   :  { %15946 = vmatprep.subr.bf16.mxu0 %v17676_v39 }
 0x7a0   :  { %15925 = vmatpush3.bf16.msra.mxu1 %v17693_v17 }
 0x7a1   :  { %15926 = vmatprep.subr.bf16.mxu1 %v17695_v19 }
 0x7a2   :  { %15947 = vmatpush3.bf16.msra.mxu0 %v17678_v21 }
 0x7a3   :  { %15948 = vmatprep.subr.bf16.mxu0 %v17680_v50 }
 0x7a4   :  { %15927 = vmatpush3.bf16.msra.mxu1 %v17697_v33 }
 0x7a5   :  { %15928 = vmatprep.subr.bf16.mxu1 %v17699_v46  ;;  %v17703_v46 = vld [vmem:[%s19308_s4 + $0x108] sm:$0xff]  }
 0x7a6   :  { %15949 = vmatpush3.bf16.msra.mxu0 %v17682_v7 }
 0x7a7   :  { %15950 = vmatprep.subr.bf16.mxu0 %v17684_v28 }
 0x7a8   :  { %15929 = vmatpush3.bf16.msra.mxu1 %v17700_v51 }
 0x7a9   :  { %16952 = vmatprep.subr.bf16.mxu1 %v17701_v56 }
 0x7aa   :  { %15951 = vmatpush3.bf16.msra.mxu0 %v17686_v30 }
 0x7ab   :  { %15952 = vmatprep.subr.bf16.mxu0 %v17688_v61 }
 0x7ae   :  { %15953 = vmatpush3.bf16.msra.mxu0 %v17690_v34  ;;  %v17702_v34 = vld [vmem:[%s19308_s4 + $0x110] sm:$0xff]  }
 0x7af   :  { %15954 = vmatprep.subr.bf16.mxu0 %v17692_v26 }
 0x7b2   :  { %15955 = vmatpush3.bf16.msra.mxu0 %v17694_v40 }
 0x7b3   :  { %15956 = vmatprep.subr.bf16.mxu0 %v17696_v15 }
 0x7b6   :  { %15957 = vmatpush3.bf16.msra.mxu0 %v17698_v58 }
 0x82d   :  { %v2447_v31 = vpop.f32.mrf.mxu1 }
 0x82f   :  { %v2449_v60 = vpop.f32.mrf.mxu1 }
 0x831   :  { %v2451_v12 = vpop.f32.mrf.mxu1 }
 0x833   :  { %v2453_v8 = vpop.f32.mrf.mxu1 }
 0x835   :  { %v2457_v0 = vpop.f32.mrf.mxu1 }
 0x837   :  { %v2459_v43 = vpop.f32.mrf.mxu1 }
 0x839   :  { %v2461_v22 = vpop.f32.mrf.mxu1  ;;  %v2500_v27 = vpop.f32.mrf.mxu0 }
 0x83b   :  { %v2463_v25 = vpop.f32.mrf.mxu1  ;;  %v2502_v6 = vpop.f32.mrf.mxu0 }
 0x83d   :  { %v2504_v49 = vpop.f32.mrf.mxu0  ;;  %v19343_v53 = vpop.f32.mrf.mxu1 }
 0x83f   :  { %v2506_v4 = vpop.f32.mrf.mxu0  ;;  %v19345_v16 = vpop.f32.mrf.mxu1 }
 0x841   :  { %v2510_v59 = vpop.f32.mrf.mxu0  ;;  %v19347_v37 = vpop.f32.mrf.mxu1 }
 0x843   :  { %v2512_v5 = vpop.f32.mrf.mxu0  ;;  %v19349_v1 = vpop.f32.mrf.mxu1 }
 0x845   :  { %v2514_v29 = vpop.f32.mrf.mxu0  ;;  %v2663_v14 = vpop.f32.mrf.mxu1 }
 0x846   :  { %v2733_v24 = vmul.f32 %v2663_v14, %v2500_v27 }
 0x847   :  { %v2516_v47 = vpop.f32.mrf.mxu0  ;;  %v2665_v42 = vpop.f32.mrf.mxu1 }
 0x848   :  { %v2734_v10 = vmul.f32 %v2665_v42, %v2502_v6 }
 0x849   :  { %v2610_v48 = vpop.f32.mrf.mxu0  ;;  %v2667_v11 = vpop.f32.mrf.mxu1 }
 0x84a   :  { %v2738_v35 = vmul.f32 %v2667_v11, %v2504_v49  ;;  %v2731_v7 = vmul.f32 %v2610_v48, %v2447_v31  ;;  %v17704_v49 = vld [vmem:[%s19308_s4 + $0x100] sm:$0xff]  }
 0x84b   :  { %v2612_v18 = vpop.f32.mrf.mxu0  ;;  %v2669_v44 = vpop.f32.mrf.mxu1 }
 0x84c   :  { %v2739_v36 = vmul.f32 %v2669_v44, %v2506_v4  ;;  %v2753_v39 = vpack.c.bf16 %v2738_v35, %v2733_v24  ;;  %v2732_v50 = vmul.f32 %v2612_v18, %v2449_v60 }
 0x84d   :  { %v2614_v9 = vpop.f32.mrf.mxu0  ;;  %v2673_v54 = vpop.f32.mrf.mxu1 }
 0x84e   :  { %v2754_v20 = vpack.c.bf16 %v2739_v36, %v2734_v10  ;;  %v2736_v45 = vmul.f32 %v2614_v9, %v2451_v12  ;;  %v2743_v17 = vmul.f32 %v2673_v54, %v2510_v59 }
 0x84f   :  { %v2616_v21 = vpop.f32.mrf.mxu0  ;;  %v2675_v52 = vpop.f32.mrf.mxu1 }
 0x850   :  { %v2737_v62 = vmul.f32 %v2616_v21, %v2453_v8  ;;  %3143 = vmatprep.mubr.bf16.mxu0 %v2754_v20  ;;  %v2751_v30 = vpack.c.bf16 %v2736_v45, %v2731_v7  ;;  %v2744_v2 = vmul.f32 %v2675_v52, %v2512_v5 }
 0x851   :  { %v2620_v38 = vpop.f32.mrf.mxu0  ;;  %v2677_v28 = vpop.f32.mrf.mxu1  ;;  %3144 = vmatmul.mubr.bf16.vlgmr.msra.gmra.mxu0 %v2753_v39  ;;  %v15061_v39 = vld [vmem:[%s14892_s20] ss:$0 sm:$0xff]  ;;  %s19741_s20 = sld [smem:[%s21939_s0 + %s18710_s17]]   ;;  %s18716_s17 = smov 29  }
 0x852   :  { %v2752_v13 = vpack.c.bf16 %v2737_v62, %v2732_v50  ;;  %v2748_v55 = vmul.f32 %v2677_v28, %v2514_v29  ;;  %v2741_v60 = vmul.f32 %v2620_v38, %v2457_v0  ;;  %v18699_v29 = vmov 0.0  }
 0x853   :  { %v2622_v61 = vpop.f32.mrf.mxu0  ;;  %v2679_v32 = vpop.f32.mrf.mxu1  ;;  %16972 = vmatprep.subr.bf16.mxu0 %v18699_v29 }
 0x854   :  { %v2749_v26 = vmul.f32 %v2679_v32, %v2516_v47  ;;  %3094 = vmatprep.mubr.bf16.mxu1 %v2752_v13  ;;  %v2758_v15 = vpack.c.bf16 %v2748_v55, %v2743_v17  ;;  %v2742_v51 = vmul.f32 %v2622_v61, %v2459_v43 }
 0x855   :  { %v2624_v40 = vpop.f32.mrf.mxu0  ;;  %3095 = vmatmul.mubr.bf16.vlgmr.msra.gmra.mxu1 %v2751_v30 }
 0x856   :  { %v2759_v19 = vpack.c.bf16 %v2749_v26, %v2744_v2  ;;  %16953 = vmatpush3.bf16.msra.mxu1 %v17701_v56  ;;  %v2746_v33 = vmul.f32 %v2624_v40, %v2461_v22 }
 0x857   :  { %v2626_v58 = vpop.f32.mrf.mxu0  ;;  %16954 = vmatprep.subr.bf16.mxu1 %v17702_v34 }
 0x858   :  { %v2747_v31 = vmul.f32 %v2626_v58, %v2463_v25  ;;  %3151 = vmatprep.mubr.bf16.mxu0 %v2759_v19  ;;  %v2756_v27 = vpack.c.bf16 %v2746_v33, %v2741_v60 }
 0x859   :  { %v16950_v12 = vpop.f32.mrf.mxu0  ;;  %3152 = vmatmul.mubr.bf16.gmra.mxu0 %v2758_v15 }
 0x85a   :  { %v2757_v8 = vpack.c.bf16 %v2747_v31, %v2742_v51  ;;  %16955 = vmatpush3.bf16.msra.mxu1 %v17702_v34  ;;  %v2745_v25 = vmul.f32 %v16950_v12, %v19343_v53  ;;  %16980 = vmatprep.mubr.msk.bf16.mxu0 %vm18701_vm13, %v18699_v29  ;;  %v17709_v53 = vld [vmem:[%s19379_s16 + $0x18] sm:$0xff]  }
 0x85b   :  { %v2716_v6 = vpop.f32.mrf.mxu0  ;;  %16956 = vmatprep.subr.bf16.mxu1 %v17703_v46  ;;  %16973 = vmatpush3.bf16.msra.mxu0 %v17709_v53  ;;  %v17710_v53 = vld [vmem:[%s19374_s12 + $0x90] ss:$36 sps:$4 sm:$0xff]  }
 0x85c   :  { %3102 = vmatprep.mubr.bf16.mxu1 %v2757_v8  ;;  %v2735_v43 = vmul.f32 %v2716_v6, %v19345_v16  ;;  %v17713_v16 = vld [vmem:[%s19379_s16 + $0x10] sm:$0xff]   ;;  %16974 = vmatprep.subr.bf16.mxu0 %v18699_v29 }
 0x85d   :  { %v16951_v56 = vpop.f32.mrf.mxu0  ;;  %3103 = vmatmul.mubr.bf16.gmra.mxu1 %v2756_v27 }
 0x85e   :  { %16957 = vmatpush3.bf16.msra.mxu1 %v17703_v46  ;;  %v2750_v22 = vmul.f32 %v16951_v56, %v19347_v37  ;;  %v17717_v37 = vld [vmem:[%s19379_s16 + $0x8] sm:$0xff]  }
 0x85f   :  { %v2719_v4 = vpop.f32.mrf.mxu0  ;;  %16958 = vmatprep.subr.bf16.mxu1 %v17704_v49  ;;  %16975 = vmatpush3.bf16.msra.mxu0 %v17713_v16  ;;  %v17716_v16 = vld [vmem:[%s19374_s12 + $0x4c] ss:$36 sps:$4 sm:$0xff]  }
 0x860   :  { %v2740_v0 = vmul.f32 %v2719_v4, %v19349_v1  ;;  %v2760_v5 = vpack.c.bf16 %v2750_v22, %v2745_v25  ;;  %16976 = vmatprep.subr.bf16.mxu0 %v18699_v29  ;;  %v17705_v25 = vld [vmem:[%s19364_s8] sm:$0xff]   ;;  %s19553_s8 = sld [smem:[%s21939_s0 + %s18707_s5]]  }
 0x861   :  { %s14899_s5 = sld [smem:[%s21939_s0 + %s18712_s28]]   ;;  %s18718_s28 = smov 34  }
 0x862   :  { %v2755_v59 = vpack.c.bf16 %v2740_v0, %v2735_v43  ;;  %16959 = vmatpush3.bf16.msra.mxu1 %v17704_v49  ;;  %v17708_v43 = vld [vmem:[%s19374_s12 + $0xdc] ss:$36 sps:$4 sm:$0xff]  }
 0x863   :  { %16964 = vmatprep.subr.bf16.mxu1 %v18699_v29  ;;  %16977 = vmatpush3.bf16.msra.mxu0 %v17717_v37  ;;  %v17714_v37 = vld [vmem:[%s19374_s12 + $0x48] ss:$36 sps:$4 sm:$0xff]  }
 0x864   :  { %16960 = vmatprep.mubr.msk.bf16.mxu1 %vm976_vm3, %v2755_v59  ;;  %16978 = vmatprep.subr.bf16.mxu0 %v18699_v29  ;;  %v17706_v59 = vld [vmem:[%s19374_s12 + $0xd8] ss:$36 sps:$4 sm:$0xff]  }
 0x865   :  { %16961 = vmatmul.mubr.msk.bf16.vlgmr.msra.gmra.mxu1 %vm976_vm3, %v2760_v5  ;;  %v17712_v5 = vld [vmem:[%s19374_s12 + $0x94] ss:$36 sps:$4 sm:$0xff]  }
 0x866   :  { %16968 = vmatprep.mubr.msk.bf16.mxu1 %vm18701_vm13, %v18699_v29 }
 0x911   :  { %v15958_v1 = vpop.f32.mrf.mxu0 }
 0x913   :  { %v15959_v14 = vpop.f32.mrf.mxu0 }
 0x914   :  { %v15960_v30 = vadd.f32 %v15959_v14, %v15958_v1  ;;  %v17720_v1 = vld [vmem:[%s19374_s12 + $0x4] ss:$36 sps:$4 sm:$0xff]  }
 0x915   :  { %v15930_v47 = vpop.f32.mrf.mxu1  ;;  %v15961_v42 = vpop.f32.mrf.mxu0  ;;  %v17718_v14 = vld [vmem:[%s19374_s12] ss:$36 sps:$4 sm:$0xff]  }
 0x917   :  { %v15931_v48 = vpop.f32.mrf.mxu1  ;;  %v15962_v11 = vpop.f32.mrf.mxu0 }
 0x918   :  { %v15932_v54 = vadd.f32 %v15931_v48, %v15930_v47  ;;  %v15963_v17 = vadd.f32 %v15962_v11, %v15961_v42  ;;  %v17721_v47 = vld [vmem:[%s19379_s16] sm:$0xff]   ;;  %v17727_v48 = vld [vmem:[%s19374_s12 + $0xec] ss:$36 sps:$4 sm:$0xff]   ;;  %s19736_s16 = sld [smem:[%s21939_s0 + %s18709_s13]]   ;;  %s18715_s13 = smov 31  }
 0x919   :  { %v15933_v35 = vpop.f32.mrf.mxu1  ;;  %v15964_v18 = vpop.f32.mrf.mxu0  ;;  %16979 = vmatpush3.bf16.msra.mxu0 %v17721_v47  ;;  %v17724_v42 = vld [vmem:[%s19374_s12 + $0xe4] ss:$36 sps:$4 sm:$0xff]  }
 0x91a   :  { %v3097_v38 = vadd.f32 %v15932_v54, %v15061_v39  ;;  %3626 = vmatprep.subr.bf16.mxu0 %v17724_v42  ;;  %v19495_v47 = vld [vmem:[%s19485_s3 + $0x8] ss:$36 sps:$4 sm:$0xff]  }
 0x91b   :  { %v15934_v44 = vpop.f32.mrf.mxu1  ;;  %v15965_v10 = vpop.f32.mrf.mxu0 }
 0x91c   :  { %v15935_v21 = vadd.f32 %v15934_v44, %v15933_v35  ;;  %v15966_v52 = vadd.f32 %v15965_v10, %v15964_v18  ;;  %v3146_v40 = vadd.f32 %v15960_v30, %v3097_v38  ;;  %v17722_v44 = vld [vmem:[%s19374_s12 + $0xe0] ss:$36 sps:$4 sm:$0xff]   ;;  %v17725_v10 = vld [vmem:[%s19374_s12 + $0xe8] ss:$36 sps:$4 sm:$0xff]   ;;  %v17746_v30 = vld [vmem:[%s19374_s12 + $0xf0] ss:$36 sps:$4 sm:$0xff]  }
 0x91d   :  { %v15936_v36 = vpop.f32.mrf.mxu1  ;;  %v15967_v24 = vpop.f32.mrf.mxu0  ;;  %v17740_v38 = vld [vmem:[%s19374_s12 + $0x8] ss:$36 sps:$4 sm:$0xff]  }
 0x91e   :  { %v3100_v61 = vadd.f32 %v15935_v21, %v15061_v39  ;;  %v17739_v21 = vld [vmem:[%s19374_s12 + $0x5c] ss:$36 sps:$4 sm:$0xff]  }
 0x91f   :  { %v15937_v9 = vpop.f32.mrf.mxu1  ;;  %v15968_v62 = vpop.f32.mrf.mxu0 }
 0x920   :  { %v15938_v20 = vadd.f32 %v15937_v9, %v15936_v36  ;;  %v15969_v32 = vadd.f32 %v15968_v62, %v15967_v24  ;;  %v3149_v51 = vadd.f32 %v15963_v17, %v3100_v61  ;;  %v17730_v24 = vld [vmem:[%s19374_s12 + $0x9c] ss:$36 sps:$4 sm:$0xff]   ;;  %v17733_v9 = vld [vmem:[%s19374_s12 + $0xa4] ss:$36 sps:$4 sm:$0xff]   ;;  %v17742_v62 = vld [vmem:[%s19374_s12 + $0xc] ss:$36 sps:$4 sm:$0xff]  }
 0x921   :  { %v15939_v45 = vpop.f32.mrf.mxu1  ;;  %v17752_v61 = vld [vmem:[%s19374_s12 + $0xac] ss:$36 sps:$4 sm:$0xff]  }
 0x922   :  { %v3105_v50 = vadd.f32 %v15938_v20, %v15061_v39  ;;  %v17728_v20 = vld [vmem:[%s19374_s12 + $0x98] ss:$36 sps:$4 sm:$0xff]   ;;  %v17757_v17 = vld [vmem:[%s19374_s12 + $0x68] ss:$36 sps:$4 sm:$0xff]  }
 0x923   :  { %v15940_v7 = vpop.f32.mrf.mxu1 }
 0x924   :  { %v15941_v28 = vadd.f32 %v15940_v7, %v15939_v45  ;;  %v3154_v13 = vadd.f32 %v15966_v52, %v3105_v50  ;;  %v17736_v45 = vld [vmem:[%s19374_s12 + $0x54] ss:$36 sps:$4 sm:$0xff]  }
 0x925   :  { %v16962_v55 = vpop.f32.mrf.mxu1  ;;  %v17734_v52 = vld [vmem:[%s19374_s12 + $0x50] ss:$36 sps:$4 sm:$0xff]   ;;  %v17737_v50 = vld [vmem:[%s19374_s12 + $0x58] ss:$36 sps:$4 sm:$0xff]  }
 0x926   :  { %v3108_v34 = vadd.f32 %v15941_v28, %v15061_v39  ;;  %v3203_v2 = vadd.f32 %v16962_v55, %v3154_v13  ;;  %v17731_v39 = vld [vmem:[%s19374_s12 + $0xa0] ss:$36 sps:$4 sm:$0xff]   ;;  %v17745_v7 = vld [vmem:[%s19374_s12 + $0x14] ss:$36 sps:$4 sm:$0xff]  }
 0x927   :  { %v3194_v26 = vpop.f32.mrf.mxu1  ;;  %v17743_v28 = vld [vmem:[%s19374_s12 + $0x10] ss:$36 sps:$4 sm:$0xff]   ;;  %v17749_v55 = vld [vmem:[%s19374_s12 + $0xf8] ss:$36 sps:$4 sm:$0xff]  }
 0x928   :  { %v3157_v19 = vadd.f32 %v15969_v32, %v3108_v34  ;;  %v3215_v15 = vmul.f32 0.1, %v3203_v2  ;;  %vm3211_vm14 = vcmp.ge.f32.partialorder %v3203_v2, 0.0  ;;  %v3195_v58 = vadd.f32 %v3194_v26, %v3146_v40  ;;  %v17748_v13 = vld [vmem:[%s19374_s12 + $0xf4] ss:$36 sps:$4 sm:$0xff]  }
 0x929   :  { %v16963_v33 = vpop.f32.mrf.mxu1  ;;  %v17750_v32 = vld [vmem:[%s19374_s12 + $0xa8] ss:$36 sps:$4 sm:$0xff]   ;;  %v17753_v34 = vld [vmem:[%s19374_s12 + $0xb0] ss:$36 sps:$4 sm:$0xff]   ;;  %v17754_v26 = vld [vmem:[%s19374_s12 + $0x60] ss:$36 sps:$4 sm:$0xff]  }
 0x92a   :  { %v3206_v46 = vadd.f32 %v16963_v33, %v3157_v19  ;;  %v3219_v8 = vsel %vm3211_vm14, %v3203_v2, %v3215_v15  ;;  %v3213_v27 = vmul.f32 0.1, %v3195_v58  ;;  %vm3209_vm1 = vcmp.ge.f32.partialorder %v3195_v58, 0.0  ;;  %v17756_v2 = vld [vmem:[%s19374_s12 + $0x64] ss:$36 sps:$4 sm:$0xff]  }
 0x92b   :  { %v3197_v31 = vpop.f32.mrf.mxu1  ;;  %v17760_v40 = vld [vmem:[%s19374_s12 + $0x1c] ss:$36 sps:$4 sm:$0xff]  }
 0x92c   :  { %vm3212_vm15 = vcmp.ge.f32.partialorder %v3206_v46, 0.0  ;;  %v3216_v60 = vmul.f32 0.1, %v3206_v46  ;;  %v3198_v12 = vadd.f32 %v3197_v31, %v3149_v51  ;;  %v3217_v4 = vsel %vm3209_vm1, %v3195_v58, %v3213_v27  ;;  %v17758_v19 = vld [vmem:[%s19374_s12 + $0x18] ss:$36 sps:$4 sm:$0xff]  }
 0x92d   :  { %v17761_v15 = vld [vmem:[%s19374_s12 + $0x20] ss:$36 sps:$4 sm:$0xff]   ;;  %s19558_s12 = sld [smem:[%s21939_s0 + %s18708_s9]]  }
 0x92e   :  { %v3220_v6 = vsel %vm3212_vm15, %v3206_v46, %v3216_v60  ;;  %vm3210_vm0 = vcmp.ge.f32.partialorder %v3198_v12, 0.0  ;;  %v3214_v49 = vmul.f32 0.1, %v3198_v12  ;;  %v15148_v33 = vld [vmem:[%s14895_s27] ss:$0 sm:$0xff]  ;;  %s14896_s27 = sld [smem:[%s21939_s0 + %s18711_s22]]   ;;  %s18717_s22 = smov 32  }
 0x92f   :  { %v19390_v56 = vpack.c.bf16 %v3220_v6, %v3219_v8 }
 0x930   :  { %v3218_v22 = vsel %vm3210_vm0, %v3198_v12, %v3214_v49 }
 0x931   :  { %16965 = vmatpush3.bf16.msra.mxu1 %v19390_v56  ;;  %v19395_v0 = vpack.c.bf16 %v3218_v22, %v3217_v4 }
 0x932   :  { %16966 = vmatprep.subr.bf16.mxu1 %v18699_v29 }
 0x935   :  { %16967 = vmatpush3.bf16.msra.mxu1 %v19395_v0 }
 0x936   :  { %3583 = vmatprep.subr.bf16.mxu1 %v17708_v43 }
 0x938   :  { %16969 = vmatmul.mubr.msk.bf16.vlgmr.msra.gmra.mxu1 %vm1468_vm4, %v17705_v25 }
 0x939   :  { %3584 = vmatpush1.bf16.msra.mxu1 %v17706_v59  ;;  %3607 = vmatprep.mubr.bf16.mxu1 %v21972_v23 }
 0x93a   :  { %3585 = vmatprep.subr.bf16.mxu1 %v17712_v5 }
 0x93d   :  { %3586 = vmatpush1.bf16.msra.mxu1 %v17710_v53 }
 0x93e   :  { %3587 = vmatprep.subr.bf16.mxu1 %v17716_v16 }
 0x941   :  { %3588 = vmatpush1.bf16.msra.mxu1 %v17714_v37 }
 0x942   :  { %3589 = vmatprep.subr.bf16.mxu1 %v17720_v1  ;;  %v19492_v1 = vld [vmem:[%s19485_s3 + $0xc] ss:$36 sps:$4 sm:$0xff]  }
 0x945   :  { %3590 = vmatpush1.bf16.msra.mxu1 %v17718_v14 }
 0x946   :  { %3669 = vmatprep.subr.bf16.mxu1 %v17727_v48 }
 0x9f8   :  { %v3267_v11 = vpop.f32.mrf.mxu1 }
 0x9fa   :  { %v16970_v35 = vpop.f32.mrf.mxu1 }
 0x9fc   :  { %v3270_v18 = vpop.f32.mrf.mxu1 }
 0x9fd   :  { %v19413_v36 = vpack.c.bf16 %v3270_v18, %v3267_v11  ;;  %v19502_v11 = vld [vmem:[%s19485_s3 + $0x1c] ss:$36 sps:$4 sm:$0xff]  }
 0x9fe   :  { %v16971_v54 = vpop.f32.mrf.mxu1 }
 0x9ff   :  { %16981 = vmatmul.mubr.msk.bf16.vlgmr.msra.gmra.mxu0 %vm976_vm3, %v19413_v36  ;;  %15143 = vmatmul.mubr.msk.bf16.vlgmr.msra.gmra.mxu1 %vm976_vm3, %v19413_v36 }
 0xa00   :  { %3627 = vmatpush1.bf16.msra.mxu0 %v17722_v44  ;;  %3670 = vmatpush1.bf16.msra.mxu1 %v17725_v10 }
 0xa01   :  { %3628 = vmatprep.subr.bf16.mxu0 %v17730_v24  ;;  %3671 = vmatprep.subr.bf16.mxu1 %v17733_v9 }
 0xa02   :  { %3650 = vmatprep.mubr.bf16.mxu0 %v21972_v23  ;;  %3693 = vmatprep.mubr.bf16.mxu1 %v21972_v23 }
 0xa04   :  { %3629 = vmatpush1.bf16.msra.mxu0 %v17728_v20  ;;  %3672 = vmatpush1.bf16.msra.mxu1 %v17731_v39 }
 0xa05   :  { %3630 = vmatprep.subr.bf16.mxu0 %v17736_v45  ;;  %3673 = vmatprep.subr.bf16.mxu1 %v17739_v21 }
 0xa08   :  { %3631 = vmatpush1.bf16.msra.mxu0 %v17734_v52  ;;  %3674 = vmatpush1.bf16.msra.mxu1 %v17737_v50 }
 0xa09   :  { %3632 = vmatprep.subr.bf16.mxu0 %v17742_v62  ;;  %3675 = vmatprep.subr.bf16.mxu1 %v17745_v7  ;;  %v19506_v62 = vld [vmem:[%s19485_s3 + $0x18] ss:$36 sps:$4 sm:$0xff]  }
 0xa0c   :  { %3633 = vmatpush1.bf16.msra.mxu0 %v17740_v38  ;;  %3676 = vmatpush1.bf16.msra.mxu1 %v17743_v28 }
 0xa0d   :  { %3712 = vmatprep.subr.bf16.mxu0 %v17748_v13  ;;  %16984 = vmatprep.subr.bf16.mxu1 %v18699_v29  ;;  %v19513_v13 = vld [vmem:[%s19485_s3 + $0x4] ss:$36 sps:$4 sm:$0xff]  }
 0xa0f   :  { %15144 = vmatmul.mubr.msk.bf16.vlgmr.msra.gmra.mxu0 %vm976_vm3, %v19413_v36  ;;  %15145 = vmatmul.mubr.msk.bf16.vlgmr.msra.gmra.mxu1 %vm976_vm3, %v19413_v36 }
 0xa10   :  { %3713 = vmatpush1.bf16.msra.mxu0 %v17746_v30  ;;  %16985 = vmatpush3.bf16.msra.mxu1 %v17749_v55  ;;  %v19522_v55 = vld [vmem:[%s19485_s3] ss:$36 sps:$4 sm:$0xff]  }
 0xa11   :  { %3714 = vmatprep.subr.bf16.mxu0 %v17752_v61  ;;  %16986 = vmatprep.subr.bf16.mxu1 %v18699_v29  ;;  %v19526_v61 = vld [vmem:[%s19485_s3 + $0x14] ss:$36 sps:$4 sm:$0xff]  }
 0xa12   :  { %3736 = vmatprep.mubr.bf16.mxu0 %v21972_v23  ;;  %16992 = vmatprep.mubr.msk.bf16.mxu1 %vm18701_vm13, %v18699_v29 }
 0xa14   :  { %3715 = vmatpush1.bf16.msra.mxu0 %v17750_v32  ;;  %16987 = vmatpush3.bf16.msra.mxu1 %v17753_v34  ;;  %v19532_v32 = vld [vmem:[%s19485_s3 + $0x10] ss:$36 sps:$4 sm:$0xff]   ;;  %v19542_v34 = vld [vmem:[%s19485_s3 + $0x20] ss:$36 sps:$4 sm:$0xff]  }
 0xa15   :  { %3716 = vmatprep.subr.bf16.mxu0 %v17756_v2  ;;  %16988 = vmatprep.subr.bf16.mxu1 %v18699_v29 }
 0xa18   :  { %3717 = vmatpush1.bf16.msra.mxu0 %v17754_v26  ;;  %16989 = vmatpush3.bf16.msra.mxu1 %v17757_v17 }
 0xa19   :  { %3718 = vmatprep.subr.bf16.mxu0 %v17760_v40  ;;  %16990 = vmatprep.subr.bf16.mxu1 %v18699_v29 }
 0xa1c   :  { %3719 = vmatpush1.bf16.msra.mxu0 %v17758_v19  ;;  %16991 = vmatpush3.bf16.msra.mxu1 %v17761_v15 }
 0xa1d   :  { %4031 = vmatprep.subr.bf16.mxu1 %v19492_v1 }
 0xa1f   :  { %15146 = vmatmul.mubr.msk.bf16.vlgmr.msra.gmra.mxu0 %vm976_vm3, %v19413_v36  ;;  %16993 = vmatmul.mubr.msk.bf16.vlgmr.msra.gmra.mxu1 %vm976_vm3, %v19413_v36 }
 0xa20   :  { %4049 = vmatprep.mubr.bf16.mxu1 %v21972_v23  ;;  %4032 = vmatpush1.bf16.msra.mxu1 %v19495_v47 }
 0xa21   :  { %4117 = vmatprep.subr.bf16.mxu1 %v19502_v11 }
 0xabf   :  { %v3384_v58 = vpop.f32.mrf.mxu0  ;;  %v19465_v60 = vpop.f32.mrf.mxu1 }
 0xac0   :  { %v3795_v46 = vadd.f32 %v15148_v33, %v3384_v58  ;;  %v3809_v4 = vsel %vm488_vm2, %v3384_v58, inf }
 0xac1   :  { %v16982_v51 = vpop.f32.mrf.mxu0  ;;  %v19469_v22 = vpop.f32.mrf.mxu1 }
 0xac2   :  { %v3797_v31 = vsel %vm488_vm2, %v3795_v46, -inf }
 0xac3   :  { %3798 = vmax.xlane.f32.xlu1 %v3797_v31  ;;  %v3387_v12 = vpop.f32.mrf.mxu0  ;;  %v19472_v43 = vpop.f32.mrf.mxu1 }
 0xac4   :  { %v3796_v8 = vadd.f32 %v15148_v33, %v3387_v12  ;;  %v3812_v6 = vsel %vm488_vm2, %v3387_v12, inf }
 0xac5   :  { %v16983_v27 = vpop.f32.mrf.mxu0  ;;  %v19474_v25 = vpop.f32.mrf.mxu1 }
 0xac6   :  { %v3800_v49 = vsel %vm488_vm2, %v3796_v8, -inf }
 0xac7   :  { %3813 = vmin.xlane.f32.xlu1 %v3812_v6  ;;  %3801 = vmax.xlane.f32.xlu0 %v3800_v49 }
 0xacb   :  { %3810 = vmin.xlane.f32.xlu0 %v3809_v4 }
 0xacf   :  { %v19476_v59 = vpop.f32.mrf.mxu1  ;;  %v3652_v2 = vpop.f32.mrf.mxu0 }
 0xad1   :  { %v19478_v5 = vpop.f32.mrf.mxu1  ;;  %v3654_v26 = vpop.f32.mrf.mxu0 }
 0xad3   :  { %v19480_v53 = vpop.f32.mrf.mxu1  ;;  %v3656_v17 = vpop.f32.mrf.mxu0 }
 0xad5   :  { %v19487_v16 = vpop.f32.mrf.mxu1  ;;  %v3658_v40 = vpop.f32.mrf.mxu0 }
 0xadf   :  { %v19489_v37 = vpop.f32.mrf.mxu1  ;;  %v3738_v19 = vpop.f32.mrf.mxu0 }
 0xae1   :  { %v16994_v14 = vpop.f32.mrf.mxu1  ;;  %v3740_v15 = vpop.f32.mrf.mxu0 }
 0xae3   :  { %v19498_v42 = vpop.f32.mrf.mxu1  ;;  %v3742_v33 = vpop.f32.mrf.mxu0 }
 0xae5   :  { %v16995_v48 = vpop.f32.mrf.mxu1  ;;  %v3744_v51 = vpop.f32.mrf.mxu0 }
 0xb4c   :  { %v3799_v35 = vpop.xlane.xlu1 %3798 }
 0xb4d   :  { %v3803_v18 = vsub.f32 %v3795_v46, %v3799_v35 }
 0xb4f   :  { %v3805_v36 = vmul.f32 1.442695, %v3803_v18 }
 0xb50   :  { %v3814_v44 = vpop.xlane.xlu1 %3813  ;;  %v3802_v10 = vpop.xlane.xlu0 %3801 }
 0xb51   :  { %v3816_v24 = vsub.f32 %v3814_v44, %v3387_v12  ;;  %v3804_v9 = vsub.f32 %v3796_v8, %v3802_v10  ;;  %18269 = vpow2.f32 %v3805_v36 }
 0xb53   :  { %v3807_v54 = vmul.f32 1.442695, %v3804_v9  ;;  %v3819_v20 = vmul.f32 1.442695, %v3816_v24 }
 0xb54   :  { %v3811_v39 = vpop.xlane.xlu0 %3810 }
 0xb55   :  { %v3815_v45 = vsub.f32 %v3811_v39, %v3384_v58  ;;  %18271 = vpow2.f32 %v3807_v54 }
 0xb56   :  { %18273 = vpow2.f32 %v3819_v20 }
 0xb57   :  { %v3817_v21 = vmul.f32 1.442695, %v3815_v45 }
 0xb59   :  { %18275 = vpow2.f32 %v3817_v21 }
 0xb5e   :  { %v18270_v52 = vpop.eup %18269 }
 0xb62   :  { %v18272_v50 = vpop.eup %18271 }
 0xb63   :  { %16996 = vmatprep.subr.msk.mxu0 %vm488_vm2, %v18272_v50  ;;  %v3924_v7 = vpack.c.bf16 %v18272_v50, %v18270_v52  ;;  %v18274_v38 = vpop.eup %18273 }
 0xb64   :  { %16997 = vmatpush3.xpose.msk.msra.mxu0 %vm488_vm2, %v18272_v50 }
 0xb65   :  { %16998 = vmatprep.subr.msk.mxu0 %vm488_vm2, %v18270_v52  ;;  %15163 = vmatmul.mubr.msk.bf16.vlgmr.msra.gmra.mxu1 %vm488_vm2, %v3924_v7 }
 0xb66   :  { %v18276_v28 = vpop.eup %18275  ;;  %4118 = vmatpush1.bf16.msra.mxu1 %v19506_v62  ;;  %4135 = vmatprep.mubr.bf16.mxu1 %v21972_v23 }
 0xb67   :  { %v19515_v30 = vpack.c.bf16 %v18274_v38, %v18276_v28  ;;  %17000 = vmatprep.mubr.msk.f32.mxu0 %vm488_vm2, %v18276_v28 }
 0xb68   :  { %16999 = vmatpush3.xpose.msk.msra.mxu0 %vm488_vm2, %v18270_v52 }
 0xb69   :  { %3988 = vmatprep.subr.bf16.mxu0 %v19513_v13 }
 0xb6b   :  { %17001 = vmatmul.mubr.msk.f32.vlgmr.msra.gmra.mxu0 %vm488_vm2, %v18274_v38 }
 0xb6c   :  { %3989 = vmatpush1.bf16.msra.mxu0 %v19522_v55  ;;  %4006 = vmatprep.mubr.bf16.mxu0 %v21972_v23 }
 0xb6d   :  { %15165 = vmatmul.mubr.msk.bf16.vlgmr.msra.gmra.mxu1 %vm488_vm2, %v3924_v7  ;;  %4074 = vmatprep.subr.bf16.mxu0 %v19526_v61 }
 0xb6e   :  { %4250 = vmatprep.mubr.bf16.mxu1 %v21972_v23 }
 0xb6f   :  { %15162 = vmatmul.mubr.msk.bf16.vlgmr.msra.gmra.mxu0 %vm488_vm2, %v3924_v7 }
 0xb70   :  { %4075 = vmatpush1.bf16.msra.mxu0 %v19532_v32  ;;  %4092 = vmatprep.mubr.bf16.mxu0 %v21972_v23 }
 0xb71   :  { %17003 = vmatprep.subr.bf16.mxu0 %v18699_v29 }
 0xb77   :  { %15164 = vmatmul.mubr.msk.bf16.vlgmr.msra.gmra.mxu0 %vm488_vm2, %v3924_v7 }
 0xb78   :  { %17004 = vmatpush3.bf16.msra.mxu0 %v19542_v34  ;;  %17005 = vmatprep.mubr.msk.bf16.mxu0 %vm18701_vm13, %v18699_v29 }
 0xb7f   :  { %17006 = vmatmul.mubr.msk.bf16.vlgmr.msra.gmra.mxu0 %vm488_vm2, %v3924_v7 }
 0xb80   :  { %4293 = vmatprep.mubr.bf16.mxu0 %v21972_v23 }
 0xc25   :  { %v4051_v58 = vpop.f32.mrf.mxu1 }
 0xc26   :  { %v4189_v14 = vmul.f32 %v4051_v58, %v3652_v2 }
 0xc27   :  { %v4053_v46 = vpop.f32.mrf.mxu1 }
 0xc28   :  { %v4190_v6 = vmul.f32 %v4053_v46, %v3654_v26 }
 0xc29   :  { %v4055_v31 = vpop.f32.mrf.mxu1 }
 0xc2a   :  { %v4198_v12 = vmul.f32 %v4055_v31, %v3656_v17  ;;  %v219_v31 = vld [vmem:[%s19558_s12] sm:$0xff] }
 0xc2b   :  { %v17002_v8 = vpop.f32.mrf.mxu0  ;;  %v4057_v27 = vpop.f32.mrf.mxu1 }
 0xc2c   :  { %v3909_v49 = vmax.f32 %v17002_v8, 1e-30  ;;  %v4199_v4 = vmul.f32 %v4057_v27, %v3658_v40  ;;  %v4208_v10 = vpack.c.bf16 %v4198_v12, %v4189_v14 }
 0xc2d   :  { %v3899_v48 = vpop.f32.mrf.mxu0  ;;  %v4137_v35 = vpop.f32.mrf.mxu1 }
 0xc2e   :  { %18277 = vrcp.f32 %v3909_v49  ;;  %v4209_v18 = vpack.c.bf16 %v4199_v4, %v4190_v6  ;;  %v3908_v44 = vmax.f32 %v3899_v48, 1e-30  ;;  %v4193_v49 = vmul.f32 %v4137_v35, %v3738_v19  ;;  %v17788_v35 = vld [vmem:[%s19553_s8 + $0xe8] sm:$0xff]  }
 0xc2f   :  { %v4008_v36 = vpop.f32.mrf.mxu0  ;;  %v4139_v24 = vpop.f32.mrf.mxu1 }
 0xc30   :  { %18279 = vrcp.f32 %v3908_v44  ;;  %4275 = vmatprep.subr.bf16.mxu0 %v4209_v18  ;;  %v4194_v45 = vmul.f32 %v4139_v24, %v3740_v15  ;;  %v4187_v2 = vmul.f32 %v4008_v36, %v19465_v60  ;;  %v220_v15 = vld [vmem:[%s19558_s12 + $0x8] sm:$0xff]  ;;  %v17789_v24 = vld [vmem:[%s19553_s8 + $0x18] sm:$0xff]  }
 0xc31   :  { %v4010_v9 = vpop.f32.mrf.mxu0  ;;  %v4141_v54 = vpop.f32.mrf.mxu1  ;;  %4276 = vmatpush1.bf16.msra.mxu0 %v4208_v10 }
 0xc32   :  { %v4188_v7 = vmul.f32 %v4010_v9, %v19469_v22  ;;  %v4202_v12 = vmul.f32 %v4141_v54, %v3742_v33  ;;  %v17787_v33 = vld [vmem:[%s19553_s8 + $0x58] sm:$0xff]   ;;  %v17790_v9 = vld [vmem:[%s19553_s8 + $0xa8] sm:$0xff]   ;;  %v17791_v54 = vld [vmem:[%s19553_s8 + $0x50] sm:$0xff]  }
 0xc33   :  { %v4012_v20 = vpop.f32.mrf.mxu0  ;;  %v4143_v39 = vpop.f32.mrf.mxu1 }
 0xc34   :  { %v4203_v21 = vmul.f32 %v4143_v39, %v3744_v51  ;;  %v4196_v52 = vmul.f32 %v4012_v20, %v19472_v43  ;;  %v4212_v44 = vpack.c.bf16 %v4202_v12, %v4193_v49  ;;  %v17792_v20 = vld [vmem:[%s19553_s8 + $0xe0] sm:$0xff]   ;;  %v17793_v39 = vld [vmem:[%s19553_s8 + $0x10] sm:$0xff]  }
 0xc35   :  { %v4014_v50 = vpop.f32.mrf.mxu0 }
 0xc36   :  { %v4213_v38 = vpack.c.bf16 %v4203_v21, %v4194_v45  ;;  %v4197_v28 = vmul.f32 %v4014_v50, %v19474_v25  ;;  %v4206_v40 = vpack.c.bf16 %v4196_v52, %v4187_v2  ;;  %v17794_v45 = vld [vmem:[%s19553_s8 + $0xa0] sm:$0xff]   ;;  %v17795_v21 = vld [vmem:[%s19553_s8 + $0x48] sm:$0xff]   ;;  %v17796_v52 = vld [vmem:[%s19553_s8 + $0xd8] sm:$0xff]  }
 0xc37   :  { %v4094_v26 = vpop.f32.mrf.mxu0  ;;  %v17797_v50 = vld [vmem:[%s19553_s8 + $0x8] sm:$0xff]   ;;  %v17801_v2 = vld [vmem:[%s19553_s8] sm:$0xff]  }
 0xc38   :  { %v4207_v17 = vpack.c.bf16 %v4197_v28, %v4188_v7  ;;  %4361 = vmatprep.subr.bf16.mxu0 %v4213_v38  ;;  %v4191_v48 = vmul.f32 %v4094_v26, %v19476_v59  ;;  %v17798_v7 = vld [vmem:[%s19553_s8 + $0x98] sm:$0xff]   ;;  %v17799_v38 = vld [vmem:[%s19553_s8 + $0x40] sm:$0xff]   ;;  %v17800_v28 = vld [vmem:[%s19553_s8 + $0xd0] sm:$0xff]  }
 0xc39   :  { %v4096_v58 = vpop.f32.mrf.mxu0  ;;  %v17802_v26 = vld [vmem:[%s19553_s8 + $0x90] sm:$0xff]  }
 0xc3a   :  { %4232 = vmatprep.subr.bf16.mxu1 %v4207_v17  ;;  %v4192_v22 = vmul.f32 %v4096_v58, %v19478_v5  ;;  %v17803_v17 = vld [vmem:[%s19553_s8 + $0xc8] sm:$0xff]  }
 0xc3b   :  { %v18278_v46 = vpop.eup %18277  ;;  %v4098_v51 = vpop.f32.mrf.mxu0  ;;  %4233 = vmatpush1.bf16.msra.mxu1 %v4206_v40  ;;  %v17804_v40 = vld [vmem:[%s19553_s8 + $0x178] sm:$0xff]   ;;  %v17805_v58 = vld [vmem:[%s19553_s8 + $0x88] sm:$0xff]  }
 0xc3c   :  { %v3913_v27 = vmul.f32 %v18278_v46, %v220_v15  ;;  %v4200_v60 = vmul.f32 %v4098_v51, %v19480_v53  ;;  %v17807_v46 = vld [vmem:[%s19553_s8 + $0xc0] sm:$0xff]  }
 0xc3d   :  { %v18280_v43 = vpop.eup %18279  ;;  %v4100_v8 = vpop.f32.mrf.mxu0  ;;  %v17809_v15 = vld [vmem:[%s19553_s8 + $0x80] sm:$0xff]  }
 0xc3e   :  { %v3912_v25 = vmul.f32 %v18280_v43, %v219_v31  ;;  %v4201_v6 = vmul.f32 %v4100_v8, %v19487_v16  ;;  %v4210_v36 = vpack.c.bf16 %v4200_v60, %v4191_v48  ;;  %v17812_v31 = vld [vmem:[%s19553_s8 + $0x1f8] sm:$0xff]  }
 0xc3f   :  { %v4180_v4 = vpop.f32.mrf.mxu0 }
 0xc40   :  { %v4205_v14 = vpack.c.bf16 %v3913_v27, %v3912_v25  ;;  %v4211_v18 = vpack.c.bf16 %v4201_v6, %v4192_v22  ;;  %v4195_v59 = vmul.f32 %v4180_v4, %v19489_v37  ;;  %v17775_v37 = vld [vmem:[%s19553_s8 + $0x78] sm:$0xff]  }
 0xc41   :  { %v17007_v10 = vpop.f32.mrf.mxu0 }
 0xc42   :  { %15167 = vmatmul.mubr.msk.bf16.vlgmr.msra.gmra.mxu1 %vm488_vm2, %v4205_v14  ;;  %15168 = vmatmul.mubr.msk.bf16.vlgmr.msra.gmra.mxu0 %vm488_vm2, %v4205_v14 }
 0xc43   :  { %4318 = vmatprep.subr.bf16.mxu1 %v4211_v18  ;;  %4362 = vmatpush1.bf16.msra.mxu0 %v4212_v44  ;;  %v4183_v5 = vpop.f32.mrf.mxu0 }
 0xc44   :  { %4319 = vmatpush1.bf16.msra.mxu1 %v4210_v36  ;;  %4336 = vmatprep.mubr.bf16.mxu1 %v21972_v23  ;;  %v4204_v53 = vmul.f32 %v4183_v5, %v19498_v42  ;;  %v17778_v42 = vld [vmem:[%s19553_s8 + $0x30] sm:$0xff]  }
 0xc45   :  { %v17008_v16 = vpop.f32.mrf.mxu0  ;;  %4379 = vmatprep.mubr.bf16.mxu0 %v21972_v23  ;;  %17009 = vmatprep.subr.bf16.mxu1 %v18699_v29 }
 0xc46   :  { %4449 = vmatprep.subr.bf16.mxu0 %v19513_v13  ;;  %v4214_v19 = vpack.c.bf16 %v4204_v53, %v4195_v59  ;;  %v17781_v13 = vld [vmem:[%s19553_s8 + $0x28] sm:$0xff]  }
 0xc4a   :  { %15169 = vmatmul.mubr.msk.bf16.vlgmr.msra.gmra.mxu1 %vm488_vm2, %v4205_v14  ;;  %15170 = vmatmul.mubr.msk.bf16.vlgmr.msra.gmra.mxu0 %vm488_vm2, %v4205_v14 }
 0xc4b   :  { %17010 = vmatpush3.bf16.msra.mxu1 %v4214_v19  ;;  %4450 = vmatpush1.bf16.msra.mxu0 %v19522_v55  ;;  %v17782_v55 = vld [vmem:[%s19553_s8 + $0xb8] sm:$0xff]  }
 0xc4c   :  { %17011 = vmatprep.mubr.msk.bf16.mxu1 %vm18701_vm13, %v18699_v29  ;;  %4467 = vmatprep.mubr.bf16.mxu0 %v21972_v23 }
 0xc4d   :  { %4492 = vmatprep.subr.bf16.mxu1 %v19492_v1  ;;  %4535 = vmatprep.subr.bf16.mxu0 %v19526_v61  ;;  %v17776_v1 = vld [vmem:[%s19553_s8 + $0x38] sm:$0xff]   ;;  %v17783_v61 = vld [vmem:[%s19553_s8 + $0x60] sm:$0xff]  }
 0xc52   :  { %17012 = vmatmul.mubr.msk.bf16.vlgmr.msra.gmra.mxu1 %vm488_vm2, %v4205_v14  ;;  %15172 = vmatmul.mubr.msk.bf16.vlgmr.msra.gmra.mxu0 %vm488_vm2, %v19515_v30 }
 0xc53   :  { %4493 = vmatpush1.bf16.msra.mxu1 %v19495_v47  ;;  %4536 = vmatpush1.bf16.msra.mxu0 %v19532_v32  ;;  %v17777_v47 = vld [vmem:[%s19553_s8 + $0x70] sm:$0xff]   ;;  %v17785_v32 = vld [vmem:[%s19553_s8 + $0x20] sm:$0xff]  }
 0xc54   :  { %4510 = vmatprep.mubr.bf16.mxu1 %v21972_v23  ;;  %4553 = vmatprep.mubr.bf16.mxu0 %v21972_v23 }
 0xc55   :  { %4578 = vmatprep.subr.bf16.mxu1 %v19502_v11  ;;  %17015 = vmatprep.subr.bf16.mxu0 %v18699_v29  ;;  %v17779_v11 = vld [vmem:[%s19553_s8 + $0x68] sm:$0xff]  }
 0xc5a   :  { %15173 = vmatmul.mubr.msk.bf16.vlgmr.msra.gmra.mxu1 %vm488_vm2, %v19515_v30  ;;  %15174 = vmatmul.mubr.msk.bf16.vlgmr.msra.gmra.mxu0 %vm488_vm2, %v19515_v30 }
 0xc5b   :  { %4579 = vmatpush1.bf16.msra.mxu1 %v19506_v62  ;;  %17016 = vmatpush3.bf16.msra.mxu0 %v19542_v34  ;;  %v17780_v62 = vld [vmem:[%s19553_s8 + $0xf8] sm:$0xff]   ;;  %v17786_v34 = vld [vmem:[%s19553_s8 + $0xb0] sm:$0xff]  }
 0xc5c   :  { %4596 = vmatprep.mubr.bf16.mxu1 %v21972_v23  ;;  %17017 = vmatprep.mubr.msk.bf16.mxu0 %vm18701_vm13, %v18699_v29 }
 0xc5d   :  { %15999 = vmatprep.subr.bf16.mxu1 %v17775_v37  ;;  %16021 = vmatprep.subr.bf16.mxu0 %v17780_v62 }
 0xc62   :  { %15175 = vmatmul.mubr.msk.bf16.vlgmr.msra.gmra.mxu1 %vm488_vm2, %v19515_v30  ;;  %17018 = vmatmul.mubr.msk.bf16.vlgmr.msra.gmra.mxu0 %vm488_vm2, %v19515_v30  ;;  %v17784_v30 = vld [vmem:[%s19553_s8 + $0xf0] sm:$0xff]  }
 0xc63   :  { %16000 = vmatpush3.bf16.msra.mxu1 %v17776_v1  ;;  %16022 = vmatpush3.bf16.msra.mxu0 %v17782_v55 }
 0xc64   :  { %16001 = vmatprep.subr.bf16.mxu1 %v17777_v47  ;;  %16023 = vmatprep.subr.bf16.mxu0 %v17784_v30  ;;  %v17806_v30 = vld [vmem:[%s19553_s8 + $0x138] sm:$0xff]  }
 0xc67   :  { %16002 = vmatpush3.bf16.msra.mxu1 %v17778_v42  ;;  %16024 = vmatpush3.bf16.msra.mxu0 %v17786_v34 }
 0xc68   :  { %16003 = vmatprep.subr.bf16.mxu1 %v17779_v11  ;;  %16025 = vmatprep.subr.bf16.mxu0 %v17788_v35  ;;  %v17808_v35 = vld [vmem:[%s19553_s8 + $0x170] sm:$0xff]  }
 0xc6b   :  { %16004 = vmatpush3.bf16.msra.mxu1 %v17781_v13  ;;  %16026 = vmatpush3.bf16.msra.mxu0 %v17790_v9 }
 0xc6c   :  { %16005 = vmatprep.subr.bf16.mxu1 %v17783_v61  ;;  %16027 = vmatprep.subr.bf16.mxu0 %v17792_v20 }
 0xc6f   :  { %16006 = vmatpush3.bf16.msra.mxu1 %v17785_v32  ;;  %16028 = vmatpush3.bf16.msra.mxu0 %v17794_v45 }
 0xc70   :  { %16007 = vmatprep.subr.bf16.mxu1 %v17787_v33  ;;  %16029 = vmatprep.subr.bf16.mxu0 %v17796_v52 }
 0xc73   :  { %16008 = vmatpush3.bf16.msra.mxu1 %v17789_v24  ;;  %16030 = vmatpush3.bf16.msra.mxu0 %v17798_v7 }
 0xc74   :  { %16009 = vmatprep.subr.bf16.mxu1 %v17791_v54  ;;  %16031 = vmatprep.subr.bf16.mxu0 %v17800_v28  ;;  %v17810_v54 = vld [vmem:[%s19553_s8 + $0x130] sm:$0xff]  }
 0xc77   :  { %16010 = vmatpush3.bf16.msra.mxu1 %v17793_v39  ;;  %16032 = vmatpush3.bf16.msra.mxu0 %v17802_v26 }
 0xc78   :  { %16011 = vmatprep.subr.bf16.mxu1 %v17795_v21  ;;  %16033 = vmatprep.subr.bf16.mxu0 %v17803_v17  ;;  %v17811_v21 = vld [vmem:[%s19553_s8 + $0x168] sm:$0xff]  }
 0xc7b   :  { %16012 = vmatpush3.bf16.msra.mxu1 %v17797_v50  ;;  %16034 = vmatpush3.bf16.msra.mxu0 %v17805_v58  ;;  %v17813_v58 = vld [vmem:[%s19553_s8 + $0x128] sm:$0xff]  }
 0xc7c   :  { %16013 = vmatprep.subr.bf16.mxu1 %v17799_v38  ;;  %16035 = vmatprep.subr.bf16.mxu0 %v17807_v46  ;;  %v17814_v46 = vld [vmem:[%s19553_s8 + $0x1b8] sm:$0xff]  }
 0xc7f   :  { %16014 = vmatpush3.bf16.msra.mxu1 %v17801_v2  ;;  %16036 = vmatpush3.bf16.msra.mxu0 %v17809_v15 }
 0xc80   :  { %16043 = vmatprep.subr.bf16.mxu1 %v17804_v40  ;;  %16065 = vmatprep.subr.bf16.mxu0 %v17812_v31 }
 0xd02   :  { %v4252_v51 = vpop.f32.mrf.mxu1  ;;  %v4295_v43 = vpop.f32.mrf.mxu0 }
 0xd04   :  { %v4254_v12 = vpop.f32.mrf.mxu1  ;;  %v4297_v22 = vpop.f32.mrf.mxu0 }
 0xd06   :  { %v4256_v8 = vpop.f32.mrf.mxu1  ;;  %v4299_v27 = vpop.f32.mrf.mxu0 }
 0xd08   :  { %v4258_v25 = vpop.f32.mrf.mxu1  ;;  %v4301_v60 = vpop.f32.mrf.mxu0 }
 0xd0a   :  { %v19642_v6 = vpop.f32.mrf.mxu1  ;;  %v19644_v49 = vpop.f32.mrf.mxu0 }
 0xd0c   :  { %v4340_v4 = vpop.f32.mrf.mxu1  ;;  %v19646_v14 = vpop.f32.mrf.mxu0 }
 0xd0e   :  { %v19648_v48 = vpop.f32.mrf.mxu1  ;;  %v19650_v18 = vpop.f32.mrf.mxu0 }
 0xd10   :  { %v4344_v44 = vpop.f32.mrf.mxu1  ;;  %v19652_v10 = vpop.f32.mrf.mxu0 }
 0xd12   :  { %v4424_v36 = vpop.f32.mrf.mxu1  ;;  %v4469_v5 = vpop.f32.mrf.mxu0 }
 0xd13   :  { %v4648_v62 = vmul.f32 %v4469_v5, %v4252_v51 }
 0xd14   :  { %v17013_v53 = vpop.f32.mrf.mxu1  ;;  %v4471_v16 = vpop.f32.mrf.mxu0 }
 0xd15   :  { %v4649_v42 = vmul.f32 %v4471_v16, %v4254_v12  ;;  %v17815_v12 = vld [vmem:[%s19553_s8 + $0x160] sm:$0xff]   ;;  %v17819_v53 = vld [vmem:[%s19553_s8 + $0x158] sm:$0xff]   ;;  %v17820_v16 = vld [vmem:[%s19553_s8 + $0x1e8] sm:$0xff]  }
 0xd16   :  { %v4427_v59 = vpop.f32.mrf.mxu1  ;;  %v4473_v19 = vpop.f32.mrf.mxu0 }
 0xd17   :  { %v4657_v37 = vmul.f32 %v4473_v19, %v4256_v8 }
 0xd18   :  { %v17014_v1 = vpop.f32.mrf.mxu1  ;;  %v4475_v47 = vpop.f32.mrf.mxu0 }
 0xd19   :  { %v4658_v11 = vmul.f32 %v4475_v47, %v4258_v25  ;;  %v4666_v32 = vpack.c.bf16 %v4657_v37, %v4648_v62  ;;  %v17821_v1 = vld [vmem:[%s19553_s8 + $0x118] sm:$0xff]   ;;  %v17822_v47 = vld [vmem:[%s19553_s8 + $0x1a8] sm:$0xff]  }
 0xd1a   :  { %v4512_v13 = vpop.f32.mrf.mxu1  ;;  %v19654_v55 = vpop.f32.mrf.mxu0  ;;  %v17827_v62 = vld [vmem:[%s19553_s8 + $0x148] sm:$0xff]  }
 0xd1b   :  { %v4667_v61 = vpack.c.bf16 %v4658_v11, %v4649_v42  ;;  %v4650_v28 = vmul.f32 %v4512_v13, %v4295_v43  ;;  %v17823_v42 = vld [vmem:[%s19553_s8 + $0x150] sm:$0xff]   ;;  %v17824_v11 = vld [vmem:[%s19553_s8 + $0x1e0] sm:$0xff]   ;;  %v17828_v13 = vld [vmem:[%s19553_s8 + $0x1d8] sm:$0xff]  }
 0xd1c   :  { %v4514_v34 = vpop.f32.mrf.mxu1  ;;  %v4557_v33 = vpop.f32.mrf.mxu0 }
 0xd1d   :  { %5290 = vmatprep.mubr.bf16.mxu1 %v4667_v61  ;;  %v4651_v52 = vmul.f32 %v4514_v34, %v4297_v22  ;;  %v4653_v50 = vmul.f32 %v4557_v33, %v4340_v4  ;;  %v17816_v22 = vld [vmem:[%s19553_s8 + $0x1f0] sm:$0xff]   ;;  %v17829_v61 = vld [vmem:[%s19553_s8 + $0x108] sm:$0xff]   ;;  %v17833_v33 = vld [vmem:[%s19553_s8 + $0x100] sm:$0xff]  }
 0xd1e   :  { %v4516_v24 = vpop.f32.mrf.mxu1  ;;  %v19658_v9 = vpop.f32.mrf.mxu0  ;;  %5291 = vmatmul.mubr.bf16.vlgmr.msra.gmra.mxu1 %v4666_v32  ;;  %v17818_v4 = vld [vmem:[%s19553_s8 + $0x1b0] sm:$0xff]   ;;  %v17831_v32 = vld [vmem:[%s19553_s8 + $0x140] sm:$0xff]  }
 0xd1f   :  { %16044 = vmatpush3.bf16.msra.mxu1 %v17806_v30  ;;  %v4659_v20 = vmul.f32 %v4516_v24, %v4299_v27  ;;  %v17830_v30 = vld [vmem:[%s19553_s8 + $0x198] sm:$0xff]   ;;  %v17832_v34 = vld [vmem:[%s19553_s8 + $0x1d0] sm:$0xff]   ;;  %v4661_v24 = vmul.f32 %v19658_v9, %v19648_v48  ;;  %v17839_v48 = vld [vmem:[%s19553_s8 + $0x180] sm:$0xff]  }
 0xd20   :  { %v4518_v39 = vpop.f32.mrf.mxu1  ;;  %v4561_v45 = vpop.f32.mrf.mxu0  ;;  %16045 = vmatprep.subr.bf16.mxu1 %v17808_v35  ;;  %v17834_v35 = vld [vmem:[%s19553_s8 + $0x190] sm:$0xff]  }
 0xd21   :  { %v4660_v7 = vmul.f32 %v4518_v39, %v4301_v60  ;;  %v4662_v38 = vmul.f32 %v4561_v45, %v4344_v44  ;;  %v4668_v15 = vpack.c.bf16 %v4659_v20, %v4650_v28  ;;  %v17817_v60 = vld [vmem:[%s19553_s8 + $0x120] sm:$0xff]   ;;  %v4652_v20 = vmul.f32 %v19654_v55, %v19642_v6  ;;  %v17836_v39 = vld [vmem:[%s19553_s8 + $0x188] sm:$0xff]   ;;  %v17837_v45 = vld [vmem:[%s19553_s8 + $0x238] sm:$0xff]  }
 0xd22   :  { %v19662_v2 = vpop.f32.mrf.mxu1  ;;  %v4641_v26 = vpop.f32.mrf.mxu0  ;;  %v17840_v9 = vld [vmem:[%s19553_s8 + $0x230] sm:$0xff]   ;;  %v17841_v55 = vld [vmem:[%s19553_s8 + $0x228] sm:$0xff]  }
 0xd23   :  { %v4669_v17 = vpack.c.bf16 %v4660_v7, %v4651_v52  ;;  %v4671_v40 = vpack.c.bf16 %v4662_v38, %v4653_v50  ;;  %16046 = vmatpush3.bf16.msra.mxu1 %v17810_v54  ;;  %v19670_v27 = vmul.f32 %v4641_v26, %v4424_v36  ;;  %v17835_v54 = vld [vmem:[%s19553_s8 + $0x1c8] sm:$0xff]   ;;  %v17838_v52 = vld [vmem:[%s19553_s8 + $0x1c0] sm:$0xff]   ;;  %v4654_v6 = vmul.f32 %v19662_v2, %v19644_v49  ;;  %v17843_v49 = vld [vmem:[%s19553_s8 + $0x218] sm:$0xff]  }
 0xd24   :  { %v4600_v31 = vpop.f32.mrf.mxu1  ;;  %v17019_v51 = vpop.f32.mrf.mxu0  ;;  %16047 = vmatprep.subr.bf16.mxu1 %v17811_v21  ;;  %v4670_v21 = vpack.c.bf16 %v4661_v24, %v4652_v20  ;;  %v17844_v38 = vld [vmem:[%s19553_s8 + $0x210] sm:$0xff]   ;;  %v17845_v28 = vld [vmem:[%s19553_s8 + $0x208] sm:$0xff]   ;;  %v17846_v2 = vld [vmem:[%s19553_s8 + $0x200] sm:$0xff]  }
 0xd25   :  { %5331 = vmatprep.mubr.bf16.mxu0 %v4669_v17  ;;  %5372 = vmatprep.mubr.bf16.mxu1 %v4671_v40  ;;  %v4655_v36 = vmul.f32 %v4600_v31, %v19646_v14  ;;  %v17825_v14 = vld [vmem:[%s19553_s8 + $0x110] sm:$0xff]   ;;  %v17849_v26 = vld [vmem:[%s19736_s16 + $0x1fc] ss:$36 sps:$4 sm:$0xff]   ;;  %v17855_v31 = vld [vmem:[%s19736_s16 + $0x168] ss:$36 sps:$4 sm:$0xff]  }
 0xd26   :  { %v19668_v43 = vpop.f32.mrf.mxu1  ;;  %v4644_v8 = vpop.f32.mrf.mxu0  ;;  %5332 = vmatmul.mubr.bf16.vlgmr.msra.gmra.mxu0 %v4668_v15  ;;  %v17847_v17 = vld [vmem:[%s19736_s16 + $0x1f8] ss:$36 sps:$4 sm:$0xff]   ;;  %v17854_v15 = vld [vmem:[%s19741_s20 + $0x30] sm:$0xff]  }
 0xd27   :  { %v19672_v25 = vmul.f32 %v4644_v8, %v4427_v59  ;;  %16048 = vmatpush3.bf16.msra.mxu1 %v17813_v58  ;;  %16066 = vmatpush3.bf16.msra.mxu0 %v17814_v46  ;;  %v4663_v50 = vmul.f32 %v19668_v43, %v19650_v18  ;;  %v17842_v18 = vld [vmem:[%s19553_s8 + $0x220] sm:$0xff]   ;;  %v17850_v40 = vld [vmem:[%s19741_s20 + $0x38] sm:$0xff]   ;;  %v17851_v46 = vld [vmem:[%s19736_s16 + $0x1b0] ss:$36 sps:$4 sm:$0xff]  }
 0xd28   :  { %v4604_v44 = vpop.f32.mrf.mxu1  ;;  %v17020_v5 = vpop.f32.mrf.mxu0  ;;  %16049 = vmatprep.subr.bf16.mxu1 %v17815_v12  ;;  %16067 = vmatprep.subr.bf16.mxu0 %v17816_v22  ;;  %v17853_v58 = vld [vmem:[%s19736_s16 + $0x1b4] ss:$36 sps:$4 sm:$0xff]   ;;  %v17857_v51 = vld [vmem:[%s19736_s16 + $0x16c] ss:$36 sps:$4 sm:$0xff]   ;;  %v17861_v22 = vld [vmem:[%s19736_s16 + $0x124] ss:$36 sps:$4 sm:$0xff]  }
 0xd29   :  { %v4674_v59 = vpack.c.bf16 %v19672_v25, %v19670_v27  ;;  %v4664_v19 = vmul.f32 %v4604_v44, %v19652_v10  ;;  %v17826_v10 = vld [vmem:[%s19553_s8 + $0x1a0] sm:$0xff]   ;;  %v4672_v7 = vpack.c.bf16 %v4663_v50, %v4654_v6  ;;  %v17858_v12 = vld [vmem:[%s19741_s20 + $0x28] sm:$0xff]   ;;  %v17863_v25 = vld [vmem:[%s19736_s16 + $0xd8] ss:$36 sps:$4 sm:$0xff]  }
 0xd2a   :  { %v17859_v43 = vld [vmem:[%s19736_s16 + $0x120] ss:$36 sps:$4 sm:$0xff]   ;;  %v17867_v44 = vld [vmem:[%s19736_s16 + $0x90] ss:$36 sps:$4 sm:$0xff]  }
 0xd2b   :  { %v4673_v37 = vpack.c.bf16 %v4664_v19, %v4655_v36  ;;  %16050 = vmatpush3.bf16.msra.mxu1 %v17817_v60  ;;  %16068 = vmatpush3.bf16.msra.mxu0 %v17818_v4  ;;  %v17862_v8 = vld [vmem:[%s19741_s20 + $0x20] sm:$0xff]   ;;  %v17866_v60 = vld [vmem:[%s19741_s20 + $0x18] sm:$0xff]   ;;  %v17870_v5 = vld [vmem:[%s19741_s20 + $0x10] sm:$0xff]  }
 0xd2c   :  { %16051 = vmatprep.subr.bf16.mxu1 %v17819_v53  ;;  %16069 = vmatprep.subr.bf16.mxu0 %v17820_v16  ;;  %v17865_v27 = vld [vmem:[%s19736_s16 + $0xdc] ss:$36 sps:$4 sm:$0xff]   ;;  %v17869_v4 = vld [vmem:[%s19736_s16 + $0x94] ss:$36 sps:$4 sm:$0xff]   ;;  %v17873_v53 = vld [vmem:[%s19736_s16 + $0x4c] ss:$36 sps:$4 sm:$0xff]  }
 0xd2d   :  { %5413 = vmatprep.mubr.bf16.mxu0 %v4673_v37  ;;  %v17871_v16 = vld [vmem:[%s19736_s16 + $0x48] ss:$36 sps:$4 sm:$0xff]   ;;  %v17875_v19 = vld [vmem:[%s19736_s16] ss:$36 sps:$4 sm:$0xff]  }
 0xd2e   :  { %v17874_v36 = vld [vmem:[%s19741_s20 + $0x8] sm:$0xff]   ;;  %v17878_v37 = vld [vmem:[%s19741_s20] sm:$0xff]   ;;  %s14900_s20 = sld [smem:[%s21939_s0 + %s18716_s17]]  }
 0xd2f   :  { %16052 = vmatpush3.bf16.msra.mxu1 %v17821_v1  ;;  %16070 = vmatpush3.bf16.msra.mxu0 %v17822_v47  ;;  %v17881_v1 = vld [vmem:[%s19736_s16 + $0x204] ss:$36 sps:$4 sm:$0xff]   ;;  %v17884_v47 = vld [vmem:[%s19736_s16 + $0x20c] ss:$36 sps:$4 sm:$0xff]  }
 0xd30   :  { %16053 = vmatprep.subr.bf16.mxu1 %v17823_v42  ;;  %16071 = vmatprep.subr.bf16.mxu0 %v17824_v11 }
 0xd33   :  { %16054 = vmatpush3.bf16.msra.mxu1 %v17825_v14  ;;  %16072 = vmatpush3.bf16.msra.mxu0 %v17826_v10 }
 0xd34   :  { %16055 = vmatprep.subr.bf16.mxu1 %v17827_v62  ;;  %16073 = vmatprep.subr.bf16.mxu0 %v17828_v13 }
 0xd37   :  { %16056 = vmatpush3.bf16.msra.mxu1 %v17829_v61  ;;  %16074 = vmatpush3.bf16.msra.mxu0 %v17830_v30 }
 0xd38   :  { %16057 = vmatprep.subr.bf16.mxu1 %v17831_v32  ;;  %16075 = vmatprep.subr.bf16.mxu0 %v17832_v34 }
 0xd3b   :  { %16058 = vmatpush3.bf16.msra.mxu1 %v17833_v33  ;;  %16076 = vmatpush3.bf16.msra.mxu0 %v17834_v35 }
 0xd3c   :  { %16077 = vmatprep.subr.bf16.mxu0 %v17835_v54  ;;  %17021 = vmatprep.subr.bf16.mxu1 %v18699_v29  ;;  %v15177_v54 = vld [vmem:[%s14896_s27] ss:$0 sm:$0xff]  ;;  %s14903_s27 = sld [smem:[%s21939_s0 + %s18717_s22]]  }
 0xd3e   :  { %5373 = vmatmul.mubr.bf16.vlgmr.msra.gmra.mxu1 %v4670_v21 }
 0xd3f   :  { %16078 = vmatpush3.bf16.msra.mxu0 %v17836_v39  ;;  %17022 = vmatpush3.bf16.msra.mxu1 %v17837_v45 }
 0xd40   :  { %16079 = vmatprep.subr.bf16.mxu0 %v17838_v52  ;;  %17023 = vmatprep.subr.bf16.mxu1 %v18699_v29 }
 0xd41   :  { %17037 = vmatprep.mubr.msk.bf16.mxu1 %vm18701_vm13, %v18699_v29 }
 0xd43   :  { %16080 = vmatpush3.bf16.msra.mxu0 %v17839_v48  ;;  %17024 = vmatpush3.bf16.msra.mxu1 %v17840_v9 }
 0xd44   :  { %17025 = vmatprep.subr.bf16.mxu1 %v18699_v29  ;;  %17041 = vmatprep.subr.bf16.mxu0 %v18699_v29 }
 0xd46   :  { %5414 = vmatmul.mubr.bf16.vlgmr.msra.gmra.mxu0 %v4672_v7 }
 0xd47   :  { %17026 = vmatpush3.bf16.msra.mxu1 %v17841_v55  ;;  %17057 = vmatprep.mubr.msk.bf16.mxu0 %vm18701_vm13, %v18699_v29 }
 0xd48   :  { %17027 = vmatprep.subr.bf16.mxu1 %v18699_v29  ;;  %17042 = vmatpush3.bf16.msra.mxu0 %v17850_v40 }
 0xd49   :  { %17043 = vmatprep.subr.bf16.mxu0 %v18699_v29 }
 0xd4b   :  { %17028 = vmatpush3.bf16.msra.mxu1 %v17842_v18 }
 0xd4c   :  { %17029 = vmatprep.subr.bf16.mxu1 %v18699_v29  ;;  %17044 = vmatpush3.bf16.msra.mxu0 %v17854_v15 }
 0xd4d   :  { %17045 = vmatprep.subr.bf16.mxu0 %v18699_v29 }
 0xd4f   :  { %17030 = vmatpush3.bf16.msra.mxu1 %v17843_v49 }
 0xd50   :  { %17031 = vmatprep.subr.bf16.mxu1 %v18699_v29  ;;  %17046 = vmatpush3.bf16.msra.mxu0 %v17858_v12 }
 0xd51   :  { %17047 = vmatprep.subr.bf16.mxu0 %v18699_v29 }
 0xd53   :  { %17032 = vmatpush3.bf16.msra.mxu1 %v17844_v38 }
 0xd54   :  { %17033 = vmatprep.subr.bf16.mxu1 %v18699_v29  ;;  %17048 = vmatpush3.bf16.msra.mxu0 %v17862_v8 }
 0xd55   :  { %17049 = vmatprep.subr.bf16.mxu0 %v18699_v29 }
 0xd57   :  { %17034 = vmatpush3.bf16.msra.mxu1 %v17845_v28 }
 0xd58   :  { %17035 = vmatprep.subr.bf16.mxu1 %v18699_v29  ;;  %17050 = vmatpush3.bf16.msra.mxu0 %v17866_v60  ;;  %v17882_v60 = vld [vmem:[%s19736_s16 + $0x208] ss:$36 sps:$4 sm:$0xff]  }
 0xd59   :  { %17051 = vmatprep.subr.bf16.mxu0 %v18699_v29 }
 0xd5b   :  { %17036 = vmatpush3.bf16.msra.mxu1 %v17846_v2 }
 0xd5c   :  { %6023 = vmatprep.subr.bf16.mxu1 %v17849_v26  ;;  %17052 = vmatpush3.bf16.msra.mxu0 %v17870_v5  ;;  %v17890_v5 = vld [vmem:[%s19736_s16 + $0x1c4] ss:$36 sps:$4 sm:$0xff]  }
 0xd5d   :  { %17053 = vmatprep.subr.bf16.mxu0 %v18699_v29 }
 0xd5e   :  { %17038 = vmatmul.mubr.bf16.vlgmr.msra.gmra.mxu1 %v4674_v59  ;;  %v17877_v59 = vld [vmem:[%s19736_s16 + $0x4] ss:$36 sps:$4 sm:$0xff]  }
 0xd5f   :  { %6055 = vmatprep.mubr.bf16.mxu1 %v21972_v23  ;;  %6024 = vmatpush1.bf16.msra.mxu1 %v17847_v17 }
 0xd60   :  { %6025 = vmatprep.subr.bf16.mxu1 %v17853_v58  ;;  %17054 = vmatpush3.bf16.msra.mxu0 %v17874_v36  ;;  %v17893_v36 = vld [vmem:[%s19736_s16 + $0x174] ss:$36 sps:$4 sm:$0xff]  }
 0xd61   :  { %17055 = vmatprep.subr.bf16.mxu0 %v18699_v29 }
 0xd63   :  { %6026 = vmatpush1.bf16.msra.mxu1 %v17851_v46 }
 0xd64   :  { %6027 = vmatprep.subr.bf16.mxu1 %v17857_v51  ;;  %17056 = vmatpush3.bf16.msra.mxu0 %v17878_v37  ;;  %v17894_v37 = vld [vmem:[%s19736_s16 + $0x178] ss:$36 sps:$4 sm:$0xff]  }
 0xd65   :  { %6066 = vmatprep.subr.bf16.mxu0 %v17881_v1  ;;  %v17899_v1 = vld [vmem:[%s19736_s16 + $0x12c] ss:$36 sps:$4 sm:$0xff]  }
 0xd67   :  { %6028 = vmatpush1.bf16.msra.mxu1 %v17855_v31 }
 0xd68   :  { %6029 = vmatprep.subr.bf16.mxu1 %v17861_v22 }
 0xd6b   :  { %6030 = vmatpush1.bf16.msra.mxu1 %v17859_v43 }
 0xd6c   :  { %6031 = vmatprep.subr.bf16.mxu1 %v17865_v27 }
 0xd6f   :  { %6032 = vmatpush1.bf16.msra.mxu1 %v17863_v25  ;;  %v17879_v25 = vld [vmem:[%s19736_s16 + $0x200] ss:$36 sps:$4 sm:$0xff]  }
 0xd70   :  { %6033 = vmatprep.subr.bf16.mxu1 %v17869_v4 }
 0xd73   :  { %6034 = vmatpush1.bf16.msra.mxu1 %v17867_v44  ;;  %v17887_v44 = vld [vmem:[%s19736_s16 + $0x1bc] ss:$36 sps:$4 sm:$0xff]  }
 0xd74   :  { %6035 = vmatprep.subr.bf16.mxu1 %v17873_v53  ;;  %v17885_v53 = vld [vmem:[%s19736_s16 + $0x1b8] ss:$36 sps:$4 sm:$0xff]  }
 0xd77   :  { %6036 = vmatpush1.bf16.msra.mxu1 %v17871_v16  ;;  %v17888_v16 = vld [vmem:[%s19736_s16 + $0x1c0] ss:$36 sps:$4 sm:$0xff]  }
 0xd78   :  { %6037 = vmatprep.subr.bf16.mxu1 %v17877_v59  ;;  %v17896_v59 = vld [vmem:[%s19736_s16 + $0x17c] ss:$36 sps:$4 sm:$0xff]  }
 0xd7b   :  { %6038 = vmatpush1.bf16.msra.mxu1 %v17875_v19  ;;  %v17891_v19 = vld [vmem:[%s19736_s16 + $0x170] ss:$36 sps:$4 sm:$0xff]  }
 0xd7c   :  { %6109 = vmatprep.subr.bf16.mxu1 %v17884_v47  ;;  %v17902_v47 = vld [vmem:[%s19736_s16 + $0x134] ss:$36 sps:$4 sm:$0xff]  }
 0xdde   :  { %v16015_v42 = vpop.f32.mrf.mxu1 }
 0xde0   :  { %v16016_v14 = vpop.f32.mrf.mxu1 }
 0xde1   :  { %v16017_v24 = vadd.f32 %v16016_v14, %v16015_v42  ;;  %v17897_v42 = vld [vmem:[%s19736_s16 + $0x128] ss:$36 sps:$4 sm:$0xff]  }
 0xde2   :  { %v16018_v62 = vpop.f32.mrf.mxu1  ;;  %v17905_v14 = vld [vmem:[%s19736_s16 + $0xe4] ss:$36 sps:$4 sm:$0xff]  }
 0xde3   :  { %v5293_v21 = vadd.f32 %v16017_v24, %v15177_v54  ;;  %v17915_v24 = vld [vmem:[%s19736_s16 + $0x50] ss:$36 sps:$4 sm:$0xff]  }
 0xde4   :  { %v16019_v61 = vpop.f32.mrf.mxu1 }
 0xde5   :  { %v16020_v52 = vadd.f32 %v16019_v61, %v16018_v62  ;;  %v17903_v62 = vld [vmem:[%s19736_s16 + $0xe0] ss:$36 sps:$4 sm:$0xff]  }
 0xde6   :  { %v16037_v11 = vpop.f32.mrf.mxu0  ;;  %v17911_v61 = vld [vmem:[%s19736_s16 + $0x9c] ss:$36 sps:$4 sm:$0xff]  }
 0xde7   :  { %v5296_v18 = vadd.f32 %v16020_v52, %v15177_v54  ;;  %v17918_v54 = vld [vmem:[%s19736_s16 + $0x58] ss:$36 sps:$4 sm:$0xff]  }
 0xde8   :  { %v16038_v10 = vpop.f32.mrf.mxu0  ;;  %v17929_v52 = vld [vmem:[%s19736_s16 + $0x214] ss:$36 sps:$4 sm:$0xff]  }
 0xde9   :  { %v16039_v39 = vadd.f32 %v16038_v10, %v16037_v11  ;;  %v17900_v11 = vld [vmem:[%s19736_s16 + $0x130] ss:$36 sps:$4 sm:$0xff]  }
 0xdea   :  { %v16040_v13 = vpop.f32.mrf.mxu0  ;;  %v17908_v10 = vld [vmem:[%s19736_s16 + $0xec] ss:$36 sps:$4 sm:$0xff]  }
 0xdeb   :  { %v5334_v50 = vadd.f32 %v16039_v39, %v5293_v21  ;;  %v17926_v39 = vld [vmem:[%s19736_s16 + $0x14] ss:$36 sps:$4 sm:$0xff]  }
 0xdec   :  { %v16041_v30 = vpop.f32.mrf.mxu0  ;;  %v17924_v21 = vld [vmem:[%s19736_s16 + $0x10] ss:$36 sps:$4 sm:$0xff]  }
 0xded   :  { %v16042_v6 = vadd.f32 %v16041_v30, %v16040_v13  ;;  %v17906_v13 = vld [vmem:[%s19736_s16 + $0xe8] ss:$36 sps:$4 sm:$0xff]  }
 0xdee   :  { %v17914_v30 = vld [vmem:[%s19736_s16 + $0xa4] ss:$36 sps:$4 sm:$0xff]  }
 0xdef   :  { %v5337_v28 = vadd.f32 %v16042_v6, %v5296_v18  ;;  %v17931_v6 = vld [vmem:[%s19736_s16 + $0x1c8] ss:$36 sps:$4 sm:$0xff]   ;;  %v17935_v18 = vld [vmem:[%s19736_s16 + $0x180] ss:$36 sps:$4 sm:$0xff]  }
 0xdfe   :  { %v16059_v32 = vpop.f32.mrf.mxu1 }
 0xe00   :  { %v16060_v33 = vpop.f32.mrf.mxu1 }
 0xe01   :  { %v16061_v48 = vadd.f32 %v16060_v33, %v16059_v32  ;;  %v17909_v32 = vld [vmem:[%s19736_s16 + $0x98] ss:$36 sps:$4 sm:$0xff]  }
 0xe02   :  { %v16062_v20 = vpop.f32.mrf.mxu1  ;;  %v17917_v33 = vld [vmem:[%s19736_s16 + $0x54] ss:$36 sps:$4 sm:$0xff]  }
 0xe03   :  { %v5375_v49 = vadd.f32 %v16061_v48, %v5334_v50  ;;  %v17927_v48 = vld [vmem:[%s19736_s16 + $0x210] ss:$36 sps:$4 sm:$0xff]  }
 0xe04   :  { %v16063_v9 = vpop.f32.mrf.mxu1  ;;  %v17933_v50 = vld [vmem:[%s19736_s16 + $0x1cc] ss:$36 sps:$4 sm:$0xff]  }
 0xe05   :  { %v16064_v38 = vadd.f32 %v16063_v9, %v16062_v20  ;;  %v17923_v20 = vld [vmem:[%s19736_s16 + $0xc] ss:$36 sps:$4 sm:$0xff]   ;;  %v17930_v9 = vld [vmem:[%s19736_s16 + $0x218] ss:$36 sps:$4 sm:$0xff]  }
 0xe06   :  { %v16081_v34 = vpop.f32.mrf.mxu0 }
 0xe07   :  { %v5378_v40 = vadd.f32 %v16064_v38, %v5337_v28  ;;  %v17941_v38 = vld [vmem:[%s19736_s16 + $0x13c] ss:$36 sps:$4 sm:$0xff]  }
 0xe08   :  { %v16082_v35 = vpop.f32.mrf.mxu0  ;;  %v17939_v28 = vld [vmem:[%s19736_s16 + $0x138] ss:$36 sps:$4 sm:$0xff]  }
 0xe09   :  { %v16083_v55 = vadd.f32 %v16082_v35, %v16081_v34  ;;  %v17912_v34 = vld [vmem:[%s19736_s16 + $0xa0] ss:$36 sps:$4 sm:$0xff]  }
 0xe0a   :  { %v16084_v45 = vpop.f32.mrf.mxu0  ;;  %v17920_v35 = vld [vmem:[%s19736_s16 + $0x5c] ss:$36 sps:$4 sm:$0xff]  }
 0xe0b   :  { %v5416_v26 = vadd.f32 %v16083_v55, %v5375_v49  ;;  %v17934_v55 = vld [vmem:[%s19736_s16 + $0x1d0] ss:$36 sps:$4 sm:$0xff]   ;;  %v17938_v49 = vld [vmem:[%s19736_s16 + $0x188] ss:$36 sps:$4 sm:$0xff]  }
 0xe0c   :  { %v16085_v7 = vpop.f32.mrf.mxu0 }
 0xe0d   :  { %v16086_v2 = vadd.f32 %v16085_v7, %v16084_v45  ;;  %v17921_v45 = vld [vmem:[%s19736_s16 + $0x8] ss:$36 sps:$4 sm:$0xff]  }
 0xe0e   :  { %v17937_v7 = vld [vmem:[%s19736_s16 + $0x184] ss:$36 sps:$4 sm:$0xff]  }
 0xe0f   :  { %v5419_v15 = vadd.f32 %v16086_v2, %v5378_v40  ;;  %v17942_v2 = vld [vmem:[%s19736_s16 + $0x140] ss:$36 sps:$4 sm:$0xff]   ;;  %v17946_v40 = vld [vmem:[%s19736_s16 + $0xf8] ss:$36 sps:$4 sm:$0xff]  }
 0xe1e   :  { %v5456_v17 = vpop.f32.mrf.mxu1 }
 0xe1f   :  { %v5457_v58 = vadd.f32 %v5456_v17, %v5416_v26  ;;  %v17945_v26 = vld [vmem:[%s19736_s16 + $0xf4] ss:$36 sps:$4 sm:$0xff]  }
 0xe20   :  { %v17039_v46 = vpop.f32.mrf.mxu1  ;;  %v17943_v17 = vld [vmem:[%s19736_s16 + $0xf0] ss:$36 sps:$4 sm:$0xff]  }
 0xe21   :  { %v5465_v51 = vmul.f32 0.1, %v5457_v58  ;;  %vm5463_vm5 = vcmp.ge.f32.partialorder %v5457_v58, 0.0  ;;  %v17947_v46 = vld [vmem:[%s19736_s16 + $0xa8] ss:$36 sps:$4 sm:$0xff]  }
 0xe22   :  { %v5459_v31 = vpop.f32.mrf.mxu1 }
 0xe23   :  { %v5460_v12 = vadd.f32 %v5459_v31, %v5419_v15  ;;  %v5467_v8 = vsel %vm5463_vm5, %v5457_v58, %v5465_v51  ;;  %v17949_v58 = vld [vmem:[%s19736_s16 + $0xac] ss:$36 sps:$4 sm:$0xff]   ;;  %v17953_v31 = vld [vmem:[%s19736_s16 + $0x64] ss:$36 sps:$4 sm:$0xff]  }
 0xe24   :  { %v17040_v22 = vpop.f32.mrf.mxu1  ;;  %v17950_v15 = vld [vmem:[%s19736_s16 + $0xb0] ss:$36 sps:$4 sm:$0xff]   ;;  %v17951_v51 = vld [vmem:[%s19736_s16 + $0x60] ss:$36 sps:$4 sm:$0xff]  }
 0xe25   :  { %vm5464_vm6 = vcmp.ge.f32.partialorder %v5460_v12, 0.0  ;;  %v5466_v43 = vmul.f32 0.1, %v5460_v12  ;;  %v17957_v22 = vld [vmem:[%s19736_s16 + $0x1c] ss:$36 sps:$4 sm:$0xff]  }
 0xe27   :  { %v5468_v27 = vsel %vm5464_vm6, %v5460_v12, %v5466_v43  ;;  %v17954_v12 = vld [vmem:[%s19736_s16 + $0x68] ss:$36 sps:$4 sm:$0xff]   ;;  %v17955_v43 = vld [vmem:[%s19736_s16 + $0x18] ss:$36 sps:$4 sm:$0xff]  }
 0xe28   :  { %v19781_v4 = vpack.c.bf16 %v5468_v27, %v5467_v8  ;;  %v17958_v8 = vld [vmem:[%s19736_s16 + $0x20] ss:$36 sps:$4 sm:$0xff]   ;;  %s20136_s16 = sld [smem:[%s21939_s0 + %s18715_s13]]   ;;  %s18721_s13 = smov 36  }
 0xe29   :  { %v19856_v27 = vld [vmem:[%s19485_s3 + $0x20] ss:$36 sps:$4 sm:$0xff]  }
 0xe2a   :  { %17058 = vmatmul.mubr.bf16.vlgmr.msra.gmra.mxu0 %v19781_v4  ;;  %6056 = vmatmul.mubr.bf16.vlgmr.msra.gmra.mxu1 %v19781_v4 }
 0xe2b   :  { %6067 = vmatpush1.bf16.msra.mxu0 %v17879_v25  ;;  %6110 = vmatpush1.bf16.msra.mxu1 %v17882_v60  ;;  %v15330_v25 = vld [vmem:[%s14899_s5] ss:$0 sm:$0xff]  ;;  %s20402_s5 = sld [smem:[%s21939_s0 + %s18718_s28]]  }
 0xe2c   :  { %6068 = vmatprep.subr.bf16.mxu0 %v17887_v44  ;;  %6111 = vmatprep.subr.bf16.mxu1 %v17890_v5  ;;  %s20705_s28 = sld [smem:[%s21939_s0 + %s18724_s23]]  }
 0xe2d   :  { %6098 = vmatprep.mubr.bf16.mxu0 %v21972_v23  ;;  %6141 = vmatprep.mubr.bf16.mxu1 %v21972_v23  ;;  %s14915_s23 = sld [smem:[%s21939_s0 + %s18730_s19]]  }
 0xe2f   :  { %6069 = vmatpush1.bf16.msra.mxu0 %v17885_v53  ;;  %6112 = vmatpush1.bf16.msra.mxu1 %v17888_v16 }
 0xe30   :  { %6070 = vmatprep.subr.bf16.mxu0 %v17893_v36  ;;  %6113 = vmatprep.subr.bf16.mxu1 %v17896_v59 }
 0xe33   :  { %6071 = vmatpush1.bf16.msra.mxu0 %v17891_v19  ;;  %6114 = vmatpush1.bf16.msra.mxu1 %v17894_v37 }
 0xe34   :  { %6072 = vmatprep.subr.bf16.mxu0 %v17899_v1  ;;  %6115 = vmatprep.subr.bf16.mxu1 %v17902_v47 }
 0xe37   :  { %6073 = vmatpush1.bf16.msra.mxu0 %v17897_v42  ;;  %6116 = vmatpush1.bf16.msra.mxu1 %v17900_v11 }
 0xe38   :  { %6074 = vmatprep.subr.bf16.mxu0 %v17905_v14  ;;  %6117 = vmatprep.subr.bf16.mxu1 %v17908_v10 }
 0xe3b   :  { %6075 = vmatpush1.bf16.msra.mxu0 %v17903_v62  ;;  %6118 = vmatpush1.bf16.msra.mxu1 %v17906_v13 }
 0xe3c   :  { %6076 = vmatprep.subr.bf16.mxu0 %v17911_v61  ;;  %6119 = vmatprep.subr.bf16.mxu1 %v17914_v30 }
 0xe3f   :  { %6077 = vmatpush1.bf16.msra.mxu0 %v17909_v32  ;;  %6120 = vmatpush1.bf16.msra.mxu1 %v17912_v34 }
 0xe40   :  { %6078 = vmatprep.subr.bf16.mxu0 %v17917_v33  ;;  %6121 = vmatprep.subr.bf16.mxu1 %v17920_v35 }
 0xe43   :  { %6079 = vmatpush1.bf16.msra.mxu0 %v17915_v24  ;;  %6122 = vmatpush1.bf16.msra.mxu1 %v17918_v54 }
 0xe44   :  { %6080 = vmatprep.subr.bf16.mxu0 %v17923_v20  ;;  %6123 = vmatprep.subr.bf16.mxu1 %v17926_v39 }
 0xe47   :  { %6081 = vmatpush1.bf16.msra.mxu0 %v17921_v45  ;;  %6124 = vmatpush1.bf16.msra.mxu1 %v17924_v21 }
 0xe48   :  { %6152 = vmatprep.subr.bf16.mxu0 %v17929_v52  ;;  %17061 = vmatprep.subr.bf16.mxu1 %v18699_v29 }
 0xe4a   :  { %6099 = vmatmul.mubr.bf16.vlgmr.msra.gmra.mxu0 %v19781_v4  ;;  %6142 = vmatmul.mubr.bf16.vlgmr.msra.gmra.mxu1 %v19781_v4 }
 0xe4b   :  { %6153 = vmatpush1.bf16.msra.mxu0 %v17927_v48  ;;  %17062 = vmatpush3.bf16.msra.mxu1 %v17930_v9 }
 0xe4c   :  { %6154 = vmatprep.subr.bf16.mxu0 %v17933_v50  ;;  %17063 = vmatprep.subr.bf16.mxu1 %v18699_v29 }
 0xe4d   :  { %6184 = vmatprep.mubr.bf16.mxu0 %v21972_v23  ;;  %17077 = vmatprep.mubr.msk.bf16.mxu1 %vm18701_vm13, %v18699_v29 }
 0xe4f   :  { %6155 = vmatpush1.bf16.msra.mxu0 %v17931_v6  ;;  %17064 = vmatpush3.bf16.msra.mxu1 %v17934_v55 }
 0xe50   :  { %6156 = vmatprep.subr.bf16.mxu0 %v17937_v7  ;;  %17065 = vmatprep.subr.bf16.mxu1 %v18699_v29 }
 0xe53   :  { %6157 = vmatpush1.bf16.msra.mxu0 %v17935_v18  ;;  %17066 = vmatpush3.bf16.msra.mxu1 %v17938_v49 }
 0xe54   :  { %6158 = vmatprep.subr.bf16.mxu0 %v17941_v38  ;;  %17067 = vmatprep.subr.bf16.mxu1 %v18699_v29 }
 0xe57   :  { %6159 = vmatpush1.bf16.msra.mxu0 %v17939_v28  ;;  %17068 = vmatpush3.bf16.msra.mxu1 %v17942_v2  ;;  %v19898_v28 = vld [vmem:[%s19485_s3 + $0x4] ss:$36 sps:$4 sm:$0xff]  }
 0xe58   :  { %6160 = vmatprep.subr.bf16.mxu0 %v17945_v26  ;;  %17069 = vmatprep.subr.bf16.mxu1 %v18699_v29  ;;  %v19903_v2 = vld [vmem:[%s19485_s3] ss:$36 sps:$4 sm:$0xff]   ;;  %v19908_v26 = vld [vmem:[%s19485_s3 + $0xc] ss:$36 sps:$4 sm:$0xff]  }
 0xe5b   :  { %6161 = vmatpush1.bf16.msra.mxu0 %v17943_v17  ;;  %17070 = vmatpush3.bf16.msra.mxu1 %v17946_v40  ;;  %v19913_v17 = vld [vmem:[%s19485_s3 + $0x8] ss:$36 sps:$4 sm:$0xff]   ;;  %v19918_v40 = vld [vmem:[%s19485_s3 + $0x14] ss:$36 sps:$4 sm:$0xff]  }
 0xe5c   :  { %6162 = vmatprep.subr.bf16.mxu0 %v17949_v58  ;;  %17071 = vmatprep.subr.bf16.mxu1 %v18699_v29  ;;  %v19923_v58 = vld [vmem:[%s19485_s3 + $0x10] ss:$36 sps:$4 sm:$0xff]  }
 0xe5f   :  { %6163 = vmatpush1.bf16.msra.mxu0 %v17947_v46  ;;  %17072 = vmatpush3.bf16.msra.mxu1 %v17950_v15  ;;  %v19928_v46 = vld [vmem:[%s19485_s3 + $0x1c] ss:$36 sps:$4 sm:$0xff]  }
 0xe60   :  { %6164 = vmatprep.subr.bf16.mxu0 %v17953_v31  ;;  %17073 = vmatprep.subr.bf16.mxu1 %v18699_v29  ;;  %v19933_v15 = vld [vmem:[%s19485_s3 + $0x18] ss:$36 sps:$4 sm:$0xff]   ;;  %s18713_s3 = smov 6  }
 0xe61   :  { %s20124_s9 = sld [smem:[%s21939_s0 + %s18713_s3]]   ;;  %s18719_s3 = smov 35  }
 0xe63   :  { %6165 = vmatpush1.bf16.msra.mxu0 %v17951_v51  ;;  %17074 = vmatpush3.bf16.msra.mxu1 %v17954_v12 }
 0xe64   :  { %6166 = vmatprep.subr.bf16.mxu0 %v17957_v22  ;;  %17075 = vmatprep.subr.bf16.mxu1 %v18699_v29 }
 0xe67   :  { %6167 = vmatpush1.bf16.msra.mxu0 %v17955_v43  ;;  %17076 = vmatpush3.bf16.msra.mxu1 %v17958_v8 }
 0xe68   :  { %17088 = vmatprep.subr.bf16.mxu1 %v18699_v29 }
 0xe6a   :  { %6185 = vmatmul.mubr.bf16.vlgmr.msra.gmra.mxu0 %v19781_v4  ;;  %17078 = vmatmul.mubr.bf16.vlgmr.msra.gmra.mxu1 %v19781_v4 }
 0xe6b   :  { %17089 = vmatpush3.bf16.msra.mxu1 %v19856_v27  ;;  %17090 = vmatprep.mubr.msk.bf16.mxu1 %vm18701_vm13, %v18699_v29 }
 0xeea   :  { %v5648_v60 = vpop.f32.mrf.mxu0  ;;  %v19868_v1 = vpop.f32.mrf.mxu1 }
 0xeeb   :  { %v6243_v44 = vadd.f32 %v15330_v25, %v5648_v60  ;;  %v6257_v37 = vsel %vm488_vm2, %v5648_v60, inf }
 0xeec   :  { %v17059_v5 = vpop.f32.mrf.mxu0  ;;  %v19870_v47 = vpop.f32.mrf.mxu1 }
 0xeed   :  { %v6245_v53 = vsel %vm488_vm2, %v6243_v44, -inf }
 0xeee   :  { %6246 = vmax.xlane.f32.xlu1 %v6245_v53  ;;  %v5651_v4 = vpop.f32.mrf.mxu0  ;;  %v19872_v42 = vpop.f32.mrf.mxu1 }
 0xeef   :  { %v6244_v16 = vadd.f32 %v15330_v25, %v5651_v4  ;;  %v6260_v59 = vsel %vm488_vm2, %v5651_v4, inf }
 0xef0   :  { %v17060_v36 = vpop.f32.mrf.mxu0  ;;  %v19874_v11 = vpop.f32.mrf.mxu1 }
 0xef1   :  { %v6248_v19 = vsel %vm488_vm2, %v6244_v16, -inf }
 0xef2   :  { %6261 = vmin.xlane.f32.xlu1 %v6260_v59  ;;  %6249 = vmax.xlane.f32.xlu0 %v6248_v19 }
 0xef6   :  { %6258 = vmin.xlane.f32.xlu0 %v6257_v37 }
 0xf0a   :  { %v19876_v14 = vpop.f32.mrf.mxu1  ;;  %v6100_v31 = vpop.f32.mrf.mxu0 }
 0xf0c   :  { %v19878_v10 = vpop.f32.mrf.mxu1  ;;  %v6102_v51 = vpop.f32.mrf.mxu0 }
 0xf0e   :  { %v19880_v62 = vpop.f32.mrf.mxu1  ;;  %v6104_v12 = vpop.f32.mrf.mxu0 }
 0xf10   :  { %v19882_v13 = vpop.f32.mrf.mxu1  ;;  %v6106_v22 = vpop.f32.mrf.mxu0 }
 0xf2a   :  { %v19884_v61 = vpop.f32.mrf.mxu1  ;;  %v19939_v43 = vpop.f32.mrf.mxu0 }
 0xf2c   :  { %v17079_v30 = vpop.f32.mrf.mxu1  ;;  %v19941_v8 = vpop.f32.mrf.mxu0 }
 0xf2e   :  { %v19886_v32 = vpop.f32.mrf.mxu1  ;;  %v19943_v25 = vpop.f32.mrf.mxu0 }
 0xf30   :  { %v17080_v34 = vpop.f32.mrf.mxu1  ;;  %v19945_v5 = vpop.f32.mrf.mxu0 }
 0xf77   :  { %v6247_v33 = vpop.xlane.xlu1 %6246 }
 0xf78   :  { %v6251_v35 = vsub.f32 %v6243_v44, %v6247_v33 }
 0xf7a   :  { %v6253_v20 = vmul.f32 1.442695, %v6251_v35 }
 0xf7b   :  { %v6262_v24 = vpop.xlane.xlu1 %6261  ;;  %v6250_v54 = vpop.xlane.xlu0 %6249 }
 0xf7c   :  { %v6264_v39 = vsub.f32 %v6262_v24, %v5651_v4  ;;  %v6252_v45 = vsub.f32 %v6244_v16, %v6250_v54  ;;  %18281 = vpow2.f32 %v6253_v20 }
 0xf7e   :  { %v6255_v21 = vmul.f32 1.442695, %v6252_v45  ;;  %v6267_v52 = vmul.f32 1.442695, %v6264_v39 }
 0xf7f   :  { %v6259_v48 = vpop.xlane.xlu0 %6258 }
 0xf80   :  { %v6263_v9 = vsub.f32 %v6259_v48, %v5648_v60  ;;  %18283 = vpow2.f32 %v6255_v21 }
 0xf81   :  { %18285 = vpow2.f32 %v6267_v52 }
 0xf82   :  { %v6265_v50 = vmul.f32 1.442695, %v6263_v9 }
 0xf84   :  { %18287 = vpow2.f32 %v6265_v50 }
 0xf89   :  { %v18282_v6 = vpop.eup %18281 }
 0xf8d   :  { %v18284_v55 = vpop.eup %18283 }
 0xf8e   :  { %17081 = vmatprep.subr.msk.mxu0 %vm488_vm2, %v18284_v55  ;;  %v6362_v7 = vpack.c.bf16 %v18284_v55, %v18282_v6  ;;  %v18286_v18 = vpop.eup %18285 }
 0xf8f   :  { %17082 = vmatpush3.xpose.msk.msra.mxu0 %vm488_vm2, %v18284_v55  ;;  %v18462_v55 = vld [vmem:[%s19558_s12 + $0x8] sm:$0xff] }
 0xf90   :  { %17083 = vmatprep.subr.msk.mxu0 %vm488_vm2, %v18282_v6  ;;  %17091 = vmatmul.mubr.msk.bf16.vlgmr.msra.gmra.mxu1 %vm488_vm2, %v6362_v7 }
 0xf91   :  { %v18288_v49 = vpop.eup %18287  ;;  %6685 = vmatprep.mubr.bf16.mxu1 %v21972_v23 }
 0xf92   :  { %v19892_v38 = vpack.c.bf16 %v18286_v18, %v18288_v49  ;;  %17085 = vmatprep.mubr.msk.f32.mxu0 %vm488_vm2, %v18288_v49 }
 0xf93   :  { %17084 = vmatpush3.xpose.msk.msra.mxu0 %vm488_vm2, %v18282_v6 }
 0xf94   :  { %6380 = vmatprep.subr.bf16.mxu0 %v19898_v28 }
 0xf96   :  { %17086 = vmatmul.mubr.msk.f32.vlgmr.msra.gmra.mxu0 %vm488_vm2, %v18286_v18  ;;  %v18463_v18 = vld [vmem:[%s19558_s12] sm:$0xff]  ;;  %s20131_s12 = sld [smem:[%s21939_s0 + %s18714_s10]]   ;;  %s18720_s10 = smov 33  }
 0xf97   :  { %6381 = vmatpush1.bf16.msra.mxu0 %v19903_v2  ;;  %6398 = vmatprep.mubr.bf16.mxu0 %v21972_v23 }
 0xf98   :  { %6423 = vmatprep.subr.bf16.mxu0 %v19908_v26 }
 0xf9a   :  { %15335 = vmatmul.mubr.msk.bf16.vlgmr.msra.gmra.mxu0 %vm488_vm2, %v6362_v7 }
 0xf9b   :  { %6424 = vmatpush1.bf16.msra.mxu0 %v19913_v17  ;;  %6441 = vmatprep.mubr.bf16.mxu0 %v21972_v23 }
 0xf9c   :  { %6466 = vmatprep.subr.bf16.mxu0 %v19918_v40 }
 0xfa2   :  { %15336 = vmatmul.mubr.msk.bf16.vlgmr.msra.gmra.mxu0 %vm488_vm2, %v6362_v7 }
 0xfa3   :  { %6467 = vmatpush1.bf16.msra.mxu0 %v19923_v58  ;;  %6484 = vmatprep.mubr.bf16.mxu0 %v21972_v23 }
 0xfa4   :  { %6509 = vmatprep.subr.bf16.mxu0 %v19928_v46 }
 0xfaa   :  { %15337 = vmatmul.mubr.msk.bf16.vlgmr.msra.gmra.mxu0 %vm488_vm2, %v6362_v7 }
 0xfab   :  { %6510 = vmatpush1.bf16.msra.mxu0 %v19933_v15  ;;  %6527 = vmatprep.mubr.bf16.mxu0 %v21972_v23 }
 0xfb2   :  { %15338 = vmatmul.mubr.msk.bf16.vlgmr.msra.gmra.mxu0 %vm488_vm2, %v6362_v7 }
 0xfb3   :  { %6642 = vmatprep.mubr.bf16.mxu0 %v21972_v23 }
0x1050   :  { %v6572_v60 = vpop.f32.mrf.mxu1 }
0x1052   :  { %v17092_v44 = vpop.f32.mrf.mxu1 }
0x1054   :  { %v6575_v53 = vpop.f32.mrf.mxu1 }
0x1056   :  { %v17087_v4 = vpop.f32.mrf.mxu0  ;;  %v17093_v16 = vpop.f32.mrf.mxu1 }
0x1057   :  { %v6357_v36 = vmax.f32 %v17087_v4, 1e-30 }
0x1058   :  { %v6347_v59 = vpop.f32.mrf.mxu0 }
0x1059   :  { %18289 = vrcp.f32 %v6357_v36  ;;  %v6356_v19 = vmax.f32 %v6347_v59, 1e-30 }
0x105a   :  { %v6400_v37 = vpop.f32.mrf.mxu0 }
0x105b   :  { %18291 = vrcp.f32 %v6356_v19  ;;  %v6579_v20 = vmul.f32 %v6400_v37, %v19868_v1 }
0x105c   :  { %v6402_v30 = vpop.f32.mrf.mxu0 }
0x105d   :  { %v6580_v24 = vmul.f32 %v6402_v30, %v19870_v47 }
0x105e   :  { %v6404_v34 = vpop.f32.mrf.mxu0 }
0x105f   :  { %v6588_v33 = vmul.f32 %v6404_v34, %v19872_v42 }
0x1060   :  { %v6406_v35 = vpop.f32.mrf.mxu0 }
0x1061   :  { %v6589_v54 = vmul.f32 %v6406_v35, %v19874_v11  ;;  %v6598_v21 = vpack.c.bf16 %v6588_v33, %v6579_v20  ;;  %v6596_v33 = vmul.f32 %v6575_v53, %v19886_v32  ;;  %v18478_v53 = vld [vmem:[%s19553_s8 + $0xa8] sm:$0xff]  }
0x1062   :  { %v6443_v39 = vpop.f32.mrf.mxu0 }
0x1063   :  { %v6599_v45 = vpack.c.bf16 %v6589_v54, %v6580_v24  ;;  %v6581_v11 = vmul.f32 %v6443_v39, %v6100_v31 }
0x1064   :  { %v6445_v52 = vpop.f32.mrf.mxu0 }
0x1065   :  { %6624 = vmatprep.subr.bf16.mxu0 %v6599_v45  ;;  %v6582_v49 = vmul.f32 %v6445_v52, %v6102_v51  ;;  %v18479_v45 = vld [vmem:[%s19553_s8 + $0xe0] sm:$0xff]   ;;  %v18481_v52 = vld [vmem:[%s19553_s8 + $0x50] sm:$0xff]  }
0x1066   :  { %v18290_v48 = vpop.eup %18289  ;;  %v6447_v9 = vpop.f32.mrf.mxu0  ;;  %6625 = vmatpush1.bf16.msra.mxu0 %v6598_v21  ;;  %v18480_v21 = vld [vmem:[%s19553_s8 + $0x18] sm:$0xff]  }
0x1067   :  { %v6590_v6 = vmul.f32 %v6447_v9, %v6104_v12  ;;  %v6361_v7 = vmul.f32 %v18462_v55, %v18290_v48  ;;  %v18482_v48 = vld [vmem:[%s19553_s8 + $0xa0] sm:$0xff]   ;;  %v18483_v9 = vld [vmem:[%s19553_s8 + $0xd8] sm:$0xff]   ;;  %v18487_v55 = vld [vmem:[%s19553_s8 + $0xd0] sm:$0xff]  }
0x1068   :  { %v18292_v50 = vpop.eup %18291  ;;  %v6449_v42 = vpop.f32.mrf.mxu0 }
0x1069   :  { %v6360_v47 = vmul.f32 %v18463_v18, %v18292_v50  ;;  %v6591_v44 = vmul.f32 %v6449_v42, %v6106_v22  ;;  %v6600_v36 = vpack.c.bf16 %v6590_v6, %v6581_v11  ;;  %v18484_v50 = vld [vmem:[%s19553_s8 + $0x10] sm:$0xff]   ;;  %v18485_v6 = vld [vmem:[%s19553_s8 + $0x48] sm:$0xff]   ;;  %v18486_v42 = vld [vmem:[%s19553_s8 + $0x98] sm:$0xff]  }
0x106a   :  { %v6486_v4 = vpop.f32.mrf.mxu0  ;;  %v18489_v18 = vld [vmem:[%s19553_s8 + $0x40] sm:$0xff]   ;;  %v18493_v11 = vld [vmem:[%s19553_s8 + $0x178] sm:$0xff]  }
0x106b   :  { %v6601_v1 = vpack.c.bf16 %v6591_v44, %v6582_v49  ;;  %v6597_v16 = vpack.c.bf16 %v6361_v7, %v6360_v47  ;;  %v6583_v31 = vmul.f32 %v6486_v4, %v19876_v14  ;;  %v18488_v7 = vld [vmem:[%s19553_s8 + $0x8] sm:$0xff]   ;;  %v18490_v47 = vld [vmem:[%s19553_s8 + $0x90] sm:$0xff]   ;;  %v18492_v44 = vld [vmem:[%s19553_s8] sm:$0xff]  }
0x106c   :  { %v6488_v59 = vpop.f32.mrf.mxu0  ;;  %v18491_v49 = vld [vmem:[%s19553_s8 + $0xc8] sm:$0xff]  }
0x106d   :  { %15340 = vmatmul.mubr.msk.bf16.vlgmr.msra.gmra.mxu0 %vm488_vm2, %v6597_v16  ;;  %6667 = vmatprep.subr.bf16.mxu1 %v6601_v1  ;;  %v6584_v30 = vmul.f32 %v6488_v59, %v19878_v10  ;;  %v18494_v4 = vld [vmem:[%s19553_s8 + $0x88] sm:$0xff]   ;;  %v18495_v1 = vld [vmem:[%s19553_s8 + $0xc0] sm:$0xff]  }
0x106e   :  { %v6490_v19 = vpop.f32.mrf.mxu0  ;;  %6668 = vmatpush1.bf16.msra.mxu1 %v6600_v36  ;;  %6728 = vmatprep.mubr.bf16.mxu0 %v21972_v23  ;;  %v18497_v36 = vld [vmem:[%s19553_s8 + $0x1f8] sm:$0xff]  }
0x106f   :  { %v6592_v12 = vmul.f32 %v6490_v19, %v19880_v62  ;;  %v6587_v62 = vmul.f32 %v6572_v60, %v19884_v61 }
0x1070   :  { %v6492_v37 = vpop.f32.mrf.mxu0 }
0x1071   :  { %v6593_v51 = vmul.f32 %v6492_v37, %v19882_v13  ;;  %15341 = vmatmul.mubr.msk.bf16.vlgmr.msra.gmra.mxu1 %vm488_vm2, %v6597_v16  ;;  %v6602_v35 = vpack.c.bf16 %v6592_v12, %v6583_v31  ;;  %v6606_v10 = vpack.c.bf16 %v6596_v33, %v6587_v62 }
0x1072   :  { %v6529_v22 = vpop.f32.mrf.mxu0  ;;  %6771 = vmatprep.mubr.bf16.mxu1 %v21972_v23 }
0x1073   :  { %v6603_v34 = vpack.c.bf16 %v6593_v51, %v6584_v30  ;;  %v6585_v32 = vmul.f32 %v6529_v22, %v19939_v43  ;;  %v18473_v43 = vld [vmem:[%s19553_s8 + $0x60] sm:$0xff]  }
0x1074   :  { %v6531_v24 = vpop.f32.mrf.mxu0 }
0x1075   :  { %6710 = vmatprep.subr.bf16.mxu0 %v6603_v34  ;;  %v6586_v14 = vmul.f32 %v6531_v24, %v19941_v8  ;;  %v18474_v8 = vld [vmem:[%s19553_s8 + $0xb0] sm:$0xff]  }
0x1076   :  { %v6533_v54 = vpop.f32.mrf.mxu0  ;;  %6711 = vmatpush1.bf16.msra.mxu0 %v6602_v35 }
0x1077   :  { %17094 = vmatprep.subr.bf16.mxu0 %v18699_v29  ;;  %v6594_v13 = vmul.f32 %v6533_v54, %v19943_v25  ;;  %v18475_v25 = vld [vmem:[%s19553_s8 + $0xe8] sm:$0xff]  }
0x1078   :  { %v6535_v20 = vpop.f32.mrf.mxu0 }
0x1079   :  { %v6595_v39 = vmul.f32 %v6535_v20, %v19945_v5  ;;  %15342 = vmatmul.mubr.msk.bf16.vlgmr.msra.gmra.mxu0 %vm488_vm2, %v6597_v16  ;;  %v6604_v60 = vpack.c.bf16 %v6594_v13, %v6585_v32  ;;  %v18476_v5 = vld [vmem:[%s19553_s8 + $0x20] sm:$0xff]  }
0x107a   :  { %17095 = vmatpush3.bf16.msra.mxu0 %v6606_v10  ;;  %17096 = vmatprep.mubr.msk.bf16.mxu0 %vm18701_vm13, %v18699_v29 }
0x107b   :  { %v6605_v61 = vpack.c.bf16 %v6595_v39, %v6586_v14  ;;  %6884 = vmatprep.subr.bf16.mxu0 %v19908_v26  ;;  %v18466_v26 = vld [vmem:[%s19553_s8 + $0x38] sm:$0xff]  }
0x107d   :  { %6753 = vmatprep.subr.bf16.mxu1 %v6605_v61 }
0x107e   :  { %6754 = vmatpush1.bf16.msra.mxu1 %v6604_v60 }
0x107f   :  { %6841 = vmatprep.subr.bf16.mxu1 %v19898_v28  ;;  %v18464_v28 = vld [vmem:[%s19553_s8 + $0x78] sm:$0xff]  }
0x1081   :  { %15343 = vmatmul.mubr.msk.bf16.vlgmr.msra.gmra.mxu1 %vm488_vm2, %v6597_v16  ;;  %17097 = vmatmul.mubr.msk.bf16.vlgmr.msra.gmra.mxu0 %vm488_vm2, %v6597_v16  ;;  %v18496_v16 = vld [vmem:[%s19553_s8 + $0x80] sm:$0xff]  }
0x1082   :  { %6842 = vmatpush1.bf16.msra.mxu1 %v19903_v2  ;;  %6885 = vmatpush1.bf16.msra.mxu0 %v19913_v17  ;;  %v18465_v2 = vld [vmem:[%s19553_s8 + $0xf8] sm:$0xff]   ;;  %v18467_v17 = vld [vmem:[%s19553_s8 + $0x70] sm:$0xff]  }
0x1083   :  { %6859 = vmatprep.mubr.bf16.mxu1 %v21972_v23  ;;  %6902 = vmatprep.mubr.bf16.mxu0 %v21972_v23 }
0x1084   :  { %6927 = vmatprep.subr.bf16.mxu1 %v19918_v40  ;;  %6970 = vmatprep.subr.bf16.mxu0 %v19928_v46  ;;  %v18468_v40 = vld [vmem:[%s19553_s8 + $0x30] sm:$0xff]  }
0x1085   :  { %v18471_v46 = vld [vmem:[%s19553_s8 + $0xf0] sm:$0xff]  }
0x1089   :  { %15345 = vmatmul.mubr.msk.bf16.vlgmr.msra.gmra.mxu1 %vm488_vm2, %v19892_v38  ;;  %15346 = vmatmul.mubr.msk.bf16.vlgmr.msra.gmra.mxu0 %vm488_vm2, %v19892_v38 }
0x108a   :  { %6928 = vmatpush1.bf16.msra.mxu1 %v19923_v58  ;;  %6971 = vmatpush1.bf16.msra.mxu0 %v19933_v15  ;;  %v18469_v58 = vld [vmem:[%s19553_s8 + $0x68] sm:$0xff]  }
0x108b   :  { %6945 = vmatprep.mubr.bf16.mxu1 %v21972_v23  ;;  %6988 = vmatprep.mubr.bf16.mxu0 %v21972_v23  ;;  %v18472_v15 = vld [vmem:[%s19553_s8 + $0x28] sm:$0xff]  }
0x108c   :  { %17100 = vmatprep.subr.bf16.mxu1 %v18699_v29  ;;  %16124 = vmatprep.subr.bf16.mxu0 %v18464_v28 }
0x1091   :  { %15347 = vmatmul.mubr.msk.bf16.vlgmr.msra.gmra.mxu1 %vm488_vm2, %v19892_v38  ;;  %15348 = vmatmul.mubr.msk.bf16.vlgmr.msra.gmra.mxu0 %vm488_vm2, %v19892_v38 }
0x1092   :  { %17101 = vmatpush3.bf16.msra.mxu1 %v19856_v27  ;;  %17102 = vmatprep.mubr.msk.bf16.mxu1 %vm18701_vm13, %v18699_v29  ;;  %v18470_v27 = vld [vmem:[%s19553_s8 + $0xb8] sm:$0xff]  }
0x1093   :  { %16146 = vmatprep.subr.bf16.mxu1 %v18465_v2  ;;  %16125 = vmatpush3.bf16.msra.mxu0 %v18466_v26 }
0x1094   :  { %16126 = vmatprep.subr.bf16.mxu0 %v18467_v17 }
0x1097   :  { %16127 = vmatpush3.bf16.msra.mxu0 %v18468_v40 }
0x1098   :  { %16128 = vmatprep.subr.bf16.mxu0 %v18469_v58 }
0x1099   :  { %17103 = vmatmul.mubr.msk.bf16.vlgmr.msra.gmra.mxu1 %vm488_vm2, %v19892_v38  ;;  %v18477_v38 = vld [vmem:[%s19553_s8 + $0x58] sm:$0xff]  }
0x109a   :  { %16147 = vmatpush3.bf16.msra.mxu1 %v18470_v27 }
0x109b   :  { %16148 = vmatprep.subr.bf16.mxu1 %v18471_v46  ;;  %16129 = vmatpush3.bf16.msra.mxu0 %v18472_v15 }
0x109c   :  { %16130 = vmatprep.subr.bf16.mxu0 %v18473_v43 }
0x109e   :  { %16149 = vmatpush3.bf16.msra.mxu1 %v18474_v8 }
0x109f   :  { %16150 = vmatprep.subr.bf16.mxu1 %v18475_v25  ;;  %16131 = vmatpush3.bf16.msra.mxu0 %v18476_v5 }
0x10a0   :  { %16132 = vmatprep.subr.bf16.mxu0 %v18477_v38 }
0x10a2   :  { %16151 = vmatpush3.bf16.msra.mxu1 %v18478_v53 }
0x10a3   :  { %16152 = vmatprep.subr.bf16.mxu1 %v18479_v45  ;;  %16133 = vmatpush3.bf16.msra.mxu0 %v18480_v21 }
0x10a4   :  { %16134 = vmatprep.subr.bf16.mxu0 %v18481_v52 }
0x10a6   :  { %16153 = vmatpush3.bf16.msra.mxu1 %v18482_v48 }
0x10a7   :  { %16154 = vmatprep.subr.bf16.mxu1 %v18483_v9  ;;  %16135 = vmatpush3.bf16.msra.mxu0 %v18484_v50 }
0x10a8   :  { %16136 = vmatprep.subr.bf16.mxu0 %v18485_v6 }
0x10aa   :  { %16155 = vmatpush3.bf16.msra.mxu1 %v18486_v42 }
0x10ab   :  { %16156 = vmatprep.subr.bf16.mxu1 %v18487_v55  ;;  %16137 = vmatpush3.bf16.msra.mxu0 %v18488_v7  ;;  %v18498_v7 = vld [vmem:[%s19553_s8 + $0x138] sm:$0xff]  }
0x10ac   :  { %16138 = vmatprep.subr.bf16.mxu0 %v18489_v18  ;;  %v18499_v18 = vld [vmem:[%s19553_s8 + $0x1b8] sm:$0xff]  }
0x10ae   :  { %16157 = vmatpush3.bf16.msra.mxu1 %v18490_v47 }
0x10af   :  { %16158 = vmatprep.subr.bf16.mxu1 %v18491_v49  ;;  %16139 = vmatpush3.bf16.msra.mxu0 %v18492_v44  ;;  %v18500_v44 = vld [vmem:[%s19553_s8 + $0x170] sm:$0xff]  }
0x10b0   :  { %16168 = vmatprep.subr.bf16.mxu0 %v18493_v11  ;;  %v18501_v11 = vld [vmem:[%s19553_s8 + $0x1f0] sm:$0xff]  }
0x10b2   :  { %16159 = vmatpush3.bf16.msra.mxu1 %v18494_v4 }
0x10b3   :  { %16160 = vmatprep.subr.bf16.mxu1 %v18495_v1 }
0x10b6   :  { %16161 = vmatpush3.bf16.msra.mxu1 %v18496_v16 }
0x10b7   :  { %16190 = vmatprep.subr.bf16.mxu1 %v18497_v36 }
0x112d   :  { %v6644_v59 = vpop.f32.mrf.mxu0 }
0x112f   :  { %v6646_v19 = vpop.f32.mrf.mxu0 }
0x1131   :  { %v6648_v12 = vpop.f32.mrf.mxu0  ;;  %v6687_v37 = vpop.f32.mrf.mxu1 }
0x1133   :  { %v6650_v30 = vpop.f32.mrf.mxu0  ;;  %v6689_v51 = vpop.f32.mrf.mxu1 }
0x1135   :  { %v6691_v22 = vpop.f32.mrf.mxu1 }
0x1137   :  { %v6693_v35 = vpop.f32.mrf.mxu1 }
0x1139   :  { %v20033_v31 = vpop.f32.mrf.mxu0 }
0x113b   :  { %v6732_v34 = vpop.f32.mrf.mxu0 }
0x113d   :  { %v20035_v33 = vpop.f32.mrf.mxu0 }
0x113f   :  { %v6736_v24 = vpop.f32.mrf.mxu0 }
0x1141   :  { %v20037_v62 = vpop.f32.mrf.mxu1  ;;  %v20039_v54 = vpop.f32.mrf.mxu0 }
0x1143   :  { %v6775_v10 = vpop.f32.mrf.mxu1  ;;  %v17098_v13 = vpop.f32.mrf.mxu0 }
0x1144   :  { %v18506_v13 = vld [vmem:[%s19553_s8 + $0x128] sm:$0xff]  }
0x1145   :  { %v20041_v20 = vpop.f32.mrf.mxu1  ;;  %v20043_v14 = vpop.f32.mrf.mxu0 }
0x1147   :  { %v6779_v39 = vpop.f32.mrf.mxu1  ;;  %v17099_v32 = vpop.f32.mrf.mxu0 }
0x1149   :  { %v6861_v61 = vpop.f32.mrf.mxu1  ;;  %v6904_v60 = vpop.f32.mrf.mxu0 }
0x114a   :  { %v7040_v5 = vmul.f32 %v6861_v61, %v6644_v59  ;;  %v7042_v38 = vmul.f32 %v6904_v60, %v6687_v37  ;;  %v18502_v37 = vld [vmem:[%s19553_s8 + $0x130] sm:$0xff]   ;;  %v18508_v61 = vld [vmem:[%s19553_s8 + $0x160] sm:$0xff]  }
0x114b   :  { %v6863_v28 = vpop.f32.mrf.mxu1  ;;  %v6906_v2 = vpop.f32.mrf.mxu0  ;;  %v18509_v60 = vld [vmem:[%s19553_s8 + $0x1e0] sm:$0xff]  }
0x114c   :  { %v7041_v15 = vmul.f32 %v6863_v28, %v6646_v19  ;;  %v7043_v43 = vmul.f32 %v6906_v2, %v6689_v51  ;;  %v18510_v28 = vld [vmem:[%s19553_s8 + $0x120] sm:$0xff]   ;;  %v18512_v2 = vld [vmem:[%s19553_s8 + $0x158] sm:$0xff]  }
0x114d   :  { %v6865_v26 = vpop.f32.mrf.mxu1  ;;  %v6908_v17 = vpop.f32.mrf.mxu0 }
0x114e   :  { %v7049_v40 = vmul.f32 %v6865_v26, %v6648_v12  ;;  %v7051_v58 = vmul.f32 %v6908_v17, %v6691_v22  ;;  %v18504_v22 = vld [vmem:[%s19553_s8 + $0x168] sm:$0xff]   ;;  %v18513_v26 = vld [vmem:[%s19553_s8 + $0x1d8] sm:$0xff]  }
0x114f   :  { %v6867_v27 = vpop.f32.mrf.mxu1  ;;  %v6910_v46 = vpop.f32.mrf.mxu0  ;;  %v18514_v17 = vld [vmem:[%s19553_s8 + $0x118] sm:$0xff]  }
0x1150   :  { %v7050_v8 = vmul.f32 %v6867_v27, %v6650_v30  ;;  %v7052_v25 = vmul.f32 %v6910_v46, %v6693_v35  ;;  %v7058_v48 = vpack.c.bf16 %v7049_v40, %v7040_v5  ;;  %v7060_v9 = vpack.c.bf16 %v7051_v58, %v7042_v38  ;;  %v18503_v30 = vld [vmem:[%s19553_s8 + $0x1b0] sm:$0xff]   ;;  %v18505_v35 = vld [vmem:[%s19553_s8 + $0x1e8] sm:$0xff]   ;;  %v18515_v40 = vld [vmem:[%s19553_s8 + $0x198] sm:$0xff]  }
0x1151   :  { %v20045_v53 = vpop.f32.mrf.mxu1  ;;  %v20047_v45 = vpop.f32.mrf.mxu0  ;;  %v18516_v58 = vld [vmem:[%s19553_s8 + $0x150] sm:$0xff]   ;;  %v18523_v5 = vld [vmem:[%s19553_s8 + $0x188] sm:$0xff]  }
0x1152   :  { %v7059_v21 = vpack.c.bf16 %v7050_v8, %v7041_v15  ;;  %v7061_v52 = vpack.c.bf16 %v7052_v25, %v7043_v43  ;;  %v18517_v27 = vld [vmem:[%s19553_s8 + $0x1d0] sm:$0xff]   ;;  %v18520_v43 = vld [vmem:[%s19553_s8 + $0x148] sm:$0xff]  }
0x1153   :  { %v6949_v50 = vpop.f32.mrf.mxu1  ;;  %v6992_v6 = vpop.f32.mrf.mxu0  ;;  %v18518_v46 = vld [vmem:[%s19553_s8 + $0x110] sm:$0xff]   ;;  %v18521_v8 = vld [vmem:[%s19553_s8 + $0x1c8] sm:$0xff]  }
0x1154   :  { %7106 = vmatprep.mubr.bf16.mxu0 %v7059_v21  ;;  %7147 = vmatprep.mubr.bf16.mxu1 %v7061_v52  ;;  %v7045_v4 = vmul.f32 %v6949_v50, %v6732_v34  ;;  %v7047_v1 = vmul.f32 %v6992_v6, %v6775_v10  ;;  %v18519_v15 = vld [vmem:[%s19553_s8 + $0x190] sm:$0xff]   ;;  %v18522_v25 = vld [vmem:[%s19553_s8 + $0x108] sm:$0xff]   ;;  %v18524_v52 = vld [vmem:[%s19553_s8 + $0x140] sm:$0xff]   ;;  %v7046_v50 = vmul.f32 %v20047_v45, %v20037_v62 }
0x1155   :  { %v20049_v42 = vpop.f32.mrf.mxu1  ;;  %v20051_v55 = vpop.f32.mrf.mxu0  ;;  %7107 = vmatmul.mubr.bf16.vlgmr.msra.gmra.mxu0 %v7058_v48  ;;  %7148 = vmatmul.mubr.bf16.vlgmr.msra.gmra.mxu1 %v7060_v9  ;;  %v18525_v48 = vld [vmem:[%s19553_s8 + $0x1c0] sm:$0xff]   ;;  %v7044_v9 = vmul.f32 %v20045_v53, %v20033_v31  ;;  %v18529_v31 = vld [vmem:[%s19553_s8 + $0x230] sm:$0xff]   ;;  %v18530_v62 = vld [vmem:[%s19553_s8 + $0x228] sm:$0xff]  }
0x1156   :  { %16169 = vmatpush3.bf16.msra.mxu0 %v18498_v7  ;;  %16191 = vmatpush3.bf16.msra.mxu1 %v18499_v18  ;;  %v7053_v38 = vmul.f32 %v20049_v42, %v20035_v33  ;;  %v7055_v21 = vmul.f32 %v20051_v55, %v20041_v20  ;;  %v18526_v6 = vld [vmem:[%s19553_s8 + $0x100] sm:$0xff]   ;;  %v18528_v42 = vld [vmem:[%s19553_s8 + $0x238] sm:$0xff]   ;;  %v18533_v55 = vld [vmem:[%s19553_s8 + $0x210] sm:$0xff]  }
0x1157   :  { %v6953_v47 = vpop.f32.mrf.mxu1  ;;  %v6996_v49 = vpop.f32.mrf.mxu0  ;;  %16170 = vmatprep.subr.bf16.mxu0 %v18500_v44  ;;  %16192 = vmatprep.subr.bf16.mxu1 %v18501_v11  ;;  %v18527_v7 = vld [vmem:[%s19553_s8 + $0x180] sm:$0xff]   ;;  %v18532_v45 = vld [vmem:[%s19553_s8 + $0x218] sm:$0xff]   ;;  %v18534_v18 = vld [vmem:[%s19553_s8 + $0x208] sm:$0xff]  }
0x1158   :  { %v7054_v16 = vmul.f32 %v6953_v47, %v6736_v24  ;;  %v7056_v36 = vmul.f32 %v6996_v49, %v6779_v39  ;;  %v18507_v39 = vld [vmem:[%s19553_s8 + $0x1a8] sm:$0xff]   ;;  %v7062_v33 = vpack.c.bf16 %v7053_v38, %v7044_v9  ;;  %v7064_v20 = vpack.c.bf16 %v7055_v21, %v7046_v50  ;;  %v18531_v53 = vld [vmem:[%s19553_s8 + $0x220] sm:$0xff]   ;;  %v17963_v44 = vld [vmem:[%s20131_s12 + $0x11c] ss:$20 sps:$4 sm:$0xff]  }
0x1159   :  { %v7033_v59 = vpop.f32.mrf.mxu1  ;;  %v18535_v47 = vld [vmem:[%s19553_s8 + $0x200] sm:$0xff]   ;;  %v17967_v11 = vld [vmem:[%s20131_s12 + $0xf4] ss:$20 sps:$4 sm:$0xff]  }
0x115a   :  { %v7063_v19 = vpack.c.bf16 %v7054_v16, %v7045_v4  ;;  %v7065_v12 = vpack.c.bf16 %v7056_v36, %v7047_v1  ;;  %16171 = vmatpush3.bf16.msra.mxu0 %v18502_v37  ;;  %16193 = vmatpush3.bf16.msra.mxu1 %v18503_v30  ;;  %v20062_v24 = vmul.f32 %v7033_v59, %v20039_v54  ;;  %v17959_v49 = vld [vmem:[%s20124_s9] sm:$0xff]   ;;  %v17969_v16 = vld [vmem:[%s20131_s12 + $0xc8] ss:$20 sps:$4 sm:$0xff]  }
0x115b   :  { %v17104_v51 = vpop.f32.mrf.mxu1  ;;  %16172 = vmatprep.subr.bf16.mxu0 %v18504_v22  ;;  %16194 = vmatprep.subr.bf16.mxu1 %v18505_v35  ;;  %v17965_v4 = vld [vmem:[%s20131_s12 + $0xf0] ss:$20 sps:$4 sm:$0xff]   ;;  %v17971_v1 = vld [vmem:[%s20131_s12 + $0xcc] ss:$20 sps:$4 sm:$0xff]   ;;  %v17983_v37 = vld [vmem:[%s20131_s12 + $0x54] ss:$20 sps:$4 sm:$0xff]  }
0x115c   :  { %7188 = vmatprep.mubr.bf16.mxu0 %v7063_v19  ;;  %7229 = vmatprep.mubr.bf16.mxu1 %v7065_v12  ;;  %v17975_v36 = vld [vmem:[%s20131_s12 + $0xa4] ss:$20 sps:$4 sm:$0xff]   ;;  %v17973_v59 = vld [vmem:[%s20131_s12 + $0xa0] ss:$20 sps:$4 sm:$0xff]   ;;  %v17979_v19 = vld [vmem:[%s20131_s12 + $0x7c] ss:$20 sps:$4 sm:$0xff]  }
0x115d   :  { %v7036_v34 = vpop.f32.mrf.mxu1  ;;  %v17977_v12 = vld [vmem:[%s20131_s12 + $0x78] ss:$20 sps:$4 sm:$0xff]   ;;  %v17981_v30 = vld [vmem:[%s20131_s12 + $0x50] ss:$20 sps:$4 sm:$0xff]  }
0x115e   :  { %v20065_v10 = vmul.f32 %v7036_v34, %v20043_v14  ;;  %16173 = vmatpush3.bf16.msra.mxu0 %v18506_v13  ;;  %16195 = vmatpush3.bf16.msra.mxu1 %v18507_v39  ;;  %v18511_v14 = vld [vmem:[%s19553_s8 + $0x1a0] sm:$0xff]  }
0x115f   :  { %v17105_v32 = vpop.f32.mrf.mxu1  ;;  %16174 = vmatprep.subr.bf16.mxu0 %v18508_v61  ;;  %16196 = vmatprep.subr.bf16.mxu1 %v18509_v60 }
0x1160   :  { %v7066_v54 = vpack.c.bf16 %v20065_v10, %v20062_v24 }
0x1162   :  { %16175 = vmatpush3.bf16.msra.mxu0 %v18510_v28  ;;  %16197 = vmatpush3.bf16.msra.mxu1 %v18511_v14 }
0x1163   :  { %16176 = vmatprep.subr.bf16.mxu0 %v18512_v2  ;;  %16198 = vmatprep.subr.bf16.mxu1 %v18513_v26 }
0x1166   :  { %16177 = vmatpush3.bf16.msra.mxu0 %v18514_v17  ;;  %16199 = vmatpush3.bf16.msra.mxu1 %v18515_v40 }
0x1167   :  { %16178 = vmatprep.subr.bf16.mxu0 %v18516_v58  ;;  %16200 = vmatprep.subr.bf16.mxu1 %v18517_v27 }
0x116a   :  { %16179 = vmatpush3.bf16.msra.mxu0 %v18518_v46  ;;  %16201 = vmatpush3.bf16.msra.mxu1 %v18519_v15 }
0x116b   :  { %16180 = vmatprep.subr.bf16.mxu0 %v18520_v43  ;;  %16202 = vmatprep.subr.bf16.mxu1 %v18521_v8 }
0x116e   :  { %16181 = vmatpush3.bf16.msra.mxu0 %v18522_v25  ;;  %16203 = vmatpush3.bf16.msra.mxu1 %v18523_v5 }
0x116f   :  { %16182 = vmatprep.subr.bf16.mxu0 %v18524_v52  ;;  %16204 = vmatprep.subr.bf16.mxu1 %v18525_v48 }
0x1172   :  { %16183 = vmatpush3.bf16.msra.mxu0 %v18526_v6  ;;  %16205 = vmatpush3.bf16.msra.mxu1 %v18527_v7 }
0x1173   :  { %17106 = vmatprep.subr.bf16.mxu0 %v18699_v29 }
0x1175   :  { %7189 = vmatmul.mubr.bf16.vlgmr.msra.gmra.mxu0 %v7062_v33  ;;  %7230 = vmatmul.mubr.bf16.vlgmr.msra.gmra.mxu1 %v7064_v20 }
0x1176   :  { %17107 = vmatpush3.bf16.msra.mxu0 %v18528_v42  ;;  %17122 = vmatprep.mubr.msk.bf16.mxu0 %vm18701_vm13, %v18699_v29 }
0x1177   :  { %17108 = vmatprep.subr.bf16.mxu0 %v18699_v29  ;;  %17128 = vmatprep.mubr.msk.bf16.mxu1 %vm488_vm2, %v17959_v49  ;;  %v17964_v49 = vld [vmem:[%s20136_s16 + $0x38] sm:$0xff]  }
0x117a   :  { %17109 = vmatpush3.bf16.msra.mxu0 %v18529_v31 }
0x117b   :  { %17110 = vmatprep.subr.bf16.mxu0 %v18699_v29 }
0x117e   :  { %17111 = vmatpush3.bf16.msra.mxu0 %v18530_v62 }
0x117f   :  { %17112 = vmatprep.subr.bf16.mxu0 %v18699_v29 }
0x1182   :  { %17113 = vmatpush3.bf16.msra.mxu0 %v18531_v53 }
0x1183   :  { %17114 = vmatprep.subr.bf16.mxu0 %v18699_v29 }
0x1186   :  { %17115 = vmatpush3.bf16.msra.mxu0 %v18532_v45 }
0x1187   :  { %17116 = vmatprep.subr.bf16.mxu0 %v18699_v29 }
0x118a   :  { %17117 = vmatpush3.bf16.msra.mxu0 %v18533_v55 }
0x118b   :  { %17118 = vmatprep.subr.bf16.mxu0 %v18699_v29 }
0x118e   :  { %17119 = vmatpush3.bf16.msra.mxu0 %v18534_v18 }
0x118f   :  { %17120 = vmatprep.subr.bf16.mxu0 %v18699_v29  ;;  %v17961_v29 = vld [vmem:[%s20131_s12 + $0x118] ss:$20 sps:$4 sm:$0xff]  }
0x1192   :  { %17121 = vmatpush3.bf16.msra.mxu0 %v18535_v47 }
0x1193   :  { %7726 = vmatprep.subr.bf16.mxu0 %v17963_v44  ;;  %v17968_v44 = vld [vmem:[%s20136_s16 + $0x30] sm:$0xff]  }
0x1195   :  { %17123 = vmatmul.mubr.bf16.vlgmr.msra.gmra.mxu0 %v7066_v54  ;;  %v15350_v54 = vld [vmem:[%s14900_s20] ss:$0 sm:$0xff] }
0x1196   :  { %7758 = vmatprep.mubr.bf16.mxu0 %v21972_v23  ;;  %7727 = vmatpush1.bf16.msra.mxu0 %v17961_v29  ;;  %v17960_v29 = vld [vmem:[%s20124_s9 + $0x8] sm:$0xff]   ;;  %s20409_s9 = sld [smem:[%s21939_s0 + %s18719_s3]]  }
0x1197   :  { %7728 = vmatprep.subr.bf16.mxu0 %v17967_v11  ;;  %v17972_v11 = vld [vmem:[%s20136_s16 + $0x28] sm:$0xff]   ;;  %s14908_s3 = sld [smem:[%s21939_s0 + %s18725_s1]]  }
0x119a   :  { %7729 = vmatpush1.bf16.msra.mxu0 %v17965_v4  ;;  %v17976_v4 = vld [vmem:[%s20136_s16 + $0x20] sm:$0xff]  }
0x119b   :  { %7730 = vmatprep.subr.bf16.mxu0 %v17971_v1  ;;  %v17980_v1 = vld [vmem:[%s20136_s16 + $0x18] sm:$0xff]  }
0x119e   :  { %7731 = vmatpush1.bf16.msra.mxu0 %v17969_v16  ;;  %v17984_v16 = vld [vmem:[%s20136_s16 + $0x10] sm:$0xff]  }
0x119f   :  { %7732 = vmatprep.subr.bf16.mxu0 %v17975_v36  ;;  %v17987_v36 = vld [vmem:[%s20131_s12 + $0x2c] ss:$20 sps:$4 sm:$0xff]  }
0x11a2   :  { %7733 = vmatpush1.bf16.msra.mxu0 %v17973_v59  ;;  %v17985_v59 = vld [vmem:[%s20131_s12 + $0x28] ss:$20 sps:$4 sm:$0xff]  }
0x11a3   :  { %7734 = vmatprep.subr.bf16.mxu0 %v17979_v19  ;;  %v17988_v19 = vld [vmem:[%s20136_s16 + $0x8] sm:$0xff]  }
0x11a6   :  { %7735 = vmatpush1.bf16.msra.mxu0 %v17977_v12  ;;  %v17991_v12 = vld [vmem:[%s20131_s12 + $0x4] ss:$20 sps:$4 sm:$0xff]  }
0x11a7   :  { %7736 = vmatprep.subr.bf16.mxu0 %v17983_v37  ;;  %v17989_v37 = vld [vmem:[%s20131_s12] ss:$20 sps:$4 sm:$0xff]  }
0x11aa   :  { %7737 = vmatpush1.bf16.msra.mxu0 %v17981_v30  ;;  %v17992_v30 = vld [vmem:[%s20136_s16] sm:$0xff]   ;;  %s14907_s16 = sld [smem:[%s21939_s0 + %s18721_s13]]  }
0x11ab   :  { %7738 = vmatprep.subr.bf16.mxu0 %v17987_v36  ;;  %s21034_s13 = sld [smem:[%s21939_s0 + %s18727_s11]]  }
0x11ae   :  { %7739 = vmatpush1.bf16.msra.mxu0 %v17985_v59 }
0x11af   :  { %7740 = vmatprep.subr.bf16.mxu0 %v17991_v12 }
0x11b2   :  { %7741 = vmatpush1.bf16.msra.mxu0 %v17989_v37 }
0x1215   :  { %v16140_v51 = vpop.f32.mrf.mxu0  ;;  %v16162_v35 = vpop.f32.mrf.mxu1 }
0x1217   :  { %v16141_v22 = vpop.f32.mrf.mxu0  ;;  %v16163_v24 = vpop.f32.mrf.mxu1 }
0x1218   :  { %v16142_v60 = vadd.f32 %v16141_v22, %v16140_v51  ;;  %v16164_v40 = vadd.f32 %v16163_v24, %v16162_v35  ;;  %v17993_v51 = vld [vmem:[%s20131_s12 + $0x128] ss:$20 sps:$4 sm:$0xff]   ;;  %v17996_v22 = vld [vmem:[%s20131_s12 + $0x124] ss:$20 sps:$4 sm:$0xff]  }
0x1219   :  { %v16143_v34 = vpop.f32.mrf.mxu0  ;;  %v16165_v13 = vpop.f32.mrf.mxu1  ;;  %17152 = vmatprep.subr.bf16.mxu0 %v17993_v51 }
0x121a   :  { %v7109_v2 = vadd.f32 %v16142_v60, %v15350_v54  ;;  %v18000_v60 = vld [vmem:[%s20131_s12 + $0xfc] ss:$20 sps:$4 sm:$0xff]  }
0x121b   :  { %v16144_v10 = vpop.f32.mrf.mxu0  ;;  %v16166_v32 = vpop.f32.mrf.mxu1 }
0x121c   :  { %v16145_v26 = vadd.f32 %v16144_v10, %v16143_v34  ;;  %v7150_v46 = vadd.f32 %v16164_v40, %v7109_v2  ;;  %v16167_v8 = vadd.f32 %v16166_v32, %v16165_v13  ;;  %v17997_v32 = vld [vmem:[%s20131_s12 + $0x100] ss:$20 sps:$4 sm:$0xff]   ;;  %v18002_v2 = vld [vmem:[%s20131_s12 + $0xd0] ss:$20 sps:$4 sm:$0xff]   ;;  %v18006_v40 = vld [vmem:[%s20131_s12 + $0xa8] ss:$20 sps:$4 sm:$0xff]  }
0x121e   :  { %v7112_v15 = vadd.f32 %v16145_v26, %v15350_v54  ;;  %v17998_v54 = vld [vmem:[%s20131_s12 + $0xf8] ss:$20 sps:$4 sm:$0xff]   ;;  %v18005_v26 = vld [vmem:[%s20131_s12 + $0xb0] ss:$20 sps:$4 sm:$0xff]  }
0x1220   :  { %v7153_v38 = vadd.f32 %v16167_v8, %v7112_v15  ;;  %v18013_v15 = vld [vmem:[%s20131_s12 + $0x60] ss:$20 sps:$4 sm:$0xff]   ;;  %v18014_v8 = vld [vmem:[%s20131_s12 + $0x58] ss:$20 sps:$4 sm:$0xff]  }
0x1235   :  { %v16184_v39 = vpop.f32.mrf.mxu0  ;;  %v16206_v28 = vpop.f32.mrf.mxu1 }
0x1237   :  { %v16185_v61 = vpop.f32.mrf.mxu0  ;;  %v16207_v17 = vpop.f32.mrf.mxu1 }
0x1238   :  { %v16186_v58 = vadd.f32 %v16185_v61, %v16184_v39  ;;  %v16208_v21 = vadd.f32 %v16207_v17, %v16206_v28  ;;  %v17994_v39 = vld [vmem:[%s20131_s12 + $0x120] ss:$20 sps:$4 sm:$0xff]   ;;  %v18001_v28 = vld [vmem:[%s20131_s12 + $0xd8] ss:$20 sps:$4 sm:$0xff]  }
0x1239   :  { %v16187_v14 = vpop.f32.mrf.mxu0  ;;  %v16209_v43 = vpop.f32.mrf.mxu1  ;;  %v18008_v17 = vld [vmem:[%s20131_s12 + $0xac] ss:$20 sps:$4 sm:$0xff]  }
0x123a   :  { %v7191_v25 = vadd.f32 %v16186_v58, %v7150_v46  ;;  %v18009_v58 = vld [vmem:[%s20131_s12 + $0x88] ss:$20 sps:$4 sm:$0xff]   ;;  %v18010_v46 = vld [vmem:[%s20131_s12 + $0x80] ss:$20 sps:$4 sm:$0xff]  }
0x123b   :  { %v16188_v27 = vpop.f32.mrf.mxu0  ;;  %v16210_v52 = vpop.f32.mrf.mxu1 }
0x123c   :  { %v16189_v5 = vadd.f32 %v16188_v27, %v16187_v14  ;;  %v7232_v9 = vadd.f32 %v16208_v21, %v7191_v25  ;;  %v16211_v6 = vadd.f32 %v16210_v52, %v16209_v43  ;;  %v18004_v14 = vld [vmem:[%s20131_s12 + $0xd4] ss:$20 sps:$4 sm:$0xff]   ;;  %v18012_v27 = vld [vmem:[%s20131_s12 + $0x84] ss:$20 sps:$4 sm:$0xff]   ;;  %v18016_v43 = vld [vmem:[%s20131_s12 + $0x5c] ss:$20 sps:$4 sm:$0xff]  }
0x123d   :  { %v18017_v25 = vld [vmem:[%s20131_s12 + $0x38] ss:$20 sps:$4 sm:$0xff]   ;;  %v18021_v21 = vld [vmem:[%s20131_s12 + $0x10] ss:$20 sps:$4 sm:$0xff]  }
0x123e   :  { %v7194_v48 = vadd.f32 %v16189_v5, %v7153_v38  ;;  %v18020_v5 = vld [vmem:[%s20131_s12 + $0x34] ss:$20 sps:$4 sm:$0xff]   ;;  %v18018_v38 = vld [vmem:[%s20131_s12 + $0x30] ss:$20 sps:$4 sm:$0xff]   ;;  %v18024_v52 = vld [vmem:[%s20131_s12 + $0xc] ss:$20 sps:$4 sm:$0xff]  }
0x1240   :  { %v7235_v20 = vadd.f32 %v16211_v6, %v7194_v48  ;;  %v18022_v48 = vld [vmem:[%s20131_s12 + $0x8] ss:$20 sps:$4 sm:$0xff]   ;;  %v15403_v6 = vld [vmem:[%s14903_s27] ss:$0 sm:$0xff]  ;;  %s14904_s12 = sld [smem:[%s21939_s0 + %s18720_s10]]   ;;  %s18732_s27 = smov 48  }
0x1241   :  { %s14911_s10 = sld [smem:[%s21939_s0 + %s18726_s6]]  }
0x1242   :  { %s21463_s2 = sld [smem:[%s21939_s0 + %s18732_s27]]  }
0x1255   :  { %v7272_v50 = vpop.f32.mrf.mxu0 }
0x1256   :  { %v7273_v7 = vadd.f32 %v7272_v50, %v7232_v9  ;;  %v20203_v9 = vld [vmem:[%s19189_s24 + $0xc] ss:$20 sps:$4 sm:$0xff]   ;;  %v20209_v50 = vld [vmem:[%s19189_s24 + $0x8] ss:$20 sps:$4 sm:$0xff]  }
0x1257   :  { %v17124_v33 = vpop.f32.mrf.mxu0 }
0x1258   :  { %v7281_v31 = vmul.f32 0.1, %v7273_v7  ;;  %vm7279_vm7 = vcmp.ge.f32.partialorder %v7273_v7, 0.0 }
0x1259   :  { %v7275_v42 = vpop.f32.mrf.mxu0 }
0x125a   :  { %v7276_v62 = vadd.f32 %v7275_v42, %v7235_v20  ;;  %v7283_v55 = vsel %vm7279_vm7, %v7273_v7, %v7281_v31 }
0x125b   :  { %v17125_v53 = vpop.f32.mrf.mxu0 }
0x125c   :  { %vm7280_vm8 = vcmp.ge.f32.partialorder %v7276_v62, 0.0  ;;  %v7282_v45 = vmul.f32 0.1, %v7276_v62 }
0x125e   :  { %v7284_v18 = vsel %vm7280_vm8, %v7276_v62, %v7282_v45 }
0x125f   :  { %v7289_v47 = vpack.c.bf16 %v7284_v18, %v7283_v55 }
0x1261   :  { %17126 = vmatprep.subr.bf16.mxu1 %v7289_v47 }
0x1262   :  { %17127 = vmatpush3.bf16.msra.mxu1 %v7289_v47 }
0x1263   :  { %17132 = vmatprep.subr.bf16.mxu1 %v17964_v49 }
0x1265   :  { %17129 = vmatmul.mubr.msk.bf16.vlgmr.msra.gmra.mxu1 %vm488_vm2, %v17960_v29 }
0x1266   :  { %17133 = vmatpush3.bf16.msra.mxu1 %v17964_v49 }
0x1267   :  { %17134 = vmatprep.subr.bf16.mxu1 %v17968_v44 }
0x126a   :  { %17135 = vmatpush3.bf16.msra.mxu1 %v17968_v44 }
0x126b   :  { %17136 = vmatprep.subr.bf16.mxu1 %v17972_v11 }
0x126e   :  { %17137 = vmatpush3.bf16.msra.mxu1 %v17972_v11 }
0x126f   :  { %17138 = vmatprep.subr.bf16.mxu1 %v17976_v4 }
0x1272   :  { %17139 = vmatpush3.bf16.msra.mxu1 %v17976_v4 }
0x1273   :  { %17140 = vmatprep.subr.bf16.mxu1 %v17980_v1 }
0x1276   :  { %17141 = vmatpush3.bf16.msra.mxu1 %v17980_v1 }
0x1277   :  { %17142 = vmatprep.subr.bf16.mxu1 %v17984_v16 }
0x127a   :  { %17143 = vmatpush3.bf16.msra.mxu1 %v17984_v16 }
0x127b   :  { %17144 = vmatprep.subr.bf16.mxu1 %v17988_v19 }
0x127e   :  { %17145 = vmatpush3.bf16.msra.mxu1 %v17988_v19 }
0x127f   :  { %17146 = vmatprep.subr.bf16.mxu1 %v17992_v30 }
0x1282   :  { %17147 = vmatpush3.bf16.msra.mxu1 %v17992_v30 }
0x1283   :  { %7779 = vmatprep.subr.bf16.mxu1 %v17996_v22 }
0x1325   :  { %v17130_v35 = vpop.f32.mrf.mxu1 }
0x1327   :  { %v7340_v34 = vpop.f32.mrf.mxu1 }
0x1329   :  { %v17131_v24 = vpop.f32.mrf.mxu1 }
0x132a   :  { %v20173_v61 = vpack.c.bf16 %v17131_v24, %v17130_v35 }
0x132b   :  { %v7343_v10 = vpop.f32.mrf.mxu1 }
0x132c   :  { %v20169_v13 = vpack.c.bf16 %v7343_v10, %v7340_v34 }
0x132e   :  { %17148 = vmatprep.mubr.bf16.mxu1 %v20169_v13  ;;  %7759 = vmatmul.mubr.bf16.vlgmr.msra.gmra.mxu0 %v20169_v13 }
0x132f   :  { %17153 = vmatpush3.bf16.msra.mxu0 %v17993_v51  ;;  %17149 = vmatmul.mubr.bf16.vlgmr.msra.gmra.mxu1 %v20173_v61 }
0x1330   :  { %7780 = vmatpush1.bf16.msra.mxu1 %v17994_v39  ;;  %17154 = vmatprep.subr.bf16.mxu0 %v17997_v32 }
0x1331   :  { %7781 = vmatprep.subr.bf16.mxu1 %v18000_v60  ;;  %7768 = vmatprep.mubr.bf16.mxu0 %v21972_v23 }
0x1332   :  { %7811 = vmatprep.mubr.bf16.mxu1 %v21972_v23 }
0x1333   :  { %17155 = vmatpush3.bf16.msra.mxu0 %v17997_v32 }
0x1334   :  { %7782 = vmatpush1.bf16.msra.mxu1 %v17998_v54  ;;  %17156 = vmatprep.subr.bf16.mxu0 %v18001_v28 }
0x1335   :  { %7783 = vmatprep.subr.bf16.mxu1 %v18004_v14 }
0x1336   :  { %7769 = vmatmul.mubr.bf16.gmra.mxu0 %v20173_v61 }
0x1337   :  { %17157 = vmatpush3.bf16.msra.mxu0 %v18001_v28  ;;  %17168 = vmatprep.mubr.bf16.mxu0 %v20169_v13 }
0x1338   :  { %7784 = vmatpush1.bf16.msra.mxu1 %v18002_v2  ;;  %17158 = vmatprep.subr.bf16.mxu0 %v18005_v26 }
0x1339   :  { %7785 = vmatprep.subr.bf16.mxu1 %v18008_v17 }
0x133b   :  { %17159 = vmatpush3.bf16.msra.mxu0 %v18005_v26 }
0x133c   :  { %7786 = vmatpush1.bf16.msra.mxu1 %v18006_v40  ;;  %17160 = vmatprep.subr.bf16.mxu0 %v18009_v58 }
0x133d   :  { %7787 = vmatprep.subr.bf16.mxu1 %v18012_v27 }
0x133f   :  { %17161 = vmatpush3.bf16.msra.mxu0 %v18009_v58 }
0x1340   :  { %7788 = vmatpush1.bf16.msra.mxu1 %v18010_v46  ;;  %17162 = vmatprep.subr.bf16.mxu0 %v18013_v15 }
0x1341   :  { %7789 = vmatprep.subr.bf16.mxu1 %v18016_v43 }
0x1343   :  { %17163 = vmatpush3.bf16.msra.mxu0 %v18013_v15 }
0x1344   :  { %7790 = vmatpush1.bf16.msra.mxu1 %v18014_v8  ;;  %17164 = vmatprep.subr.bf16.mxu0 %v18017_v25 }
0x1345   :  { %7791 = vmatprep.subr.bf16.mxu1 %v18020_v5 }
0x1347   :  { %17165 = vmatpush3.bf16.msra.mxu0 %v18017_v25 }
0x1348   :  { %7792 = vmatpush1.bf16.msra.mxu1 %v18018_v38  ;;  %17166 = vmatprep.subr.bf16.mxu0 %v18021_v21 }
0x1349   :  { %7793 = vmatprep.subr.bf16.mxu1 %v18024_v52  ;;  %v20243_v52 = vld [vmem:[%s19189_s24 + $0x4] ss:$20 sps:$4 sm:$0xff]  }
0x134b   :  { %17167 = vmatpush3.bf16.msra.mxu0 %v18021_v21 }
0x134c   :  { %7794 = vmatpush1.bf16.msra.mxu1 %v18022_v48  ;;  %8136 = vmatprep.subr.bf16.mxu0 %v20203_v9  ;;  %v20250_v48 = vld [vmem:[%s19189_s24] ss:$20 sps:$4 sm:$0xff]  }
0x134e   :  { %17169 = vmatmul.mubr.bf16.vlgmr.msra.gmra.mxu0 %v20173_v61 }
0x134f   :  { %7812 = vmatmul.mubr.bf16.vlgmr.msra.gmra.mxu1 %v20169_v13  ;;  %8137 = vmatpush1.bf16.msra.mxu0 %v20209_v50 }
0x1350   :  { %7821 = vmatprep.mubr.bf16.mxu1 %v21972_v23  ;;  %8154 = vmatprep.mubr.bf16.mxu0 %v21972_v23 }
0x1357   :  { %7822 = vmatmul.mubr.bf16.gmra.mxu1 %v20173_v61 }
0x13ef   :  { %v17150_v7 = vpop.f32.mrf.mxu1 }
0x13f0   :  { %v7890_v33 = vadd.f32 %v17150_v7, %v15403_v6  ;;  %v7922_v4 = vsel %vm488_vm2, %v17150_v7, inf }
0x13f1   :  { %v7503_v20 = vpop.f32.mrf.mxu1 }
0x13f2   :  { %v7898_v42 = vsel %vm488_vm2, %v7890_v33, -inf  ;;  %v7888_v31 = vadd.f32 %v15403_v6, %v7503_v20  ;;  %v7916_v11 = vsel %vm488_vm2, %v7503_v20, inf }
0x13f3   :  { %7899 = vmax.xlane.f32.xlu1 %v7898_v42  ;;  %v17151_v62 = vpop.f32.mrf.mxu1 }
0x13f4   :  { %v7891_v53 = vadd.f32 %v17151_v62, %v15403_v6  ;;  %v7892_v55 = vsel %vm488_vm2, %v7888_v31, -inf  ;;  %v7925_v44 = vsel %vm488_vm2, %v17151_v62, inf }
0x13f5   :  { %v7506_v45 = vpop.f32.mrf.mxu1 }
0x13f6   :  { %v7901_v18 = vsel %vm488_vm2, %v7891_v53, -inf  ;;  %v7889_v47 = vadd.f32 %v15403_v6, %v7506_v45  ;;  %v7919_v49 = vsel %vm488_vm2, %v7506_v45, inf  ;;  %v20254_v6 = vld [vmem:[%s19189_s24 + $0x10] ss:$20 sps:$4 sm:$0xff]  }
0x13f7   :  { %7893 = vmax.xlane.f32.xlu1 %v7892_v55  ;;  %7902 = vmax.xlane.f32.xlu0 %v7901_v18 }
0x13f8   :  { %v7895_v29 = vsel %vm488_vm2, %v7889_v47, -inf }
0x13fb   :  { %7920 = vmin.xlane.f32.xlu1 %v7919_v49  ;;  %7896 = vmax.xlane.f32.xlu0 %v7895_v29 }
0x13ff   :  { %7926 = vmin.xlane.f32.xlu1 %v7925_v44  ;;  %7917 = vmin.xlane.f32.xlu0 %v7916_v11 }
0x1403   :  { %7923 = vmin.xlane.f32.xlu0 %v7922_v4 }
0x147c   :  { %v7900_v1 = vpop.xlane.xlu1 %7899 }
0x147d   :  { %v7906_v16 = vsub.f32 %v7890_v33, %v7900_v1 }
0x147f   :  { %v7912_v30 = vmul.f32 1.442695, %v7906_v16 }
0x1480   :  { %v7894_v36 = vpop.xlane.xlu1 %7893  ;;  %v7903_v59 = vpop.xlane.xlu0 %7902 }
0x1481   :  { %v7904_v19 = vsub.f32 %v7888_v31, %v7894_v36  ;;  %v7907_v12 = vsub.f32 %v7891_v53, %v7903_v59 }
0x1483   :  { %v7914_v37 = vmul.f32 1.442695, %v7907_v12  ;;  %v7908_v35 = vmul.f32 1.442695, %v7904_v19 }
0x1484   :  { %v7921_v51 = vpop.xlane.xlu1 %7920  ;;  %v7897_v22 = vpop.xlane.xlu0 %7896 }
0x1485   :  { %v7929_v34 = vsub.f32 %v7921_v51, %v7506_v45  ;;  %v7905_v24 = vsub.f32 %v7889_v47, %v7897_v22  ;;  %18293 = vpow2.f32 %v7914_v37  ;;  %v7813_v45 = vpop.f32.mrf.mxu1 }
0x1486   :  { %18295 = vpow2.f32 %v7912_v30 }
0x1487   :  { %v7910_v10 = vmul.f32 1.442695, %v7905_v24  ;;  %18297 = vpow2.f32 %v7908_v35  ;;  %v7934_v32 = vmul.f32 1.442695, %v7929_v34  ;;  %v7815_v18 = vpop.f32.mrf.mxu1 }
0x1488   :  { %v7927_v13 = vpop.xlane.xlu1 %7926  ;;  %v7918_v39 = vpop.xlane.xlu0 %7917 }
0x1489   :  { %v7931_v61 = vsub.f32 %v7927_v13, %v17151_v62  ;;  %v7928_v60 = vsub.f32 %v7918_v39, %v7503_v20  ;;  %18299 = vpow2.f32 %v7910_v10  ;;  %v7817_v49 = vpop.f32.mrf.mxu1 }
0x148a   :  { %18301 = vpow2.f32 %v7934_v32 }
0x148b   :  { %v7932_v54 = vmul.f32 1.442695, %v7928_v60  ;;  %v7938_v28 = vmul.f32 1.442695, %v7931_v61  ;;  %v7819_v44 = vpop.f32.mrf.mxu1 }
0x148c   :  { %v7924_v14 = vpop.xlane.xlu0 %7923 }
0x148d   :  { %v7930_v2 = vsub.f32 %v7924_v14, %v17150_v7  ;;  %18303 = vpow2.f32 %v7932_v54  ;;  %v20266_v7 = vpop.f32.mrf.mxu0  ;;  %v7823_v4 = vpop.f32.mrf.mxu1 }
0x148e   :  { %18305 = vpow2.f32 %v7938_v28 }
0x148f   :  { %v7936_v26 = vmul.f32 1.442695, %v7930_v2  ;;  %v20268_v33 = vpop.f32.mrf.mxu0  ;;  %v7825_v16 = vpop.f32.mrf.mxu1 }
0x1491   :  { %18307 = vpow2.f32 %v7936_v26  ;;  %v20270_v20 = vpop.f32.mrf.mxu0  ;;  %v7827_v19 = vpop.f32.mrf.mxu1 }
0x1492   :  { %v18294_v17 = vpop.eup %18293 }
0x1493   :  { %17172 = vmatprep.subr.msk.mxu1 %vm488_vm2, %v18294_v17  ;;  %v18296_v40 = vpop.eup %18295  ;;  %v20272_v42 = vpop.f32.mrf.mxu0 }
0x1494   :  { %17173 = vmatpush3.xpose.msk.msra.mxu1 %vm488_vm2, %v18294_v17  ;;  %v18298_v58 = vpop.eup %18297  ;;  %v8062_v21 = vpack.c.bf16 %v18294_v17, %v18296_v40  ;;  %v7829_v30 = vpop.f32.mrf.mxu1 }
0x1495   :  { %17174 = vmatprep.subr.msk.mxu1 %vm488_vm2, %v18296_v40  ;;  %v20274_v31 = vpop.f32.mrf.mxu0 }
0x1496   :  { %v18300_v27 = vpop.eup %18299 }
0x1497   :  { %v8061_v46 = vpack.c.bf16 %v18300_v27, %v18298_v58  ;;  %v18302_v15 = vpop.eup %18301  ;;  %v20276_v62 = vpop.f32.mrf.mxu0 }
0x1498   :  { %17175 = vmatpush3.xpose.msk.msra.mxu1 %vm488_vm2, %v18296_v40 }
0x1499   :  { %17176 = vmatprep.subr.msk.mxu1 %vm488_vm2, %v18300_v27  ;;  %15414 = vmatmul.mubr.msk.bf16.vlgmr.msra.gmra.mxu0 %vm488_vm2, %v8061_v46  ;;  %v20278_v53 = vpop.f32.mrf.mxu0 }
0x149a   :  { %v18304_v43 = vpop.eup %18303  ;;  %8164 = vmatprep.mubr.bf16.mxu0 %v21972_v23 }
0x149b   :  { %v20233_v8 = vpack.c.bf16 %v18302_v15, %v18304_v43  ;;  %17180 = vmatprep.mubr.msk.f32.mxu1 %vm488_vm2, %v18304_v43  ;;  %v18306_v25 = vpop.eup %18305  ;;  %v20280_v55 = vpop.f32.mrf.mxu0 }
0x149c   :  { %17177 = vmatpush3.xpose.msk.msra.mxu1 %vm488_vm2, %v18300_v27 }
0x149d   :  { %17178 = vmatprep.subr.msk.mxu1 %vm488_vm2, %v18298_v58  ;;  %v20282_v47 = vpop.f32.mrf.mxu0 }
0x149e   :  { %v18308_v5 = vpop.eup %18307 }
0x149f   :  { %v20238_v38 = vpack.c.bf16 %v18306_v25, %v18308_v5  ;;  %v20284_v29 = vpop.f32.mrf.mxu0 }
0x14a0   :  { %17179 = vmatpush3.xpose.msk.msra.mxu1 %vm488_vm2, %v18298_v58 }
0x14a1   :  { %15415 = vmatmul.mubr.msk.bf16.gmra.mxu0 %vm488_vm2, %v8062_v21  ;;  %8083 = vmatprep.subr.bf16.mxu1 %v20243_v52  ;;  %v20286_v11 = vpop.f32.mrf.mxu0 }
0x14a2   :  { %8294 = vmatprep.mubr.bf16.mxu0 %v21972_v23 }
0x14a3   :  { %17181 = vmatmul.mubr.msk.f32.vlgmr.msra.gmra.mxu1 %vm488_vm2, %v18302_v15  ;;  %v20288_v1 = vpop.f32.mrf.mxu0 }
0x14a4   :  { %17183 = vmatprep.mubr.msk.f32.mxu1 %vm488_vm2, %v18308_v5  ;;  %8084 = vmatpush1.bf16.msra.mxu1 %v20250_v48 }
0x14a5   :  { %17186 = vmatprep.subr.bf16.mxu1 %v20254_v6 }
0x14a7   :  { %17184 = vmatmul.mubr.msk.f32.gmra.mxu1 %vm488_vm2, %v18306_v25 }
0x14a8   :  { %8101 = vmatprep.mubr.bf16.mxu1 %v21972_v23 }
0x14ab   :  { %15412 = vmatmul.mubr.msk.bf16.vlgmr.msra.gmra.mxu1 %vm488_vm2, %v8061_v46 }
0x14ac   :  { %8111 = vmatprep.mubr.bf16.mxu1 %v21972_v23  ;;  %17187 = vmatpush3.bf16.msra.mxu1 %v20254_v6 }
0x14b3   :  { %15413 = vmatmul.mubr.msk.bf16.gmra.mxu1 %vm488_vm2, %v8062_v21 }
0x14b4   :  { %17188 = vmatprep.mubr.msk.bf16.mxu1 %vm488_vm2, %v8061_v46 }
0x14bb   :  { %17189 = vmatmul.mubr.msk.bf16.vlgmr.msra.gmra.mxu1 %vm488_vm2, %v8062_v21 }
0x14bc   :  { %8347 = vmatprep.mubr.bf16.mxu1 %v21972_v23 }
0x1559   :  { %v8156_v36 = vpop.f32.mrf.mxu0 }
0x155a   :  { %v8226_v25 = vmul.f32 %v8156_v36, %v7813_v45 }
0x155b   :  { %v8158_v59 = vpop.f32.mrf.mxu0 }
0x155c   :  { %v8227_v26 = vmul.f32 %v8158_v59, %v7815_v18 }
0x155d   :  { %v8160_v12 = vpop.f32.mrf.mxu0 }
0x155e   :  { %v8231_v27 = vmul.f32 %v8160_v12, %v7817_v49 }
0x155f   :  { %v8162_v37 = vpop.f32.mrf.mxu0 }
0x1560   :  { %v8232_v60 = vmul.f32 %v8162_v37, %v7819_v44  ;;  %v8248_v21 = vpack.c.bf16 %v8231_v27, %v8226_v25  ;;  %v18542_v37 = vld [vmem:[%s19260_s30] sm:$0xff]  ;;  %v18552_v25 = vld [vmem:[%s19308_s4 + $0xe8] sm:$0xff]  }
0x1561   :  { %v8166_v51 = vpop.f32.mrf.mxu0 }
0x1562   :  { %v8236_v14 = vmul.f32 %v8166_v51, %v7823_v4  ;;  %v8249_v43 = vpack.c.bf16 %v8232_v60, %v8227_v26  ;;  %v18543_v60 = vld [vmem:[%s19260_s30 + $0x10] sm:$0xff] }
0x1563   :  { %v17182_v22 = vpop.f32.mrf.mxu1  ;;  %v8168_v35 = vpop.f32.mrf.mxu0 }
0x1564   :  { %v8050_v34 = vmax.f32 %v17182_v22, 1e-30  ;;  %v8237_v54 = vmul.f32 %v8168_v35, %v7825_v16 }
0x1565   :  { %v8030_v24 = vpop.f32.mrf.mxu1  ;;  %v8170_v10 = vpop.f32.mrf.mxu0 }
0x1566   :  { %18309 = vrcp.f32 %v8050_v34  ;;  %v8049_v13 = vmax.f32 %v8030_v24, 1e-30  ;;  %v8241_v39 = vmul.f32 %v8170_v10, %v7827_v19  ;;  %v18541_v19 = vld [vmem:[%s19260_s30 + $0x8] sm:$0xff] }
0x1567   :  { %v17185_v32 = vpop.f32.mrf.mxu1  ;;  %v8172_v61 = vpop.f32.mrf.mxu0 }
0x1568   :  { %18311 = vrcp.f32 %v8049_v13  ;;  %v8242_v28 = vmul.f32 %v8172_v61, %v7829_v30  ;;  %v8052_v17 = vmax.f32 %v17185_v32, 1e-30  ;;  %v8253_v46 = vpack.c.bf16 %v8241_v39, %v8236_v14  ;;  %v18544_v14 = vld [vmem:[%s19260_s30 + $0x18] sm:$0xff] }
0x1569   :  { %v8040_v2 = vpop.f32.mrf.mxu1 }
0x156a   :  { %v8254_v40 = vpack.c.bf16 %v8242_v28, %v8237_v54  ;;  %v8051_v58 = vmax.f32 %v8040_v2, 1e-30 }
0x156b   :  { %v8103_v15 = vpop.f32.mrf.mxu1 }
0x156c   :  { %18313 = vrcp.f32 %v8051_v58  ;;  %8327 = vmatprep.subr.bf16.mxu1 %v8254_v40  ;;  %v8224_v2 = vmul.f32 %v8103_v15, %v20266_v7 }
0x156d   :  { %v8105_v5 = vpop.f32.mrf.mxu1  ;;  %8328 = vmatpush1.bf16.msra.mxu1 %v8253_v46  ;;  %18315 = vrcp.f32 %v8052_v17 }
0x156e   :  { %8329 = vmatprep.subr.bf16.mxu1 %v8249_v43  ;;  %v18551_v43 = vld [vmem:[%s19308_s4 + $0xb0] sm:$0xff]  }
0x156f   :  { %v8107_v44 = vpop.f32.mrf.mxu1 }
0x1571   :  { %v8109_v4 = vpop.f32.mrf.mxu1  ;;  %8330 = vmatpush1.bf16.msra.mxu1 %v8248_v21  ;;  %v18554_v21 = vld [vmem:[%s19308_s4 + $0x68] sm:$0xff]  }
0x1572   :  { %8439 = vmatprep.subr.bf16.mxu1 %v20243_v52  ;;  %v8230_v34 = vmul.f32 %v8109_v4, %v20272_v42  ;;  %v18557_v4 = vld [vmem:[%s19308_s4 + $0x28] sm:$0xff]  }
0x1573   :  { %v18310_v18 = vpop.eup %18309  ;;  %v8113_v49 = vpop.f32.mrf.mxu1 }
0x1574   :  { %v8058_v12 = vmul.f32 %v18541_v19, %v18310_v18  ;;  %v8234_v39 = vmul.f32 %v8113_v49, %v20274_v31  ;;  %v18558_v18 = vld [vmem:[%s19308_s4 + $0x60] sm:$0xff]   ;;  %v18562_v19 = vld [vmem:[%s19308_s4 + $0x58] sm:$0xff]  }
0x1575   :  { %v18312_v16 = vpop.eup %18311  ;;  %v8115_v59 = vpop.f32.mrf.mxu1  ;;  %v18559_v49 = vld [vmem:[%s19308_s4 + $0xa0] sm:$0xff]  }
0x1576   :  { %v8057_v30 = vmul.f32 %v18542_v37, %v18312_v16  ;;  %v8235_v24 = vmul.f32 %v8115_v59, %v20276_v62  ;;  %v8229_v62 = vmul.f32 %v8107_v44, %v20270_v20  ;;  %v18556_v44 = vld [vmem:[%s19308_s4 + $0xe0] sm:$0xff]   ;;  %v18560_v16 = vld [vmem:[%s19308_s4 + $0xd8] sm:$0xff]  }
0x1577   :  { %v8117_v45 = vpop.f32.mrf.mxu1  ;;  %v18561_v59 = vld [vmem:[%s19308_s4 + $0x20] sm:$0xff]   ;;  %v18565_v37 = vld [vmem:[%s19308_s4 + $0x18] sm:$0xff]  }
0x1578   :  { %v8244_v36 = vpack.c.bf16 %v8058_v12, %v8057_v30  ;;  %v8239_v22 = vmul.f32 %v8117_v45, %v20278_v53  ;;  %v8225_v53 = vmul.f32 %v8105_v5, %v20268_v33  ;;  %v8246_v58 = vpack.c.bf16 %v8229_v62, %v8224_v2  ;;  %v18553_v5 = vld [vmem:[%s19308_s4 + $0x30] sm:$0xff]   ;;  %v18563_v12 = vld [vmem:[%s19308_s4 + $0x98] sm:$0xff]  }
0x1579   :  { %v18314_v51 = vpop.eup %18313  ;;  %v8119_v35 = vpop.f32.mrf.mxu1  ;;  %v18566_v30 = vld [vmem:[%s19308_s4 + $0x50] sm:$0xff]  }
0x157a   :  { %v8240_v10 = vmul.f32 %v8119_v35, %v20280_v55  ;;  %15420 = vmatmul.mubr.msk.bf16.vlgmr.msra.gmra.mxu1 %vm1468_vm4, %v8244_v36  ;;  %v18316_v13 = vpop.eup %18315  ;;  %v8059_v42 = vmul.f32 %v18543_v60, %v18314_v51  ;;  %v8251_v55 = vpack.c.bf16 %v8239_v22, %v8234_v39  ;;  %v8247_v28 = vpack.c.bf16 %v8230_v34, %v8225_v53  ;;  %v18567_v45 = vld [vmem:[%s19308_s4 + $0x90] sm:$0xff]   ;;  %v18570_v22 = vld [vmem:[%s19308_s4 + $0x48] sm:$0xff]   ;;  %v18572_v34 = vld [vmem:[%s19308_s4 + $0xc0] sm:$0xff]  }
0x157b   :  { %v17190_v32 = vpop.f32.mrf.mxu1  ;;  %8357 = vmatprep.mubr.bf16.mxu1 %v21972_v23  ;;  %8440 = vmatpush1.bf16.msra.mxu1 %v20250_v48  ;;  %v8060_v31 = vmul.f32 %v18544_v14, %v18316_v13  ;;  %v18569_v51 = vld [vmem:[%s19308_s4 + $0x10] sm:$0xff]   ;;  %v18571_v35 = vld [vmem:[%s19308_s4 + $0x88] sm:$0xff]   ;;  %v18575_v13 = vld [vmem:[%s19308_s4 + $0x80] sm:$0xff]  }
0x157c   :  { %v8252_v61 = vpack.c.bf16 %v8240_v10, %v8235_v24  ;;  %17200 = vmatprep.subr.bf16.mxu1 %v20254_v6  ;;  %v8238_v17 = vmul.f32 %v17190_v32, %v20282_v47  ;;  %v18545_v47 = vld [vmem:[%s19308_s4 + $0xf8] sm:$0xff]   ;;  %v18573_v24 = vld [vmem:[%s19308_s4 + $0x8] sm:$0xff]   ;;  %v18574_v10 = vld [vmem:[%s19308_s4 + $0x40] sm:$0xff]  }
0x157d   :  { %v8209_v54 = vpop.f32.mrf.mxu1  ;;  %v8245_v40 = vpack.c.bf16 %v8060_v31, %v8059_v42  ;;  %v18576_v39 = vld [vmem:[%s19308_s4] sm:$0xff]   ;;  %v18577_v32 = vld [vmem:[%s19308_s4 + $0x118] sm:$0xff]  }
0x157e   :  { %8274 = vmatprep.subr.bf16.mxu0 %v8252_v61  ;;  %v8228_v7 = vmul.f32 %v8209_v54, %v20284_v29  ;;  %v18547_v29 = vld [vmem:[%s19308_s4 + $0xb8] sm:$0xff]  }
0x157f   :  { %v17191_v26 = vpop.f32.mrf.mxu1  ;;  %8275 = vmatpush1.bf16.msra.mxu0 %v8251_v55 }
0x1580   :  { %v8243_v33 = vmul.f32 %v17191_v26, %v20286_v11  ;;  %8276 = vmatprep.subr.bf16.mxu0 %v8247_v28  ;;  %v18548_v11 = vld [vmem:[%s19308_s4 + $0xf0] sm:$0xff]  }
0x1581   :  { %v8212_v27 = vpop.f32.mrf.mxu1 }
0x1582   :  { %v8255_v46 = vpack.c.bf16 %v8243_v33, %v8238_v17  ;;  %v8233_v20 = vmul.f32 %v8212_v27, %v20288_v1  ;;  %15421 = vmatmul.mubr.msk.bf16.gmra.mxu1 %vm1468_vm4, %v8245_v40  ;;  %v18550_v1 = vld [vmem:[%s19308_s4 + $0x70] sm:$0xff]  }
0x1583   :  { %8277 = vmatpush1.bf16.msra.mxu0 %v8246_v58  ;;  %8457 = vmatprep.mubr.bf16.mxu1 %v21972_v23 }
0x1584   :  { %17192 = vmatprep.subr.bf16.mxu0 %v8255_v46  ;;  %v8250_v15 = vpack.c.bf16 %v8233_v20, %v8228_v7 }
0x1586   :  { %15418 = vmatmul.mubr.msk.bf16.vlgmr.msra.gmra.mxu0 %vm1468_vm4, %v8244_v36 }
0x1587   :  { %17193 = vmatpush3.bf16.msra.mxu0 %v8255_v46  ;;  %8304 = vmatprep.mubr.bf16.mxu0 %v21972_v23 }
0x1588   :  { %17194 = vmatprep.subr.bf16.mxu0 %v8250_v15 }
0x158a   :  { %15424 = vmatmul.mubr.msk.bf16.vlgmr.msra.gmra.mxu1 %vm488_vm2, %v20233_v8 }
0x158b   :  { %17195 = vmatpush3.bf16.msra.mxu0 %v8250_v15  ;;  %8467 = vmatprep.mubr.bf16.mxu1 %v21972_v23 }
0x158c   :  { %17201 = vmatpush3.bf16.msra.mxu1 %v20254_v6  ;;  %8492 = vmatprep.subr.bf16.mxu0 %v20203_v9  ;;  %v18546_v9 = vld [vmem:[%s19308_s4 + $0x78] sm:$0xff]  }
0x158d   :  { %16290 = vmatprep.subr.bf16.mxu1 %v18545_v47 }
0x158e   :  { %15419 = vmatmul.mubr.msk.bf16.gmra.mxu0 %vm1468_vm4, %v8245_v40 }
0x158f   :  { %17196 = vmatprep.mubr.msk.bf16.mxu0 %vm1468_vm4, %v8244_v36  ;;  %v18568_v36 = vld [vmem:[%s19308_s4 + $0xc8] sm:$0xff]  }
0x1592   :  { %15425 = vmatmul.mubr.msk.bf16.gmra.mxu1 %vm488_vm2, %v20238_v38 }
0x1593   :  { %17202 = vmatprep.mubr.msk.bf16.mxu1 %vm488_vm2, %v20233_v8 }
0x1596   :  { %17197 = vmatmul.mubr.msk.bf16.vlgmr.msra.gmra.mxu0 %vm1468_vm4, %v8245_v40 }
0x1597   :  { %8493 = vmatpush1.bf16.msra.mxu0 %v20209_v50  ;;  %8510 = vmatprep.mubr.bf16.mxu0 %v21972_v23  ;;  %v18549_v50 = vld [vmem:[%s19308_s4 + $0x38] sm:$0xff]  }
0x1598   :  { %16262 = vmatprep.subr.bf16.mxu0 %v18546_v9 }
0x159a   :  { %17203 = vmatmul.mubr.msk.bf16.vlgmr.msra.gmra.mxu1 %vm488_vm2, %v20238_v38 }
0x159b   :  { %16291 = vmatpush3.bf16.msra.mxu1 %v18547_v29 }
0x159c   :  { %16292 = vmatprep.subr.bf16.mxu1 %v18548_v11 }
0x159e   :  { %15426 = vmatmul.mubr.msk.bf16.vlgmr.msra.gmra.mxu0 %vm488_vm2, %v20233_v8  ;;  %v18555_v8 = vld [vmem:[%s19308_s4 + $0xa8] sm:$0xff]  }
0x159f   :  { %8520 = vmatprep.mubr.bf16.mxu0 %v21972_v23  ;;  %16263 = vmatpush3.bf16.msra.mxu0 %v18549_v50 }
0x15a0   :  { %16264 = vmatprep.subr.bf16.mxu0 %v18550_v1  ;;  %16293 = vmatpush3.bf16.msra.mxu1 %v18551_v43 }
0x15a1   :  { %16294 = vmatprep.subr.bf16.mxu1 %v18552_v25 }
0x15a3   :  { %16265 = vmatpush3.bf16.msra.mxu0 %v18553_v5 }
0x15a4   :  { %16266 = vmatprep.subr.bf16.mxu0 %v18554_v21  ;;  %16295 = vmatpush3.bf16.msra.mxu1 %v18555_v8 }
0x15a5   :  { %16296 = vmatprep.subr.bf16.mxu1 %v18556_v44 }
0x15a6   :  { %15427 = vmatmul.mubr.msk.bf16.gmra.mxu0 %vm488_vm2, %v20238_v38  ;;  %v18564_v38 = vld [vmem:[%s19308_s4 + $0xd0] sm:$0xff]  }
0x15a7   :  { %16267 = vmatpush3.bf16.msra.mxu0 %v18557_v4  ;;  %v18578_v4 = vld [vmem:[%s19308_s4 + $0x110] sm:$0xff]  }
0x15a8   :  { %16268 = vmatprep.subr.bf16.mxu0 %v18558_v18  ;;  %16297 = vmatpush3.bf16.msra.mxu1 %v18559_v49 }
0x15a9   :  { %16298 = vmatprep.subr.bf16.mxu1 %v18560_v16 }
0x15ab   :  { %16269 = vmatpush3.bf16.msra.mxu0 %v18561_v59 }
0x15ac   :  { %16270 = vmatprep.subr.bf16.mxu0 %v18562_v19  ;;  %16299 = vmatpush3.bf16.msra.mxu1 %v18563_v12 }
0x15ad   :  { %16300 = vmatprep.subr.bf16.mxu1 %v18564_v38 }
0x15af   :  { %16271 = vmatpush3.bf16.msra.mxu0 %v18565_v37 }
0x15b0   :  { %16272 = vmatprep.subr.bf16.mxu0 %v18566_v30  ;;  %16301 = vmatpush3.bf16.msra.mxu1 %v18567_v45  ;;  %v18579_v45 = vld [vmem:[%s19308_s4 + $0x108] sm:$0xff]  }
0x15b1   :  { %16302 = vmatprep.subr.bf16.mxu1 %v18568_v36 }
0x15b3   :  { %16273 = vmatpush3.bf16.msra.mxu0 %v18569_v51 }
0x15b4   :  { %16274 = vmatprep.subr.bf16.mxu0 %v18570_v22  ;;  %16303 = vmatpush3.bf16.msra.mxu1 %v18571_v35 }
0x15b5   :  { %16304 = vmatprep.subr.bf16.mxu1 %v18572_v34 }
0x15b7   :  { %16275 = vmatpush3.bf16.msra.mxu0 %v18573_v24  ;;  %v18580_v24 = vld [vmem:[%s19308_s4 + $0x100] sm:$0xff]  }
0x15b8   :  { %16276 = vmatprep.subr.bf16.mxu0 %v18574_v10  ;;  %16305 = vmatpush3.bf16.msra.mxu1 %v18575_v13 }
0x15bb   :  { %16277 = vmatpush3.bf16.msra.mxu0 %v18576_v39 }
0x15bc   :  { %17206 = vmatprep.subr.bf16.mxu0 %v18577_v32 }
0x163a   :  { %v20369_v53 = vpop.f32.mrf.mxu1 }
0x163c   :  { %v20371_v61 = vpop.f32.mrf.mxu1 }
0x163e   :  { %v20373_v60 = vpop.f32.mrf.mxu1 }
0x1640   :  { %v20375_v42 = vpop.f32.mrf.mxu1 }
0x1642   :  { %v20377_v62 = vpop.f32.mrf.mxu1 }
0x1644   :  { %v20379_v55 = vpop.f32.mrf.mxu1 }
0x1646   :  { %v8296_v54 = vpop.f32.mrf.mxu0  ;;  %v20381_v28 = vpop.f32.mrf.mxu1 }
0x1648   :  { %v8298_v14 = vpop.f32.mrf.mxu0  ;;  %v20383_v31 = vpop.f32.mrf.mxu1 }
0x164a   :  { %v8300_v2 = vpop.f32.mrf.mxu0  ;;  %v8459_v26 = vpop.f32.mrf.mxu1 }
0x164b   :  { %v8580_v47 = vmul.f32 %v8459_v26, %v8296_v54 }
0x164c   :  { %v8302_v17 = vpop.f32.mrf.mxu0  ;;  %v8461_v33 = vpop.f32.mrf.mxu1 }
0x164d   :  { %v8581_v7 = vmul.f32 %v8461_v33, %v8298_v14 }
0x164e   :  { %v8306_v40 = vpop.f32.mrf.mxu0  ;;  %v8463_v58 = vpop.f32.mrf.mxu1 }
0x164f   :  { %v8585_v27 = vmul.f32 %v8463_v58, %v8300_v2 }
0x1650   :  { %v8308_v46 = vpop.f32.mrf.mxu0  ;;  %v8465_v20 = vpop.f32.mrf.mxu1 }
0x1651   :  { %v8586_v15 = vmul.f32 %v8465_v20, %v8302_v17  ;;  %v8600_v50 = vpack.c.bf16 %v8585_v27, %v8580_v47 }
0x1652   :  { %v8310_v9 = vpop.f32.mrf.mxu0  ;;  %v8469_v29 = vpop.f32.mrf.mxu1 }
0x1653   :  { %v8601_v11 = vpack.c.bf16 %v8586_v15, %v8581_v7  ;;  %v8590_v16 = vmul.f32 %v8469_v29, %v8306_v40  ;;  %v18031_v29 = vld [vmem:[%s20409_s9 + $0x38] sm:$0xff]  }
0x1654   :  { %v8312_v1 = vpop.f32.mrf.mxu0  ;;  %v8471_v43 = vpop.f32.mrf.mxu1  ;;  %17218 = vmatprep.subr.bf16.mxu1 %v18031_v29 }
0x1655   :  { %8655 = vmatprep.mubr.bf16.mxu0 %v8601_v11  ;;  %v8591_v18 = vmul.f32 %v8471_v43, %v8308_v46  ;;  %v18032_v11 = vld [vmem:[%s20402_s5 + $0xc8] ss:$20 sps:$4 sm:$0xff]   ;;  %v18038_v43 = vld [vmem:[%s20402_s5 + $0xa4] ss:$20 sps:$4 sm:$0xff]  }
0x1656   :  { %v17198_v25 = vpop.f32.mrf.mxu0  ;;  %v8473_v5 = vpop.f32.mrf.mxu1  ;;  %8656 = vmatmul.mubr.bf16.vlgmr.msra.gmra.mxu0 %v8600_v50  ;;  %v18034_v50 = vld [vmem:[%s20402_s5 + $0xcc] ss:$20 sps:$4 sm:$0xff]  }
0x1657   :  { %17207 = vmatpush3.bf16.msra.mxu0 %v18577_v32  ;;  %v8595_v21 = vmul.f32 %v8473_v5, %v8310_v9  ;;  %v18039_v5 = vld [vmem:[%s20409_s9 + $0x28] sm:$0xff]  }
0x1658   :  { %v8402_v8 = vpop.f32.mrf.mxu0  ;;  %v8475_v44 = vpop.f32.mrf.mxu1  ;;  %17208 = vmatprep.subr.bf16.mxu0 %v18578_v4 }
0x1659   :  { %v8596_v49 = vmul.f32 %v8475_v44, %v8312_v1  ;;  %v8605_v38 = vpack.c.bf16 %v8595_v21, %v8590_v16  ;;  %v18035_v1 = vld [vmem:[%s20409_s9 + $0x30] sm:$0xff]   ;;  %v18040_v21 = vld [vmem:[%s20402_s5 + $0x128] ss:$20 sps:$4 sm:$0xff]   ;;  %v18045_v44 = vld [vmem:[%s20402_s5 + $0x124] ss:$20 sps:$4 sm:$0xff]  }
0x165a   :  { %v17199_v59 = vpop.f32.mrf.mxu0  ;;  %v17204_v19 = vpop.f32.mrf.mxu1 }
0x165b   :  { %v8606_v12 = vpack.c.bf16 %v8596_v49, %v8591_v18  ;;  %17209 = vmatpush3.bf16.msra.mxu0 %v18578_v4  ;;  %v8594_v39 = vmul.f32 %v17204_v19, %v17198_v25  ;;  %v18036_v25 = vld [vmem:[%s20402_s5 + $0xa0] ss:$20 sps:$4 sm:$0xff]  }
0x165c   :  { %v8405_v37 = vpop.f32.mrf.mxu0  ;;  %v8565_v30 = vpop.f32.mrf.mxu1  ;;  %17210 = vmatprep.subr.bf16.mxu0 %v18579_v45 }
0x165d   :  { %8663 = vmatprep.mubr.bf16.mxu0 %v8606_v12  ;;  %v8584_v10 = vmul.f32 %v8565_v30, %v8402_v8  ;;  %v18041_v8 = vld [vmem:[%s20409_s9 + $0x20] sm:$0xff]  }
0x165e   :  { %v8512_v36 = vpop.f32.mrf.mxu0  ;;  %v17205_v51 = vpop.f32.mrf.mxu1  ;;  %8664 = vmatmul.mubr.bf16.gmra.mxu0 %v8605_v38 }
0x165f   :  { %17211 = vmatpush3.bf16.msra.mxu0 %v18579_v45  ;;  %v8599_v22 = vmul.f32 %v17205_v51, %v17199_v59  ;;  %v8582_v40 = vmul.f32 %v8512_v36, %v20369_v53  ;;  %v15430_v36 = vld [vmem:[%s14904_s12] ss:$0 sm:$0xff]  ;;  %s18735_s12 = smov 49  }
0x1660   :  { %v8514_v35 = vpop.f32.mrf.mxu0  ;;  %v8568_v34 = vpop.f32.mrf.mxu1  ;;  %17212 = vmatprep.subr.bf16.mxu0 %v18580_v24  ;;  %s14920_s15 = sld [smem:[%s21939_s0 + %s18735_s12]]  }
0x1661   :  { %v8589_v13 = vmul.f32 %v8568_v34, %v8405_v37  ;;  %v8609_v14 = vpack.c.bf16 %v8599_v22, %v8594_v39  ;;  %v8583_v17 = vmul.f32 %v8514_v35, %v20371_v61 }
0x1662   :  { %v8516_v32 = vpop.f32.mrf.mxu0 }
0x1663   :  { %v8604_v54 = vpack.c.bf16 %v8589_v13, %v8584_v10  ;;  %17213 = vmatpush3.bf16.msra.mxu0 %v18580_v24  ;;  %v8587_v2 = vmul.f32 %v8516_v32, %v20373_v60 }
0x1664   :  { %v8518_v26 = vpop.f32.mrf.mxu0 }
0x1665   :  { %v8588_v33 = vmul.f32 %v8518_v26, %v20375_v42  ;;  %17214 = vmatprep.mubr.msk.bf16.mxu0 %vm976_vm3, %v8604_v54  ;;  %v8602_v46 = vpack.c.bf16 %v8587_v2, %v8582_v40 }
0x1666   :  { %v8522_v58 = vpop.f32.mrf.mxu0  ;;  %17215 = vmatmul.mubr.msk.bf16.vlgmr.msra.gmra.mxu0 %vm976_vm3, %v8609_v14 }
0x1667   :  { %v8603_v27 = vpack.c.bf16 %v8588_v33, %v8583_v17  ;;  %9051 = vmatprep.mubr.bf16.mxu0 %v21972_v23  ;;  %v8592_v53 = vmul.f32 %v8522_v58, %v20377_v62  ;;  %v18030_v62 = vld [vmem:[%s20402_s5 + $0xf4] ss:$20 sps:$4 sm:$0xff]  }
0x1668   :  { %v8524_v20 = vpop.f32.mrf.mxu0 }
0x1669   :  { %8704 = vmatprep.mubr.bf16.mxu1 %v8603_v27  ;;  %v8593_v42 = vmul.f32 %v8524_v20, %v20379_v55  ;;  %v18027_v55 = vld [vmem:[%s20402_s5 + $0x11c] ss:$20 sps:$4 sm:$0xff]  }
0x166a   :  { %v8526_v7 = vpop.f32.mrf.mxu0  ;;  %8705 = vmatmul.mubr.bf16.vlgmr.msra.gmra.mxu1 %v8602_v46  ;;  %9027 = vmatprep.subr.bf16.mxu0 %v18027_v55 }
0x166b   :  { %v8597_v60 = vmul.f32 %v8526_v7, %v20381_v28  ;;  %v18025_v28 = vld [vmem:[%s20402_s5 + $0x118] ss:$20 sps:$4 sm:$0xff]   ;;  %17219 = vmatpush3.bf16.msra.mxu1 %v18031_v29  ;;  %v18043_v29 = vld [vmem:[%s20402_s5 + $0x120] ss:$20 sps:$4 sm:$0xff]  }
0x166c   :  { %v8528_v61 = vpop.f32.mrf.mxu0  ;;  %9028 = vmatpush1.bf16.msra.mxu0 %v18025_v28  ;;  %17220 = vmatprep.subr.bf16.mxu1 %v18035_v1  ;;  %v18046_v28 = vld [vmem:[%s20402_s5 + $0xd8] ss:$20 sps:$4 sm:$0xff]  }
0x166d   :  { %v8598_v15 = vmul.f32 %v8528_v61, %v20383_v31  ;;  %v8607_v9 = vpack.c.bf16 %v8597_v60, %v8592_v53  ;;  %v18028_v31 = vld [vmem:[%s20402_s5 + $0xf0] ss:$20 sps:$4 sm:$0xff]   ;;  %9029 = vmatprep.subr.bf16.mxu0 %v18030_v62 }
0x166f   :  { %v8608_v47 = vpack.c.bf16 %v8598_v15, %v8593_v42  ;;  %17221 = vmatpush3.bf16.msra.mxu1 %v18035_v1  ;;  %v18042_v42 = vld [vmem:[%s20402_s5 + $0x100] ss:$20 sps:$4 sm:$0xff]   ;;  %v18050_v1 = vld [vmem:[%s20402_s5 + $0xb0] ss:$20 sps:$4 sm:$0xff]  }
0x1670   :  { %9030 = vmatpush1.bf16.msra.mxu0 %v18028_v31  ;;  %17222 = vmatprep.subr.bf16.mxu1 %v18039_v5 }
0x1671   :  { %8712 = vmatprep.mubr.bf16.mxu1 %v8608_v47  ;;  %9031 = vmatprep.subr.bf16.mxu0 %v18034_v50  ;;  %v18049_v50 = vld [vmem:[%s20402_s5 + $0xfc] ss:$20 sps:$4 sm:$0xff]  }
0x1672   :  { %8713 = vmatmul.mubr.bf16.gmra.mxu1 %v8607_v9 }
0x1673   :  { %17223 = vmatpush3.bf16.msra.mxu1 %v18039_v5  ;;  %v18056_v5 = vld [vmem:[%s20402_s5 + $0x7c] ss:$20 sps:$4 sm:$0xff]  }
0x1674   :  { %9032 = vmatpush1.bf16.msra.mxu0 %v18032_v11  ;;  %17224 = vmatprep.subr.bf16.mxu1 %v18041_v8 }
0x1675   :  { %9033 = vmatprep.subr.bf16.mxu0 %v18038_v43  ;;  %v18047_v43 = vld [vmem:[%s20402_s5 + $0xf8] ss:$20 sps:$4 sm:$0xff]  }
0x1677   :  { %17225 = vmatpush3.bf16.msra.mxu1 %v18041_v8  ;;  %v18054_v8 = vld [vmem:[%s20402_s5 + $0x78] ss:$20 sps:$4 sm:$0xff]  }
0x1678   :  { %9034 = vmatpush1.bf16.msra.mxu0 %v18036_v25  ;;  %9080 = vmatprep.subr.bf16.mxu1 %v18045_v44  ;;  %v18053_v25 = vld [vmem:[%s20402_s5 + $0xd4] ss:$20 sps:$4 sm:$0xff]   ;;  %v18059_v44 = vld [vmem:[%s20402_s5 + $0xac] ss:$20 sps:$4 sm:$0xff]  }
0x1679   :  { %17230 = vmatprep.subr.bf16.mxu0 %v18040_v21 }
0x1716   :  { %v16278_v4 = vpop.f32.mrf.mxu0 }
0x1718   :  { %v16279_v18 = vpop.f32.mrf.mxu0 }
0x1719   :  { %v16280_v45 = vadd.f32 %v16279_v18, %v16278_v4  ;;  %v18062_v4 = vld [vmem:[%s20402_s5 + $0x54] ss:$20 sps:$4 sm:$0xff]  }
0x171a   :  { %v16281_v49 = vpop.f32.mrf.mxu0  ;;  %v18057_v18 = vld [vmem:[%s20402_s5 + $0xa8] ss:$20 sps:$4 sm:$0xff]  }
0x171b   :  { %v8658_v10 = vadd.f32 %v16280_v45, %v15430_v36  ;;  %v18072_v45 = vld [vmem:[%s20402_s5 + $0x88] ss:$20 sps:$4 sm:$0xff]  }
0x171c   :  { %v16282_v16 = vpop.f32.mrf.mxu0 }
0x171d   :  { %v16283_v35 = vadd.f32 %v16282_v16, %v16281_v49  ;;  %v18060_v49 = vld [vmem:[%s20402_s5 + $0x50] ss:$20 sps:$4 sm:$0xff]   ;;  %v18063_v16 = vld [vmem:[%s20409_s9 + $0x18] sm:$0xff]  }
0x171e   :  { %v16284_v59 = vpop.f32.mrf.mxu0 }
0x171f   :  { %v8661_v32 = vadd.f32 %v16283_v35, %v15430_v36  ;;  %v18078_v35 = vld [vmem:[%s20402_s5 + $0x38] ss:$20 sps:$4 sm:$0xff]  }
0x1720   :  { %v16285_v19 = vpop.f32.mrf.mxu0 }
0x1721   :  { %v16286_v26 = vadd.f32 %v16285_v19, %v16284_v59  ;;  %v18066_v59 = vld [vmem:[%s20402_s5 + $0x2c] ss:$20 sps:$4 sm:$0xff]   ;;  %v18064_v19 = vld [vmem:[%s20402_s5 + $0x28] ss:$20 sps:$4 sm:$0xff]  }
0x1722   :  { %v16287_v12 = vpop.f32.mrf.mxu0 }
0x1723   :  { %v8666_v60 = vadd.f32 %v16286_v26, %v15430_v36 }
0x1724   :  { %v16288_v38 = vpop.f32.mrf.mxu0 }
0x1725   :  { %v16289_v58 = vadd.f32 %v16288_v38, %v16287_v12  ;;  %v18067_v12 = vld [vmem:[%s20409_s9 + $0x10] sm:$0xff]   ;;  %v18070_v38 = vld [vmem:[%s20402_s5 + $0x4] ss:$20 sps:$4 sm:$0xff]  }
0x1726   :  { %v17216_v37 = vpop.f32.mrf.mxu0 }
0x1727   :  { %v8669_v53 = vadd.f32 %v16289_v58, %v15430_v36  ;;  %v18073_v36 = vld [vmem:[%s20409_s9] sm:$0xff]  }
0x1728   :  { %v8755_v51 = vpop.f32.mrf.mxu0 }
0x172a   :  { %v16306_v30 = vpop.f32.mrf.mxu1  ;;  %v17217_v13 = vpop.f32.mrf.mxu0 }
0x172c   :  { %v16307_v22 = vpop.f32.mrf.mxu1  ;;  %v8758_v33 = vpop.f32.mrf.mxu0 }
0x172d   :  { %v16308_v34 = vadd.f32 %v16307_v22, %v16306_v30  ;;  %v18071_v30 = vld [vmem:[%s20409_s9 + $0x8] sm:$0xff]   ;;  %v18077_v22 = vld [vmem:[%s20402_s5 + $0x84] ss:$20 sps:$4 sm:$0xff]   ;;  %s18734_s9 = smov 47  }
0x172e   :  { %v16309_v24 = vpop.f32.mrf.mxu1  ;;  %s14918_s8 = sld [smem:[%s21939_s0 + %s18734_s9]]  }
0x172f   :  { %v8707_v54 = vadd.f32 %v16308_v34, %v8658_v10  ;;  %v18075_v34 = vld [vmem:[%s20402_s5 + $0x80] ss:$20 sps:$4 sm:$0xff]   ;;  %v18082_v10 = vld [vmem:[%s20402_s5 + $0x10] ss:$20 sps:$4 sm:$0xff]  }
0x1730   :  { %v16310_v39 = vpop.f32.mrf.mxu1 }
0x1731   :  { %v16311_v14 = vadd.f32 %v16310_v39, %v16309_v24  ;;  %v8756_v27 = vadd.f32 %v8755_v51, %v8707_v54  ;;  %v18074_v51 = vld [vmem:[%s20402_s5 + $0x60] ss:$20 sps:$4 sm:$0xff]   ;;  %v18081_v24 = vld [vmem:[%s20402_s5 + $0x5c] ss:$20 sps:$4 sm:$0xff]  }
0x1732   :  { %v16312_v2 = vpop.f32.mrf.mxu1  ;;  %v18085_v39 = vld [vmem:[%s20402_s5 + $0x34] ss:$20 sps:$4 sm:$0xff]   ;;  %v18088_v54 = vld [vmem:[%s20402_s5 + $0xc] ss:$20 sps:$4 sm:$0xff]  }
0x1733   :  { %v8710_v17 = vadd.f32 %v16311_v14, %v8661_v32  ;;  %v18083_v32 = vld [vmem:[%s20402_s5 + $0x30] ss:$20 sps:$4 sm:$0xff]   ;;  %v18086_v14 = vld [vmem:[%s20402_s5 + $0x8] ss:$20 sps:$4 sm:$0xff]  }
0x1734   :  { %v16313_v40 = vpop.f32.mrf.mxu1 }
0x1735   :  { %v8759_v46 = vadd.f32 %v8758_v33, %v8710_v17  ;;  %v16314_v20 = vadd.f32 %v16313_v40, %v16312_v2 }
0x1736   :  { %v16315_v7 = vpop.f32.mrf.mxu1 }
0x1737   :  { %v8834_v61 = vpack.c.bf16 %v8759_v46, %v8756_v27  ;;  %v8715_v47 = vadd.f32 %v16314_v20, %v8666_v60  ;;  %v15497_v20 = vld [vmem:[%s14907_s16] ss:$0 sm:$0xff]  ;;  %s18736_s16 = smov 50  }
0x1738   :  { %v16316_v15 = vpop.f32.mrf.mxu1  ;;  %s21923_s17 = sld [smem:[%s21939_s0 + %s18736_s16]]  }
0x1739   :  { %v16317_v9 = vadd.f32 %v16316_v15, %v16315_v7  ;;  %17226 = vmatprep.mubr.msk.bf16.mxu1 %vm976_vm3, %v8834_v61  ;;  %15459 = vmatmul.mubr.msk.bf16.vlgmr.msra.gmra.mxu0 %vm976_vm3, %v8834_v61  ;;  %v8764_v62 = vadd.f32 %v17216_v37, %v8715_v47  ;;  %v18068_v37 = vld [vmem:[%s20402_s5] ss:$20 sps:$4 sm:$0xff]  }
0x173a   :  { %17231 = vmatpush3.bf16.msra.mxu0 %v18040_v21  ;;  %9061 = vmatprep.mubr.bf16.mxu0 %v21972_v23  ;;  %v18051_v21 = vld [vmem:[%s20402_s5 + $0xd0] ss:$20 sps:$4 sm:$0xff]  }
0x173b   :  { %v8718_v55 = vadd.f32 %v16317_v9, %v8669_v53  ;;  %17232 = vmatprep.subr.bf16.mxu0 %v18042_v42 }
0x173d   :  { %v8767_v31 = vadd.f32 %v17217_v13, %v8718_v55  ;;  %v18079_v13 = vld [vmem:[%s20402_s5 + $0x58] ss:$20 sps:$4 sm:$0xff]   ;;  %s18733_s5 = smov 45  }
0x173e   :  { %17233 = vmatpush3.bf16.msra.mxu0 %v18042_v42  ;;  %s14916_s7 = sld [smem:[%s21939_s0 + %s18733_s5]]  }
0x173f   :  { %v8835_v11 = vpack.c.bf16 %v8767_v31, %v8764_v62  ;;  %17234 = vmatprep.subr.bf16.mxu0 %v18046_v28 }
0x1741   :  { %17227 = vmatmul.mubr.msk.bf16.vlgmr.msra.gmra.mxu1 %vm976_vm3, %v8835_v11  ;;  %15460 = vmatmul.mubr.msk.bf16.gmra.mxu0 %vm976_vm3, %v8835_v11 }
0x1742   :  { %9081 = vmatpush1.bf16.msra.mxu1 %v18043_v29  ;;  %17235 = vmatpush3.bf16.msra.mxu0 %v18046_v28 }
0x1743   :  { %17238 = vmatprep.mubr.msk.bf16.mxu0 %vm976_vm3, %v8834_v61  ;;  %9082 = vmatprep.subr.bf16.mxu1 %v18049_v50 }
0x1744   :  { %17236 = vmatprep.subr.bf16.mxu0 %v18050_v1  ;;  %9104 = vmatprep.mubr.bf16.mxu1 %v21972_v23 }
0x1746   :  { %9083 = vmatpush1.bf16.msra.mxu1 %v18047_v43  ;;  %17237 = vmatpush3.bf16.msra.mxu0 %v18050_v1 }
0x1747   :  { %9084 = vmatprep.subr.bf16.mxu1 %v18053_v25  ;;  %9365 = vmatprep.subr.bf16.mxu0 %v18056_v5 }
0x1749   :  { %17239 = vmatmul.mubr.msk.bf16.vlgmr.msra.gmra.mxu0 %vm976_vm3, %v8835_v11 }
0x174a   :  { %9085 = vmatpush1.bf16.msra.mxu1 %v18051_v21  ;;  %9366 = vmatpush1.bf16.msra.mxu0 %v18054_v8 }
0x174b   :  { %9086 = vmatprep.subr.bf16.mxu1 %v18059_v44  ;;  %9367 = vmatprep.subr.bf16.mxu0 %v18062_v4 }
0x174c   :  { %9389 = vmatprep.mubr.bf16.mxu0 %v21972_v23 }
0x174e   :  { %9087 = vmatpush1.bf16.msra.mxu1 %v18057_v18  ;;  %9368 = vmatpush1.bf16.msra.mxu0 %v18060_v49 }
0x174f   :  { %17242 = vmatprep.subr.bf16.mxu1 %v18063_v16  ;;  %9369 = vmatprep.subr.bf16.mxu0 %v18066_v59 }
0x1751   :  { %15461 = vmatmul.mubr.msk.bf16.vlgmr.msra.gmra.mxu1 %vm976_vm3, %v8834_v61 }
0x1752   :  { %17243 = vmatpush3.bf16.msra.mxu1 %v18063_v16  ;;  %9370 = vmatpush1.bf16.msra.mxu0 %v18064_v19 }
0x1753   :  { %17244 = vmatprep.subr.bf16.mxu1 %v18067_v12  ;;  %9371 = vmatprep.subr.bf16.mxu0 %v18070_v38 }
0x1754   :  { %9114 = vmatprep.mubr.bf16.mxu1 %v21972_v23 }
0x1756   :  { %17245 = vmatpush3.bf16.msra.mxu1 %v18067_v12  ;;  %9372 = vmatpush1.bf16.msra.mxu0 %v18068_v37 }
0x1757   :  { %17246 = vmatprep.subr.bf16.mxu1 %v18071_v30  ;;  %17254 = vmatprep.subr.bf16.mxu0 %v18072_v45 }
0x1759   :  { %15462 = vmatmul.mubr.msk.bf16.gmra.mxu1 %vm976_vm3, %v8835_v11  ;;  %15491 = vmatmul.mubr.msk.bf16.vlgmr.msra.gmra.mxu0 %vm976_vm3, %v19395_v0 }
0x175a   :  { %17247 = vmatpush3.bf16.msra.mxu1 %v18071_v30  ;;  %17250 = vmatprep.mubr.msk.bf16.mxu1 %vm976_vm3, %v19395_v0 }
0x175b   :  { %17255 = vmatpush3.bf16.msra.mxu0 %v18072_v45  ;;  %17248 = vmatprep.subr.bf16.mxu1 %v18073_v36 }
0x175c   :  { %17256 = vmatprep.subr.bf16.mxu0 %v18074_v51  ;;  %9399 = vmatprep.mubr.bf16.mxu0 %v21972_v23 }
0x175e   :  { %17249 = vmatpush3.bf16.msra.mxu1 %v18073_v36 }
0x175f   :  { %17257 = vmatpush3.bf16.msra.mxu0 %v18074_v51  ;;  %9418 = vmatprep.subr.bf16.mxu1 %v18077_v22 }
0x1760   :  { %17258 = vmatprep.subr.bf16.mxu0 %v18078_v35 }
0x1761   :  { %17251 = vmatmul.mubr.msk.bf16.vlgmr.msra.gmra.mxu1 %vm976_vm3, %v19390_v56  ;;  %15492 = vmatmul.mubr.msk.bf16.gmra.mxu0 %vm976_vm3, %v19390_v56 }
0x1762   :  { %9419 = vmatpush1.bf16.msra.mxu1 %v18075_v34  ;;  %17262 = vmatprep.mubr.msk.bf16.mxu0 %vm976_vm3, %v19395_v0 }
0x1763   :  { %17259 = vmatpush3.bf16.msra.mxu0 %v18078_v35  ;;  %9420 = vmatprep.subr.bf16.mxu1 %v18081_v24 }
0x1764   :  { %17260 = vmatprep.subr.bf16.mxu0 %v18082_v10  ;;  %9442 = vmatprep.mubr.bf16.mxu1 %v21972_v23 }
0x1766   :  { %9421 = vmatpush1.bf16.msra.mxu1 %v18079_v13 }
0x1767   :  { %17261 = vmatpush3.bf16.msra.mxu0 %v18082_v10  ;;  %9422 = vmatprep.subr.bf16.mxu1 %v18085_v39 }
0x1768   :  { %9714 = vmatprep.subr.bf16.mxu0 %v20243_v52 }
0x176a   :  { %17263 = vmatmul.mubr.msk.bf16.vlgmr.msra.gmra.mxu0 %vm976_vm3, %v19390_v56  ;;  %9423 = vmatpush1.bf16.msra.mxu1 %v18083_v32 }
0x176b   :  { %9424 = vmatprep.subr.bf16.mxu1 %v18088_v54  ;;  %9715 = vmatpush1.bf16.msra.mxu0 %v20250_v48 }
0x176c   :  { %9732 = vmatprep.mubr.bf16.mxu0 %v21972_v23  ;;  %17280 = vmatprep.subr.bf16.mxu0 %v20254_v6 }
0x176e   :  { %9425 = vmatpush1.bf16.msra.mxu1 %v18086_v14 }
0x1771   :  { %15493 = vmatmul.mubr.msk.bf16.vlgmr.msra.gmra.mxu1 %vm976_vm3, %v19395_v0 }
0x1772   :  { %9452 = vmatprep.mubr.bf16.mxu1 %v21972_v23 }
0x1779   :  { %15494 = vmatmul.mubr.msk.bf16.gmra.mxu1 %vm976_vm3, %v19390_v56 }
0x1801   :  { %v17228_v52 = vpop.f32.mrf.mxu1 }
0x1803   :  { %v8900_v2 = vpop.f32.mrf.mxu1 }
0x1805   :  { %v17229_v26 = vpop.f32.mrf.mxu1 }
0x1807   :  { %v8903_v17 = vpop.f32.mrf.mxu1 }
0x1811   :  { %v20495_v33 = vpop.f32.mrf.mxu1 }
0x1813   :  { %v20497_v48 = vpop.f32.mrf.mxu1 }
0x1815   :  { %v20499_v40 = vpop.f32.mrf.mxu1 }
0x1817   :  { %v20501_v6 = vpop.f32.mrf.mxu1 }
0x1819   :  { %v20503_v58 = vpop.f32.mrf.mxu1 }
0x181b   :  { %v20508_v56 = vpop.f32.mrf.mxu1 }
0x181d   :  { %v20510_v0 = vpop.f32.mrf.mxu1 }
0x181f   :  { %v20512_v27 = vpop.f32.mrf.mxu1 }
0x1821   :  { %v17252_v46 = vpop.f32.mrf.mxu1 }
0x1822   :  { %v9247_v7 = vadd.f32 %v17252_v46, %v17228_v52 }
0x1823   :  { %v9238_v60 = vpop.f32.mrf.mxu1 }
0x1824   :  { %v9239_v61 = vadd.f32 %v9238_v60, %v8900_v2  ;;  %v9521_v42 = vadd.f32 %v15497_v20, %v9247_v7  ;;  %v9553_v5 = vsel %vm488_vm2, %v9247_v7, inf }
0x1825   :  { %v17253_v15 = vpop.f32.mrf.mxu1 }
0x1826   :  { %v9250_v53 = vadd.f32 %v17253_v15, %v17229_v26  ;;  %v9529_v47 = vsel %vm488_vm2, %v9521_v42, -inf  ;;  %v9519_v9 = vadd.f32 %v15497_v20, %v9239_v61  ;;  %v9547_v43 = vsel %vm488_vm2, %v9239_v61, inf }
0x1827   :  { %9530 = vmax.xlane.f32.xlu1 %v9529_v47  ;;  %v9241_v55 = vpop.f32.mrf.mxu1  ;;  %v20550_v47 = vld [vmem:[%s19189_s24 + $0x8] ss:$20 sps:$4 sm:$0xff]  }
0x1828   :  { %v9242_v28 = vadd.f32 %v9241_v55, %v8903_v17  ;;  %v9522_v62 = vadd.f32 %v15497_v20, %v9250_v53  ;;  %v9523_v29 = vsel %vm488_vm2, %v9519_v9, -inf  ;;  %v9556_v25 = vsel %vm488_vm2, %v9250_v53, inf  ;;  %21983 = vst [vmem:[#allocation10_spill] sm:$0xff] %v20550_v47 }
0x182a   :  { %v9532_v31 = vsel %vm488_vm2, %v9522_v62, -inf  ;;  %v9520_v11 = vadd.f32 %v15497_v20, %v9242_v28  ;;  %v9550_v1 = vsel %vm488_vm2, %v9242_v28, inf  ;;  %v20530_v20 = vld [vmem:[%s19189_s24 + $0x10] ss:$20 sps:$4 sm:$0xff]  }
0x182b   :  { %9533 = vmax.xlane.f32.xlu0 %v9532_v31  ;;  %9524 = vmax.xlane.f32.xlu1 %v9523_v29  ;;  %21979 = vst [vmem:[#allocation6_spill] sm:$0xff] %v20530_v20 }
0x182c   :  { %v9526_v50 = vsel %vm488_vm2, %v9520_v11, -inf }
0x182f   :  { %9527 = vmax.xlane.f32.xlu0 %v9526_v50  ;;  %9551 = vmin.xlane.f32.xlu1 %v9550_v1 }
0x1833   :  { %9548 = vmin.xlane.f32.xlu0 %v9547_v43  ;;  %9557 = vmin.xlane.f32.xlu1 %v9556_v25 }
0x1837   :  { %9554 = vmin.xlane.f32.xlu0 %v9553_v5 }
0x18b0   :  { %v9531_v21 = vpop.xlane.xlu1 %9530 }
0x18b1   :  { %v9537_v8 = vsub.f32 %v9521_v42, %v9531_v21 }
0x18b3   :  { %v9543_v16 = vmul.f32 1.442695, %v9537_v8 }
0x18b4   :  { %v9534_v44 = vpop.xlane.xlu0 %9533  ;;  %v9525_v4 = vpop.xlane.xlu1 %9524 }
0x18b5   :  { %v9538_v18 = vsub.f32 %v9522_v62, %v9534_v44  ;;  %v9535_v49 = vsub.f32 %v9519_v9, %v9525_v4  ;;  %v20561_v9 = vpop.f32.mrf.mxu0 }
0x18b7   :  { %v9545_v59 = vmul.f32 1.442695, %v9538_v18  ;;  %v9539_v19 = vmul.f32 1.442695, %v9535_v49  ;;  %v9055_v55 = vpop.f32.mrf.mxu0 }
0x18b8   :  { %v9528_v12 = vpop.xlane.xlu0 %9527  ;;  %v9552_v38 = vpop.xlane.xlu1 %9551 }
0x18b9   :  { %18317 = vpow2.f32 %v9545_v59  ;;  %v9536_v37 = vsub.f32 %v9520_v11, %v9528_v12  ;;  %v9560_v30 = vsub.f32 %v9552_v38, %v9242_v28  ;;  %v9057_v28 = vpop.f32.mrf.mxu0  ;;  %v9444_v59 = vpop.f32.mrf.mxu1 }
0x18ba   :  { %18319 = vpow2.f32 %v9543_v16 }
0x18bb   :  { %v9541_v45 = vmul.f32 1.442695, %v9536_v37  ;;  %18321 = vpow2.f32 %v9539_v19  ;;  %v9565_v36 = vmul.f32 1.442695, %v9560_v30  ;;  %v9059_v62 = vpop.f32.mrf.mxu0  ;;  %v20567_v12 = vpop.f32.mrf.mxu1 }
0x18bc   :  { %v9549_v51 = vpop.xlane.xlu0 %9548  ;;  %v9558_v22 = vpop.xlane.xlu1 %9557  ;;  %21984 = vst [vmem:[#allocation11_spill] sm:$0xff] %v20567_v12 }
0x18bd   :  { %18323 = vpow2.f32 %v9541_v45  ;;  %v9559_v35 = vsub.f32 %v9549_v51, %v9239_v61  ;;  %v9562_v34 = vsub.f32 %v9558_v22, %v9250_v53  ;;  %v20543_v53 = vld [vmem:[%s19189_s24 + $0xc] ss:$20 sps:$4 sm:$0xff]   ;;  %v9063_v31 = vpop.f32.mrf.mxu0  ;;  %v9448_v37 = vpop.f32.mrf.mxu1 }
0x18be   :  { %18325 = vpow2.f32 %v9565_v36  ;;  %21982 = vst [vmem:[#allocation9_spill] sm:$0xff] %v20543_v53 }
0x18bf   :  { %v9563_v24 = vmul.f32 1.442695, %v9559_v35  ;;  %v9569_v10 = vmul.f32 1.442695, %v9562_v34  ;;  %v9065_v29 = vpop.f32.mrf.mxu0  ;;  %v20571_v45 = vpop.f32.mrf.mxu1 }
0x18c0   :  { %v9555_v13 = vpop.xlane.xlu0 %9554 }
0x18c1   :  { %18327 = vpow2.f32 %v9563_v24  ;;  %v9561_v39 = vsub.f32 %v9555_v13, %v9247_v7  ;;  %v9067_v11 = vpop.f32.mrf.mxu0  ;;  %v20573_v51 = vpop.f32.mrf.mxu1 }
0x18c2   :  { %18329 = vpow2.f32 %v9569_v10 }
0x18c3   :  { %v9567_v32 = vmul.f32 1.442695, %v9561_v39  ;;  %v9069_v50 = vpop.f32.mrf.mxu0  ;;  %v20577_v35 = vpop.f32.mrf.mxu1 }
0x18c5   :  { %18331 = vpow2.f32 %v9567_v32  ;;  %v17240_v1 = vpop.f32.mrf.mxu0  ;;  %v20579_v10 = vpop.f32.mrf.mxu1 }
0x18c6   :  { %v18318_v54 = vpop.eup %18317 }
0x18c7   :  { %17266 = vmatprep.subr.msk.mxu1 %vm488_vm2, %v18318_v54  ;;  %v18320_v14 = vpop.eup %18319  ;;  %v20563_v43 = vpop.f32.mrf.mxu0 }
0x18c8   :  { %17267 = vmatpush3.xpose.msk.msra.mxu1 %vm488_vm2, %v18318_v54  ;;  %v18322_v52 = vpop.eup %18321  ;;  %v9693_v42 = vpack.c.bf16 %v18318_v54, %v18320_v14  ;;  %v20581_v32 = vpop.f32.mrf.mxu1 }
0x18c9   :  { %17268 = vmatprep.subr.msk.mxu1 %vm488_vm2, %v18320_v14  ;;  %v17241_v25 = vpop.f32.mrf.mxu0 }
0x18ca   :  { %v18324_v2 = vpop.eup %18323 }
0x18cb   :  { %v9692_v26 = vpack.c.bf16 %v18324_v2, %v18322_v52  ;;  %v18326_v17 = vpop.eup %18325  ;;  %v20565_v5 = vpop.f32.mrf.mxu0 }
0x18cc   :  { %17269 = vmatpush3.xpose.msk.msra.mxu1 %vm488_vm2, %v18320_v14 }
0x18cd   :  { %17270 = vmatprep.subr.msk.mxu1 %vm488_vm2, %v18324_v2  ;;  %15506 = vmatmul.mubr.msk.bf16.vlgmr.msra.gmra.mxu0 %vm488_vm2, %v9692_v26  ;;  %v9391_v21 = vpop.f32.mrf.mxu0 }
0x18ce   :  { %v18328_v46 = vpop.eup %18327  ;;  %9742 = vmatprep.mubr.bf16.mxu0 %v21972_v23  ;;  %17281 = vmatpush3.bf16.msra.mxu0 %v20530_v20 }
0x18cf   :  { %v20533_v7 = vpack.c.bf16 %v18326_v17, %v18328_v46  ;;  %17274 = vmatprep.mubr.msk.f32.mxu1 %vm488_vm2, %v18328_v46  ;;  %v18330_v60 = vpop.eup %18329  ;;  %v9393_v8 = vpop.f32.mrf.mxu0 }
0x18d0   :  { %17271 = vmatpush3.xpose.msk.msra.mxu1 %vm488_vm2, %v18324_v2  ;;  %v9394_v41 = vadd.f32 %v9393_v8, %v9055_v55 }
0x18d1   :  { %21980 = vst [vmem:[#allocation7_spill] sm:$0xff] %v20533_v7  ;;  %17272 = vmatprep.subr.msk.mxu1 %vm488_vm2, %v18322_v52  ;;  %v9395_v44 = vpop.f32.mrf.mxu0 }
0x18d2   :  { %v18332_v61 = vpop.eup %18331 }
0x18d3   :  { %v20538_v15 = vpack.c.bf16 %v18330_v60, %v18332_v61  ;;  %v9397_v4 = vpop.f32.mrf.mxu0 }
0x18d4   :  { %17273 = vmatpush3.xpose.msk.msra.mxu1 %vm488_vm2, %v18322_v52 }
0x18d5   :  { %21981 = vst [vmem:[#allocation8_spill] sm:$0xff] %v20538_v15  ;;  %15507 = vmatmul.mubr.msk.bf16.gmra.mxu0 %vm488_vm2, %v9693_v42  ;;  %9767 = vmatprep.subr.bf16.mxu1 %v20543_v53  ;;  %v9401_v18 = vpop.f32.mrf.mxu0 }
0x18d6   :  { %17282 = vmatprep.mubr.msk.bf16.mxu0 %vm488_vm2, %v9692_v26  ;;  %v9402_v57 = vadd.f32 %v9401_v18, %v9063_v31 }
0x18d7   :  { %17275 = vmatmul.mubr.msk.f32.vlgmr.msra.gmra.mxu1 %vm488_vm2, %v18326_v17  ;;  %v9403_v49 = vpop.f32.mrf.mxu0 }
0x18d8   :  { %17277 = vmatprep.mubr.msk.f32.mxu1 %vm488_vm2, %v18332_v61  ;;  %9768 = vmatpush1.bf16.msra.mxu1 %v20550_v47  ;;  %v9404_v61 = vadd.f32 %v9403_v49, %v9065_v29 }
0x18d9   :  { %v9405_v16 = vpop.f32.mrf.mxu0 }
0x18da   :  { %v9406_v17 = vadd.f32 %v9405_v16, %v9067_v11 }
0x18db   :  { %17278 = vmatmul.mubr.msk.f32.gmra.mxu1 %vm488_vm2, %v18330_v60  ;;  %v9407_v19 = vpop.f32.mrf.mxu0 }
0x18dc   :  { %9785 = vmatprep.mubr.bf16.mxu1 %v21972_v23 }
0x18dd   :  { %17283 = vmatmul.mubr.msk.bf16.vlgmr.msra.gmra.mxu0 %vm488_vm2, %v9693_v42  ;;  %v17264_v38 = vpop.f32.mrf.mxu0 }
0x18de   :  { %9925 = vmatprep.mubr.bf16.mxu0 %v21972_v23  ;;  %v9506_v18 = vadd.f32 %v17264_v38, %v17240_v1 }
0x18df   :  { %15508 = vmatmul.mubr.msk.bf16.vlgmr.msra.gmra.mxu1 %vm488_vm2, %v9692_v26  ;;  %v20569_v30 = vpop.f32.mrf.mxu0  ;;  %v9398_v26 = vadd.f32 %v9397_v4, %v9059_v62 }
0x18e0   :  { %9795 = vmatprep.mubr.bf16.mxu1 %v21972_v23 }
0x18e1   :  { %v17265_v36 = vpop.f32.mrf.mxu0 }
0x18e3   :  { %v20575_v22 = vpop.f32.mrf.mxu0 }
0x18e7   :  { %15509 = vmatmul.mubr.msk.bf16.gmra.mxu1 %vm488_vm2, %v9693_v42  ;;  %v9408_v42 = vadd.f32 %v9407_v19, %v9069_v50  ;;  %v9392_v50 = vadd.f32 %v9391_v21, %v20561_v9  ;;  %v9509_v19 = vadd.f32 %v17265_v36, %v17241_v25  ;;  %v9455_v36 = vadd.f32 %v20573_v51, %v20503_v58 }
0x18e8   :  { %9978 = vmatprep.mubr.bf16.mxu1 %v21972_v23  ;;  %v9396_v23 = vadd.f32 %v9395_v44, %v9057_v28 }
0x198d   :  { %v9734_v34 = vpop.f32.mrf.mxu0 }
0x198f   :  { %v9736_v24 = vpop.f32.mrf.mxu0 }
0x1990   :  { %v9856_v11 = vmul.f32 %v9736_v24, %v9394_v41  ;;  %v9449_v41 = vadd.f32 %v9448_v37, %v20499_v40  ;;  %v9501_v40 = vadd.f32 %v20575_v22, %v20565_v5  ;;  %v18584_v24 = vld [vmem:[%s19260_s30 + $0x8] sm:$0xff]  ;;  %v9451_v5 = vadd.f32 %v20571_v45, %v20501_v6 }
0x1991   :  { %v9738_v13 = vpop.f32.mrf.mxu0  ;;  %v9457_v22 = vadd.f32 %v20577_v35, %v20508_v56 }
0x1992   :  { %v9860_v49 = vmul.f32 %v9738_v13, %v9396_v23 }
0x1993   :  { %v9740_v39 = vpop.f32.mrf.mxu0 }
0x1994   :  { %v9861_v47 = vmul.f32 %v9740_v39, %v9398_v26 }
0x1995   :  { %v9744_v54 = vpop.f32.mrf.mxu0 }
0x1996   :  { %v9865_v12 = vmul.f32 %v9744_v54, %v9402_v57  ;;  %v9878_v39 = vpack.c.bf16 %v9861_v47, %v9856_v11  ;;  %v9855_v57 = vmul.f32 %v9734_v34, %v9392_v50  ;;  %v9459_v34 = vadd.f32 %v20579_v10, %v20510_v0  ;;  %v18585_v54 = vld [vmem:[%s19260_s30] sm:$0xff]  ;;  %v21985_v10 = vld [vmem:[#allocation11_spill] sm:$0xff]  ;;  %v18587_v11 = vld [vmem:[%s19260_s30 + $0x18] sm:$0xff] }
0x1997   :  { %v17276_v14 = vpop.f32.mrf.mxu1  ;;  %v9746_v52 = vpop.f32.mrf.mxu0  ;;  %v18588_v50 = vld [vmem:[%s19189_s24 + $0x4] ss:$20 sps:$4 sm:$0xff]  }
0x1998   :  { %v9681_v2 = vmax.f32 %v17276_v14, 1e-30  ;;  %v9866_v20 = vmul.f32 %v9746_v52, %v9404_v61  ;;  %v9877_v23 = vpack.c.bf16 %v9860_v49, %v9855_v57  ;;  %v18589_v49 = vld [vmem:[%s19189_s24] ss:$20 sps:$4 sm:$0xff]   ;;  %s18722_s24 = smov 7  }
0x1999   :  { %v9661_v46 = vpop.f32.mrf.mxu1  ;;  %v9748_v60 = vpop.f32.mrf.mxu0  ;;  %v18594_v57 = vld [vmem:[%s19308_s4 + $0x30] sm:$0xff]   ;;  %s20693_s18 = sld [smem:[%s21939_s0 + %s18722_s24]]  }
0x199a   :  { %18333 = vrcp.f32 %v9681_v2  ;;  %v9680_v3 = vmax.f32 %v9661_v46, 1e-30  ;;  %v9870_v63 = vmul.f32 %v9748_v60, %v9406_v17  ;;  %v9447_v17 = vadd.f32 %v21985_v10, %v20497_v48  ;;  %s21039_s24 = sld [smem:[%s21939_s0 + %s18728_s14]]  }
0x199b   :  { %v17279_v15 = vpop.f32.mrf.mxu1  ;;  %v9750_v7 = vpop.f32.mrf.mxu0 }
0x199c   :  { %18335 = vrcp.f32 %v9680_v3  ;;  %v9871_v53 = vmul.f32 %v9750_v7, %v9408_v42  ;;  %v9683_v4 = vmax.f32 %v17279_v15, 1e-30  ;;  %v9882_v55 = vpack.c.bf16 %v9870_v63, %v9865_v12 }
0x199d   :  { %v9671_v14 = vpop.f32.mrf.mxu1  ;;  %v17284_v62 = vpop.f32.mrf.mxu0  ;;  %v9445_v3 = vadd.f32 %v9444_v59, %v20495_v33  ;;  %v9498_v12 = vadd.f32 %v20569_v30, %v20563_v43  ;;  %v9461_v30 = vadd.f32 %v20581_v32, %v20512_v27  ;;  %v21986_v27 = vmov 0  }
0x199e   :  { %v9883_v16 = vpack.c.bf16 %v9871_v53, %v9866_v20  ;;  %v9682_v29 = vmax.f32 %v9671_v14, 1e-30  ;;  %v9869_v20 = vmul.f32 %v17284_v62, %v9506_v18  ;;  %v18586_v14 = vld [vmem:[%s19260_s30 + $0x10] sm:$0xff]  ;;  %v21990_v18 = vld [vmem:[#allocation7_spill] sm:$0xff]  ;;  %s18729_s30 = smov 41  }
0x199f   :  { %v9787_v31 = vpop.f32.mrf.mxu1  ;;  %v9840_v8 = vpop.f32.mrf.mxu0 }
0x19a0   :  { %18337 = vrcp.f32 %v9682_v29  ;;  %9905 = vmatprep.subr.bf16.mxu0 %v9883_v16  ;;  %v9857_v53 = vmul.f32 %v9787_v31, %v9445_v3  ;;  %v9859_v2 = vmul.f32 %v9840_v8, %v9498_v12  ;;  %v21987_v29 = vld [vmem:[#allocation9_spill] sm:$0xff]  ;;  %v21989_v31 = vld [vmem:[#allocation10_spill] sm:$0xff] }
0x19a1   :  { %v9789_v7 = vpop.f32.mrf.mxu1  ;;  %v17285_v28 = vpop.f32.mrf.mxu0  ;;  %9906 = vmatpush1.bf16.msra.mxu0 %v9882_v55  ;;  %18339 = vrcp.f32 %v9683_v4  ;;  %v21988_v55 = vld [vmem:[#allocation6_spill] sm:$0xff]  ;;  %v18590_v8 = vld [vmem:[%s19308_s4 + $0x78] sm:$0xff]  }
0x19a2   :  { %v9874_v15 = vmul.f32 %v17285_v28, %v9509_v19  ;;  %9907 = vmatprep.subr.bf16.mxu0 %v9878_v39  ;;  %v9858_v32 = vmul.f32 %v9789_v7, %v9447_v17  ;;  %v18591_v19 = vld [vmem:[%s19308_s4 + $0x38] sm:$0xff]   ;;  %v18592_v39 = vld [vmem:[%s19308_s4 + $0x70] sm:$0xff]   ;;  %v18595_v7 = vld [vmem:[%s19308_s4 + $0x68] sm:$0xff]  }
0x19a3   :  { %v9791_v63 = vpop.f32.mrf.mxu1  ;;  %v9843_v25 = vpop.f32.mrf.mxu0  ;;  %v18593_v3 = vld [vmem:[%s19308_s4 + $0xf8] sm:$0xff]   ;;  %v21991_v28 = vld [vmem:[#allocation8_spill] sm:$0xff]  ;;  %v18611_v12 = vld [vmem:[%s19308_s4 + $0xe0] sm:$0xff]  }
0x19a4   :  { %v9886_v9 = vpack.c.bf16 %v9874_v15, %v9869_v20  ;;  %v9862_v47 = vmul.f32 %v9791_v63, %v9449_v41  ;;  %v9864_v38 = vmul.f32 %v9843_v25, %v9501_v40  ;;  %v18596_v41 = vld [vmem:[%s19308_s4 + $0x28] sm:$0xff]   ;;  %v18597_v20 = vld [vmem:[%s19308_s4 + $0x60] sm:$0xff]   ;;  %v18600_v63 = vld [vmem:[%s19308_s4 + $0x18] sm:$0xff]  }
0x19a5   :  { %v9793_v1 = vpop.f32.mrf.mxu1  ;;  %9908 = vmatpush1.bf16.msra.mxu0 %v9877_v23  ;;  %v18598_v15 = vld [vmem:[%s19308_s4 + $0x20] sm:$0xff]   ;;  %v18599_v23 = vld [vmem:[%s19308_s4 + $0x58] sm:$0xff]   ;;  %v18606_v25 = vld [vmem:[%s19308_s4 + $0xb0] sm:$0xff]  }
0x19a6   :  { %v9879_v33 = vpack.c.bf16 %v9862_v47, %v9857_v53  ;;  %17286 = vmatprep.subr.bf16.mxu0 %v9886_v9  ;;  %v9881_v46 = vpack.c.bf16 %v9864_v38, %v9859_v2  ;;  %v9863_v6 = vmul.f32 %v9793_v1, %v9451_v5  ;;  %v18601_v53 = vld [vmem:[%s19308_s4 + $0x50] sm:$0xff]   ;;  %v18608_v40 = vld [vmem:[%s19308_s4 + $0x8] sm:$0xff]   ;;  %v18612_v38 = vld [vmem:[%s19308_s4] sm:$0xff]  }
0x19a7   :  { %v18334_v21 = vpop.eup %18333  ;;  %v9797_v44 = vpop.f32.mrf.mxu1  ;;  %v18603_v47 = vld [vmem:[%s19308_s4 + $0xf0] sm:$0xff]   ;;  %v18620_v5 = vld [vmem:[%s19308_s4 + $0x88] sm:$0xff]   ;;  %v18622_v2 = vld [vmem:[%s19308_s4 + $0x80] sm:$0xff]  }
0x19a8   :  { %v9689_v13 = vmul.f32 %v18584_v24, %v18334_v21  ;;  %v9867_v58 = vmul.f32 %v9797_v44, %v9455_v36  ;;  %v9880_v48 = vpack.c.bf16 %v9863_v6, %v9858_v32  ;;  %v18604_v1 = vld [vmem:[%s19308_s4 + $0x10] sm:$0xff]   ;;  %v18607_v21 = vld [vmem:[%s19308_s4 + $0xe8] sm:$0xff]   ;;  %v18609_v44 = vld [vmem:[%s19308_s4 + $0x40] sm:$0xff]  }
0x19a9   :  { %v18336_v59 = vpop.eup %18335  ;;  %v9799_v37 = vpop.f32.mrf.mxu1  ;;  %v18614_v36 = vld [vmem:[%s19308_s4 + $0xa0] sm:$0xff]   ;;  %v18616_v24 = vld [vmem:[%s19308_s4 + $0x98] sm:$0xff]  }
0x19aa   :  { %v9688_v52 = vmul.f32 %v18585_v54, %v18336_v59  ;;  %v9868_v45 = vmul.f32 %v9799_v37, %v9457_v22  ;;  %v18610_v59 = vld [vmem:[%s19308_s4 + $0xa8] sm:$0xff]   ;;  %v20660_v37 = vld [vmem:[%s19308_s4 + $0x118] sm:$0xff]   ;;  %v18618_v54 = vld [vmem:[%s19308_s4 + $0x90] sm:$0xff]  }
0x19ab   :  { %v9801_v43 = vpop.f32.mrf.mxu1  ;;  %v18621_v22 = vld [vmem:[%s19308_s4 + $0xc0] sm:$0xff]  }
0x19ac   :  { %v9875_v26 = vpack.c.bf16 %v9689_v13, %v9688_v52  ;;  %v9872_v51 = vmul.f32 %v9801_v43, %v9459_v34  ;;  %v18615_v34 = vld [vmem:[%s19308_s4 + $0xd8] sm:$0xff]   ;;  %v18617_v13 = vld [vmem:[%s19308_s4 + $0xd0] sm:$0xff]   ;;  %v18619_v52 = vld [vmem:[%s19308_s4 + $0xc8] sm:$0xff]  }
0x19ad   :  { %v18338_v0 = vpop.eup %18337  ;;  %v9803_v60 = vpop.f32.mrf.mxu1 }
0x19ae   :  { %v9884_v61 = vpack.c.bf16 %v9872_v51, %v9867_v58  ;;  %v9873_v56 = vmul.f32 %v9803_v60, %v9461_v30  ;;  %15512 = vmatmul.mubr.msk.bf16.vlgmr.msra.gmra.mxu0 %vm1468_vm4, %v9875_v26  ;;  %v18340_v35 = vpop.eup %18339  ;;  %v9690_v62 = vmul.f32 %v18586_v14, %v18338_v0 }
0x19af   :  { %17287 = vmatpush3.bf16.msra.mxu0 %v9886_v9  ;;  %9935 = vmatprep.mubr.bf16.mxu0 %v21986_v27  ;;  %v9691_v4 = vmul.f32 %v18587_v11, %v18340_v35  ;;  %v18602_v9 = vld [vmem:[%s19308_s4 + $0xb8] sm:$0xff]  }
0x19b0   :  { %v9885_v42 = vpack.c.bf16 %v9873_v56, %v9868_v45  ;;  %17288 = vmatprep.subr.bf16.mxu0 %v9881_v46 }
0x19b1   :  { %v9876_v16 = vpack.c.bf16 %v9691_v4, %v9690_v62 }
0x19b2   :  { %9958 = vmatprep.subr.bf16.mxu1 %v9885_v42 }
0x19b3   :  { %17289 = vmatpush3.bf16.msra.mxu0 %v9881_v46  ;;  %9959 = vmatpush1.bf16.msra.mxu1 %v9884_v61 }
0x19b4   :  { %9960 = vmatprep.subr.bf16.mxu1 %v9880_v48  ;;  %10123 = vmatprep.subr.bf16.mxu0 %v21987_v29 }
0x19b6   :  { %15513 = vmatmul.mubr.msk.bf16.gmra.mxu0 %vm1468_vm4, %v9876_v16 }
0x19b7   :  { %9961 = vmatpush1.bf16.msra.mxu1 %v9879_v33  ;;  %17290 = vmatprep.mubr.msk.bf16.mxu0 %vm1468_vm4, %v9875_v26  ;;  %v18605_v33 = vld [vmem:[%s19308_s4 + $0x48] sm:$0xff]  }
0x19b8   :  { %10070 = vmatprep.subr.bf16.mxu1 %v18588_v50 }
0x19ba   :  { %15514 = vmatmul.mubr.msk.bf16.vlgmr.msra.gmra.mxu1 %vm1468_vm4, %v9875_v26 }
0x19bb   :  { %9988 = vmatprep.mubr.bf16.mxu1 %v21986_v27  ;;  %10071 = vmatpush1.bf16.msra.mxu1 %v18589_v49 }
0x19bc   :  { %17294 = vmatprep.subr.bf16.mxu1 %v21988_v55 }
0x19be   :  { %17291 = vmatmul.mubr.msk.bf16.vlgmr.msra.gmra.mxu0 %vm1468_vm4, %v9876_v16 }
0x19bf   :  { %10124 = vmatpush1.bf16.msra.mxu0 %v21989_v31  ;;  %10141 = vmatprep.mubr.bf16.mxu0 %v21986_v27 }
0x19c0   :  { %16366 = vmatprep.subr.bf16.mxu0 %v18590_v8 }
0x19c2   :  { %15515 = vmatmul.mubr.msk.bf16.gmra.mxu1 %vm1468_vm4, %v9876_v16 }
0x19c3   :  { %10088 = vmatprep.mubr.bf16.mxu1 %v21986_v27 }
0x19c6   :  { %15520 = vmatmul.mubr.msk.bf16.vlgmr.msra.gmra.mxu0 %vm488_vm2, %v21990_v18 }
0x19c7   :  { %10151 = vmatprep.mubr.bf16.mxu0 %v21986_v27  ;;  %16367 = vmatpush3.bf16.msra.mxu0 %v18591_v19 }
0x19c8   :  { %16368 = vmatprep.subr.bf16.mxu0 %v18592_v39 }
0x19ca   :  { %15518 = vmatmul.mubr.msk.bf16.vlgmr.msra.gmra.mxu1 %vm488_vm2, %v21990_v18 }
0x19cb   :  { %10098 = vmatprep.mubr.bf16.mxu1 %v21986_v27  ;;  %17295 = vmatpush3.bf16.msra.mxu1 %v21988_v55 }
0x19cc   :  { %16394 = vmatprep.subr.bf16.mxu1 %v18593_v3  ;;  %16369 = vmatpush3.bf16.msra.mxu0 %v18594_v57 }
0x19cd   :  { %16370 = vmatprep.subr.bf16.mxu0 %v18595_v7 }
0x19ce   :  { %15521 = vmatmul.mubr.msk.bf16.gmra.mxu0 %vm488_vm2, %v21991_v28 }
0x19d0   :  { %16371 = vmatpush3.bf16.msra.mxu0 %v18596_v41 }
0x19d1   :  { %16372 = vmatprep.subr.bf16.mxu0 %v18597_v20 }
0x19d2   :  { %15519 = vmatmul.mubr.msk.bf16.gmra.mxu1 %vm488_vm2, %v21991_v28 }
0x19d3   :  { %17296 = vmatprep.mubr.msk.bf16.mxu1 %vm488_vm2, %v21990_v18 }
0x19d4   :  { %16373 = vmatpush3.bf16.msra.mxu0 %v18598_v15 }
0x19d5   :  { %16374 = vmatprep.subr.bf16.mxu0 %v18599_v23 }
0x19d8   :  { %16375 = vmatpush3.bf16.msra.mxu0 %v18600_v63 }
0x19d9   :  { %16376 = vmatprep.subr.bf16.mxu0 %v18601_v53 }
0x19da   :  { %17297 = vmatmul.mubr.msk.bf16.vlgmr.msra.gmra.mxu1 %vm488_vm2, %v21991_v28 }
0x19db   :  { %16395 = vmatpush3.bf16.msra.mxu1 %v18602_v9 }
0x19dc   :  { %16396 = vmatprep.subr.bf16.mxu1 %v18603_v47  ;;  %16377 = vmatpush3.bf16.msra.mxu0 %v18604_v1 }
0x19dd   :  { %16378 = vmatprep.subr.bf16.mxu0 %v18605_v33 }
0x19df   :  { %16397 = vmatpush3.bf16.msra.mxu1 %v18606_v25 }
0x19e0   :  { %16398 = vmatprep.subr.bf16.mxu1 %v18607_v21  ;;  %16379 = vmatpush3.bf16.msra.mxu0 %v18608_v40 }
0x19e1   :  { %16380 = vmatprep.subr.bf16.mxu0 %v18609_v44 }
0x19e3   :  { %16399 = vmatpush3.bf16.msra.mxu1 %v18610_v59 }
0x19e4   :  { %16400 = vmatprep.subr.bf16.mxu1 %v18611_v12  ;;  %16381 = vmatpush3.bf16.msra.mxu0 %v18612_v38 }
0x19e5   :  { %17300 = vmatprep.subr.bf16.mxu0 %v20660_v37 }
0x19e7   :  { %16401 = vmatpush3.bf16.msra.mxu1 %v18614_v36 }
0x19e8   :  { %16402 = vmatprep.subr.bf16.mxu1 %v18615_v34 }
0x19eb   :  { %16403 = vmatpush3.bf16.msra.mxu1 %v18616_v24  ;;  %v18623_v24 = vld [vmem:[%s19308_s4 + $0x110] sm:$0xff]  }
0x19ec   :  { %16404 = vmatprep.subr.bf16.mxu1 %v18617_v13 }
0x19ef   :  { %16405 = vmatpush3.bf16.msra.mxu1 %v18618_v54 }
0x19f0   :  { %16406 = vmatprep.subr.bf16.mxu1 %v18619_v52 }
0x19f3   :  { %16407 = vmatpush3.bf16.msra.mxu1 %v18620_v5 }
0x19f4   :  { %16408 = vmatprep.subr.bf16.mxu1 %v18621_v22 }
0x19f7   :  { %16409 = vmatpush3.bf16.msra.mxu1 %v18622_v2 }
0x1a6e   :  { %v9927_v43 = vpop.f32.mrf.mxu0 }
0x1a70   :  { %v9929_v30 = vpop.f32.mrf.mxu0 }
0x1a72   :  { %v9931_v26 = vpop.f32.mrf.mxu0 }
0x1a74   :  { %v9933_v58 = vpop.f32.mrf.mxu0 }
0x1a76   :  { %v9937_v51 = vpop.f32.mrf.mxu0 }
0x1a78   :  { %v9939_v0 = vpop.f32.mrf.mxu0 }
0x1a7a   :  { %v9941_v10 = vpop.f32.mrf.mxu0  ;;  %v9980_v17 = vpop.f32.mrf.mxu1 }
0x1a7c   :  { %v9943_v46 = vpop.f32.mrf.mxu0  ;;  %v9982_v60 = vpop.f32.mrf.mxu1 }
0x1a7e   :  { %v9984_v6 = vpop.f32.mrf.mxu1  ;;  %v20672_v45 = vpop.f32.mrf.mxu0 }
0x1a80   :  { %v9986_v61 = vpop.f32.mrf.mxu1  ;;  %v20674_v56 = vpop.f32.mrf.mxu0 }
0x1a82   :  { %v9990_v35 = vpop.f32.mrf.mxu1  ;;  %v20676_v32 = vpop.f32.mrf.mxu0 }
0x1a84   :  { %v9992_v42 = vpop.f32.mrf.mxu1  ;;  %v20678_v14 = vpop.f32.mrf.mxu0 }
0x1a86   :  { %v9994_v62 = vpop.f32.mrf.mxu1  ;;  %v10143_v48 = vpop.f32.mrf.mxu0 }
0x1a87   :  { %v10213_v18 = vmul.f32 %v10143_v48, %v9980_v17 }
0x1a88   :  { %v9996_v11 = vpop.f32.mrf.mxu1  ;;  %v10145_v4 = vpop.f32.mrf.mxu0 }
0x1a89   :  { %v10214_v31 = vmul.f32 %v10145_v4, %v9982_v60 }
0x1a8a   :  { %v10090_v16 = vpop.f32.mrf.mxu1  ;;  %v10147_v29 = vpop.f32.mrf.mxu0 }
0x1a8b   :  { %v10218_v50 = vmul.f32 %v10147_v29, %v9984_v6  ;;  %v10211_v23 = vmul.f32 %v10090_v16, %v9927_v43  ;;  %v18089_v6 = vld [vmem:[%s20693_s18] sm:$0xff]  }
0x1a8c   :  { %v10092_v49 = vpop.f32.mrf.mxu1  ;;  %v10149_v55 = vpop.f32.mrf.mxu0 }
0x1a8d   :  { %v10219_v8 = vmul.f32 %v10149_v55, %v9986_v61  ;;  %v10233_v57 = vpack.c.bf16 %v10218_v50, %v10213_v18  ;;  %v10212_v20 = vmul.f32 %v10092_v49, %v9929_v30  ;;  %v18624_v30 = vld [vmem:[%s19308_s4 + $0x108] sm:$0xff]   ;;  %v18100_v61 = vld [vmem:[%s20705_s28 + $0x10] sm:$0xff]   ;;  %v15524_v49 = vld [vmem:[%s14908_s3] ss:$0 sm:$0xff] }
0x1a8e   :  { %v10094_v19 = vpop.f32.mrf.mxu1  ;;  %v10153_v39 = vpop.f32.mrf.mxu0 }
0x1a8f   :  { %v10234_v3 = vpack.c.bf16 %v10219_v8, %v10214_v31  ;;  %v10216_v7 = vmul.f32 %v10094_v19, %v9931_v26  ;;  %v10223_v44 = vmul.f32 %v10153_v39, %v9990_v35 }
0x1a90   :  { %v10096_v28 = vpop.f32.mrf.mxu1  ;;  %v10155_v41 = vpop.f32.mrf.mxu0 }
0x1a91   :  { %v10217_v15 = vmul.f32 %v10096_v28, %v9933_v58  ;;  %10335 = vmatprep.mubr.bf16.mxu1 %v10234_v3  ;;  %v10231_v47 = vpack.c.bf16 %v10216_v7, %v10211_v23  ;;  %v10224_v21 = vmul.f32 %v10155_v41, %v9992_v42 }
0x1a92   :  { %v10100_v63 = vpop.f32.mrf.mxu1  ;;  %v10157_v53 = vpop.f32.mrf.mxu0  ;;  %10336 = vmatmul.mubr.bf16.vlgmr.msra.gmra.mxu1 %v10233_v57 }
0x1a93   :  { %v10232_v9 = vpack.c.bf16 %v10217_v15, %v10212_v20  ;;  %v10228_v1 = vmul.f32 %v10157_v53, %v9994_v62  ;;  %v10221_v52 = vmul.f32 %v10100_v63, %v9937_v51 }
0x1a94   :  { %v10102_v33 = vpop.f32.mrf.mxu1  ;;  %v10159_v25 = vpop.f32.mrf.mxu0 }
0x1a95   :  { %v10229_v40 = vmul.f32 %v10159_v25, %v9996_v11  ;;  %10286 = vmatprep.mubr.bf16.mxu0 %v10232_v9  ;;  %v10238_v38 = vpack.c.bf16 %v10228_v1, %v10223_v44  ;;  %v10222_v13 = vmul.f32 %v10102_v33, %v9939_v0  ;;  %v18625_v0 = vld [vmem:[%s19308_s4 + $0x100] sm:$0xff]   ;;  %s18723_s4 = smov 38  }
0x1a96   :  { %v10104_v59 = vpop.f32.mrf.mxu1  ;;  %10287 = vmatmul.mubr.bf16.vlgmr.msra.gmra.mxu0 %v10231_v47  ;;  %s20700_s22 = sld [smem:[%s21939_s0 + %s18723_s4]]  }
0x1a97   :  { %v10239_v12 = vpack.c.bf16 %v10229_v40, %v10224_v21  ;;  %17301 = vmatpush3.bf16.msra.mxu0 %v20660_v37  ;;  %v10226_v36 = vmul.f32 %v10104_v59, %v9941_v10  ;;  %s14912_s4 = sld [smem:[%s21939_s0 + %s18729_s30]]  }
0x1a98   :  { %v10106_v34 = vpop.f32.mrf.mxu1  ;;  %17302 = vmatprep.subr.bf16.mxu0 %v18623_v24 }
0x1a99   :  { %v10227_v54 = vmul.f32 %v10106_v34, %v9943_v46  ;;  %10343 = vmatprep.mubr.bf16.mxu1 %v10239_v12  ;;  %v10236_v2 = vpack.c.bf16 %v10226_v36, %v10221_v52 }
0x1a9a   :  { %v17298_v5 = vpop.f32.mrf.mxu1  ;;  %10344 = vmatmul.mubr.bf16.gmra.mxu1 %v10238_v38 }
0x1a9b   :  { %v10237_v22 = vpack.c.bf16 %v10227_v54, %v10222_v13  ;;  %17303 = vmatpush3.bf16.msra.mxu0 %v18623_v24  ;;  %v10225_v17 = vmul.f32 %v17298_v5, %v20672_v45  ;;  %v18096_v45 = vld [vmem:[%s20705_s28 + $0x18] sm:$0xff]  }
0x1a9c   :  { %v10196_v43 = vpop.f32.mrf.mxu1  ;;  %17304 = vmatprep.subr.bf16.mxu0 %v18624_v30  ;;  %17324 = vmatprep.subr.bf16.mxu1 %v18096_v45 }
0x1a9d   :  { %10294 = vmatprep.mubr.bf16.mxu0 %v10237_v22  ;;  %v10215_v10 = vmul.f32 %v10196_v43, %v20674_v56  ;;  %17325 = vmatpush3.bf16.msra.mxu1 %v18096_v45  ;;  %v18107_v45 = vld [vmem:[%s20700_s22 + $0x4] ss:$12 sps:$4 sm:$0xff]  }
0x1a9e   :  { %v17299_v37 = vpop.f32.mrf.mxu1  ;;  %10295 = vmatmul.mubr.bf16.gmra.mxu0 %v10236_v2  ;;  %17326 = vmatprep.subr.bf16.mxu1 %v18100_v61 }
0x1a9f   :  { %17305 = vmatpush3.bf16.msra.mxu0 %v18624_v30  ;;  %v10230_v26 = vmul.f32 %v17299_v37, %v20676_v32  ;;  %v18095_v37 = vld [vmem:[%s20700_s22 + $0x4c] ss:$12 sps:$4 sm:$0xff]  }
0x1aa0   :  { %v10199_v58 = vpop.f32.mrf.mxu1  ;;  %17306 = vmatprep.subr.bf16.mxu0 %v18625_v0 }
0x1aa1   :  { %v10220_v51 = vmul.f32 %v10199_v58, %v20678_v14  ;;  %v10240_v60 = vpack.c.bf16 %v10230_v26, %v10225_v17  ;;  %17327 = vmatpush3.bf16.msra.mxu1 %v18100_v61  ;;  %v18090_v26 = vld [vmem:[%s20693_s18 + $0x8] sm:$0xff]   ;;  %v18091_v58 = vld [vmem:[%s20693_s18 + $0x10] sm:$0xff]   ;;  %v18092_v17 = vld [vmem:[%s20693_s18 + $0x18] sm:$0xff]  }
0x1aa2   :  { %v18105_v61 = vld [vmem:[%s20700_s22] ss:$12 sps:$4 sm:$0xff]  }
0x1aa3   :  { %v10235_v46 = vpack.c.bf16 %v10220_v51, %v10215_v10  ;;  %17307 = vmatpush3.bf16.msra.mxu0 %v18625_v0  ;;  %v18093_v0 = vld [vmem:[%s20700_s22 + $0x48] ss:$12 sps:$4 sm:$0xff]   ;;  %v18097_v51 = vld [vmem:[%s20700_s22 + $0x30] ss:$12 sps:$4 sm:$0xff]  }
0x1aa4   :  { %v18099_v10 = vld [vmem:[%s20700_s22 + $0x34] ss:$12 sps:$4 sm:$0xff]  }
0x1aa5   :  { %17308 = vmatprep.mubr.msk.bf16.mxu0 %vm976_vm3, %v10235_v46  ;;  %v18101_v46 = vld [vmem:[%s20700_s22 + $0x18] ss:$12 sps:$4 sm:$0xff]  }
0x1aa6   :  { %17309 = vmatmul.mubr.msk.bf16.vlgmr.msra.gmra.mxu0 %vm976_vm3, %v10240_v60  ;;  %v18103_v60 = vld [vmem:[%s20700_s22 + $0x1c] ss:$12 sps:$4 sm:$0xff]  }
0x1aa7   :  { %17316 = vmatprep.mubr.msk.bf16.mxu0 %vm1468_vm4, %v18089_v6  ;;  %v18104_v6 = vld [vmem:[%s20705_s28 + $0x8] sm:$0xff]  }
0x1aa8   :  { %17328 = vmatprep.subr.bf16.mxu1 %v18104_v6 }
0x1aa9   :  { %17329 = vmatpush3.bf16.msra.mxu1 %v18104_v6 }
0x1b52   :  { %v16410_v56 = vpop.f32.mrf.mxu1 }
0x1b54   :  { %v16411_v35 = vpop.f32.mrf.mxu1 }
0x1b55   :  { %v16412_v7 = vadd.f32 %v16411_v35, %v16410_v56  ;;  %v18108_v56 = vld [vmem:[%s20705_s28] sm:$0xff]   ;;  %v18109_v35 = vld [vmem:[%s20700_s22 + $0x50] ss:$12 sps:$4 sm:$0xff]  }
0x1b56   :  { %v16382_v32 = vpop.f32.mrf.mxu0  ;;  %v16413_v42 = vpop.f32.mrf.mxu1  ;;  %17330 = vmatprep.subr.bf16.mxu1 %v18108_v56 }
0x1b57   :  { %17331 = vmatpush3.bf16.msra.mxu1 %v18108_v56 }
0x1b58   :  { %v16383_v14 = vpop.f32.mrf.mxu0  ;;  %v16414_v62 = vpop.f32.mrf.mxu1  ;;  %17340 = vmatprep.subr.bf16.mxu1 %v18109_v35 }
0x1b59   :  { %v16384_v29 = vadd.f32 %v16383_v14, %v16382_v32  ;;  %v16415_v25 = vadd.f32 %v16414_v62, %v16413_v42 }
0x1b5a   :  { %v16385_v48 = vpop.f32.mrf.mxu0  ;;  %v16416_v11 = vpop.f32.mrf.mxu1 }
0x1b5b   :  { %v10289_v18 = vadd.f32 %v16384_v29, %v15524_v49 }
0x1b5c   :  { %v16386_v4 = vpop.f32.mrf.mxu0  ;;  %v16417_v16 = vpop.f32.mrf.mxu1 }
0x1b5d   :  { %v16387_v39 = vadd.f32 %v16386_v4, %v16385_v48  ;;  %v16418_v3 = vadd.f32 %v16417_v16, %v16416_v11  ;;  %v10338_v63 = vadd.f32 %v16412_v7, %v10289_v18  ;;  %v18110_v16 = vld [vmem:[%s20700_s22 + $0x38] ss:$12 sps:$4 sm:$0xff]   ;;  %v18112_v18 = vld [vmem:[%s20700_s22 + $0x8] ss:$12 sps:$4 sm:$0xff]  }
0x1b5e   :  { %v16388_v50 = vpop.f32.mrf.mxu0  ;;  %v16419_v55 = vpop.f32.mrf.mxu1 }
0x1b5f   :  { %v10292_v53 = vadd.f32 %v16387_v39, %v15524_v49  ;;  %v20751_v39 = vld [vmem:[%s18864_s21] ss:$12 sps:$4 sm:$0xff]  }
0x1b60   :  { %v16389_v31 = vpop.f32.mrf.mxu0  ;;  %v16420_v28 = vpop.f32.mrf.mxu1 }
0x1b61   :  { %v16390_v8 = vadd.f32 %v16389_v31, %v16388_v50  ;;  %v16421_v9 = vadd.f32 %v16420_v28, %v16419_v55  ;;  %v10341_v38 = vadd.f32 %v16415_v25, %v10292_v53 }
0x1b62   :  { %v16391_v19 = vpop.f32.mrf.mxu0 }
0x1b63   :  { %v10297_v57 = vadd.f32 %v16390_v8, %v15524_v49 }
0x1b64   :  { %v16392_v41 = vpop.f32.mrf.mxu0 }
0x1b65   :  { %v16393_v20 = vadd.f32 %v16392_v41, %v16391_v19  ;;  %v10346_v15 = vadd.f32 %v16418_v3, %v10297_v57  ;;  %v20743_v19 = vld [vmem:[%s18864_s21 + $0x4] ss:$12 sps:$4 sm:$0xff]  }
0x1b66   :  { %v17310_v23 = vpop.f32.mrf.mxu0 }
0x1b67   :  { %v10300_v47 = vadd.f32 %v16393_v20, %v15524_v49  ;;  %v10395_v1 = vadd.f32 %v17310_v23, %v10346_v15  ;;  %v18111_v49 = vld [vmem:[%s20700_s22 + $0x20] ss:$12 sps:$4 sm:$0xff]  }
0x1b68   :  { %v10386_v33 = vpop.f32.mrf.mxu0  ;;  %v15563_v20 = vld [vmem:[%s14911_s10] ss:$0 sm:$0xff] }
0x1b69   :  { %v10387_v21 = vadd.f32 %v10386_v33, %v10338_v63  ;;  %v10349_v40 = vadd.f32 %v16421_v9, %v10300_v47  ;;  %v10407_v59 = vmul.f32 0.1, %v10395_v1  ;;  %vm10403_vm9 = vcmp.ge.f32.partialorder %v10395_v1, 0.0 }
0x1b6a   :  { %v17311_v44 = vpop.f32.mrf.mxu0 }
0x1b6b   :  { %v10398_v12 = vadd.f32 %v17311_v44, %v10349_v40  ;;  %v10405_v34 = vmul.f32 0.1, %v10387_v21  ;;  %vm10401_vm11 = vcmp.ge.f32.partialorder %v10387_v21, 0.0  ;;  %v10411_v52 = vsel %vm10403_vm9, %v10395_v1, %v10407_v59 }
0x1b6c   :  { %v10389_v36 = vpop.f32.mrf.mxu0 }
0x1b6d   :  { %vm10404_vm10 = vcmp.ge.f32.partialorder %v10398_v12, 0.0  ;;  %v10408_v24 = vmul.f32 0.1, %v10398_v12  ;;  %v10390_v13 = vadd.f32 %v10389_v36, %v10341_v38  ;;  %v10409_v2 = vsel %vm10401_vm11, %v10387_v21, %v10405_v34 }
0x1b6f   :  { %vm10402_vm12 = vcmp.ge.f32.partialorder %v10390_v13, 0.0  ;;  %v10406_v54 = vmul.f32 0.1, %v10390_v13  ;;  %v10412_v5 = vsel %vm10404_vm10, %v10398_v12, %v10408_v24 }
0x1b70   :  { %v10422_v22 = vpack.c.bf16 %v10412_v5, %v10411_v52 }
0x1b71   :  { %v10410_v43 = vsel %vm10402_vm12, %v10390_v13, %v10406_v54 }
0x1b72   :  { %17312 = vmatprep.subr.bf16.mxu0 %v10422_v22  ;;  %v10421_v30 = vpack.c.bf16 %v10410_v43, %v10409_v2 }
0x1b73   :  { %17313 = vmatpush3.bf16.msra.mxu0 %v10422_v22 }
0x1b74   :  { %17314 = vmatprep.subr.bf16.mxu0 %v10421_v30 }
0x1b77   :  { %17315 = vmatpush3.bf16.msra.mxu0 %v10421_v30 }
0x1b78   :  { %10721 = vmatprep.subr.bf16.mxu0 %v18095_v37 }
0x1b7a   :  { %17317 = vmatmul.mubr.msk.bf16.vlgmr.msra.gmra.mxu0 %vm1468_vm4, %v18090_v26 }
0x1b7b   :  { %17320 = vmatprep.mubr.msk.bf16.mxu0 %vm1468_vm4, %v18091_v58  ;;  %10722 = vmatpush1.bf16.msra.mxu0 %v18093_v0 }
0x1b7c   :  { %10723 = vmatprep.subr.bf16.mxu0 %v18099_v10 }
0x1b7f   :  { %10724 = vmatpush1.bf16.msra.mxu0 %v18097_v51 }
0x1b80   :  { %10725 = vmatprep.subr.bf16.mxu0 %v18103_v60 }
0x1b82   :  { %17321 = vmatmul.mubr.msk.bf16.gmra.mxu0 %vm1468_vm4, %v18092_v17 }
0x1b83   :  { %10745 = vmatprep.mubr.bf16.mxu0 %v21986_v27  ;;  %10726 = vmatpush1.bf16.msra.mxu0 %v18101_v46 }
0x1b84   :  { %10727 = vmatprep.subr.bf16.mxu0 %v18107_v45 }
0x1b87   :  { %10728 = vmatpush1.bf16.msra.mxu0 %v18105_v61 }
0x1c3a   :  { %v17318_v32 = vpop.f32.mrf.mxu0 }
0x1c3c   :  { %v10489_v42 = vpop.f32.mrf.mxu0 }
0x1c3e   :  { %v17319_v14 = vpop.f32.mrf.mxu0 }
0x1c3f   :  { %v10545_v11 = vpack.c.bf16 %v17319_v14, %v17318_v32 }
0x1c40   :  { %v10492_v62 = vpop.f32.mrf.mxu0 }
0x1c41   :  { %v10544_v48 = vpack.c.bf16 %v10492_v62, %v10489_v42 }
0x1c42   :  { %v17322_v4 = vpop.f32.mrf.mxu0 }
0x1c43   :  { %17332 = vmatprep.mubr.msk.bf16.mxu1 %vm976_vm3, %v10544_v48  ;;  %15555 = vmatmul.mubr.msk.bf16.vlgmr.msra.gmra.mxu0 %vm976_vm3, %v10544_v48 }
0x1c44   :  { %v10505_v29 = vpop.f32.mrf.mxu0  ;;  %17333 = vmatmul.mubr.msk.bf16.vlgmr.msra.gmra.mxu1 %vm976_vm3, %v10545_v11  ;;  %10755 = vmatprep.mubr.bf16.mxu0 %v21986_v27 }
0x1c45   :  { %17341 = vmatpush3.bf16.msra.mxu1 %v18109_v35 }
0x1c46   :  { %v17323_v50 = vpop.f32.mrf.mxu0  ;;  %17342 = vmatprep.subr.bf16.mxu1 %v18110_v16 }
0x1c47   :  { %v10547_v8 = vpack.c.bf16 %v17323_v50, %v17322_v4 }
0x1c48   :  { %v10508_v55 = vpop.f32.mrf.mxu0 }
0x1c49   :  { %v10546_v31 = vpack.c.bf16 %v10508_v55, %v10505_v29  ;;  %17343 = vmatpush3.bf16.msra.mxu1 %v18110_v16 }
0x1c4a   :  { %17344 = vmatprep.subr.bf16.mxu1 %v18111_v49 }
0x1c4b   :  { %17336 = vmatprep.mubr.msk.bf16.mxu1 %vm976_vm3, %v10546_v31  ;;  %15556 = vmatmul.mubr.msk.bf16.gmra.mxu0 %vm976_vm3, %v10545_v11 }
0x1c4c   :  { %17337 = vmatmul.mubr.msk.bf16.gmra.mxu1 %vm976_vm3, %v10547_v8  ;;  %10765 = vmatprep.mubr.bf16.mxu0 %v21986_v27 }
0x1c4d   :  { %17345 = vmatpush3.bf16.msra.mxu1 %v18111_v49  ;;  %17348 = vmatprep.mubr.msk.bf16.mxu1 %vm976_vm3, %v10544_v48 }
0x1c4e   :  { %17346 = vmatprep.subr.bf16.mxu1 %v18112_v18 }
0x1c51   :  { %17347 = vmatpush3.bf16.msra.mxu1 %v18112_v18 }
0x1c52   :  { %11169 = vmatprep.subr.bf16.mxu1 %v20743_v19 }
0x1c53   :  { %15557 = vmatmul.mubr.msk.bf16.gmra.mxu0 %vm976_vm3, %v10546_v31 }
0x1c54   :  { %17349 = vmatmul.mubr.msk.bf16.vlgmr.msra.gmra.mxu1 %vm976_vm3, %v10545_v11  ;;  %10775 = vmatprep.mubr.bf16.mxu0 %v21986_v27 }
0x1c55   :  { %17352 = vmatprep.mubr.msk.bf16.mxu1 %vm976_vm3, %v10546_v31  ;;  %11170 = vmatpush1.bf16.msra.mxu1 %v20751_v39 }
0x1c5b   :  { %15558 = vmatmul.mubr.msk.bf16.gmra.mxu0 %vm976_vm3, %v10547_v8 }
0x1c5c   :  { %17353 = vmatmul.mubr.msk.bf16.gmra.mxu1 %vm976_vm3, %v10547_v8 }
0x1c5d   :  { %11187 = vmatprep.mubr.bf16.mxu1 %v21986_v27 }
0x1d04   :  { %v20757_v3 = vpop.f32.mrf.mxu1 }
0x1d05   :  { %v20783_v21 = vadd.f32 %v20757_v3, %v15563_v20  ;;  %v10920_v2 = vsel %vm488_vm2, %v20757_v3, inf }
0x1d06   :  { %v20762_v57 = vpop.f32.mrf.mxu1 }
0x1d07   :  { %v10872_v44 = vsel %vm488_vm2, %v20783_v21, -inf  ;;  %v10858_v12 = vadd.f32 %v15563_v20, %v20762_v57  ;;  %v10914_v5 = vsel %vm488_vm2, %v20762_v57, inf }
0x1d08   :  { %v20764_v7 = vpop.f32.mrf.mxu1 }
0x1d09   :  { %v10861_v38 = vadd.f32 %v20764_v7, %v15563_v20  ;;  %v10866_v36 = vsel %vm488_vm2, %v10858_v12, -inf  ;;  %v10923_v52 = vsel %vm488_vm2, %v20764_v7, inf }
0x1d0a   :  { %v20766_v28 = vpop.f32.mrf.mxu1 }
0x1d0b   :  { %v10875_v34 = vsel %vm488_vm2, %v10861_v38, -inf  ;;  %v10859_v24 = vadd.f32 %v15563_v20, %v20766_v28  ;;  %v10917_v13 = vsel %vm488_vm2, %v20766_v28, inf }
0x1d0c   :  { %v20768_v41 = vpop.f32.mrf.mxu1 }
0x1d0d   :  { %v10864_v15 = vadd.f32 %v20768_v41, %v15563_v20  ;;  %v10869_v54 = vsel %vm488_vm2, %v10859_v24, -inf  ;;  %v10932_v37 = vsel %vm488_vm2, %v20768_v41, inf }
0x1d0e   :  { %v20771_v23 = vpop.f32.mrf.mxu1 }
0x1d0f   :  { %v10884_v63 = vsel %vm488_vm2, %v10864_v15, -inf  ;;  %v10862_v53 = vadd.f32 %v15563_v20, %v20771_v23  ;;  %v10926_v30 = vsel %vm488_vm2, %v20771_v23, inf }
0x1d10   :  { %10885 = vmax.xlane.f32.xlu1 %v10884_v63  ;;  %v20775_v9 = vpop.f32.mrf.mxu1 }
0x1d11   :  { %v10865_v47 = vadd.f32 %v20775_v9, %v15563_v20  ;;  %v10878_v33 = vsel %vm488_vm2, %v10862_v53, -inf  ;;  %v10935_v43 = vsel %vm488_vm2, %v20775_v9, inf }
0x1d12   :  { %v20778_v1 = vpop.f32.mrf.mxu1 }
0x1d13   :  { %v10887_v25 = vsel %vm488_vm2, %v10865_v47, -inf  ;;  %v10863_v40 = vadd.f32 %v15563_v20, %v20778_v1  ;;  %v10929_v22 = vsel %vm488_vm2, %v20778_v1, inf }
0x1d14   :  { %10879 = vmax.xlane.f32.xlu1 %v10878_v33  ;;  %10888 = vmax.xlane.f32.xlu0 %v10887_v25 }
0x1d15   :  { %v10881_v59 = vsel %vm488_vm2, %v10863_v40, -inf }
0x1d18   :  { %10873 = vmax.xlane.f32.xlu1 %v10872_v44  ;;  %10882 = vmax.xlane.f32.xlu0 %v10881_v59 }
0x1d1c   :  { %10867 = vmax.xlane.f32.xlu1 %v10866_v36  ;;  %10876 = vmax.xlane.f32.xlu0 %v10875_v34 }
0x1d20   :  { %10918 = vmin.xlane.f32.xlu1 %v10917_v13  ;;  %10870 = vmax.xlane.f32.xlu0 %v10869_v54 }
0x1d24   :  { %10924 = vmin.xlane.f32.xlu1 %v10923_v52  ;;  %10915 = vmin.xlane.f32.xlu0 %v10914_v5 }
0x1d28   :  { %10930 = vmin.xlane.f32.xlu1 %v10929_v22  ;;  %10921 = vmin.xlane.f32.xlu0 %v10920_v2 }
0x1d2c   :  { %10936 = vmin.xlane.f32.xlu1 %v10935_v43  ;;  %10927 = vmin.xlane.f32.xlu0 %v10926_v30 }
0x1d30   :  { %10933 = vmin.xlane.f32.xlu0 %v10932_v37 }
0x1d99   :  { %v10886_v26 = vpop.xlane.xlu1 %10885 }
0x1d9a   :  { %v10896_v58 = vsub.f32 %v10864_v15, %v10886_v26 }
0x1d9c   :  { %v10910_v46 = vmul.f32 1.442695, %v10896_v58 }
0x1d9d   :  { %v10880_v0 = vpop.xlane.xlu1 %10879  ;;  %v10889_v10 = vpop.xlane.xlu0 %10888 }
0x1d9e   :  { %v10897_v51 = vsub.f32 %v10865_v47, %v10889_v10  ;;  %v10894_v61 = vsub.f32 %v10862_v53, %v10880_v0 }
0x1da0   :  { %v10912_v17 = vmul.f32 1.442695, %v10897_v51  ;;  %v10906_v14 = vmul.f32 1.442695, %v10894_v61  ;;  %v20859_v61 = vld [vmem:[%s18864_s21 + $0x8] ss:$12 sps:$4 sm:$0xff]  }
0x1da1   :  { %v10874_v60 = vpop.xlane.xlu1 %10873  ;;  %v10883_v6 = vpop.xlane.xlu0 %10882 }
0x1da2   :  { %v10895_v45 = vsub.f32 %v10863_v40, %v10883_v6  ;;  %18341 = vpow2.f32 %v10912_v17  ;;  %v10892_v49 = vsub.f32 %v20783_v21, %v10874_v60 }
0x1da3   :  { %18343 = vpow2.f32 %v10910_v46 }
0x1da4   :  { %v10908_v56 = vmul.f32 1.442695, %v10895_v45  ;;  %v10902_v47 = vmul.f32 1.442695, %v10892_v49 }
0x1da5   :  { %v10868_v35 = vpop.xlane.xlu1 %10867  ;;  %v10877_v32 = vpop.xlane.xlu0 %10876 }
0x1da6   :  { %v10890_v42 = vsub.f32 %v10858_v12, %v10868_v35  ;;  %18345 = vpow2.f32 %v10908_v56  ;;  %v10893_v62 = vsub.f32 %v10861_v38, %v10877_v32  ;;  %v20879_v35 = vpop.f32.mrf.mxu0 }
0x1da7   :  { %18347 = vpow2.f32 %v10906_v14 }
0x1da8   :  { %v10898_v4 = vmul.f32 1.442695, %v10890_v42  ;;  %v10904_v55 = vmul.f32 1.442695, %v10893_v62  ;;  %v20881_v32 = vpop.f32.mrf.mxu0  ;;  %v20887_v62 = vpop.f32.mrf.mxu1 }
0x1da9   :  { %v10919_v48 = vpop.xlane.xlu1 %10918  ;;  %v10871_v11 = vpop.xlane.xlu0 %10870 }
0x1daa   :  { %v10939_v16 = vsub.f32 %v10919_v48, %v20766_v28  ;;  %v10891_v29 = vsub.f32 %v10859_v24, %v10871_v11  ;;  %18349 = vpow2.f32 %v10898_v4  ;;  %v20883_v42 = vpop.f32.mrf.mxu0  ;;  %v20891_v11 = vpop.f32.mrf.mxu1 }
0x1dac   :  { %v10900_v50 = vmul.f32 1.442695, %v10891_v29  ;;  %v10948_v18 = vmul.f32 1.442695, %v10939_v16  ;;  %v20885_v14 = vpop.f32.mrf.mxu0  ;;  %v20895_v16 = vpop.f32.mrf.mxu1 }
0x1dad   :  { %v10925_v31 = vpop.xlane.xlu1 %10924  ;;  %v10916_v8 = vpop.xlane.xlu0 %10915 }
0x1dae   :  { %v10941_v20 = vsub.f32 %v10925_v31, %v20764_v7  ;;  %v10938_v15 = vsub.f32 %v10916_v8, %v20762_v57  ;;  %18351 = vpow2.f32 %v10900_v50  ;;  %v20889_v48 = vpop.f32.mrf.mxu0  ;;  %v20899_v50 = vpop.f32.mrf.mxu1 }
0x1daf   :  { %v20815_v63 = vpop.eup %18341  ;;  %18353 = vpow2.f32 %v10904_v55 }
0x1db0   :  { %v10946_v53 = vmul.f32 1.442695, %v10938_v15  ;;  %17356 = vmatprep.subr.msk.mxu0 %vm488_vm2, %v20815_v63  ;;  %v20819_v25 = vpop.eup %18343  ;;  %18355 = vpow2.f32 %v10948_v18  ;;  %v10952_v21 = vmul.f32 1.442695, %v10941_v20  ;;  %v20893_v4 = vpop.f32.mrf.mxu0 }
0x1db1   :  { %v10931_v28 = vpop.xlane.xlu1 %10930  ;;  %v10922_v33 = vpop.xlane.xlu0 %10921  ;;  %17357 = vmatpush3.xpose.msk.msra.mxu0 %vm488_vm2, %v20815_v63  ;;  %v11142_v56 = vpack.c.bf16 %v20815_v63, %v20819_v25 }
0x1db2   :  { %v10943_v57 = vsub.f32 %v10931_v28, %v20778_v1  ;;  %v10940_v7 = vsub.f32 %v10922_v33, %v20757_v3  ;;  %18357 = vpow2.f32 %v10946_v53  ;;  %17358 = vmatprep.subr.msk.mxu0 %vm488_vm2, %v20819_v25  ;;  %v20897_v29 = vpop.f32.mrf.mxu0  ;;  %v20901_v55 = vpop.f32.mrf.mxu1 }
0x1db3   :  { %18359 = vpow2.f32 %v10902_v47  ;;  %v18346_v12 = vpop.eup %18345 }
0x1db4   :  { %v10950_v40 = vmul.f32 1.442695, %v10940_v7  ;;  %18361 = vpow2.f32 %v10952_v21  ;;  %v10956_v38 = vmul.f32 1.442695, %v10943_v57  ;;  %v18348_v13 = vpop.eup %18347  ;;  %v10763_v49 = vpop.f32.mrf.mxu0 }
0x1db5   :  { %v10937_v44 = vpop.xlane.xlu1 %10936  ;;  %v10928_v59 = vpop.xlane.xlu0 %10927  ;;  %17359 = vmatpush3.xpose.msk.msra.mxu0 %vm488_vm2, %v20819_v25  ;;  %v11141_v45 = vpack.c.bf16 %v18346_v12, %v18348_v13 }
0x1db6   :  { %v10945_v36 = vsub.f32 %v10937_v44, %v20775_v9  ;;  %v10942_v1 = vsub.f32 %v10928_v59, %v20771_v23  ;;  %18363 = vpow2.f32 %v10950_v40  ;;  %17360 = vmatprep.subr.msk.mxu0 %vm488_vm2, %v18346_v12  ;;  %v10767_v31 = vpop.f32.mrf.mxu0  ;;  %v20903_v8 = vpop.f32.mrf.mxu1 }
0x1db7   :  { %18365 = vpow2.f32 %v10956_v38  ;;  %v18350_v52 = vpop.eup %18349 }
0x1db8   :  { %v10954_v3 = vmul.f32 1.442695, %v10942_v1  ;;  %v10960_v34 = vmul.f32 1.442695, %v10945_v36  ;;  %v10769_v18 = vpop.f32.mrf.mxu0  ;;  %v20905_v20 = vpop.f32.mrf.mxu1 }
0x1db9   :  { %v10934_v24 = vpop.xlane.xlu0 %10933  ;;  %17361 = vmatpush3.xpose.msk.msra.mxu0 %vm488_vm2, %v18346_v12 }
0x1dba   :  { %v10944_v54 = vsub.f32 %v10934_v24, %v20768_v41  ;;  %18367 = vpow2.f32 %v10954_v3  ;;  %17362 = vmatprep.subr.msk.mxu0 %vm488_vm2, %v18348_v13  ;;  %v10771_v15 = vpop.f32.mrf.mxu0  ;;  %v20907_v63 = vpop.f32.mrf.mxu1 }
0x1dbb   :  { %v18352_v5 = vpop.eup %18351  ;;  %18369 = vpow2.f32 %v10960_v34 }
0x1dbc   :  { %v10958_v9 = vmul.f32 1.442695, %v10944_v54  ;;  %v11139_v23 = vpack.c.bf16 %v18352_v5, %v18350_v52  ;;  %v18354_v22 = vpop.eup %18353  ;;  %v10773_v53 = vpop.f32.mrf.mxu0 }
0x1dbd   :  { %17363 = vmatpush3.xpose.msk.msra.mxu0 %vm488_vm2, %v18348_v13  ;;  %v18356_v2 = vpop.eup %18355 }
0x1dbe   :  { %18371 = vpow2.f32 %v10958_v9  ;;  %17364 = vmatprep.subr.msk.mxu0 %vm488_vm2, %v18354_v22  ;;  %15580 = vmatmul.mubr.msk.bf16.vlgmr.msra.gmra.mxu1 %vm488_vm2, %v11139_v23  ;;  %v10777_v33 = vpop.f32.mrf.mxu0 }
0x1dbf   :  { %v18358_v43 = vpop.eup %18357  ;;  %11197 = vmatprep.mubr.bf16.mxu1 %v21986_v27 }
0x1dc0   :  { %17372 = vmatprep.mubr.msk.f32.mxu0 %vm488_vm2, %v18358_v43  ;;  %v20840_v41 = vpack.c.bf16 %v18356_v2, %v18358_v43  ;;  %v18360_v30 = vpop.eup %18359  ;;  %v10779_v57 = vpop.f32.mrf.mxu0 }
0x1dc1   :  { %17365 = vmatpush3.xpose.msk.msra.mxu0 %vm488_vm2, %v18354_v22  ;;  %v18362_v37 = vpop.eup %18361  ;;  %v11140_v0 = vpack.c.bf16 %v18354_v22, %v18360_v30 }
0x1dc2   :  { %21992 = vst [vmem:[#allocation11_spill] sm:$0xff] %v20840_v41  ;;  %17366 = vmatprep.subr.msk.mxu0 %vm488_vm2, %v18360_v30  ;;  %v10781_v44 = vpop.f32.mrf.mxu0 }
0x1dc3   :  { %v18364_v26 = vpop.eup %18363 }
0x1dc4   :  { %v20844_v58 = vpack.c.bf16 %v18362_v37, %v18364_v26  ;;  %v18366_v10 = vpop.eup %18365  ;;  %v10783_v38 = vpop.f32.mrf.mxu0 }
0x1dc5   :  { %17367 = vmatpush3.xpose.msk.msra.mxu0 %vm488_vm2, %v18360_v30 }
0x1dc6   :  { %21993 = vst [vmem:[#allocation9_spill] sm:$0xff] %v20844_v58  ;;  %17368 = vmatprep.subr.msk.mxu0 %vm488_vm2, %v18352_v5  ;;  %15581 = vmatmul.mubr.msk.bf16.gmra.mxu1 %vm488_vm2, %v11140_v0 }
0x1dc7   :  { %v18368_v51 = vpop.eup %18367  ;;  %11207 = vmatprep.mubr.bf16.mxu1 %v21986_v27 }
0x1dc8   :  { %v20850_v17 = vpack.c.bf16 %v18366_v10, %v18368_v51  ;;  %v18370_v46 = vpop.eup %18369 }
0x1dc9   :  { %17369 = vmatpush3.xpose.msk.msra.mxu0 %vm488_vm2, %v18352_v5 }
0x1dca   :  { %21994 = vst [vmem:[#allocation6_spill] sm:$0xff] %v20850_v17  ;;  %17370 = vmatprep.subr.msk.mxu0 %vm488_vm2, %v18350_v52 }
0x1dcb   :  { %v18372_v60 = vpop.eup %18371 }
0x1dcc   :  { %v20854_v6 = vpack.c.bf16 %v18370_v46, %v18372_v60 }
0x1dcd   :  { %17371 = vmatpush3.xpose.msk.msra.mxu0 %vm488_vm2, %v18350_v52 }
0x1dce   :  { %21995 = vst [vmem:[#allocation10_spill] sm:$0xff] %v20854_v6  ;;  %15582 = vmatmul.mubr.msk.bf16.gmra.mxu1 %vm488_vm2, %v11141_v45  ;;  %17384 = vmatprep.subr.bf16.mxu0 %v20859_v61 }
0x1dcf   :  { %11217 = vmatprep.mubr.bf16.mxu1 %v21986_v27 }
0x1dd0   :  { %17373 = vmatmul.mubr.msk.f32.vlgmr.msra.gmra.mxu0 %vm488_vm2, %v18356_v2 }
0x1dd1   :  { %17375 = vmatprep.mubr.msk.f32.mxu0 %vm488_vm2, %v18364_v26  ;;  %17385 = vmatpush3.bf16.msra.mxu0 %v20859_v61 }
0x1dd4   :  { %17376 = vmatmul.mubr.msk.f32.gmra.mxu0 %vm488_vm2, %v18362_v37 }
0x1dd5   :  { %17378 = vmatprep.mubr.msk.f32.mxu0 %vm488_vm2, %v18368_v51 }
0x1dd6   :  { %15583 = vmatmul.mubr.msk.bf16.gmra.mxu1 %vm488_vm2, %v11142_v56 }
0x1dd7   :  { %11377 = vmatprep.mubr.bf16.mxu1 %v21986_v27 }
0x1dd8   :  { %17379 = vmatmul.mubr.msk.f32.gmra.mxu0 %vm488_vm2, %v18366_v10 }
0x1dd9   :  { %17381 = vmatprep.mubr.msk.f32.mxu0 %vm488_vm2, %v18372_v60 }
0x1ddc   :  { %17382 = vmatmul.mubr.msk.f32.gmra.mxu0 %vm488_vm2, %v18370_v46 }
0x1ddd   :  { %17386 = vmatprep.mubr.msk.bf16.mxu0 %vm488_vm2, %v11139_v23 }
0x1de0   :  { %17387 = vmatmul.mubr.msk.bf16.vlgmr.msra.gmra.mxu0 %vm488_vm2, %v11140_v0 }
0x1de1   :  { %17390 = vmatprep.mubr.msk.bf16.mxu0 %vm488_vm2, %v11141_v45 }
0x1de8   :  { %17391 = vmatmul.mubr.msk.bf16.gmra.mxu0 %vm488_vm2, %v11142_v56 }
0x1e7e   :  { %v20909_v47 = vpop.f32.mrf.mxu1 }
0x1e80   :  { %v20911_v28 = vpop.f32.mrf.mxu1 }
0x1e82   :  { %v20913_v25 = vpop.f32.mrf.mxu1 }
0x1e84   :  { %v11195_v21 = vpop.f32.mrf.mxu1 }
0x1e86   :  { %v11199_v7 = vpop.f32.mrf.mxu1 }
0x1e88   :  { %v11201_v40 = vpop.f32.mrf.mxu1 }
0x1e8a   :  { %v11203_v59 = vpop.f32.mrf.mxu1 }
0x1e8c   :  { %v11205_v12 = vpop.f32.mrf.mxu1 }
0x1e8d   :  { %v11303_v58 = vmul.f32 %v11205_v12, %v10763_v49  ;;  %v11297_v12 = vmul.f32 %v11195_v21, %v20885_v14  ;;  %v11293_v21 = vmul.f32 %v20909_v47, %v20879_v35 }
0x1e8e   :  { %v11209_v36 = vpop.f32.mrf.mxu1 }
0x1e90   :  { %v17374_v1 = vpop.f32.mrf.mxu0  ;;  %v11211_v3 = vpop.f32.mrf.mxu1 }
0x1e91   :  { %v11116_v34 = vmax.f32 %v17374_v1, 1e-30  ;;  %v11306_v56 = vmul.f32 %v11211_v3, %v10769_v18  ;;  %v18629_v18 = vld [vmem:[%s19000_s25] sm:$0xff]  ;;  %v18630_v3 = vld [vmem:[%s19000_s25 + $0x8] sm:$0xff] }
0x1e92   :  { %v11076_v24 = vpop.f32.mrf.mxu0  ;;  %v11213_v13 = vpop.f32.mrf.mxu1 }
0x1e93   :  { %18373 = vrcp.f32 %v11116_v34  ;;  %v11115_v54 = vmax.f32 %v11076_v24, 1e-30 }
0x1e94   :  { %v17377_v52 = vpop.f32.mrf.mxu0  ;;  %v11215_v5 = vpop.f32.mrf.mxu1 }
0x1e95   :  { %18375 = vrcp.f32 %v11115_v54  ;;  %v11309_v10 = vmul.f32 %v11215_v5, %v10773_v53  ;;  %v11308_v54 = vmul.f32 %v11213_v13, %v10771_v15  ;;  %v11305_v53 = vmul.f32 %v11209_v36, %v10767_v31 }
0x1e96   :  { %v11086_v9 = vpop.f32.mrf.mxu0  ;;  %v11219_v23 = vpop.f32.mrf.mxu1  ;;  %v11302_v13 = vmul.f32 %v11203_v59, %v20897_v29  ;;  %v11299_v36 = vmul.f32 %v11199_v7, %v20889_v48 }
0x1e97   :  { %v11311_v60 = vmul.f32 %v11219_v23, %v10777_v33  ;;  %v11117_v1 = vmax.f32 %v11086_v9, 1e-30  ;;  %v11300_v33 = vmul.f32 %v11201_v40, %v20893_v4  ;;  %v11327_v5 = vpack.c.bf16 %v11308_v54, %v11305_v53  ;;  %v18636_v54 = vld [vmem:[%s19000_s25 + $0x30] sm:$0xff]  ;;  %v18638_v53 = vld [vmem:[%s19000_s25 + $0x38] sm:$0xff] }
0x1e98   :  { %v17380_v22 = vpop.f32.mrf.mxu0  ;;  %v11221_v2 = vpop.f32.mrf.mxu1  ;;  %v11294_v4 = vmul.f32 %v20911_v28, %v20881_v32  ;;  %v11324_v29 = vpack.c.bf16 %v11302_v13, %v11299_v36  ;;  %v18642_v13 = vld [vmem:[%s19071_s29 + $0x30] sm:$0xff]   ;;  %v18647_v36 = vld [vmem:[%s19071_s29 + $0x58] sm:$0xff]  }
0x1e99   :  { %v11312_v51 = vmul.f32 %v11221_v2, %v10779_v57  ;;  %18377 = vrcp.f32 %v11117_v1 }
0x1e9a   :  { %v11096_v43 = vpop.f32.mrf.mxu0  ;;  %v11223_v30 = vpop.f32.mrf.mxu1  ;;  %v11322_v14 = vpack.c.bf16 %v11297_v12, %v11294_v4  ;;  %v18644_v12 = vld [vmem:[%s19071_s29 + $0x28] sm:$0xff]   ;;  %v18649_v4 = vld [vmem:[%s19071_s29 + $0x50] sm:$0xff]  }
0x1e9b   :  { %v11314_v37 = vmul.f32 %v11223_v30, %v10781_v44  ;;  %v11118_v44 = vmax.f32 %v17377_v52, 1e-30  ;;  %v11328_v30 = vpack.c.bf16 %v11309_v10, %v11306_v56  ;;  %v11325_v52 = vpack.c.bf16 %v11303_v58, %v11300_v33  ;;  %v18633_v10 = vld [vmem:[%s19000_s25 + $0x18] sm:$0xff]  ;;  %v18635_v56 = vld [vmem:[%s19000_s25 + $0x28] sm:$0xff] }
0x1e9c   :  { %v20915_v26 = vpop.f32.mrf.mxu0  ;;  %v11225_v0 = vpop.f32.mrf.mxu1  ;;  %v11119_v40 = vmax.f32 %v11096_v43, 1e-30  ;;  %v11120_v58 = vmax.f32 %v17380_v22, 1e-30  ;;  %v21996_v33 = vld [vmem:[#allocation11_spill] sm:$0xff] }
0x1e9d   :  { %v11315_v46 = vmul.f32 %v11225_v0, %v10783_v38  ;;  %v11330_v6 = vpack.c.bf16 %v11314_v37, %v11311_v60  ;;  %18379 = vrcp.f32 %v11118_v44  ;;  %v11122_v2 = vmax.f32 %v20915_v26, 1e-30  ;;  %v18632_v26 = vld [vmem:[%s19071_s29 + $0x88] sm:$0xff]  }
0x1e9e   :  { %v20917_v45 = vpop.f32.mrf.mxu0  ;;  %18381 = vrcp.f32 %v11119_v40  ;;  %v18650_v40 = vld [vmem:[%s19071_s29 + $0x10] sm:$0xff]  }
0x1e9f   :  { %v11331_v34 = vpack.c.bf16 %v11315_v46, %v11312_v51  ;;  %18383 = vrcp.f32 %v11120_v58 }
0x1ea0   :  { %v18374_v24 = vpop.eup %18373  ;;  %v17388_v17 = vpop.f32.mrf.mxu0 }
0x1ea1   :  { %11353 = vmatprep.subr.bf16.mxu1 %v11331_v34  ;;  %v11132_v15 = vmul.f32 %v18630_v3, %v18374_v24  ;;  %v18640_v3 = vld [vmem:[%s19071_s29 + $0x70] sm:$0xff]  }
0x1ea2   :  { %v18376_v41 = vpop.eup %18375  ;;  %v20919_v57 = vpop.f32.mrf.mxu0  ;;  %11354 = vmatpush1.bf16.msra.mxu1 %v11330_v6 }
0x1ea3   :  { %11355 = vmatprep.subr.bf16.mxu1 %v11328_v30  ;;  %v11131_v38 = vmul.f32 %v18629_v18, %v18376_v41  ;;  %v11296_v41 = vmul.f32 %v20913_v25, %v20883_v42  ;;  %v11121_v42 = vmax.f32 %v20917_v45, 1e-30  ;;  %v11295_v46 = vmul.f32 %v20919_v57, %v20891_v11  ;;  %v18637_v30 = vld [vmem:[%s19071_s29 + $0x78] sm:$0xff]   ;;  %v21998_v18 = vld [vmem:[#allocation6_spill] sm:$0xff] }
0x1ea4   :  { %v17389_v49 = vpop.f32.mrf.mxu0 }
0x1ea5   :  { %v11317_v31 = vpack.c.bf16 %v11132_v15, %v11131_v38  ;;  %v11321_v7 = vpack.c.bf16 %v11296_v41, %v11293_v21  ;;  %18385 = vrcp.f32 %v11121_v42  ;;  %v18639_v38 = vld [vmem:[%s19071_s29 + $0x38] sm:$0xff]   ;;  %v18641_v15 = vld [vmem:[%s19071_s29 + $0x80] sm:$0xff]   ;;  %v18651_v41 = vld [vmem:[%s19071_s29 + $0x48] sm:$0xff]  }
0x1ea6   :  { %v11265_v6 = vpop.f32.mrf.mxu0  ;;  %11356 = vmatpush1.bf16.msra.mxu1 %v11327_v5  ;;  %v18378_v47 = vpop.eup %18377  ;;  %18387 = vrcp.f32 %v11122_v2  ;;  %v18643_v5 = vld [vmem:[%s19071_s29 + $0x68] sm:$0xff]  }
0x1ea7   :  { %11357 = vmatprep.subr.bf16.mxu1 %v11325_v52  ;;  %17402 = vmatprep.mubr.msk.bf16.mxu0 %vm976_vm3, %v11317_v31  ;;  %v11298_v0 = vmul.f32 %v11265_v6, %v20899_v50  ;;  %v18634_v50 = vld [vmem:[%s19000_s25 + $0x20] sm:$0xff]  ;;  %v18648_v6 = vld [vmem:[%s19071_s29 + $0x18] sm:$0xff]  }
0x1ea8   :  { %v17392_v59 = vpop.f32.mrf.mxu0  ;;  %v18645_v52 = vld [vmem:[%s19071_s29 + $0x60] sm:$0xff]  }
0x1ea9   :  { %v11313_v28 = vmul.f32 %v17392_v59, %v20901_v55  ;;  %v11304_v55 = vmul.f32 %v17389_v49, %v20895_v16  ;;  %v11323_v60 = vpack.c.bf16 %v11298_v0, %v11295_v46  ;;  %v21999_v49 = vld [vmem:[#allocation10_spill] sm:$0xff] }
0x1eaa   :  { %v11278_v48 = vpop.f32.mrf.mxu0  ;;  %11358 = vmatpush1.bf16.msra.mxu1 %v11324_v29  ;;  %v18652_v29 = vld [vmem:[%s19071_s29 + $0x8] sm:$0xff]   ;;  %v18653_v59 = vld [vmem:[%s19071_s29 + $0x40] sm:$0xff]  }
0x1eab   :  { %11359 = vmatprep.subr.bf16.mxu1 %v11322_v14  ;;  %v11307_v25 = vmul.f32 %v11278_v48, %v20903_v8  ;;  %v11301_v8 = vmul.f32 %v17388_v17, %v20887_v62  ;;  %v18654_v14 = vld [vmem:[%s19071_s29] sm:$0xff]  }
0x1eac   :  { %v17393_v32 = vpop.f32.mrf.mxu0 }
0x1ead   :  { %v11316_v9 = vmul.f32 %v17393_v32, %v20905_v20  ;;  %v18380_v20 = vpop.eup %18379  ;;  %v11326_v16 = vpack.c.bf16 %v11304_v55, %v11301_v8 }
0x1eae   :  { %v11281_v23 = vpop.f32.mrf.mxu0  ;;  %11360 = vmatpush1.bf16.msra.mxu1 %v11321_v7  ;;  %v11134_v51 = vmul.f32 %v18633_v10, %v18380_v20  ;;  %v18382_v62 = vpop.eup %18381 }
0x1eaf   :  { %v11332_v22 = vpack.c.bf16 %v11316_v9, %v11313_v28  ;;  %v11310_v35 = vmul.f32 %v11281_v23, %v20907_v63  ;;  %17410 = vmatprep.subr.bf16.mxu1 %v20859_v61  ;;  %v18631_v63 = vld [vmem:[%s19000_s25 + $0x10] sm:$0xff]  ;;  %v11135_v45 = vmul.f32 %v18634_v50, %v18382_v62 }
0x1eb0   :  { %v11133_v37 = vmul.f32 %v18631_v63, %v18378_v47 }
0x1eb1   :  { %v11329_v43 = vpack.c.bf16 %v11310_v35, %v11307_v25  ;;  %15588 = vmatmul.mubr.msk.bf16.vlgmr.msra.gmra.mxu1 %vm976_vm3, %v11317_v31  ;;  %17394 = vmatprep.subr.bf16.mxu0 %v11332_v22  ;;  %v18646_v31 = vld [vmem:[%s19071_s29 + $0x20] sm:$0xff]  }
0x1eb2   :  { %17395 = vmatpush3.bf16.msra.mxu0 %v11332_v22  ;;  %11387 = vmatprep.mubr.bf16.mxu1 %v21986_v27  ;;  %v11318_v17 = vpack.c.bf16 %v11134_v51, %v11133_v37 }
0x1eb3   :  { %17396 = vmatprep.subr.bf16.mxu0 %v11329_v43  ;;  %17411 = vmatpush3.bf16.msra.mxu1 %v20859_v61  ;;  %v18384_v61 = vpop.eup %18383 }
0x1eb4   :  { %17420 = vmatprep.subr.bf16.mxu1 %v18632_v26  ;;  %v11136_v1 = vmul.f32 %v18635_v56, %v18384_v61  ;;  %v18386_v34 = vpop.eup %18385 }
0x1eb5   :  { %v18388_v24 = vpop.eup %18387  ;;  %v11137_v44 = vmul.f32 %v18636_v54, %v18386_v34 }
0x1eb6   :  { %17397 = vmatpush3.bf16.msra.mxu0 %v11329_v43  ;;  %v11319_v11 = vpack.c.bf16 %v11136_v1, %v11135_v45 }
0x1eb7   :  { %17398 = vmatprep.subr.bf16.mxu0 %v11326_v16 }
0x1eb9   :  { %15589 = vmatmul.mubr.msk.bf16.gmra.mxu1 %vm976_vm3, %v11318_v17 }
0x1eba   :  { %17399 = vmatpush3.bf16.msra.mxu0 %v11326_v16  ;;  %11397 = vmatprep.mubr.bf16.mxu1 %v21986_v27 }
0x1ebb   :  { %17400 = vmatprep.subr.bf16.mxu0 %v11323_v60 }
0x1ebe   :  { %17401 = vmatpush3.bf16.msra.mxu0 %v11323_v60 }
0x1ebf   :  { %11513 = vmatprep.subr.bf16.mxu0 %v20743_v19  ;;  %v11138_v19 = vmul.f32 %v18638_v53, %v18388_v24 }
0x1ec1   :  { %15590 = vmatmul.mubr.msk.bf16.gmra.mxu1 %vm976_vm3, %v11319_v11  ;;  %17403 = vmatmul.mubr.msk.bf16.vlgmr.msra.gmra.mxu0 %vm976_vm3, %v11318_v17  ;;  %v11320_v57 = vpack.c.bf16 %v11138_v19, %v11137_v44 }
0x1ec2   :  { %17406 = vmatprep.mubr.msk.bf16.mxu0 %vm976_vm3, %v11319_v11  ;;  %11407 = vmatprep.mubr.bf16.mxu1 %v21986_v27 }
0x1ec3   :  { %11514 = vmatpush1.bf16.msra.mxu0 %v20751_v39  ;;  %v21997_v39 = vld [vmem:[#allocation9_spill] sm:$0xff] }
0x1ec4   :  { %16484 = vmatprep.subr.bf16.mxu0 %v18637_v30 }
0x1ec9   :  { %15591 = vmatmul.mubr.msk.bf16.gmra.mxu1 %vm976_vm3, %v11320_v57  ;;  %17407 = vmatmul.mubr.msk.bf16.gmra.mxu0 %vm976_vm3, %v11320_v57 }
0x1eca   :  { %17412 = vmatprep.mubr.msk.bf16.mxu1 %vm488_vm2, %v21996_v33  ;;  %11531 = vmatprep.mubr.bf16.mxu0 %v21986_v27 }
0x1ed1   :  { %15596 = vmatmul.mubr.msk.bf16.vlgmr.msra.gmra.mxu0 %vm488_vm2, %v21996_v33  ;;  %17413 = vmatmul.mubr.msk.bf16.vlgmr.msra.gmra.mxu1 %vm488_vm2, %v21997_v39 }
0x1ed2   :  { %17416 = vmatprep.mubr.msk.bf16.mxu1 %vm488_vm2, %v21998_v18  ;;  %11541 = vmatprep.mubr.bf16.mxu0 %v21986_v27 }
0x1ed3   :  { %16485 = vmatpush3.bf16.msra.mxu0 %v18639_v38  ;;  %17421 = vmatpush3.bf16.msra.mxu1 %v18632_v26 }
0x1ed4   :  { %16486 = vmatprep.subr.bf16.mxu0 %v18640_v3  ;;  %17422 = vmatprep.subr.bf16.mxu1 %v18641_v15 }
0x1ed7   :  { %16487 = vmatpush3.bf16.msra.mxu0 %v18642_v13  ;;  %17423 = vmatpush3.bf16.msra.mxu1 %v18641_v15 }
0x1ed8   :  { %16488 = vmatprep.subr.bf16.mxu0 %v18643_v5 }
0x1ed9   :  { %15597 = vmatmul.mubr.msk.bf16.gmra.mxu0 %vm488_vm2, %v21997_v39  ;;  %17417 = vmatmul.mubr.msk.bf16.gmra.mxu1 %vm488_vm2, %v21999_v49 }
0x1eda   :  { %11551 = vmatprep.mubr.bf16.mxu0 %v21986_v27 }
0x1edb   :  { %16489 = vmatpush3.bf16.msra.mxu0 %v18644_v12 }
0x1edc   :  { %16490 = vmatprep.subr.bf16.mxu0 %v18645_v52 }
0x1edf   :  { %16491 = vmatpush3.bf16.msra.mxu0 %v18646_v31 }
0x1ee0   :  { %16492 = vmatprep.subr.bf16.mxu0 %v18647_v36 }
0x1ee1   :  { %15598 = vmatmul.mubr.msk.bf16.gmra.mxu0 %vm488_vm2, %v21998_v18 }
0x1ee2   :  { %11561 = vmatprep.mubr.bf16.mxu0 %v21986_v27 }
0x1ee3   :  { %16493 = vmatpush3.bf16.msra.mxu0 %v18648_v6 }
0x1ee4   :  { %16494 = vmatprep.subr.bf16.mxu0 %v18649_v4 }
0x1ee7   :  { %16495 = vmatpush3.bf16.msra.mxu0 %v18650_v40 }
0x1ee8   :  { %16496 = vmatprep.subr.bf16.mxu0 %v18651_v41 }
0x1ee9   :  { %15599 = vmatmul.mubr.msk.bf16.gmra.mxu0 %vm488_vm2, %v21999_v49 }
0x1eeb   :  { %16497 = vmatpush3.bf16.msra.mxu0 %v18652_v29 }
0x1eec   :  { %16498 = vmatprep.subr.bf16.mxu0 %v18653_v59 }
0x1eef   :  { %16499 = vmatpush3.bf16.msra.mxu0 %v18654_v14 }
0x1f71   :  { %v11379_v58 = vpop.f32.mrf.mxu1 }
0x1f73   :  { %v11381_v21 = vpop.f32.mrf.mxu1 }
0x1f75   :  { %v11383_v48 = vpop.f32.mrf.mxu1 }
0x1f77   :  { %v11385_v7 = vpop.f32.mrf.mxu1 }
0x1f79   :  { %v11389_v32 = vpop.f32.mrf.mxu1 }
0x1f7b   :  { %v11391_v28 = vpop.f32.mrf.mxu1 }
0x1f7d   :  { %v11393_v9 = vpop.f32.mrf.mxu1 }
0x1f7f   :  { %v11395_v23 = vpop.f32.mrf.mxu1 }
0x1f81   :  { %v21003_v42 = vpop.f32.mrf.mxu1  ;;  %v17404_v25 = vpop.f32.mrf.mxu0 }
0x1f83   :  { %v21005_v22 = vpop.f32.mrf.mxu1  ;;  %v11452_v35 = vpop.f32.mrf.mxu0 }
0x1f85   :  { %v21007_v47 = vpop.f32.mrf.mxu1  ;;  %v17405_v2 = vpop.f32.mrf.mxu0 }
0x1f87   :  { %v21009_v55 = vpop.f32.mrf.mxu1  ;;  %v11455_v43 = vpop.f32.mrf.mxu0 }
0x1f89   :  { %v21011_v20 = vpop.f32.mrf.mxu1  ;;  %v17408_v8 = vpop.f32.mrf.mxu0 }
0x1f8b   :  { %v21013_v63 = vpop.f32.mrf.mxu1  ;;  %v11468_v37 = vpop.f32.mrf.mxu0 }
0x1f8d   :  { %v21015_v26 = vpop.f32.mrf.mxu1  ;;  %v17409_v16 = vpop.f32.mrf.mxu0 }
0x1f8f   :  { %v21017_v0 = vpop.f32.mrf.mxu1  ;;  %v11471_v10 = vpop.f32.mrf.mxu0 }
0x1f91   :  { %v11533_v51 = vpop.f32.mrf.mxu0  ;;  %v17414_v46 = vpop.f32.mrf.mxu1 }
0x1f92   :  { %v11637_v44 = vmul.f32 %v11533_v51, %v11379_v58  ;;  %v11645_v30 = vmul.f32 %v17414_v46, %v17404_v25 }
0x1f93   :  { %v11535_v17 = vpop.f32.mrf.mxu0  ;;  %v11606_v62 = vpop.f32.mrf.mxu1 }
0x1f94   :  { %v11638_v11 = vmul.f32 %v11535_v17, %v11381_v21  ;;  %v11639_v34 = vmul.f32 %v11606_v62, %v11452_v35  ;;  %v18120_v17 = vld [vmem:[%s21039_s24 + $0x8] sm:$0xff]  }
0x1f95   :  { %v11537_v60 = vpop.f32.mrf.mxu0  ;;  %v17415_v61 = vpop.f32.mrf.mxu1 }
0x1f96   :  { %v11640_v50 = vmul.f32 %v11537_v60, %v11383_v48  ;;  %v11648_v45 = vmul.f32 %v17415_v61, %v17405_v2 }
0x1f97   :  { %v11539_v56 = vpop.f32.mrf.mxu0  ;;  %v11609_v1 = vpop.f32.mrf.mxu1 }
0x1f98   :  { %v11641_v24 = vmul.f32 %v11539_v56, %v11385_v7  ;;  %v11642_v54 = vmul.f32 %v11609_v1, %v11455_v43  ;;  %v11661_v39 = vpack.c.bf16 %v11640_v50, %v11637_v44  ;;  %v11666_v18 = vpack.c.bf16 %v11648_v45, %v11645_v30  ;;  %v21050_v56 = vld [vmem:[%s14912_s4] ss:$0 sm:$0xff] }
0x1f99   :  { %v11543_v53 = vpop.f32.mrf.mxu0  ;;  %v17418_v19 = vpop.f32.mrf.mxu1 }
0x1f9a   :  { %v11662_v57 = vpack.c.bf16 %v11641_v24, %v11638_v11  ;;  %v11663_v33 = vpack.c.bf16 %v11642_v54, %v11639_v34  ;;  %v11643_v40 = vmul.f32 %v11543_v53, %v11389_v32  ;;  %v11657_v41 = vmul.f32 %v17418_v19, %v17408_v8 }
0x1f9b   :  { %v11545_v38 = vpop.f32.mrf.mxu0  ;;  %v11622_v3 = vpop.f32.mrf.mxu1 }
0x1f9c   :  { %11724 = vmatprep.mubr.bf16.mxu0 %v11662_v57  ;;  %17424 = vmatprep.mubr.msk.bf16.mxu1 %vm1468_vm4, %v11663_v33  ;;  %v11644_v31 = vmul.f32 %v11545_v38, %v11391_v28  ;;  %v11651_v36 = vmul.f32 %v11622_v3, %v11468_v37 }
0x1f9d   :  { %v11547_v15 = vpop.f32.mrf.mxu0  ;;  %v17419_v13 = vpop.f32.mrf.mxu1  ;;  %11725 = vmatmul.mubr.bf16.vlgmr.msra.gmra.mxu0 %v11661_v39  ;;  %17425 = vmatmul.mubr.msk.bf16.vlgmr.msra.gmra.mxu1 %vm1468_vm4, %v11666_v18 }
0x1f9e   :  { %v11646_v5 = vmul.f32 %v11547_v15, %v11393_v9  ;;  %v11660_v49 = vmul.f32 %v17419_v13, %v17409_v16 }
0x1f9f   :  { %v11549_v12 = vpop.f32.mrf.mxu0  ;;  %v11625_v52 = vpop.f32.mrf.mxu1 }
0x1fa0   :  { %v11647_v6 = vmul.f32 %v11549_v12, %v11395_v23  ;;  %v11654_v4 = vmul.f32 %v11625_v52, %v11471_v10  ;;  %v11664_v58 = vpack.c.bf16 %v11646_v5, %v11643_v40  ;;  %v11672_v21 = vpack.c.bf16 %v11660_v49, %v11657_v41  ;;  %v18117_v41 = vld [vmem:[%s21034_s13 + $0x48] ss:$12 sps:$4 sm:$0xff]  }
0x1fa1   :  { %v11553_v29 = vpop.f32.mrf.mxu0 }
0x1fa2   :  { %v11665_v59 = vpack.c.bf16 %v11647_v6, %v11644_v31  ;;  %v11669_v14 = vpack.c.bf16 %v11654_v4, %v11651_v36  ;;  %v11649_v25 = vmul.f32 %v11553_v29, %v21003_v42  ;;  %v18113_v42 = vld [vmem:[%s21034_s13 + $0x50] ss:$12 sps:$4 sm:$0xff]  }
0x1fa3   :  { %v11555_v48 = vpop.f32.mrf.mxu0  ;;  %17444 = vmatprep.subr.bf16.mxu0 %v18113_v42 }
0x1fa4   :  { %11732 = vmatprep.mubr.bf16.mxu0 %v11665_v59  ;;  %17428 = vmatprep.mubr.msk.bf16.mxu1 %vm1468_vm4, %v11669_v14  ;;  %v11650_v23 = vmul.f32 %v11555_v48, %v21005_v22  ;;  %v18123_v59 = vld [vmem:[%s21034_s13 + $0x34] ss:$12 sps:$4 sm:$0xff]  }
0x1fa5   :  { %v11557_v7 = vpop.f32.mrf.mxu0  ;;  %11733 = vmatmul.mubr.bf16.gmra.mxu0 %v11664_v58  ;;  %17429 = vmatmul.mubr.msk.bf16.gmra.mxu1 %vm1468_vm4, %v11672_v21  ;;  %v18124_v14 = vld [vmem:[%s21039_s24] sm:$0xff]  }
0x1fa6   :  { %v11652_v28 = vmul.f32 %v11557_v7, %v21007_v47  ;;  %17445 = vmatpush3.bf16.msra.mxu0 %v18113_v42 }
0x1fa7   :  { %v11559_v9 = vpop.f32.mrf.mxu0 }
0x1fa8   :  { %v11653_v32 = vmul.f32 %v11559_v9, %v21009_v55  ;;  %v11667_v43 = vpack.c.bf16 %v11652_v28, %v11649_v25  ;;  %v18121_v9 = vld [vmem:[%s21034_s13 + $0x30] ss:$12 sps:$4 sm:$0xff]  }
0x1fa9   :  { %v11563_v35 = vpop.f32.mrf.mxu0  ;;  %v18129_v25 = vld [vmem:[%s21034_s13 + $0x1c] ss:$12 sps:$4 sm:$0xff]  }
0x1faa   :  { %v11668_v2 = vpack.c.bf16 %v11653_v32, %v11650_v23  ;;  %v11655_v22 = vmul.f32 %v11563_v35, %v21011_v20  ;;  %v18114_v20 = vld [vmem:[%s21039_s24 + $0x18] sm:$0xff]   ;;  %v18125_v32 = vld [vmem:[%s21034_s13 + $0x20] ss:$12 sps:$4 sm:$0xff]  }
0x1fab   :  { %v11565_v8 = vpop.f32.mrf.mxu0  ;;  %17432 = vmatprep.subr.bf16.mxu1 %v18114_v20 }
0x1fac   :  { %11740 = vmatprep.mubr.bf16.mxu0 %v11668_v2  ;;  %v11656_v51 = vmul.f32 %v11565_v8, %v21013_v63  ;;  %17433 = vmatpush3.bf16.msra.mxu1 %v18114_v20  ;;  %v18115_v63 = vld [vmem:[%s21039_s24 + $0x10] sm:$0xff]  }
0x1fad   :  { %v11567_v37 = vpop.f32.mrf.mxu0  ;;  %11741 = vmatmul.mubr.bf16.gmra.mxu0 %v11667_v43  ;;  %17434 = vmatprep.subr.bf16.mxu1 %v18115_v63 }
0x1fae   :  { %v11658_v16 = vmul.f32 %v11567_v37, %v21015_v26  ;;  %v18116_v26 = vld [vmem:[%s21034_s13 + $0x38] ss:$12 sps:$4 sm:$0xff]  }
0x1faf   :  { %v11569_v10 = vpop.f32.mrf.mxu0  ;;  %17446 = vmatprep.subr.bf16.mxu0 %v18116_v26 }
0x1fb0   :  { %v11659_v47 = vmul.f32 %v11569_v10, %v21017_v0  ;;  %v11670_v55 = vpack.c.bf16 %v11658_v16, %v11655_v22  ;;  %17447 = vmatpush3.bf16.msra.mxu0 %v18116_v26  ;;  %17435 = vmatpush3.bf16.msra.mxu1 %v18115_v63  ;;  %v18119_v0 = vld [vmem:[%s21034_s13 + $0x4c] ss:$12 sps:$4 sm:$0xff]  }
0x1fb1   :  { %11983 = vmatprep.subr.bf16.mxu1 %v18119_v0  ;;  %17456 = vmatprep.subr.bf16.mxu0 %v18120_v17  ;;  %v22000_v63 = vld [vmem:[#allocation5_spill] sm:$0xff]  ;;  %v18126_v0 = vld [vmem:[%s21034_s13 + $0x8] ss:$12 sps:$4 sm:$0xff]  }
0x1fb2   :  { %v11671_v46 = vpack.c.bf16 %v11659_v47, %v11656_v51  ;;  %v18127_v26 = vld [vmem:[%s21034_s13 + $0x18] ss:$12 sps:$4 sm:$0xff]  }
0x1fb4   :  { %11748 = vmatprep.mubr.bf16.mxu0 %v11671_v46 }
0x1fb5   :  { %11749 = vmatmul.mubr.bf16.gmra.mxu0 %v11670_v55 }
0x205d   :  { %v16500_v62 = vpop.f32.mrf.mxu0  ;;  %v17426_v60 = vpop.f32.mrf.mxu1 }
0x205f   :  { %v16501_v61 = vpop.f32.mrf.mxu0  ;;  %v11791_v50 = vpop.f32.mrf.mxu1 }
0x2060   :  { %v16502_v45 = vadd.f32 %v16501_v61, %v16500_v62  ;;  %v22001_v62 = vld [vmem:[#allocation4_spill] sm:$0xff]  ;;  %v18130_v61 = vld [vmem:[%s21034_s13] ss:$12 sps:$4 sm:$0xff]  }
0x2061   :  { %v16503_v1 = vpop.f32.mrf.mxu0  ;;  %v17427_v11 = vpop.f32.mrf.mxu1 }
0x2062   :  { %v11727_v24 = vadd.f32 %v16502_v45, %v21050_v56  ;;  %v22004_v45 = vld [vmem:[#allocation2_spill] sm:$0xff] }
0x2063   :  { %v16504_v34 = vpop.f32.mrf.mxu0  ;;  %v11794_v53 = vpop.f32.mrf.mxu1 }
0x2064   :  { %v16505_v54 = vadd.f32 %v16504_v34, %v16503_v1  ;;  %v11792_v57 = vadd.f32 %v11791_v50, %v11727_v24  ;;  %v21088_v50 = vld [vmem:[%s18864_s21 + $0x4] ss:$12 sps:$4 sm:$0xff]  }
0x2065   :  { %v16506_v44 = vpop.f32.mrf.mxu0  ;;  %v17430_v3 = vpop.f32.mrf.mxu1  ;;  %22003 = vst [vmem:[#allocation7_spill] sm:$0xff] %v21088_v50 }
0x2066   :  { %v11730_v30 = vadd.f32 %v16505_v54, %v21050_v56 }
0x2067   :  { %v16507_v19 = vpop.f32.mrf.mxu0  ;;  %v11807_v52 = vpop.f32.mrf.mxu1 }
0x2068   :  { %v11795_v33 = vadd.f32 %v11794_v53, %v11730_v30  ;;  %v16508_v39 = vadd.f32 %v16507_v19, %v16506_v44 }
0x2069   :  { %v16509_v18 = vpop.f32.mrf.mxu0  ;;  %v17431_v58 = vpop.f32.mrf.mxu1 }
0x206a   :  { %v11846_v38 = vpack.c.bf16 %v11795_v33, %v11792_v57  ;;  %v11735_v13 = vadd.f32 %v16508_v39, %v21050_v56 }
0x206b   :  { %v16510_v15 = vpop.f32.mrf.mxu0  ;;  %v11810_v35 = vpop.f32.mrf.mxu1 }
0x206c   :  { %v16511_v5 = vadd.f32 %v16510_v15, %v16509_v18  ;;  %17436 = vmatprep.mubr.msk.bf16.mxu1 %vm1468_vm4, %v11846_v38  ;;  %17448 = vmatprep.mubr.msk.bf16.mxu0 %vm1468_vm4, %v11846_v38  ;;  %v11800_v36 = vadd.f32 %v17426_v60, %v11735_v13  ;;  %v22002_v60 = vld [vmem:[#allocation3_spill] sm:$0xff] }
0x206d   :  { %v16512_v49 = vpop.f32.mrf.mxu0 }
0x206e   :  { %v11738_v12 = vadd.f32 %v16511_v5, %v21050_v56 }
0x206f   :  { %v16513_v31 = vpop.f32.mrf.mxu0 }
0x2070   :  { %v11803_v6 = vadd.f32 %v17427_v11, %v11738_v12  ;;  %v16514_v4 = vadd.f32 %v16513_v31, %v16512_v49 }
0x2071   :  { %v16515_v40 = vpop.f32.mrf.mxu0 }
0x2072   :  { %v11847_v29 = vpack.c.bf16 %v11803_v6, %v11800_v36  ;;  %v11743_v48 = vadd.f32 %v16514_v4, %v21050_v56  ;;  %v15649_v36 = vld [vmem:[%s14915_s23] ss:$0 sm:$0xff] }
0x2073   :  { %v16516_v21 = vpop.f32.mrf.mxu0 }
0x2074   :  { %v16517_v7 = vadd.f32 %v16516_v21, %v16515_v40  ;;  %17437 = vmatmul.mubr.msk.bf16.vlgmr.msra.gmra.mxu1 %vm1468_vm4, %v11847_v29  ;;  %17449 = vmatmul.mubr.msk.bf16.vlgmr.msra.gmra.mxu0 %vm1468_vm4, %v11847_v29  ;;  %v11808_v43 = vadd.f32 %v11807_v52, %v11743_v48 }
0x2075   :  { %v16518_v28 = vpop.f32.mrf.mxu0  ;;  %11984 = vmatpush1.bf16.msra.mxu1 %v18117_v41  ;;  %17457 = vmatpush3.bf16.msra.mxu0 %v18120_v17  ;;  %v18132_v17 = vld [vmem:[%s21034_s13 + $0x4] ss:$12 sps:$4 sm:$0xff]  }
0x2076   :  { %v11746_v23 = vadd.f32 %v16517_v7, %v21050_v56  ;;  %11985 = vmatprep.subr.bf16.mxu1 %v18123_v59  ;;  %17458 = vmatprep.subr.bf16.mxu0 %v18124_v14 }
0x2077   :  { %v16519_v2 = vpop.f32.mrf.mxu0 }
0x2078   :  { %v11811_v8 = vadd.f32 %v11810_v35, %v11746_v23  ;;  %v16520_v37 = vadd.f32 %v16519_v2, %v16518_v28 }
0x2079   :  { %v16521_v16 = vpop.f32.mrf.mxu0  ;;  %11986 = vmatpush1.bf16.msra.mxu1 %v18121_v9  ;;  %17459 = vmatpush3.bf16.msra.mxu0 %v18124_v14 }
0x207a   :  { %v11848_v10 = vpack.c.bf16 %v11811_v8, %v11808_v43  ;;  %17468 = vmatprep.subr.bf16.mxu0 %v18125_v32  ;;  %12242 = vmatprep.subr.bf16.mxu1 %v18129_v25  ;;  %v11751_v47 = vadd.f32 %v16520_v37, %v21050_v56 }
0x207b   :  { %v16522_v51 = vpop.f32.mrf.mxu0 }
0x207c   :  { %v16523_v22 = vadd.f32 %v16522_v51, %v16521_v16  ;;  %17440 = vmatprep.mubr.msk.bf16.mxu1 %vm1468_vm4, %v11848_v10  ;;  %17452 = vmatprep.mubr.msk.bf16.mxu0 %vm1468_vm4, %v11848_v10  ;;  %v11816_v55 = vadd.f32 %v17430_v3, %v11751_v47 }
0x207e   :  { %v11754_v46 = vadd.f32 %v16523_v22, %v21050_v56  ;;  %v21104_v56 = vld [vmem:[%s18864_s21] ss:$12 sps:$4 sm:$0xff]  }
0x207f   :  { %22005 = vst [vmem:[#allocation8_spill] sm:$0xff] %v21104_v56 }
0x2080   :  { %v11819_v42 = vadd.f32 %v17431_v58, %v11754_v46 }
0x2082   :  { %v11849_v20 = vpack.c.bf16 %v11819_v42, %v11816_v55 }
0x2084   :  { %17441 = vmatmul.mubr.msk.bf16.gmra.mxu1 %vm1468_vm4, %v11849_v20  ;;  %17453 = vmatmul.mubr.msk.bf16.gmra.mxu0 %vm1468_vm4, %v11849_v20 }
0x2085   :  { %17460 = vmatprep.mubr.msk.bf16.mxu0 %vm1468_vm4, %v22000_v63  ;;  %12003 = vmatprep.mubr.bf16.mxu1 %v21986_v27 }
0x208c   :  { %15621 = vmatmul.mubr.msk.bf16.vlgmr.msra.gmra.mxu1 %vm1468_vm4, %v11846_v38  ;;  %17461 = vmatmul.mubr.msk.bf16.vlgmr.msra.gmra.mxu0 %vm1468_vm4, %v22001_v62 }
0x208d   :  { %17464 = vmatprep.mubr.msk.bf16.mxu0 %vm1468_vm4, %v22002_v60  ;;  %12013 = vmatprep.mubr.bf16.mxu1 %v21986_v27 }
0x208e   :  { %17469 = vmatpush3.bf16.msra.mxu0 %v18125_v32  ;;  %12243 = vmatpush1.bf16.msra.mxu1 %v18127_v26 }
0x208f   :  { %17470 = vmatprep.subr.bf16.mxu0 %v18126_v0  ;;  %12244 = vmatprep.subr.bf16.mxu1 %v18132_v17 }
0x2092   :  { %17471 = vmatpush3.bf16.msra.mxu0 %v18126_v0  ;;  %12245 = vmatpush1.bf16.msra.mxu1 %v18130_v61 }
0x2093   :  { %12686 = vmatprep.subr.bf16.mxu0 %v21088_v50 }
0x2094   :  { %15622 = vmatmul.mubr.msk.bf16.gmra.mxu1 %vm1468_vm4, %v11847_v29  ;;  %17465 = vmatmul.mubr.msk.bf16.gmra.mxu0 %vm1468_vm4, %v22004_v45 }
0x2095   :  { %17472 = vmatprep.mubr.msk.bf16.mxu0 %vm1468_vm4, %v22000_v63  ;;  %12023 = vmatprep.mubr.bf16.mxu1 %v21986_v27 }
0x209c   :  { %15623 = vmatmul.mubr.msk.bf16.gmra.mxu1 %vm1468_vm4, %v11848_v10  ;;  %17473 = vmatmul.mubr.msk.bf16.vlgmr.msra.gmra.mxu0 %vm1468_vm4, %v22001_v62 }
0x209d   :  { %17476 = vmatprep.mubr.msk.bf16.mxu0 %vm1468_vm4, %v22002_v60  ;;  %12033 = vmatprep.mubr.bf16.mxu1 %v21986_v27 }
0x209e   :  { %12687 = vmatpush1.bf16.msra.mxu0 %v21104_v56 }
0x20a4   :  { %15624 = vmatmul.mubr.msk.bf16.gmra.mxu1 %vm1468_vm4, %v11849_v20  ;;  %17477 = vmatmul.mubr.msk.bf16.gmra.mxu0 %vm1468_vm4, %v22004_v45 }
0x20a5   :  { %12262 = vmatprep.mubr.bf16.mxu1 %v21986_v27  ;;  %12704 = vmatprep.mubr.bf16.mxu0 %v21986_v27 }
0x20ac   :  { %15641 = vmatmul.mubr.msk.bf16.vlgmr.msra.gmra.mxu1 %vm1468_vm4, %v22000_v63 }
0x20ad   :  { %12272 = vmatprep.mubr.bf16.mxu1 %v21986_v27 }
0x20b4   :  { %15642 = vmatmul.mubr.msk.bf16.gmra.mxu1 %vm1468_vm4, %v22001_v62 }
0x20b5   :  { %12282 = vmatprep.mubr.bf16.mxu1 %v21986_v27 }
0x20bc   :  { %15643 = vmatmul.mubr.msk.bf16.gmra.mxu1 %vm1468_vm4, %v22002_v60 }
0x20bd   :  { %12292 = vmatprep.mubr.bf16.mxu1 %v21986_v27 }
0x20c4   :  { %15644 = vmatmul.mubr.msk.bf16.gmra.mxu1 %vm1468_vm4, %v22004_v45 }
0x2134   :  { %v17450_v1 = vpop.f32.mrf.mxu0  ;;  %v17438_v24 = vpop.f32.mrf.mxu1 }
0x2136   :  { %v12078_v11 = vpop.f32.mrf.mxu0  ;;  %v11908_v44 = vpop.f32.mrf.mxu1 }
0x2138   :  { %v17451_v34 = vpop.f32.mrf.mxu0  ;;  %v17439_v19 = vpop.f32.mrf.mxu1 }
0x213a   :  { %v21123_v54 = vpop.f32.mrf.mxu0  ;;  %v11911_v39 = vpop.f32.mrf.mxu1 }
0x213b   :  { %22006 = vst [vmem:[#allocation11_spill] sm:$0xff] %v21123_v54 }
0x2144   :  { %v21125_v30 = vpop.f32.mrf.mxu0  ;;  %v17442_v38 = vpop.f32.mrf.mxu1 }
0x2146   :  { %v21127_v53 = vpop.f32.mrf.mxu0  ;;  %v11924_v13 = vpop.f32.mrf.mxu1 }
0x2147   :  { %22007 = vst [vmem:[#allocation9_spill] sm:$0xff] %v21127_v53 }
0x2148   :  { %v21129_v57 = vpop.f32.mrf.mxu0  ;;  %v17443_v52 = vpop.f32.mrf.mxu1 }
0x214a   :  { %v21131_v33 = vpop.f32.mrf.mxu0  ;;  %v11927_v58 = vpop.f32.mrf.mxu1 }
0x214b   :  { %22008 = vst [vmem:[#allocation6_spill] sm:$0xff] %v21131_v33 }
0x214c   :  { %v17462_v18 = vpop.f32.mrf.mxu0 }
0x214d   :  { %v21152_v28 = vadd.f32 %v17462_v18, %v17438_v24 }
0x214e   :  { %v12167_v3 = vpop.f32.mrf.mxu0 }
0x214f   :  { %v21154_v9 = vadd.f32 %v12167_v3, %v11908_v44  ;;  %v12377_v51 = vadd.f32 %v15649_v36, %v21152_v28  ;;  %v12437_v61 = vsel %vm488_vm2, %v21152_v28, inf }
0x2150   :  { %v17463_v15 = vpop.f32.mrf.mxu0 }
0x2151   :  { %v21165_v16 = vadd.f32 %v17463_v15, %v17439_v19  ;;  %v12375_v55 = vadd.f32 %v15649_v36, %v21154_v9  ;;  %v12389_v42 = vsel %vm488_vm2, %v12377_v51, -inf  ;;  %v12431_v62 = vsel %vm488_vm2, %v21154_v9, inf }
0x2152   :  { %v12170_v5 = vpop.f32.mrf.mxu0 }
0x2153   :  { %v21141_v40 = vadd.f32 %v12170_v5, %v11911_v39  ;;  %v12383_v20 = vsel %vm488_vm2, %v12375_v55, -inf  ;;  %v12378_v63 = vadd.f32 %v15649_v36, %v21165_v16  ;;  %v12440_v17 = vsel %vm488_vm2, %v21165_v16, inf }
0x2154   :  { %v17466_v49 = vpop.f32.mrf.mxu0 }
0x2155   :  { %v21136_v12 = vadd.f32 %v17466_v49, %v17442_v38  ;;  %v12376_v32 = vadd.f32 %v15649_v36, %v21141_v40  ;;  %v12434_v26 = vsel %vm488_vm2, %v21141_v40, inf  ;;  %v12392_v0 = vsel %vm488_vm2, %v12378_v63, -inf }
0x2156   :  { %v12183_v31 = vpop.f32.mrf.mxu0 }
0x2157   :  { %v21138_v6 = vadd.f32 %v12183_v31, %v11924_v13  ;;  %v12381_v4 = vadd.f32 %v15649_v36, %v21136_v12  ;;  %v12386_v22 = vsel %vm488_vm2, %v12376_v32, -inf }
0x2158   :  { %v17467_v41 = vpop.f32.mrf.mxu0 }
0x2159   :  { %v21143_v29 = vadd.f32 %v17467_v41, %v17443_v52  ;;  %v12401_v59 = vsel %vm488_vm2, %v12381_v4, -inf  ;;  %v21147_v14 = vadd.f32 %v15649_v36, %v21138_v6 }
0x215a   :  { %v12186_v21 = vpop.f32.mrf.mxu0  ;;  %12402 = vmax.xlane.f32.xlu1 %v12401_v59 }
0x215b   :  { %v21149_v48 = vadd.f32 %v12186_v21, %v11927_v58  ;;  %v12382_v7 = vadd.f32 %v15649_v36, %v21143_v29  ;;  %v12395_v35 = vsel %vm488_vm2, %v21147_v14, -inf  ;;  %v12452_v45 = vsel %vm488_vm2, %v21143_v29, inf }
0x215c   :  { %v17474_v23 = vpop.f32.mrf.mxu0 }
0x215d   :  { %v21157_v25 = vadd.f32 %v17474_v23, %v17450_v1  ;;  %v12404_v2 = vsel %vm488_vm2, %v12382_v7, -inf  ;;  %v12380_v43 = vadd.f32 %v15649_v36, %v21149_v48  ;;  %v12446_v60 = vsel %vm488_vm2, %v21149_v48, inf }
0x215e   :  { %v12337_v8 = vpop.f32.mrf.mxu0  ;;  %12396 = vmax.xlane.f32.xlu1 %v12395_v35  ;;  %12405 = vmax.xlane.f32.xlu0 %v12404_v2  ;;  %v12443_v1 = vsel %vm488_vm2, %v21138_v6, inf }
0x215f   :  { %v21163_v37 = vadd.f32 %v12337_v8, %v12078_v11  ;;  %v12398_v46 = vsel %vm488_vm2, %v12380_v43, -inf  ;;  %v12449_v11 = vsel %vm488_vm2, %v21136_v12, inf }
0x2160   :  { %v17475_v10 = vpop.f32.mrf.mxu0 }
0x2161   :  { %22009 = vst [vmem:[#allocation10_spill] sm:$0xff] %v21163_v37  ;;  %v21168_v47 = vadd.f32 %v17475_v10, %v17451_v34 }
0x2162   :  { %12387 = vmax.xlane.f32.xlu1 %v12386_v22  ;;  %12399 = vmax.xlane.f32.xlu0 %v12398_v46 }
0x2166   :  { %12390 = vmax.xlane.f32.xlu1 %v12389_v42  ;;  %12384 = vmax.xlane.f32.xlu0 %v12383_v20 }
0x216a   :  { %12435 = vmin.xlane.f32.xlu1 %v12434_v26  ;;  %12393 = vmax.xlane.f32.xlu0 %v12392_v0 }
0x216e   :  { %12441 = vmin.xlane.f32.xlu1 %v12440_v17  ;;  %12432 = vmin.xlane.f32.xlu0 %v12431_v62 }
0x2172   :  { %12447 = vmin.xlane.f32.xlu1 %v12446_v60  ;;  %12438 = vmin.xlane.f32.xlu0 %v12437_v61 }
0x2176   :  { %12453 = vmin.xlane.f32.xlu1 %v12452_v45  ;;  %12444 = vmin.xlane.f32.xlu0 %v12443_v1 }
0x217a   :  { %12450 = vmin.xlane.f32.xlu0 %v12449_v11 }
0x21e3   :  { %v12403_v34 = vpop.xlane.xlu1 %12402 }
0x21e4   :  { %v12413_v24 = vsub.f32 %v12381_v4, %v12403_v34 }
0x21e6   :  { %v12427_v38 = vmul.f32 1.442695, %v12413_v24 }
0x21e7   :  { %v12397_v44 = vpop.xlane.xlu1 %12396  ;;  %v12406_v19 = vpop.xlane.xlu0 %12405 }
0x21e8   :  { %v12414_v39 = vsub.f32 %v12382_v7, %v12406_v19  ;;  %v12411_v49 = vsub.f32 %v21147_v14, %v12397_v44 }
0x21ea   :  { %v12429_v18 = vmul.f32 1.442695, %v12414_v39  ;;  %v12423_v21 = vmul.f32 1.442695, %v12411_v49 }
0x21eb   :  { %v12388_v3 = vpop.xlane.xlu1 %12387  ;;  %v12400_v15 = vpop.xlane.xlu0 %12399 }
0x21ec   :  { %v12408_v13 = vsub.f32 %v12376_v32, %v12388_v3  ;;  %v12412_v5 = vsub.f32 %v12380_v43, %v12400_v15  ;;  %18389 = vpow2.f32 %v12429_v18 }
0x21ed   :  { %18391 = vpow2.f32 %v12427_v38 }
0x21ee   :  { %v12425_v52 = vmul.f32 1.442695, %v12412_v5  ;;  %v12417_v41 = vmul.f32 1.442695, %v12408_v13 }
0x21ef   :  { %v12391_v31 = vpop.xlane.xlu1 %12390  ;;  %v12385_v36 = vpop.xlane.xlu0 %12384 }
0x21f0   :  { %v12407_v59 = vsub.f32 %v12375_v55, %v12385_v36  ;;  %v12409_v58 = vsub.f32 %v12377_v51, %v12391_v31  ;;  %18393 = vpow2.f32 %v12425_v52 }
0x21f1   :  { %18395 = vpow2.f32 %v12417_v41 }
0x21f2   :  { %v12415_v4 = vmul.f32 1.442695, %v12407_v59  ;;  %v12419_v2 = vmul.f32 1.442695, %v12409_v58 }
0x21f3   :  { %v12436_v7 = vpop.xlane.xlu1 %12435  ;;  %v12394_v23 = vpop.xlane.xlu0 %12393 }
0x21f4   :  { %v12456_v35 = vsub.f32 %v12436_v7, %v21141_v40  ;;  %v12410_v32 = vsub.f32 %v12378_v63, %v12394_v23  ;;  %18397 = vpow2.f32 %v12415_v4  ;;  %v21242_v4 = vld [vmem:[%s18864_s21 + $0x8] ss:$12 sps:$4 sm:$0xff]   ;;  %v12005_v7 = vpop.f32.mrf.mxu1  ;;  %s18731_s21 = smov 46  }
0x21f5   :  { %18399 = vpow2.f32 %v12423_v21  ;;  %s21438_s26 = sld [smem:[%s21939_s0 + %s18731_s21]]  }
0x21f6   :  { %v12421_v43 = vmul.f32 1.442695, %v12410_v32  ;;  %v12465_v10 = vmul.f32 1.442695, %v12456_v35  ;;  %18401 = vpow2.f32 %v12419_v2  ;;  %v21261_v23 = vpop.f32.mrf.mxu1 }
0x21f7   :  { %v12442_v14 = vpop.xlane.xlu1 %12441  ;;  %v12433_v8 = vpop.xlane.xlu0 %12432 }
0x21f8   :  { %v12458_v22 = vsub.f32 %v12442_v14, %v21165_v16  ;;  %v12455_v51 = vsub.f32 %v12433_v8, %v21154_v9  ;;  %18403 = vpow2.f32 %v12421_v43  ;;  %v12009_v35 = vpop.f32.mrf.mxu1 }
0x21f9   :  { %v21197_v46 = vpop.eup %18389  ;;  %18405 = vpow2.f32 %v12465_v10 }
0x21fa   :  { %v12463_v55 = vmul.f32 1.442695, %v12455_v51  ;;  %17480 = vmatprep.subr.msk.mxu1 %vm488_vm2, %v21197_v46  ;;  %v21201_v20 = vpop.eup %18391  ;;  %v12469_v63 = vmul.f32 1.442695, %v12458_v22  ;;  %v21263_v32 = vpop.f32.mrf.mxu1 }
0x21fb   :  { %v12448_v40 = vpop.xlane.xlu1 %12447  ;;  %v12439_v42 = vpop.xlane.xlu0 %12438  ;;  %17481 = vmatpush3.xpose.msk.msra.mxu1 %vm488_vm2, %v21197_v46  ;;  %v12659_v21 = vpack.c.bf16 %v21197_v46, %v21201_v20 }
0x21fc   :  { %v12460_v16 = vsub.f32 %v12448_v40, %v21149_v48  ;;  %v12457_v9 = vsub.f32 %v12439_v42, %v21152_v28  ;;  %18407 = vpow2.f32 %v12463_v55  ;;  %17482 = vmatprep.subr.msk.mxu1 %vm488_vm2, %v21201_v20  ;;  %v12015_v2 = vpop.f32.mrf.mxu1 }
0x21fd   :  { %v18394_v62 = vpop.eup %18393  ;;  %18409 = vpow2.f32 %v12469_v63 }
0x21fe   :  { %v12467_v26 = vmul.f32 1.442695, %v12457_v9  ;;  %v12473_v60 = vmul.f32 1.442695, %v12460_v16  ;;  %v18396_v48 = vpop.eup %18395  ;;  %v21265_v43 = vpop.f32.mrf.mxu1 }
0x21ff   :  { %v12454_v0 = vpop.xlane.xlu1 %12453  ;;  %v12445_v17 = vpop.xlane.xlu0 %12444  ;;  %17483 = vmatpush3.xpose.msk.msra.mxu1 %vm488_vm2, %v21201_v20 }
0x2200   :  { %v12462_v61 = vsub.f32 %v12454_v0, %v21143_v29  ;;  %v12459_v45 = vsub.f32 %v12445_v17, %v21138_v6  ;;  %18411 = vpow2.f32 %v12467_v26  ;;  %17484 = vmatprep.subr.msk.mxu1 %vm488_vm2, %v18394_v62  ;;  %v12019_v14 = vpop.f32.mrf.mxu1 }
0x2201   :  { %v18398_v28 = vpop.eup %18397  ;;  %18413 = vpow2.f32 %v12473_v60 }
0x2202   :  { %v12471_v1 = vmul.f32 1.442695, %v12459_v45  ;;  %v12477_v11 = vmul.f32 1.442695, %v12462_v61  ;;  %v12656_v24 = vpack.c.bf16 %v18396_v48, %v18398_v28  ;;  %v18400_v44 = vpop.eup %18399  ;;  %v21267_v8 = vpop.f32.mrf.mxu1 }
0x2203   :  { %v12451_v34 = vpop.xlane.xlu0 %12450  ;;  %17485 = vmatpush3.xpose.msk.msra.mxu1 %vm488_vm2, %v18394_v62  ;;  %v18402_v29 = vpop.eup %18401  ;;  %v12658_v31 = vpack.c.bf16 %v18394_v62, %v18400_v44 }
0x2204   :  { %v12461_v19 = vsub.f32 %v12451_v34, %v21136_v12  ;;  %18415 = vpow2.f32 %v12471_v1  ;;  %17486 = vmatprep.subr.msk.mxu1 %vm488_vm2, %v18400_v44  ;;  %15666 = vmatmul.mubr.msk.bf16.vlgmr.msra.gmra.mxu0 %vm488_vm2, %v12656_v24  ;;  %v21269_v10 = vpop.f32.mrf.mxu1  ;;  %v21281_v62 = vpop.f32.mrf.mxu0 }
0x2205   :  { %12714 = vmatprep.mubr.bf16.mxu0 %v21986_v27  ;;  %18417 = vpow2.f32 %v12477_v11  ;;  %v18404_v39 = vpop.eup %18403  ;;  %22014 = vst [vmem:[#allocation12_spill] sm:$0xff] %v21281_v62 }
0x2206   :  { %v12475_v6 = vmul.f32 1.442695, %v12461_v19  ;;  %v18406_v18 = vpop.eup %18405  ;;  %v12657_v12 = vpack.c.bf16 %v18404_v39, %v18402_v29  ;;  %v21271_v22 = vpop.f32.mrf.mxu1 }
0x2207   :  { %17487 = vmatpush3.xpose.msk.msra.mxu1 %vm488_vm2, %v18400_v44  ;;  %v21283_v61 = vpop.f32.mrf.mxu0 }
0x2208   :  { %18419 = vpow2.f32 %v12475_v6  ;;  %17488 = vmatprep.subr.msk.mxu1 %vm488_vm2, %v18404_v39  ;;  %v21273_v51 = vpop.f32.mrf.mxu1 }
0x2209   :  { %v18408_v38 = vpop.eup %18407 }
0x220a   :  { %17496 = vmatprep.mubr.msk.f32.mxu1 %vm488_vm2, %v18408_v38  ;;  %v21222_v3 = vpack.c.bf16 %v18406_v18, %v18408_v38  ;;  %v18410_v15 = vpop.eup %18409  ;;  %v12031_v46 = vpop.f32.mrf.mxu1 }
0x220b   :  { %17489 = vmatpush3.xpose.msk.msra.mxu1 %vm488_vm2, %v18404_v39 }
0x220c   :  { %22010 = vst [vmem:[#allocation5_spill] sm:$0xff] %v21222_v3  ;;  %17490 = vmatprep.subr.msk.mxu1 %vm488_vm2, %v18402_v29  ;;  %15667 = vmatmul.mubr.msk.bf16.gmra.mxu0 %vm488_vm2, %v12657_v12  ;;  %v12035_v55 = vpop.f32.mrf.mxu1 }
0x220d   :  { %v18412_v13 = vpop.eup %18411  ;;  %12724 = vmatprep.mubr.bf16.mxu0 %v21986_v27 }
0x220e   :  { %v21228_v5 = vpack.c.bf16 %v18410_v15, %v18412_v13  ;;  %v18414_v49 = vpop.eup %18413  ;;  %v12037_v40 = vpop.f32.mrf.mxu1 }
0x220f   :  { %17491 = vmatpush3.xpose.msk.msra.mxu1 %vm488_vm2, %v18402_v29 }
0x2210   :  { %22011 = vst [vmem:[#allocation4_spill] sm:$0xff] %v21228_v5  ;;  %17492 = vmatprep.subr.msk.mxu1 %vm488_vm2, %v18396_v48  ;;  %v12039_v42 = vpop.f32.mrf.mxu1 }
0x2211   :  { %v18416_v52 = vpop.eup %18415 }
0x2212   :  { %v21232_v36 = vpack.c.bf16 %v18414_v49, %v18416_v52  ;;  %v18418_v41 = vpop.eup %18417  ;;  %v12041_v20 = vpop.f32.mrf.mxu1 }
0x2213   :  { %17493 = vmatpush3.xpose.msk.msra.mxu1 %vm488_vm2, %v18396_v48  ;;  %v21285_v48 = vpop.f32.mrf.mxu0 }
0x2214   :  { %22012 = vst [vmem:[#allocation3_spill] sm:$0xff] %v21232_v36  ;;  %17494 = vmatprep.subr.msk.mxu1 %vm488_vm2, %v18398_v28  ;;  %15668 = vmatmul.mubr.msk.bf16.gmra.mxu0 %vm488_vm2, %v12658_v31  ;;  %v12264_v63 = vpop.f32.mrf.mxu1  ;;  %22015 = vst [vmem:[#allocation13_spill] sm:$0xff] %v21285_v48 }
0x2215   :  { %v18420_v59 = vpop.eup %18419  ;;  %12734 = vmatprep.mubr.bf16.mxu0 %v21986_v27  ;;  %v21287_v1 = vpop.f32.mrf.mxu0  ;;  %v12265_v6 = vadd.f32 %v12264_v63, %v12005_v7 }
0x2216   :  { %v21238_v58 = vpack.c.bf16 %v18418_v41, %v18420_v59  ;;  %v21275_v16 = vpop.f32.mrf.mxu1 }
0x2217   :  { %17495 = vmatpush3.xpose.msk.msra.mxu1 %vm488_vm2, %v18398_v28  ;;  %v21289_v34 = vpop.f32.mrf.mxu0 }
0x2218   :  { %22013 = vst [vmem:[#allocation2_spill] sm:$0xff] %v21238_v58  ;;  %17508 = vmatprep.subr.bf16.mxu1 %v21242_v4  ;;  %v12268_v9 = vpop.f32.mrf.mxu1  ;;  %22016 = vst [vmem:[#allocation14_spill] sm:$0xff] %v21289_v34 }
0x2219   :  { %v12269_v29 = vadd.f32 %v12268_v9, %v12009_v35 }
0x221a   :  { %17497 = vmatmul.mubr.msk.f32.vlgmr.msra.gmra.mxu1 %vm488_vm2, %v18406_v18  ;;  %v21277_v26 = vpop.f32.mrf.mxu1 }
0x221b   :  { %17499 = vmatprep.mubr.msk.f32.mxu1 %vm488_vm2, %v18412_v13  ;;  %17509 = vmatpush3.bf16.msra.mxu1 %v21242_v4 }
0x221c   :  { %15669 = vmatmul.mubr.msk.bf16.gmra.mxu0 %vm488_vm2, %v12659_v21  ;;  %v12274_v0 = vpop.f32.mrf.mxu1 }
0x221d   :  { %12894 = vmatprep.mubr.bf16.mxu0 %v21986_v27 }
0x221e   :  { %17500 = vmatmul.mubr.msk.f32.gmra.mxu1 %vm488_vm2, %v18410_v15  ;;  %v21279_v17 = vpop.f32.mrf.mxu1 }
0x221f   :  { %17502 = vmatprep.mubr.msk.f32.mxu1 %vm488_vm2, %v18416_v52 }
0x2220   :  { %v12278_v60 = vpop.f32.mrf.mxu1 }
0x2222   :  { %17503 = vmatmul.mubr.msk.f32.gmra.mxu1 %vm488_vm2, %v18414_v49  ;;  %v12280_v45 = vpop.f32.mrf.mxu1 }
0x2223   :  { %17505 = vmatprep.mubr.msk.f32.mxu1 %vm488_vm2, %v18420_v59  ;;  %v12279_v59 = vadd.f32 %v12278_v60, %v12019_v14 }
0x2224   :  { %v12284_v28 = vpop.f32.mrf.mxu1 }
0x2226   :  { %17506 = vmatmul.mubr.msk.f32.gmra.mxu1 %vm488_vm2, %v18418_v41  ;;  %v12286_v11 = vpop.f32.mrf.mxu1  ;;  %v12275_v41 = vadd.f32 %v12274_v0, %v12015_v2 }
0x2227   :  { %17510 = vmatprep.mubr.msk.bf16.mxu1 %vm488_vm2, %v12656_v24  ;;  %v12287_v34 = vadd.f32 %v12286_v11, %v21271_v22  ;;  %v18658_v11 = vld [vmem:[%s19000_s25] sm:$0xff] }
0x2228   :  { %v12288_v24 = vpop.f32.mrf.mxu1 }
0x222a   :  { %17511 = vmatmul.mubr.msk.bf16.vlgmr.msra.gmra.mxu1 %vm488_vm2, %v12657_v12  ;;  %v12290_v39 = vpop.f32.mrf.mxu1 }
0x222b   :  { %17514 = vmatprep.mubr.msk.bf16.mxu1 %vm488_vm2, %v12658_v31  ;;  %v12291_v56 = vadd.f32 %v12290_v39, %v12031_v46 }
0x222c   :  { %v12294_v49 = vpop.f32.mrf.mxu1 }
0x222d   :  { %v12295_v37 = vadd.f32 %v12294_v49, %v12035_v55 }
0x2232   :  { %17515 = vmatmul.mubr.msk.bf16.gmra.mxu1 %vm488_vm2, %v12659_v21  ;;  %v12296_v21 = vpop.f32.mrf.mxu1 }
0x2233   :  { %v12297_v9 = vadd.f32 %v12296_v21, %v12037_v40  ;;  %v12285_v40 = vadd.f32 %v12284_v28, %v21269_v10 }
0x22c4   :  { %v12706_v44 = vpop.f32.mrf.mxu0 }
0x22c5   :  { %v21293_v38 = vmul.f32 %v12706_v44, %v12265_v6  ;;  %v12298_v44 = vpop.f32.mrf.mxu1 }
0x22c6   :  { %v21291_v19 = vpop.f32.mrf.mxu0 }
0x22c8   :  { %v12710_v18 = vpop.f32.mrf.mxu0 }
0x22c9   :  { %v21295_v12 = vmul.f32 %v12710_v18, %v12269_v29  ;;  %v12300_v18 = vpop.f32.mrf.mxu1 }
0x22ca   :  { %v21297_v15 = vpop.f32.mrf.mxu0  ;;  %v12301_v50 = vadd.f32 %v12300_v18, %v12041_v20  ;;  %v22020_v18 = vld [vmem:[#allocation13_spill] sm:$0xff] }
0x22cc   :  { %v12716_v52 = vpop.f32.mrf.mxu0 }
0x22cd   :  { %v21301_v7 = vmul.f32 %v12716_v52, %v12275_v41 }
0x22ce   :  { %v12718_v31 = vpop.f32.mrf.mxu0 }
0x22d0   :  { %v12720_v58 = vpop.f32.mrf.mxu0 }
0x22d1   :  { %v21303_v35 = vmul.f32 %v12720_v58, %v12279_v59  ;;  %v12299_v58 = vadd.f32 %v12298_v44, %v12039_v42  ;;  %v12281_v42 = vadd.f32 %v12280_v45, %v21267_v8 }
0x22d2   :  { %v12722_v63 = vpop.f32.mrf.mxu0 }
0x22d4   :  { %v12726_v6 = vpop.f32.mrf.mxu0 }
0x22d5   :  { %v12822_v8 = vmul.f32 %v12726_v6, %v12285_v40 }
0x22d6   :  { %v12728_v29 = vpop.f32.mrf.mxu0 }
0x22d7   :  { %v12823_v44 = vmul.f32 %v12728_v29, %v12287_v34 }
0x22d8   :  { %v12730_v13 = vpop.f32.mrf.mxu0 }
0x22da   :  { %v17498_v36 = vpop.f32.mrf.mxu1  ;;  %v12732_v5 = vpop.f32.mrf.mxu0 }
0x22db   :  { %v12633_v3 = vmax.f32 %v17498_v36, 1e-30  ;;  %v12826_v36 = vmul.f32 %v12732_v5, %v12291_v56  ;;  %v12277_v56 = vadd.f32 %v21279_v17, %v21265_v43  ;;  %v12820_v5 = vmul.f32 %v12722_v63, %v12281_v42 }
0x22dc   :  { %v12593_v2 = vpop.f32.mrf.mxu1  ;;  %v12736_v14 = vpop.f32.mrf.mxu0 }
0x22dd   :  { %18421 = vrcp.f32 %v12633_v3  ;;  %v12632_v0 = vmax.f32 %v12593_v2, 1e-30  ;;  %v12289_v3 = vadd.f32 %v12288_v24, %v21273_v51  ;;  %v12828_v2 = vmul.f32 %v12736_v14, %v12295_v37  ;;  %v18659_v24 = vld [vmem:[%s19000_s25 + $0x8] sm:$0xff] }
0x22de   :  { %v17501_v60 = vpop.f32.mrf.mxu1  ;;  %v12738_v52 = vpop.f32.mrf.mxu0  ;;  %v12271_v37 = vadd.f32 %v21277_v26, %v21263_v32  ;;  %v12267_v51 = vadd.f32 %v21275_v16, %v21261_v23 }
0x22df   :  { %18423 = vrcp.f32 %v12632_v0  ;;  %v12829_v33 = vmul.f32 %v12738_v52, %v12297_v9  ;;  %v12825_v55 = vmul.f32 %v12730_v13, %v12289_v3  ;;  %v22021_v52 = vld [vmem:[#allocation6_spill] sm:$0xff] }
0x22e0   :  { %v12603_v41 = vpop.f32.mrf.mxu1  ;;  %v12740_v59 = vpop.f32.mrf.mxu0  ;;  %v12814_v43 = vmul.f32 %v21297_v15, %v12271_v37  ;;  %v12811_v32 = vmul.f32 %v21291_v19, %v12267_v51  ;;  %v22017_v19 = vpack.c.bf16 %v21303_v35, %v21301_v7  ;;  %v22019_v35 = vld [vmem:[#allocation9_spill] sm:$0xff] }
0x22e1   :  { %v12831_v62 = vmul.f32 %v12740_v59, %v12299_v58  ;;  %v12634_v0 = vmax.f32 %v12603_v41, 1e-30  ;;  %v12844_v17 = vpack.c.bf16 %v12825_v55, %v12822_v8  ;;  %v12354_v14 = vadd.f32 %v22020_v18, %v22019_v35  ;;  %v22022_v58 = vld [vmem:[#allocation14_spill] sm:$0xff]  ;;  %v22024_v55 = vld [vmem:[#allocation11_spill] sm:$0xff] }
0x22e2   :  { %v17504_v54 = vpop.f32.mrf.mxu1  ;;  %v12742_v27 = vpop.f32.mrf.mxu0  ;;  %v12839_v49 = vpack.c.bf16 %v12814_v43, %v12811_v32  ;;  %v12357_v41 = vadd.f32 %v22022_v58, %v22021_v52  ;;  %v18663_v8 = vld [vmem:[%s19000_s25 + $0x20] sm:$0xff]  ;;  %v22027_v32 = vld [vmem:[#allocation7_spill] sm:$0xff] }
0x22e3   :  { %v12832_v48 = vmul.f32 %v12742_v27, %v12301_v50  ;;  %v12847_v20 = vpack.c.bf16 %v12831_v62, %v12828_v2  ;;  %v12845_v27 = vpack.c.bf16 %v12826_v36, %v12823_v44  ;;  %v12635_v50 = vmax.f32 %v17501_v60, 1e-30  ;;  %v18660_v2 = vld [vmem:[%s19000_s25 + $0x10] sm:$0xff]  ;;  %v18661_v44 = vld [vmem:[%s19071_s29 + $0x88] sm:$0xff]   ;;  %v18682_v18 = vld [vmem:[%s19071_s29 + $0x40] sm:$0xff]  }
0x22e4   :  { %v12613_v53 = vpop.f32.mrf.mxu1  ;;  %18425 = vrcp.f32 %v12634_v0  ;;  %v12637_v16 = vmax.f32 %v17504_v54, 1e-30  ;;  %v22018_v54 = vpack.c.bf16 %v21295_v12, %v21293_v38  ;;  %v18681_v35 = vld [vmem:[%s19071_s29 + $0x8] sm:$0xff]  }
0x22e5   :  { %v12848_v46 = vpack.c.bf16 %v12832_v48, %v12829_v33  ;;  %v12817_v33 = vmul.f32 %v12718_v31, %v12277_v56  ;;  %18427 = vrcp.f32 %v12635_v50  ;;  %v12636_v28 = vmax.f32 %v12613_v53, 1e-30  ;;  %v22026_v50 = vld [vmem:[#allocation10_spill] sm:$0xff] }
0x22e6   :  { %v21311_v39 = vpop.f32.mrf.mxu1 }
0x22e7   :  { %12870 = vmatprep.subr.bf16.mxu0 %v12848_v46  ;;  %v12842_v45 = vpack.c.bf16 %v12820_v5, %v12817_v33  ;;  %18429 = vrcp.f32 %v12636_v28  ;;  %v12639_v38 = vmax.f32 %v21311_v39, 1e-30  ;;  %v18662_v46 = vld [vmem:[%s19000_s25 + $0x18] sm:$0xff] }
0x22e8   :  { %v12623_v22 = vpop.f32.mrf.mxu1  ;;  %12871 = vmatpush1.bf16.msra.mxu0 %v12847_v20  ;;  %18431 = vrcp.f32 %v12637_v16  ;;  %v22025_v20 = vld [vmem:[#allocation12_spill] sm:$0xff]  ;;  %v18668_v16 = vld [vmem:[%s19071_s29 + $0x80] sm:$0xff]  }
0x22e9   :  { %12872 = vmatprep.subr.bf16.mxu0 %v12845_v27  ;;  %v12638_v6 = vmax.f32 %v12623_v22, 1e-30  ;;  %v12341_v39 = vadd.f32 %v22025_v20, %v22024_v55 }
0x22ea   :  { %v18422_v10 = vpop.eup %18421  ;;  %v17512_v62 = vpop.f32.mrf.mxu1 }
0x22eb   :  { %v12649_v13 = vmul.f32 %v18659_v24, %v18422_v10  ;;  %v12818_v15 = vmul.f32 %v17512_v62, %v21157_v25  ;;  %v12362_v25 = vadd.f32 %v21283_v61, %v21125_v30  ;;  %18433 = vrcp.f32 %v12638_v6  ;;  %v18664_v10 = vld [vmem:[%s19000_s25 + $0x28] sm:$0xff]  ;;  %v18667_v24 = vld [vmem:[%s19071_s29 + $0x78] sm:$0xff]   ;;  %v18675_v6 = vld [vmem:[%s19071_s29 + $0x20] sm:$0xff]  }
0x22ec   :  { %v18424_v48 = vpop.eup %18423  ;;  %v21321_v26 = vpop.f32.mrf.mxu1  ;;  %12873 = vmatpush1.bf16.msra.mxu0 %v12844_v17  ;;  %v22023_v61 = vmov 0   ;;  %18435 = vrcp.f32 %v12639_v38 }
0x22ed   :  { %12874 = vmatprep.subr.bf16.mxu0 %v12842_v45  ;;  %v12648_v34 = vmul.f32 %v18658_v11, %v18424_v48  ;;  %v12812_v37 = vmul.f32 %v21321_v26, %v22026_v50  ;;  %v18665_v45 = vld [vmem:[%s19000_s25 + $0x30] sm:$0xff]  ;;  %v18666_v26 = vld [vmem:[%s19000_s25 + $0x38] sm:$0xff] }
0x22ee   :  { %v17513_v23 = vpop.f32.mrf.mxu1  ;;  %v22028_v11 = vld [vmem:[#allocation8_spill] sm:$0xff] }
0x22ef   :  { %v12821_v31 = vmul.f32 %v17513_v23, %v21168_v47  ;;  %v12834_v21 = vpack.c.bf16 %v12649_v13, %v12648_v34  ;;  %v12365_v47 = vadd.f32 %v21287_v1, %v21129_v57  ;;  %v22029_v13 = vld [vmem:[#allocation5_spill] sm:$0xff]  ;;  %v22031_v23 = vld [vmem:[#allocation3_spill] sm:$0xff] }
0x22f0   :  { %v12782_v63 = vpop.f32.mrf.mxu1  ;;  %12875 = vmatpush1.bf16.msra.mxu0 %v22017_v19  ;;  %v18672_v19 = vld [vmem:[%s19071_s29 + $0x68] sm:$0xff]  }
0x22f1   :  { %v12843_v53 = vpack.c.bf16 %v12821_v31, %v12818_v15  ;;  %12876 = vmatprep.subr.bf16.mxu0 %v12839_v49  ;;  %17526 = vmatprep.mubr.msk.bf16.mxu1 %vm976_vm3, %v12834_v21  ;;  %v18426_v7 = vpop.eup %18425  ;;  %v12815_v5 = vmul.f32 %v12782_v63, %v12341_v39  ;;  %v22030_v49 = vld [vmem:[#allocation4_spill] sm:$0xff]  ;;  %v18669_v15 = vld [vmem:[%s19071_s29 + $0x38] sm:$0xff]  }
0x22f2   :  { %v17516_v9 = vpop.f32.mrf.mxu1  ;;  %v18428_v30 = vpop.eup %18427  ;;  %v12650_v42 = vmul.f32 %v18660_v2, %v18426_v7  ;;  %v18670_v31 = vld [vmem:[%s19071_s29 + $0x70] sm:$0xff]   ;;  %v18680_v7 = vld [vmem:[%s19071_s29 + $0x48] sm:$0xff]  }
0x22f3   :  { %v12830_v12 = vmul.f32 %v17516_v9, %v12362_v25  ;;  %v12651_v40 = vmul.f32 %v18662_v46, %v18428_v30  ;;  %v12840_v33 = vpack.c.bf16 %v12815_v5, %v12812_v37  ;;  %v18671_v63 = vld [vmem:[%s19071_s29 + $0x30] sm:$0xff]   ;;  %v18674_v9 = vld [vmem:[%s19071_s29 + $0x60] sm:$0xff]  }
0x22f4   :  { %v12795_v29 = vpop.f32.mrf.mxu1  ;;  %12877 = vmatpush1.bf16.msra.mxu0 %v22018_v54  ;;  %v18430_v56 = vpop.eup %18429  ;;  %v18677_v54 = vld [vmem:[%s19071_s29 + $0x18] sm:$0xff]   ;;  %v18678_v25 = vld [vmem:[%s19071_s29 + $0x50] sm:$0xff]  }
0x22f5   :  { %17534 = vmatprep.subr.bf16.mxu0 %v21242_v4  ;;  %v12824_v1 = vmul.f32 %v12795_v29, %v12354_v14  ;;  %v18432_v27 = vpop.eup %18431  ;;  %v12652_v22 = vmul.f32 %v18663_v8, %v18430_v56  ;;  %v18676_v29 = vld [vmem:[%s19071_s29 + $0x58] sm:$0xff]   ;;  %v18683_v14 = vld [vmem:[%s19071_s29] sm:$0xff]  }
0x22f6   :  { %v17517_v60 = vpop.f32.mrf.mxu1  ;;  %v12653_v51 = vmul.f32 %v18664_v10, %v18432_v27 }
0x22f7   :  { %v12833_v59 = vmul.f32 %v17517_v60, %v12365_v47  ;;  %15674 = vmatmul.mubr.msk.bf16.vlgmr.msra.gmra.mxu0 %vm976_vm3, %v12834_v21  ;;  %v22032_v21 = vld [vmem:[#allocation2_spill] sm:$0xff]  ;;  %v18679_v47 = vld [vmem:[%s19071_s29 + $0x10] sm:$0xff]  }
0x22f8   :  { %v12798_v57 = vpop.f32.mrf.mxu1  ;;  %12904 = vmatprep.mubr.bf16.mxu0 %v22023_v61  ;;  %17535 = vmatpush3.bf16.msra.mxu0 %v21242_v4  ;;  %v12835_v4 = vpack.c.bf16 %v12651_v40, %v12650_v42  ;;  %v18434_v43 = vpop.eup %18433  ;;  %v12836_v17 = vpack.c.bf16 %v12653_v51, %v12652_v22 }
0x22f9   :  { %v12849_v36 = vpack.c.bf16 %v12833_v59, %v12830_v12  ;;  %v12827_v3 = vmul.f32 %v12798_v57, %v12357_v41  ;;  %17544 = vmatprep.subr.bf16.mxu0 %v18661_v44  ;;  %v18436_v62 = vpop.eup %18435  ;;  %v12654_v48 = vmul.f32 %v18665_v45, %v18434_v43 }
0x22fa   :  { %v12655_v28 = vmul.f32 %v18666_v26, %v18436_v62 }
0x22fb   :  { %v12846_v0 = vpack.c.bf16 %v12827_v3, %v12824_v1  ;;  %17518 = vmatprep.subr.bf16.mxu1 %v12849_v36 }
0x22fc   :  { %17519 = vmatpush3.bf16.msra.mxu1 %v12849_v36  ;;  %v12837_v34 = vpack.c.bf16 %v12655_v28, %v12654_v48 }
0x22fd   :  { %17520 = vmatprep.subr.bf16.mxu1 %v12846_v0 }
0x22ff   :  { %15675 = vmatmul.mubr.msk.bf16.gmra.mxu0 %vm976_vm3, %v12835_v4 }
0x2300   :  { %17521 = vmatpush3.bf16.msra.mxu1 %v12846_v0  ;;  %12914 = vmatprep.mubr.bf16.mxu0 %v22023_v61 }
0x2301   :  { %17522 = vmatprep.subr.bf16.mxu1 %v12843_v53 }
0x2304   :  { %17523 = vmatpush3.bf16.msra.mxu1 %v12843_v53  ;;  %v18673_v53 = vld [vmem:[%s19071_s29 + $0x28] sm:$0xff]  }
0x2305   :  { %17524 = vmatprep.subr.bf16.mxu1 %v12840_v33 }
0x2307   :  { %15676 = vmatmul.mubr.msk.bf16.gmra.mxu0 %vm976_vm3, %v12836_v17 }
0x2308   :  { %17525 = vmatpush3.bf16.msra.mxu1 %v12840_v33  ;;  %12924 = vmatprep.mubr.bf16.mxu0 %v22023_v61 }
0x2309   :  { %13030 = vmatprep.subr.bf16.mxu1 %v22027_v32 }
0x230b   :  { %17527 = vmatmul.mubr.msk.bf16.vlgmr.msra.gmra.mxu1 %vm976_vm3, %v12835_v4 }
0x230c   :  { %17530 = vmatprep.mubr.msk.bf16.mxu1 %vm976_vm3, %v12836_v17  ;;  %13031 = vmatpush1.bf16.msra.mxu1 %v22028_v11 }
0x230d   :  { %16588 = vmatprep.subr.bf16.mxu1 %v18667_v24 }
0x230f   :  { %15677 = vmatmul.mubr.msk.bf16.gmra.mxu0 %vm976_vm3, %v12837_v34 }
0x2310   :  { %17536 = vmatprep.mubr.msk.bf16.mxu0 %vm488_vm2, %v22029_v13 }
0x2313   :  { %17531 = vmatmul.mubr.msk.bf16.gmra.mxu1 %vm976_vm3, %v12837_v34 }
0x2314   :  { %13048 = vmatprep.mubr.bf16.mxu1 %v22023_v61 }
0x2317   :  { %17537 = vmatmul.mubr.msk.bf16.vlgmr.msra.gmra.mxu0 %vm488_vm2, %v22030_v49 }
0x2318   :  { %17540 = vmatprep.mubr.msk.bf16.mxu0 %vm488_vm2, %v22031_v23  ;;  %17545 = vmatpush3.bf16.msra.mxu0 %v18661_v44 }
0x2319   :  { %17546 = vmatprep.subr.bf16.mxu0 %v18668_v16 }
0x231b   :  { %15682 = vmatmul.mubr.msk.bf16.vlgmr.msra.gmra.mxu1 %vm488_vm2, %v22029_v13 }
0x231c   :  { %13058 = vmatprep.mubr.bf16.mxu1 %v22023_v61  ;;  %16589 = vmatpush3.bf16.msra.mxu1 %v18669_v15 }
0x231d   :  { %16590 = vmatprep.subr.bf16.mxu1 %v18670_v31  ;;  %17547 = vmatpush3.bf16.msra.mxu0 %v18668_v16 }
0x231f   :  { %17541 = vmatmul.mubr.msk.bf16.gmra.mxu0 %vm488_vm2, %v22032_v21 }
0x2320   :  { %16591 = vmatpush3.bf16.msra.mxu1 %v18671_v63 }
0x2321   :  { %16592 = vmatprep.subr.bf16.mxu1 %v18672_v19 }
0x2323   :  { %15683 = vmatmul.mubr.msk.bf16.gmra.mxu1 %vm488_vm2, %v22030_v49 }
0x2324   :  { %13068 = vmatprep.mubr.bf16.mxu1 %v22023_v61  ;;  %16593 = vmatpush3.bf16.msra.mxu1 %v18673_v53 }
0x2325   :  { %16594 = vmatprep.subr.bf16.mxu1 %v18674_v9 }
0x2328   :  { %16595 = vmatpush3.bf16.msra.mxu1 %v18675_v6 }
0x2329   :  { %16596 = vmatprep.subr.bf16.mxu1 %v18676_v29 }
0x232b   :  { %15684 = vmatmul.mubr.msk.bf16.gmra.mxu1 %vm488_vm2, %v22031_v23 }
0x232c   :  { %13078 = vmatprep.mubr.bf16.mxu1 %v22023_v61  ;;  %16597 = vmatpush3.bf16.msra.mxu1 %v18677_v54 }
0x232d   :  { %16598 = vmatprep.subr.bf16.mxu1 %v18678_v25 }
0x2330   :  { %16599 = vmatpush3.bf16.msra.mxu1 %v18679_v47 }
0x2331   :  { %16600 = vmatprep.subr.bf16.mxu1 %v18680_v7 }
0x2333   :  { %15685 = vmatmul.mubr.msk.bf16.gmra.mxu1 %vm488_vm2, %v22032_v21 }
0x2334   :  { %16601 = vmatpush3.bf16.msra.mxu1 %v18681_v35 }
0x2335   :  { %16602 = vmatprep.subr.bf16.mxu1 %v18682_v18 }
0x2338   :  { %16603 = vmatpush3.bf16.msra.mxu1 %v18683_v14 }
0x23b7   :  { %v12896_v60 = vpop.f32.mrf.mxu0 }
0x23b9   :  { %v12898_v52 = vpop.f32.mrf.mxu0 }
0x23bb   :  { %v12900_v58 = vpop.f32.mrf.mxu0 }
0x23bd   :  { %v12902_v41 = vpop.f32.mrf.mxu0 }
0x23bf   :  { %v12906_v38 = vpop.f32.mrf.mxu0 }
0x23c1   :  { %v12908_v12 = vpop.f32.mrf.mxu0 }
0x23c3   :  { %v12910_v59 = vpop.f32.mrf.mxu0 }
0x23c5   :  { %v12912_v30 = vpop.f32.mrf.mxu0 }
0x23c7   :  { %v21405_v57 = vpop.f32.mrf.mxu0 }
0x23c9   :  { %v21407_v1 = vpop.f32.mrf.mxu0 }
0x23cb   :  { %v21409_v36 = vpop.f32.mrf.mxu0  ;;  %v17528_v3 = vpop.f32.mrf.mxu1 }
0x23cd   :  { %v21411_v2 = vpop.f32.mrf.mxu0  ;;  %v12969_v42 = vpop.f32.mrf.mxu1 }
0x23cf   :  { %v21413_v44 = vpop.f32.mrf.mxu0  ;;  %v17529_v0 = vpop.f32.mrf.mxu1 }
0x23d1   :  { %v21415_v46 = vpop.f32.mrf.mxu0  ;;  %v12972_v40 = vpop.f32.mrf.mxu1 }
0x23d3   :  { %v21417_v55 = vpop.f32.mrf.mxu0  ;;  %v17532_v20 = vpop.f32.mrf.mxu1 }
0x23d5   :  { %v21419_v39 = vpop.f32.mrf.mxu0  ;;  %v12985_v4 = vpop.f32.mrf.mxu1 }
0x23d7   :  { %v17533_v56 = vpop.f32.mrf.mxu1  ;;  %v17538_v5 = vpop.f32.mrf.mxu0 }
0x23d8   :  { %v13162_v17 = vmul.f32 %v17538_v5, %v17528_v3 }
0x23d9   :  { %v12988_v27 = vpop.f32.mrf.mxu1  ;;  %v13123_v50 = vpop.f32.mrf.mxu0 }
0x23da   :  { %v13156_v51 = vmul.f32 %v13123_v50, %v12969_v42 }
0x23db   :  { %v13050_v37 = vpop.f32.mrf.mxu1  ;;  %v17539_v8 = vpop.f32.mrf.mxu0 }
0x23dc   :  { %v13165_v22 = vmul.f32 %v17539_v8, %v17529_v0  ;;  %v13154_v13 = vmul.f32 %v13050_v37, %v12896_v60  ;;  %v13379_v37 = vld [vmem:[%s21438_s26 + $0x60] sm:$0xff] }
0x23dd   :  { %v13052_v33 = vpop.f32.mrf.mxu1  ;;  %v13126_v10 = vpop.f32.mrf.mxu0 }
0x23de   :  { %v13159_v43 = vmul.f32 %v13126_v10, %v12972_v40  ;;  %v13183_v32 = vpack.c.bf16 %v13165_v22, %v13162_v17  ;;  %v13155_v34 = vmul.f32 %v13052_v33, %v12898_v52  ;;  %v13367_v33 = vld [vmem:[%s21438_s26] sm:$0xff]  ;;  %v13372_v17 = vld [vmem:[%s21438_s26 + $0x28] sm:$0xff] }
0x23df   :  { %v13054_v62 = vpop.f32.mrf.mxu1  ;;  %v17542_v45 = vpop.f32.mrf.mxu0  ;;  %v13371_v10 = vld [vmem:[%s21438_s26 + $0x20] sm:$0xff] }
0x23e0   :  { %v13180_v48 = vpack.c.bf16 %v13159_v43, %v13156_v51  ;;  %v13157_v26 = vmul.f32 %v13054_v62, %v12900_v58  ;;  %v13174_v9 = vmul.f32 %v17542_v45, %v17532_v20  ;;  %v13368_v51 = vld [vmem:[%s21438_s26 + $0x8] sm:$0xff]  ;;  %v15696_v43 = vcombine.high %v13367_v33, %v13371_v10 }
0x23e1   :  { %v13056_v28 = vpop.f32.mrf.mxu1  ;;  %v13139_v11 = vpop.f32.mrf.mxu0  ;;  %v15695_v62 = vcombine.low %v13367_v33, %v13371_v10  ;;  %v15697_v45 = vcombine.low %v13368_v51, %v13372_v17  ;;  %v18133_v33 = vld [vmem:[%s21463_s2 + $0x78] sm:$0xff]  }
0x23e2   :  { %v13158_v24 = vmul.f32 %v13056_v28, %v12902_v41  ;;  %17548 = vmatprep.mubr.msk.bf16.mxu0 %vm1468_vm4, %v13180_v48  ;;  %v13178_v15 = vpack.c.bf16 %v13157_v26, %v13154_v13  ;;  %v13168_v19 = vmul.f32 %v13139_v11, %v12985_v4  ;;  %v15698_v48 = vcombine.high %v13368_v51, %v13372_v17  ;;  %v21452_v26 = vld [vmem:[%s21438_s26 + $0x70] sm:$0xff]  ;;  %v18134_v10 = vld [vmem:[%s21463_s2 + $0xf8] sm:$0xff]  }
0x23e3   :  { %v13060_v49 = vpop.f32.mrf.mxu1  ;;  %v17543_v23 = vpop.f32.mrf.mxu0  ;;  %17549 = vmatmul.mubr.msk.bf16.vlgmr.msra.gmra.mxu0 %vm1468_vm4, %v13183_v32  ;;  %v21449_v32 = vld [vmem:[%s21438_s26 + $0x50] sm:$0xff] }
0x23e4   :  { %v13179_v16 = vpack.c.bf16 %v13158_v24, %v13155_v34  ;;  %v13177_v31 = vmul.f32 %v17543_v23, %v17533_v56  ;;  %v13160_v18 = vmul.f32 %v13060_v49, %v12906_v38  ;;  %v15707_v28 = vcombine.low %v21449_v32, %v21452_v26  ;;  %v13378_v34 = vld [vmem:[%s21438_s26 + $0x58] sm:$0xff] }
0x23e5   :  { %v13062_v21 = vpop.f32.mrf.mxu1  ;;  %v13142_v63 = vpop.f32.mrf.mxu0  ;;  %v15708_v11 = vcombine.high %v21449_v32, %v21452_v26  ;;  %v13382_v24 = vld [vmem:[%s21438_s26 + $0x78] sm:$0xff] }
0x23e6   :  { %v13171_v53 = vmul.f32 %v13142_v63, %v12988_v27  ;;  %13241 = vmatprep.mubr.bf16.mxu1 %v13179_v16  ;;  %v13189_v54 = vpack.c.bf16 %v13177_v31, %v13174_v9  ;;  %v13161_v7 = vmul.f32 %v13062_v21, %v12908_v12  ;;  %v15709_v13 = vcombine.low %v13378_v34, %v13382_v24  ;;  %v21468_v31 = vld [vmem:[%s14916_s7] ss:$0 sm:$0xff] }
0x23e7   :  { %v13064_v6 = vpop.f32.mrf.mxu1  ;;  %13242 = vmatmul.mubr.bf16.vlgmr.msra.gmra.mxu1 %v13178_v15  ;;  %v15710_v49 = vcombine.high %v13378_v34, %v13382_v24 }
0x23e8   :  { %v13186_v29 = vpack.c.bf16 %v13171_v53, %v13168_v19  ;;  %v13163_v25 = vmul.f32 %v13064_v6, %v12910_v59 }
0x23e9   :  { %v13066_v47 = vpop.f32.mrf.mxu1 }
0x23ea   :  { %v13164_v35 = vmul.f32 %v13066_v47, %v12912_v30  ;;  %17552 = vmatprep.mubr.msk.bf16.mxu0 %vm1468_vm4, %v13186_v29  ;;  %v13181_v52 = vpack.c.bf16 %v13163_v25, %v13160_v18 }
0x23eb   :  { %v13070_v14 = vpop.f32.mrf.mxu1  ;;  %17553 = vmatmul.mubr.msk.bf16.gmra.mxu0 %vm1468_vm4, %v13189_v54 }
0x23ec   :  { %v13182_v60 = vpack.c.bf16 %v13164_v35, %v13161_v7  ;;  %13549 = vmatprep.mubr.bf16.mxu0 %v22023_v61  ;;  %v13166_v38 = vmul.f32 %v13070_v14, %v21405_v57  ;;  %v13376_v57 = vld [vmem:[%s21438_s26 + $0x48] sm:$0xff] }
0x23ed   :  { %v13072_v58 = vpop.f32.mrf.mxu1 }
0x23ee   :  { %13249 = vmatprep.mubr.bf16.mxu1 %v13182_v60  ;;  %v13167_v12 = vmul.f32 %v13072_v58, %v21407_v1 }
0x23ef   :  { %v13074_v41 = vpop.f32.mrf.mxu1  ;;  %13250 = vmatmul.mubr.bf16.gmra.mxu1 %v13181_v52 }
0x23f0   :  { %v13169_v3 = vmul.f32 %v13074_v41, %v21409_v36 }
0x23f1   :  { %v13076_v59 = vpop.f32.mrf.mxu1 }
0x23f2   :  { %v13170_v30 = vmul.f32 %v13076_v59, %v21411_v2  ;;  %v13184_v40 = vpack.c.bf16 %v13169_v3, %v13166_v38  ;;  %v13369_v3 = vld [vmem:[%s21438_s26 + $0x10] sm:$0xff]  ;;  %v13370_v38 = vld [vmem:[%s21438_s26 + $0x18] sm:$0xff] }
0x23f3   :  { %v13080_v42 = vpop.f32.mrf.mxu1 }
0x23f4   :  { %v13185_v0 = vpack.c.bf16 %v13170_v30, %v13167_v12  ;;  %v13172_v1 = vmul.f32 %v13080_v42, %v21413_v44  ;;  %v13380_v44 = vld [vmem:[%s21438_s26 + $0x68] sm:$0xff]  ;;  %v13373_v30 = vld [vmem:[%s21438_s26 + $0x30] sm:$0xff]  ;;  %v13374_v42 = vld [vmem:[%s21438_s26 + $0x38] sm:$0xff] }
0x23f5   :  { %v13082_v20 = vpop.f32.mrf.mxu1 }
0x23f6   :  { %13257 = vmatprep.mubr.bf16.mxu1 %v13185_v0  ;;  %v13173_v27 = vmul.f32 %v13082_v20, %v21415_v46  ;;  %v15705_v46 = vcombine.low %v13376_v57, %v13380_v44 }
0x23f7   :  { %v13084_v4 = vpop.f32.mrf.mxu1  ;;  %13258 = vmatmul.mubr.bf16.gmra.mxu1 %v13184_v40 }
0x23f8   :  { %v13175_v56 = vmul.f32 %v13084_v4, %v21417_v55  ;;  %v15706_v55 = vcombine.high %v13376_v57, %v13380_v44 }
0x23f9   :  { %v13086_v5 = vpop.f32.mrf.mxu1 }
0x23fa   :  { %v13176_v36 = vmul.f32 %v13086_v5, %v21419_v39  ;;  %v13187_v2 = vpack.c.bf16 %v13175_v56, %v13172_v1  ;;  %v13375_v39 = vld [vmem:[%s21438_s26 + $0x40] sm:$0xff]  ;;  %13602 = vmatprep.subr.bf16.mxu1 %v15706_v55  ;;  %v15702_v1 = vcombine.high %v13370_v38, %v13374_v42 }
0x23fb   :  { %v15704_v8 = vcombine.high %v13375_v39, %v13379_v37  ;;  %13603 = vmatpush1.bf16.msra.mxu1 %v15705_v46  ;;  %v15703_v22 = vcombine.low %v13375_v39, %v13379_v37  ;;  %v15699_v39 = vcombine.low %v13369_v3, %v13373_v30  ;;  %v15701_v37 = vcombine.low %v13370_v38, %v13374_v42  ;;  %v18145_v38 = vld [vmem:[%s21463_s2 + $0x60] sm:$0xff]  }
0x23fc   :  { %v13188_v50 = vpack.c.bf16 %v13176_v36, %v13173_v27  ;;  %13604 = vmatprep.subr.bf16.mxu1 %v15698_v48  ;;  %v15700_v36 = vcombine.high %v13369_v3, %v13373_v30  ;;  %v18141_v3 = vld [vmem:[%s21463_s2 + $0x68] sm:$0xff]   ;;  %v18146_v42 = vld [vmem:[%s21463_s2 + $0xe0] sm:$0xff]  }
0x23fd   :  { %13529 = vmatprep.subr.bf16.mxu0 %v15704_v8  ;;  %v18144_v30 = vld [vmem:[%s21463_s2 + $0xa8] sm:$0xff]  }
0x23fe   :  { %13265 = vmatprep.mubr.bf16.mxu1 %v13188_v50  ;;  %13530 = vmatpush1.bf16.msra.mxu0 %v15703_v22 }
0x23ff   :  { %13266 = vmatmul.mubr.bf16.gmra.mxu1 %v13187_v2  ;;  %13531 = vmatprep.subr.bf16.mxu0 %v15696_v43 }
0x2400   :  { %13622 = vmatprep.mubr.bf16.mxu1 %v22023_v61  ;;  %13605 = vmatpush1.bf16.msra.mxu1 %v15697_v45 }
0x2401   :  { %13748 = vmatprep.subr.bf16.mxu1 %v15710_v49 }
0x2402   :  { %13532 = vmatpush1.bf16.msra.mxu0 %v15695_v62 }
0x2403   :  { %13675 = vmatprep.subr.bf16.mxu0 %v15708_v11 }
0x24a3   :  { %v17550_v23 = vpop.f32.mrf.mxu0 }
0x24a5   :  { %v13308_v15 = vpop.f32.mrf.mxu0 }
0x24a7   :  { %v16604_v16 = vpop.f32.mrf.mxu1  ;;  %v17551_v9 = vpop.f32.mrf.mxu0 }
0x24a9   :  { %v16605_v21 = vpop.f32.mrf.mxu1  ;;  %v13311_v7 = vpop.f32.mrf.mxu0 }
0x24aa   :  { %v16606_v63 = vadd.f32 %v16605_v21, %v16604_v16 }
0x24ab   :  { %v16607_v19 = vpop.f32.mrf.mxu1  ;;  %v21474_v59 = vpop.f32.mrf.mxu0 }
0x24ac   :  { %v13244_v53 = vadd.f32 %v16606_v63, %v21468_v31 }
0x24ad   :  { %v16608_v6 = vpop.f32.mrf.mxu1  ;;  %v13324_v50 = vpop.f32.mrf.mxu0 }
0x24ae   :  { %v13309_v29 = vadd.f32 %v13308_v15, %v13244_v53  ;;  %v16609_v54 = vadd.f32 %v16608_v6, %v16607_v19 }
0x24af   :  { %v16610_v25 = vpop.f32.mrf.mxu1  ;;  %v17555_v51 = vpop.f32.mrf.mxu0 }
0x24b0   :  { %v13247_v47 = vadd.f32 %v16609_v54, %v21468_v31  ;;  %v13347_v18 = vmul.f32 0.1, %v13309_v29  ;;  %vm13339_vm2 = vcmp.ge.f32.partialorder %v13309_v29, 0.0 }
0x24b1   :  { %v16611_v35 = vpop.f32.mrf.mxu1  ;;  %v13327_v11 = vpop.f32.mrf.mxu0 }
0x24b2   :  { %v13312_v14 = vadd.f32 %v13311_v7, %v13247_v47  ;;  %v16612_v60 = vadd.f32 %v16611_v35, %v16610_v25  ;;  %v13355_v0 = vsel %vm13339_vm2, %v13309_v29, %v13347_v18  ;;  %v18135_v18 = vld [vmem:[%s21463_s2 + $0x38] sm:$0xff]  }
0x24b3   :  { %v16613_v52 = vpop.f32.mrf.mxu1 }
0x24b4   :  { %vm13340_vm3 = vcmp.ge.f32.partialorder %v13312_v14, 0.0  ;;  %v13348_v58 = vmul.f32 0.1, %v13312_v14  ;;  %v13252_v41 = vadd.f32 %v16612_v60, %v21468_v31  ;;  %v18137_v60 = vld [vmem:[%s21463_s2 + $0x70] sm:$0xff]  }
0x24b5   :  { %v16614_v12 = vpop.f32.mrf.mxu1 }
0x24b6   :  { %v13356_v40 = vsel %vm13340_vm3, %v13312_v14, %v13348_v58  ;;  %v13317_v20 = vadd.f32 %v17550_v23, %v13252_v41  ;;  %v16615_v4 = vadd.f32 %v16614_v12, %v16613_v52  ;;  %v18136_v14 = vld [vmem:[%s21463_s2 + $0xb8] sm:$0xff]   ;;  %v18138_v52 = vld [vmem:[%s21463_s2 + $0xf0] sm:$0xff]   ;;  %v18143_v12 = vld [vmem:[%s21463_s2 + $0x28] sm:$0xff]  }
0x24b7   :  { %v21479_v56 = vpack.c.bf16 %v13356_v40, %v13355_v0  ;;  %v16616_v5 = vpop.f32.mrf.mxu1  ;;  %v18139_v58 = vld [vmem:[%s21463_s2 + $0x30] sm:$0xff]   ;;  %v18147_v0 = vld [vmem:[%s21463_s2 + $0x20] sm:$0xff]  }
0x24b8   :  { %v13255_v27 = vadd.f32 %v16615_v4, %v21468_v31  ;;  %v13349_v57 = vmul.f32 0.1, %v13317_v20  ;;  %vm13341_vm13 = vcmp.ge.f32.partialorder %v13317_v20, 0.0  ;;  %v18140_v41 = vld [vmem:[%s21463_s2 + $0xb0] sm:$0xff]   ;;  %v18148_v40 = vld [vmem:[%s21463_s2 + $0xa0] sm:$0xff]   ;;  %v18150_v4 = vld [vmem:[%s21463_s2 + $0xd8] sm:$0xff]  }
0x24b9   :  { %v16617_v2 = vpop.f32.mrf.mxu1  ;;  %15711 = vmatmul.mubr.msk.bf16.vlgmr.msra.gmra.mxu0 %vm1468_vm4, %v21479_v56  ;;  %15715 = vmatmul.mubr.msk.bf16.vlgmr.msra.gmra.mxu1 %vm1468_vm4, %v21479_v56 }
0x24ba   :  { %v13320_v44 = vadd.f32 %v17551_v9, %v13255_v27  ;;  %v16618_v46 = vadd.f32 %v16617_v2, %v16616_v5  ;;  %13559 = vmatprep.mubr.bf16.mxu0 %v22023_v61  ;;  %13632 = vmatprep.mubr.bf16.mxu1 %v22023_v61  ;;  %v13357_v17 = vsel %vm13341_vm13, %v13317_v20, %v13349_v57  ;;  %v18149_v20 = vld [vmem:[%s21463_s2 + $0x58] sm:$0xff]   ;;  %v18153_v27 = vld [vmem:[%s21463_s2 + $0x50] sm:$0xff]   ;;  %v18158_v2 = vld [vmem:[%s21463_s2 + $0xc8] sm:$0xff]  }
0x24bb   :  { %v16619_v55 = vpop.f32.mrf.mxu1  ;;  %13676 = vmatpush1.bf16.msra.mxu0 %v15707_v28  ;;  %13749 = vmatpush1.bf16.msra.mxu1 %v15709_v13  ;;  %v18152_v5 = vld [vmem:[%s21463_s2 + $0x98] sm:$0xff]   ;;  %v18159_v57 = vld [vmem:[%s21463_s2 + $0x8] sm:$0xff]  }
0x24bc   :  { %vm13342_vm14 = vcmp.ge.f32.partialorder %v13320_v44, 0.0  ;;  %v13350_v8 = vmul.f32 0.1, %v13320_v44  ;;  %v13260_v22 = vadd.f32 %v16618_v46, %v21468_v31  ;;  %13677 = vmatprep.subr.bf16.mxu0 %v15700_v36  ;;  %13750 = vmatprep.subr.bf16.mxu1 %v15702_v1  ;;  %v18154_v36 = vld [vmem:[%s21463_s2 + $0xd0] sm:$0xff]   ;;  %v18161_v46 = vld [vmem:[%s21463_s2 + $0x40] sm:$0xff]  }
0x24bd   :  { %v16620_v43 = vpop.f32.mrf.mxu1  ;;  %v18155_v1 = vld [vmem:[%s21463_s2 + $0x10] sm:$0xff]  }
0x24be   :  { %v13358_v62 = vsel %vm13342_vm14, %v13320_v44, %v13350_v8  ;;  %v13325_v45 = vadd.f32 %v13324_v50, %v13260_v22  ;;  %v16621_v48 = vadd.f32 %v16620_v43, %v16619_v55  ;;  %v18156_v50 = vld [vmem:[%s21463_s2 + $0x90] sm:$0xff]   ;;  %v18160_v44 = vld [vmem:[%s21463_s2 + $0x88] sm:$0xff]   ;;  %v18162_v55 = vld [vmem:[%s21463_s2 + $0xc0] sm:$0xff]  }
0x24bf   :  { %v21491_v32 = vpack.c.bf16 %v13358_v62, %v13357_v17  ;;  %v16622_v26 = vpop.f32.mrf.mxu1  ;;  %13678 = vmatpush1.bf16.msra.mxu0 %v15699_v39  ;;  %13751 = vmatpush1.bf16.msra.mxu1 %v15701_v37  ;;  %v18163_v39 = vld [vmem:[%s21463_s2] sm:$0xff]   ;;  %v18165_v8 = vld [vmem:[%s21463_s2 + $0x178] sm:$0xff]  }
0x24c0   :  { %v13263_v28 = vadd.f32 %v16621_v48, %v21468_v31  ;;  %16634 = vmatprep.subr.bf16.mxu0 %v18133_v33  ;;  %16674 = vmatprep.subr.bf16.mxu1 %v18134_v10  ;;  %v13351_v24 = vmul.f32 0.1, %v13325_v45  ;;  %vm13343_vm15 = vcmp.ge.f32.partialorder %v13325_v45, 0.0  ;;  %v18164_v37 = vld [vmem:[%s21463_s2 + $0x80] sm:$0xff]   ;;  %v18166_v22 = vld [vmem:[%s21463_s2 + $0x1f8] sm:$0xff]   ;;  %v13385_v33 = vlaneseq }
0x24c1   :  { %v16623_v34 = vpop.f32.mrf.mxu1  ;;  %15712 = vmatmul.mubr.msk.bf16.gmra.mxu0 %vm1468_vm4, %v21491_v32  ;;  %15716 = vmatmul.mubr.msk.bf16.gmra.mxu1 %vm1468_vm4, %v21491_v32  ;;  %v13383_v43 = vld [vmem:[%s14918_s8] sm:$0xff] }
0x24c2   :  { %v13328_v13 = vadd.f32 %v13327_v11, %v13263_v28  ;;  %v16624_v49 = vadd.f32 %v16623_v34, %v16622_v26  ;;  %13569 = vmatprep.mubr.bf16.mxu0 %v22023_v61  ;;  %13642 = vmatprep.mubr.bf16.mxu1 %v22023_v61  ;;  %v13359_v63 = vsel %vm13343_vm15, %v13325_v45, %v13351_v24  ;;  %v13386_v10 = vshrl.u32 %v13385_v33, 7 }
0x24c3   :  { %v16625_v23 = vpop.f32.mrf.mxu1 }
0x24c4   :  { %vm13344_vm0 = vcmp.ge.f32.partialorder %v13328_v13, 0.0  ;;  %v13352_v16 = vmul.f32 0.1, %v13328_v13  ;;  %v13268_v15 = vadd.f32 %v16624_v49, %v21468_v31  ;;  %v13395_v17 = vsub.s32 2, %v13386_v10 }
0x24c5   :  { %v16626_v21 = vpop.f32.mrf.mxu1  ;;  %v13391_v62 = vsub.s32 1, %v13386_v10  ;;  %v13399_v34 = vsub.s32 3, %v13386_v10  ;;  %v13411_v49 = vsub.s32 6, %v13386_v10 }
0x24c6   :  { %v13360_v19 = vsel %vm13344_vm0, %v13328_v13, %v13352_v16  ;;  %v13333_v53 = vadd.f32 %v21474_v59, %v13268_v15  ;;  %v16627_v9 = vadd.f32 %v16626_v21, %v16625_v23  ;;  %v18142_v59 = vld [vmem:[%s21463_s2 + $0xe8] sm:$0xff]   ;;  %v21566_v26 = vrot.slane %v13383_v43, %v13395_v17  ;;  %v18167_v17 = vld [vmem:[%s21463_s2 + $0x138] sm:$0xff]  }
0x24c7   :  { %v13365_v6 = vpack.c.bf16 %v13360_v19, %v13359_v63  ;;  %v21568_v28 = vrot.slane %v13383_v43, %v13391_v62  ;;  %v13403_v13 = vsub.s32 4, %v13386_v10  ;;  %v13407_v23 = vsub.s32 5, %v13386_v10 }
0x24c8   :  { %v13271_v29 = vadd.f32 %v16627_v9, %v21468_v31  ;;  %v13353_v54 = vmul.f32 0.1, %v13333_v53  ;;  %vm13345_vm1 = vcmp.ge.f32.partialorder %v13333_v53, 0.0  ;;  %v21574_v9 = vrot.slane %v13383_v43, %v13399_v34 }
0x24c9   :  { %15713 = vmatmul.mubr.msk.bf16.gmra.mxu0 %vm1468_vm4, %v13365_v6  ;;  %15717 = vmatmul.mubr.msk.bf16.gmra.mxu1 %vm1468_vm4, %v13365_v6 }
0x24ca   :  { %v13336_v25 = vadd.f32 %v17555_v51, %v13271_v29  ;;  %13579 = vmatprep.mubr.bf16.mxu0 %v22023_v61  ;;  %13652 = vmatprep.mubr.bf16.mxu1 %v22023_v61  ;;  %v13361_v7 = vsel %vm13345_vm1, %v13333_v53, %v13353_v54  ;;  %v13387_v51 = vsub.s32 0, %v13386_v10  ;;  %v21576_v54 = vrot.slane %v13383_v43, %v13403_v13 }
0x24cc   :  { %vm13346_vm5 = vcmp.ge.f32.partialorder %v13336_v25, 0.0  ;;  %v13354_v47 = vmul.f32 0.1, %v13336_v25  ;;  %v21564_v45 = vrot.slane %v13383_v43, %v13387_v51 }
0x24ce   :  { %v13362_v35 = vsel %vm13346_vm5, %v13336_v25, %v13354_v47  ;;  %v21579_v47 = vrot.slane %v13383_v43, %v13411_v49 }
0x24cf   :  { %v13366_v31 = vpack.c.bf16 %v13362_v35, %v13361_v7  ;;  %v21581_v7 = vrot.slane %v13383_v43, %v13407_v23  ;;  %v13415_v35 = vsub.s32 7, %v13386_v10 }
0x24d1   :  { %15714 = vmatmul.mubr.msk.bf16.gmra.mxu0 %vm1468_vm4, %v13366_v31  ;;  %15718 = vmatmul.mubr.msk.bf16.gmra.mxu1 %vm1468_vm4, %v13366_v31 }
0x24d2   :  { %13695 = vmatprep.mubr.bf16.mxu0 %v22023_v61  ;;  %13768 = vmatprep.mubr.bf16.mxu1 %v22023_v61 }
0x24d9   :  { %15719 = vmatmul.mubr.msk.bf16.vlgmr.msra.gmra.mxu0 %vm1468_vm4, %v21479_v56  ;;  %15723 = vmatmul.mubr.msk.bf16.vlgmr.msra.gmra.mxu1 %vm1468_vm4, %v21479_v56  ;;  %v18151_v56 = vld [vmem:[%s21463_s2 + $0x18] sm:$0xff]  }
0x24da   :  { %13705 = vmatprep.mubr.bf16.mxu0 %v22023_v61  ;;  %13778 = vmatprep.mubr.bf16.mxu1 %v22023_v61 }
0x24db   :  { %16635 = vmatpush3.bf16.msra.mxu0 %v18135_v18  ;;  %16675 = vmatpush3.bf16.msra.mxu1 %v18136_v14 }
0x24dc   :  { %16636 = vmatprep.subr.bf16.mxu0 %v18137_v60  ;;  %16676 = vmatprep.subr.bf16.mxu1 %v18138_v52 }
0x24df   :  { %16637 = vmatpush3.bf16.msra.mxu0 %v18139_v58  ;;  %16677 = vmatpush3.bf16.msra.mxu1 %v18140_v41 }
0x24e0   :  { %16638 = vmatprep.subr.bf16.mxu0 %v18141_v3  ;;  %16678 = vmatprep.subr.bf16.mxu1 %v18142_v59 }
0x24e1   :  { %15720 = vmatmul.mubr.msk.bf16.gmra.mxu0 %vm1468_vm4, %v21491_v32  ;;  %15724 = vmatmul.mubr.msk.bf16.gmra.mxu1 %vm1468_vm4, %v21491_v32 }
0x24e2   :  { %13715 = vmatprep.mubr.bf16.mxu0 %v22023_v61  ;;  %13788 = vmatprep.mubr.bf16.mxu1 %v22023_v61 }
0x24e3   :  { %16639 = vmatpush3.bf16.msra.mxu0 %v18143_v12  ;;  %16679 = vmatpush3.bf16.msra.mxu1 %v18144_v30 }
0x24e4   :  { %16640 = vmatprep.subr.bf16.mxu0 %v18145_v38  ;;  %16680 = vmatprep.subr.bf16.mxu1 %v18146_v42 }
0x24e7   :  { %16641 = vmatpush3.bf16.msra.mxu0 %v18147_v0  ;;  %16681 = vmatpush3.bf16.msra.mxu1 %v18148_v40  ;;  %v21587_v40 = vrot.slane %v13383_v43, %v13415_v35 }
0x24e8   :  { %16642 = vmatprep.subr.bf16.mxu0 %v18149_v20  ;;  %16682 = vmatprep.subr.bf16.mxu1 %v18150_v4 }
0x24e9   :  { %15721 = vmatmul.mubr.msk.bf16.gmra.mxu0 %vm1468_vm4, %v13365_v6  ;;  %15725 = vmatmul.mubr.msk.bf16.gmra.mxu1 %vm1468_vm4, %v13365_v6 }
0x24ea   :  { %13725 = vmatprep.mubr.bf16.mxu0 %v22023_v61  ;;  %13798 = vmatprep.mubr.bf16.mxu1 %v22023_v61  ;;  %v18157_v61 = vld [vmem:[%s21463_s2 + $0x48] sm:$0xff]  }
0x24eb   :  { %16643 = vmatpush3.bf16.msra.mxu0 %v18151_v56  ;;  %16683 = vmatpush3.bf16.msra.mxu1 %v18152_v5 }
0x24ec   :  { %16644 = vmatprep.subr.bf16.mxu0 %v18153_v27  ;;  %16684 = vmatprep.subr.bf16.mxu1 %v18154_v36 }
0x24ef   :  { %16645 = vmatpush3.bf16.msra.mxu0 %v18155_v1  ;;  %16685 = vmatpush3.bf16.msra.mxu1 %v18156_v50 }
0x24f0   :  { %16646 = vmatprep.subr.bf16.mxu0 %v18157_v61  ;;  %16686 = vmatprep.subr.bf16.mxu1 %v18158_v2 }
0x24f1   :  { %15722 = vmatmul.mubr.msk.bf16.gmra.mxu0 %vm1468_vm4, %v13366_v31  ;;  %15726 = vmatmul.mubr.msk.bf16.gmra.mxu1 %vm1468_vm4, %v13366_v31 }
0x24f3   :  { %16647 = vmatpush3.bf16.msra.mxu0 %v18159_v57  ;;  %16687 = vmatpush3.bf16.msra.mxu1 %v18160_v44 }
0x24f4   :  { %16648 = vmatprep.subr.bf16.mxu0 %v18161_v46  ;;  %16688 = vmatprep.subr.bf16.mxu1 %v18162_v55 }
0x24f7   :  { %16649 = vmatpush3.bf16.msra.mxu0 %v18163_v39  ;;  %16689 = vmatpush3.bf16.msra.mxu1 %v18164_v37 }
0x24f8   :  { %16714 = vmatprep.subr.bf16.mxu0 %v18165_v8  ;;  %16754 = vmatprep.subr.bf16.mxu1 %v18166_v22 }
0x2579   :  { %v13551_v48 = vpop.f32.mrf.mxu0  ;;  %v13624_v32 = vpop.f32.mrf.mxu1 }
0x257a   :  { %v13552_v16 = vadd.f32 %v13551_v48, %v21564_v45  ;;  %v13625_v63 = vadd.f32 %v13624_v32, %v21566_v26 }
0x257b   :  { %v13553_v11 = vpop.f32.mrf.mxu0  ;;  %v13626_v24 = vpop.f32.mrf.mxu1 }
0x257c   :  { %v13554_v53 = vadd.f32 %v13553_v11, %v21568_v28  ;;  %vm13809_vm4 = vcmp.ge.f32.partialorder %v13552_v16, 0.0  ;;  %v13873_v31 = vmul.f32 0.1, %v13552_v16  ;;  %vm13811_vm6 = vcmp.ge.f32.partialorder %v13625_v63, 0.0  ;;  %v18169_v11 = vld [vmem:[%s21463_s2 + $0x170] sm:$0xff]  }
0x257d   :  { %v13555_v15 = vpop.f32.mrf.mxu0  ;;  %v13628_v21 = vpop.f32.mrf.mxu1  ;;  %v13875_v58 = vmul.f32 0.1, %v13625_v63  ;;  %v13627_v59 = vadd.f32 %v13626_v24, %v21574_v9 }
0x257e   :  { %v13556_v19 = vadd.f32 %v13555_v15, %v21564_v45  ;;  %v13629_v25 = vadd.f32 %v13628_v21, %v21566_v26  ;;  %v13874_v3 = vmul.f32 0.1, %v13554_v53  ;;  %vm13810_vm9 = vcmp.ge.f32.partialorder %v13554_v53, 0.0 }
0x257f   :  { %v13557_v6 = vpop.f32.mrf.mxu0  ;;  %v13630_v29 = vpop.f32.mrf.mxu1  ;;  %v13937_v20 = vsel %vm13809_vm4, %v13552_v16, %v13873_v31  ;;  %v13939_v36 = vsel %vm13811_vm6, %v13625_v63, %v13875_v58  ;;  %vm13812_vm11 = vcmp.ge.f32.partialorder %v13627_v59, 0.0  ;;  %v13876_v2 = vmul.f32 0.1, %v13627_v59  ;;  %v18173_v58 = vld [vmem:[%s21463_s2 + $0x168] sm:$0xff]  }
0x2580   :  { %v13881_v18 = vmul.f32 0.1, %v13556_v19  ;;  %v13558_v14 = vadd.f32 %v13557_v6, %v21568_v28  ;;  %vm13817_vm7 = vcmp.ge.f32.partialorder %v13556_v19, 0.0  ;;  %v13631_v41 = vadd.f32 %v13630_v29, %v21574_v9 }
0x2581   :  { %v13561_v60 = vpop.f32.mrf.mxu0  ;;  %v13634_v52 = vpop.f32.mrf.mxu1  ;;  %v13883_v42 = vmul.f32 0.1, %v13629_v25  ;;  %vm13819_vm10 = vcmp.ge.f32.partialorder %v13629_v25, 0.0  ;;  %v13938_v46 = vsel %vm13810_vm9, %v13554_v53, %v13874_v3  ;;  %v13940_v13 = vsel %vm13812_vm11, %v13627_v59, %v13876_v2 }
0x2582   :  { %vm13818_vm8 = vcmp.ge.f32.partialorder %v13558_v14, 0.0  ;;  %v13882_v12 = vmul.f32 0.1, %v13558_v14  ;;  %v13562_v0 = vadd.f32 %v13561_v60, %v21564_v45  ;;  %v13945_v4 = vsel %vm13817_vm7, %v13556_v19, %v13881_v18  ;;  %v18168_v19 = vld [vmem:[%s21463_s2 + $0x1b8] sm:$0xff]   ;;  %v18171_v18 = vld [vmem:[%s21463_s2 + $0x130] sm:$0xff]  }
0x2583   :  { %v13563_v30 = vpop.f32.mrf.mxu0  ;;  %v13636_v38 = vpop.f32.mrf.mxu1  ;;  %v13635_v56 = vadd.f32 %v13634_v52, %v21566_v26  ;;  %v13884_v1 = vmul.f32 0.1, %v13631_v41  ;;  %vm13820_vm12 = vcmp.ge.f32.partialorder %v13631_v41, 0.0  ;;  %v14001_v55 = vpack.c.bf16 %v13945_v4, %v13937_v20 }
0x2584   :  { %v13946_v61 = vsel %vm13818_vm8, %v13558_v14, %v13882_v12  ;;  %v13947_v39 = vsel %vm13819_vm10, %v13629_v25, %v13883_v42  ;;  %v13889_v37 = vmul.f32 0.1, %v13562_v0  ;;  %vm13825_vm2 = vcmp.ge.f32.partialorder %v13562_v0, 0.0  ;;  %v18170_v25 = vld [vmem:[%s21463_s2 + $0x1f0] sm:$0xff]  }
0x2585   :  { %v13565_v5 = vpop.f32.mrf.mxu0  ;;  %v13638_v27 = vpop.f32.mrf.mxu1  ;;  %v13891_v22 = vmul.f32 0.1, %v13635_v56  ;;  %v14002_v10 = vpack.c.bf16 %v13946_v61, %v13938_v46  ;;  %v13564_v62 = vadd.f32 %v13563_v30, %v21568_v28  ;;  %v13948_v32 = vsel %vm13820_vm12, %v13631_v41, %v13884_v1 }
0x2586   :  { %v13566_v50 = vadd.f32 %v13565_v5, %v21564_v45  ;;  %v13639_v8 = vadd.f32 %v13638_v27, %v21566_v26  ;;  %vm13827_vm13 = vcmp.ge.f32.partialorder %v13635_v56, 0.0  ;;  %v21602_v34 = vadd.f32 %v13636_v38, %v21574_v9 }
0x2587   :  { %v13567_v57 = vpop.f32.mrf.mxu0  ;;  %v13640_v44 = vpop.f32.mrf.mxu1  ;;  %14584 = vmatprep.mubr.bf16.mxu0 %v14002_v10  ;;  %v14003_v16 = vpack.c.bf16 %v13947_v39, %v13939_v36  ;;  %v21607_v15 = vsel %vm13825_vm2, %v13562_v0, %v13889_v37  ;;  %v14004_v63 = vpack.c.bf16 %v13948_v32, %v13940_v13  ;;  %v21620_v14 = vsel %vm13827_vm13, %v13635_v56, %v13891_v22  ;;  %v18172_v0 = vld [vmem:[%s21463_s2 + $0x1b0] sm:$0xff]   ;;  %v18174_v56 = vld [vmem:[%s21463_s2 + $0x1e8] sm:$0xff]   ;;  %v18177_v10 = vld [vmem:[%s21463_s2 + $0x160] sm:$0xff]  }
0x2588   :  { %v13897_v33 = vmul.f32 0.1, %v13566_v50  ;;  %vm13833_vm3 = vcmp.ge.f32.partialorder %v13566_v50, 0.0  ;;  %v13568_v48 = vadd.f32 %v13567_v57, %v21568_v28  ;;  %v13641_v24 = vadd.f32 %v13640_v44, %v21574_v9  ;;  %14585 = vmatmul.mubr.bf16.vlgmr.msra.gmra.mxu0 %v14001_v55  ;;  %v18175_v55 = vld [vmem:[%s21463_s2 + $0x128] sm:$0xff]   ;;  %v18178_v13 = vld [vmem:[%s21463_s2 + $0x1e0] sm:$0xff]  }
0x2589   :  { %v13571_v51 = vpop.f32.mrf.mxu0  ;;  %v13644_v43 = vpop.f32.mrf.mxu1  ;;  %v13899_v21 = vmul.f32 0.1, %v13639_v8  ;;  %vm13835_vm14 = vcmp.ge.f32.partialorder %v13639_v8, 0.0  ;;  %16715 = vmatpush3.bf16.msra.mxu0 %v18167_v17  ;;  %vm13826_vm15 = vcmp.ge.f32.partialorder %v13564_v62, 0.0  ;;  %v13890_v60 = vmul.f32 0.1, %v13564_v62  ;;  %14649 = vmatprep.mubr.bf16.mxu1 %v14004_v63 }
0x258a   :  { %v21611_v53 = vsel %vm13833_vm3, %v13566_v50, %v13897_v33  ;;  %v13572_v6 = vadd.f32 %v13571_v51, %v21564_v45  ;;  %v21615_v29 = vadd.f32 %v13644_v43, %v21566_v26  ;;  %v13898_v52 = vmul.f32 0.1, %v13568_v48  ;;  %16716 = vmatprep.subr.bf16.mxu0 %v18169_v11  ;;  %14650 = vmatmul.mubr.bf16.vlgmr.msra.gmra.mxu1 %v14003_v16 }
0x258b   :  { %v13573_v49 = vpop.f32.mrf.mxu0  ;;  %v13646_v23 = vpop.f32.mrf.mxu1  ;;  %vm13828_vm0 = vcmp.ge.f32.partialorder %v21602_v34, 0.0  ;;  %vm13834_vm1 = vcmp.ge.f32.partialorder %v13568_v48, 0.0  ;;  %v13900_v41 = vmul.f32 0.1, %v13641_v24  ;;  %v13892_v30 = vmul.f32 0.1, %v21602_v34  ;;  %16755 = vmatpush3.bf16.msra.mxu1 %v18168_v19 }
0x258c   :  { %v14009_v38 = vpack.c.bf16 %v21611_v53, %v21607_v15  ;;  %v13963_v42 = vsel %vm13835_vm14, %v13639_v8, %v13899_v21  ;;  %vm13836_vm5 = vcmp.ge.f32.partialorder %v13641_v24, 0.0  ;;  %vm13841_vm4 = vcmp.ge.f32.partialorder %v13572_v6, 0.0  ;;  %16756 = vmatprep.subr.bf16.mxu1 %v18170_v25  ;;  %v18179_v21 = vld [vmem:[%s21463_s2 + $0x120] sm:$0xff]  }
0x258d   :  { %v13575_v35 = vpop.f32.mrf.mxu0  ;;  %v13648_v31 = vpop.f32.mrf.mxu1  ;;  %v13905_v20 = vmul.f32 0.1, %v13572_v6  ;;  %vm13843_vm6 = vcmp.ge.f32.partialorder %v21615_v29, 0.0  ;;  %16717 = vmatpush3.bf16.msra.mxu0 %v18171_v18  ;;  %v13907_v36 = vmul.f32 0.1, %v21615_v29  ;;  %v21635_v1 = vadd.f32 %v13573_v49, %v21568_v28 }
0x258e   :  { %v13576_v3 = vadd.f32 %v13575_v35, %v21564_v45  ;;  %v13649_v4 = vadd.f32 %v13648_v31, %v21566_v26  ;;  %v13954_v50 = vsel %vm13826_vm15, %v13564_v62, %v13890_v60  ;;  %v13962_v61 = vsel %vm13834_vm1, %v13568_v48, %v13898_v52  ;;  %16718 = vmatprep.subr.bf16.mxu0 %v18173_v58  ;;  %v18176_v48 = vld [vmem:[%s21463_s2 + $0x1a8] sm:$0xff]   ;;  %v18180_v31 = vld [vmem:[%s21463_s2 + $0x1a0] sm:$0xff]  }
0x258f   :  { %v13577_v59 = vpop.f32.mrf.mxu0  ;;  %v13650_v12 = vpop.f32.mrf.mxu1  ;;  %v14010_v44 = vpack.c.bf16 %v13962_v61, %v13954_v50  ;;  %v13964_v46 = vsel %vm13836_vm5, %v13641_v24, %v13900_v41  ;;  %v21643_v8 = vadd.f32 %v13646_v23, %v21574_v9  ;;  %16757 = vmatpush3.bf16.msra.mxu1 %v18172_v0  ;;  %v13956_v33 = vsel %vm13828_vm0, %v21602_v34, %v13892_v30  ;;  %v18182_v41 = vld [vmem:[%s21463_s2 + $0x1d8] sm:$0xff]  }
0x2590   :  { %v13913_v2 = vmul.f32 0.1, %v13576_v3  ;;  %v13578_v57 = vadd.f32 %v13577_v59, %v21568_v28  ;;  %vm13849_vm7 = vcmp.ge.f32.partialorder %v13576_v3, 0.0  ;;  %v13651_v22 = vadd.f32 %v13650_v12, %v21574_v9  ;;  %16758 = vmatprep.subr.bf16.mxu1 %v18174_v56 }
0x2591   :  { %v13581_v5 = vpop.f32.mrf.mxu0  ;;  %v13654_v27 = vpop.f32.mrf.mxu1  ;;  %v14011_v51 = vpack.c.bf16 %v13963_v42, %v21620_v14  ;;  %v21652_v43 = vsel %vm13841_vm4, %v13572_v6, %v13905_v20  ;;  %v13915_v17 = vmul.f32 0.1, %v13649_v4  ;;  %14592 = vmatprep.mubr.bf16.mxu0 %v14010_v44  ;;  %v14012_v62 = vpack.c.bf16 %v13964_v46, %v13956_v33  ;;  %16719 = vmatpush3.bf16.msra.mxu0 %v18175_v55 }
0x2592   :  { %v21658_v24 = vsel %vm13843_vm6, %v21615_v29, %v13907_v36  ;;  %vm13842_vm8 = vcmp.ge.f32.partialorder %v21635_v1, 0.0  ;;  %vm13851_vm9 = vcmp.ge.f32.partialorder %v13649_v4, 0.0  ;;  %14593 = vmatmul.mubr.bf16.gmra.mxu0 %v14009_v38  ;;  %v13582_v34 = vadd.f32 %v13581_v5, %v21564_v45  ;;  %16720 = vmatprep.subr.bf16.mxu0 %v18177_v10  ;;  %v18181_v29 = vld [vmem:[%s21463_s2 + $0x158] sm:$0xff]   ;;  %v18185_v36 = vld [vmem:[%s21463_s2 + $0x150] sm:$0xff]  }
0x2593   :  { %v13583_v39 = vpop.f32.mrf.mxu0  ;;  %v13656_v37 = vpop.f32.mrf.mxu1  ;;  %v13906_v49 = vmul.f32 0.1, %v21635_v1  ;;  %v13977_v23 = vsel %vm13849_vm7, %v13576_v3, %v13913_v2  ;;  %v13914_v16 = vmul.f32 0.1, %v13578_v57  ;;  %14657 = vmatprep.mubr.bf16.mxu1 %v14012_v62  ;;  %vm13844_vm10 = vcmp.ge.f32.partialorder %v21643_v8, 0.0  ;;  %16759 = vmatpush3.bf16.msra.mxu1 %v18176_v48  ;;  %v18189_v48 = vld [vmem:[%s21463_s2 + $0x148] sm:$0xff]  }
0x2594   :  { %vm13850_vm11 = vcmp.ge.f32.partialorder %v13578_v57, 0.0  ;;  %v13916_v53 = vmul.f32 0.1, %v13651_v22  ;;  %14658 = vmatmul.mubr.bf16.gmra.mxu1 %v14011_v51  ;;  %v13908_v25 = vmul.f32 0.1, %v21643_v8  ;;  %v13979_v35 = vsel %vm13851_vm9, %v13649_v4, %v13915_v17  ;;  %16760 = vmatprep.subr.bf16.mxu1 %v18178_v13  ;;  %v18183_v4 = vld [vmem:[%s21463_s2 + $0x118] sm:$0xff]  }
0x2595   :  { %v13585_v32 = vpop.f32.mrf.mxu0  ;;  %v13658_v11 = vpop.f32.mrf.mxu1  ;;  %vm13852_vm12 = vcmp.ge.f32.partialorder %v13651_v22, 0.0  ;;  %v14017_v60 = vpack.c.bf16 %v13977_v23, %v21652_v43  ;;  %vm13857_vm2 = vcmp.ge.f32.partialorder %v13582_v34, 0.0  ;;  %v21676_v52 = vadd.f32 %v13583_v39, %v21568_v28  ;;  %16721 = vmatpush3.bf16.msra.mxu0 %v18179_v21  ;;  %v18186_v39 = vld [vmem:[%s21463_s2 + $0x1d0] sm:$0xff]   ;;  %v18191_v21 = vld [vmem:[%s21463_s2 + $0x108] sm:$0xff]  }
0x2596   :  { %v13586_v15 = vadd.f32 %v13585_v32, %v21564_v45  ;;  %v13659_v6 = vadd.f32 %v13658_v11, %v21566_v26  ;;  %v13655_v45 = vadd.f32 %v13654_v27, %v21566_v26  ;;  %v21679_v58 = vadd.f32 %v13656_v37, %v21574_v9  ;;  %16722 = vmatprep.subr.bf16.mxu0 %v18181_v29 }
0x2597   :  { %v13587_v63 = vpop.f32.mrf.mxu0  ;;  %v13660_v19 = vpop.f32.mrf.mxu1  ;;  %v13921_v3 = vmul.f32 0.1, %v13582_v34  ;;  %v13970_v26 = vsel %vm13842_vm8, %v21635_v1, %v13906_v49  ;;  %v13978_v12 = vsel %vm13850_vm11, %v13578_v57, %v13914_v16  ;;  %v13980_v20 = vsel %vm13852_vm12, %v13651_v22, %v13916_v53  ;;  %16761 = vmatpush3.bf16.msra.mxu1 %v18180_v31  ;;  %v18184_v57 = vld [vmem:[%s21463_s2 + $0x198] sm:$0xff]   ;;  %v18188_v49 = vld [vmem:[%s21463_s2 + $0x190] sm:$0xff]   ;;  %v18193_v31 = vld [vmem:[%s21463_s2 + $0x140] sm:$0xff]  }
0x2598   :  { %v13929_v59 = vmul.f32 0.1, %v13586_v15  ;;  %vm13865_vm3 = vcmp.ge.f32.partialorder %v13586_v15, 0.0  ;;  %v13931_v42 = vmul.f32 0.1, %v13659_v6  ;;  %v14018_v0 = vpack.c.bf16 %v13978_v12, %v13970_v26  ;;  %16762 = vmatprep.subr.bf16.mxu1 %v18182_v41 }
0x2599   :  { %v13697_v18 = vpop.f32.mrf.mxu0  ;;  %v13770_v14 = vpop.f32.mrf.mxu1  ;;  %v13923_v56 = vmul.f32 0.1, %v13655_v45  ;;  %vm13867_vm13 = vcmp.ge.f32.partialorder %v13659_v6, 0.0  ;;  %v13588_v5 = vadd.f32 %v13587_v63, %v21568_v28  ;;  %v13972_v27 = vsel %vm13844_vm10, %v21643_v8, %v13908_v25  ;;  %16723 = vmatpush3.bf16.msra.mxu0 %v18183_v4 }
0x259a   :  { %v14019_v61 = vpack.c.bf16 %v13979_v35, %v21658_v24  ;;  %vm13859_vm14 = vcmp.ge.f32.partialorder %v13655_v45, 0.0  ;;  %vm13858_vm15 = vcmp.ge.f32.partialorder %v21676_v52, 0.0  ;;  %14600 = vmatprep.mubr.bf16.mxu0 %v14018_v0  ;;  %v14020_v2 = vpack.c.bf16 %v13980_v20, %v13972_v27  ;;  %16724 = vmatprep.subr.bf16.mxu0 %v18185_v36  ;;  %v18192_v20 = vld [vmem:[%s21463_s2 + $0x188] sm:$0xff]   ;;  %v18194_v36 = vld [vmem:[%s21463_s2 + $0x1c0] sm:$0xff]  }
0x259b   :  { %v13699_v30 = vpop.f32.mrf.mxu0  ;;  %v13772_v38 = vpop.f32.mrf.mxu1  ;;  %v21697_v28 = vsel %vm13857_vm2, %v13582_v34, %v13921_v3  ;;  %v21700_v44 = vsel %vm13865_vm3, %v13586_v15, %v13929_v59  ;;  %v13661_v46 = vadd.f32 %v13660_v19, %v21574_v9  ;;  %14601 = vmatmul.mubr.bf16.gmra.mxu0 %v14017_v60  ;;  %v21704_v55 = vadd.f32 %v13697_v18, %v21576_v54  ;;  %v18187_v9 = vld [vmem:[%s21463_s2 + $0x110] sm:$0xff]   ;;  %v18190_v15 = vld [vmem:[%s21463_s2 + $0x1c8] sm:$0xff]  }
0x259c   :  { %v13922_v22 = vmul.f32 0.1, %v21676_v52  ;;  %v21709_v33 = vsel %vm13867_vm13, %v13659_v6, %v13931_v42  ;;  %14665 = vmatprep.mubr.bf16.mxu1 %v14020_v2  ;;  %v21715_v43 = vsel %vm13859_vm14, %v13655_v45, %v13923_v56  ;;  %vm13860_vm0 = vcmp.ge.f32.partialorder %v21679_v58, 0.0  ;;  %16763 = vmatpush3.bf16.msra.mxu1 %v18184_v57  ;;  %v18195_v56 = vld [vmem:[%s21463_s2 + $0x100] sm:$0xff]  }
0x259d   :  { %v13701_v1 = vpop.f32.mrf.mxu0  ;;  %v13774_v50 = vpop.f32.mrf.mxu1  ;;  %v13924_v17 = vmul.f32 0.1, %v21679_v58  ;;  %v13930_v62 = vmul.f32 0.1, %v13588_v5  ;;  %14666 = vmatmul.mubr.bf16.gmra.mxu1 %v14019_v61  ;;  %v14025_v24 = vpack.c.bf16 %v21700_v44, %v21697_v28  ;;  %vm13866_vm1 = vcmp.ge.f32.partialorder %v13588_v5, 0.0  ;;  %16764 = vmatprep.subr.bf16.mxu1 %v18186_v39 }
0x259e   :  { %v13702_v10 = vadd.f32 %v13701_v1, %v21576_v54  ;;  %v13775_v51 = vadd.f32 %v13774_v50, %v21579_v47  ;;  %v13771_v34 = vadd.f32 %v13770_v14, %v21579_v47  ;;  %v21728_v13 = vadd.f32 %v13699_v30, %v21581_v7  ;;  %16725 = vmatpush3.bf16.msra.mxu0 %v18187_v9 }
0x259f   :  { %v13703_v37 = vpop.f32.mrf.mxu0  ;;  %v13776_v8 = vpop.f32.mrf.mxu1  ;;  %v14027_v23 = vpack.c.bf16 %v21709_v33, %v21715_v43  ;;  %vm13868_vm5 = vcmp.ge.f32.partialorder %v13661_v46, 0.0  ;;  %v13932_v16 = vmul.f32 0.1, %v13661_v46  ;;  %vm13813_vm4 = vcmp.ge.f32.partialorder %v21704_v55, 0.0  ;;  %16726 = vmatprep.subr.bf16.mxu0 %v18189_v48 }
0x25a0   :  { %v13877_v53 = vmul.f32 0.1, %v21704_v55  ;;  %v21738_v6 = vadd.f32 %v13772_v38, %v21587_v40  ;;  %v13885_v29 = vmul.f32 0.1, %v13702_v10  ;;  %v13887_v25 = vmul.f32 0.1, %v13775_v51  ;;  %16765 = vmatpush3.bf16.msra.mxu1 %v18188_v49 }
0x25a1   :  { %v21720_v32 = vpop.f32.mrf.mxu0  ;;  %v21722_v11 = vpop.f32.mrf.mxu1  ;;  %vm13821_vm6 = vcmp.ge.f32.partialorder %v13702_v10, 0.0  ;;  %vm13823_vm7 = vcmp.ge.f32.partialorder %v13775_v51, 0.0  ;;  %v13704_v35 = vadd.f32 %v13703_v37, %v21581_v7  ;;  %v13994_v45 = vsel %vm13866_vm1, %v13588_v5, %v13930_v62  ;;  %16766 = vmatprep.subr.bf16.mxu1 %v18190_v15 }
0x25a2   :  { %vm13815_vm8 = vcmp.ge.f32.partialorder %v13771_v34, 0.0  ;;  %v13879_v60 = vmul.f32 0.1, %v13771_v34  ;;  %vm13814_vm9 = vcmp.ge.f32.partialorder %v21728_v13, 0.0  ;;  %v13986_v41 = vsel %vm13858_vm15, %v21676_v52, %v13922_v22  ;;  %16727 = vmatpush3.bf16.msra.mxu0 %v18191_v21 }
0x25a3   :  { %v13709_v63 = vpop.f32.mrf.mxu0  ;;  %v13782_v19 = vpop.f32.mrf.mxu1  ;;  %v21748_v3 = vadd.f32 %v13776_v8, %v21587_v40  ;;  %v14026_v59 = vpack.c.bf16 %v13994_v45, %v13986_v41  ;;  %v13988_v26 = vsel %vm13860_vm0, %v21679_v58, %v13924_v17  ;;  %v13996_v12 = vsel %vm13868_vm5, %v13661_v46, %v13932_v16  ;;  %16728 = vmatprep.subr.bf16.mxu0 %v18193_v31 }
0x25a4   :  { %v21755_v42 = vsel %vm13821_vm6, %v13702_v10, %v13885_v29  ;;  %v21758_v0 = vsel %vm13823_vm7, %v13775_v51, %v13887_v25  ;;  %v14028_v52 = vpack.c.bf16 %v13996_v12, %v13988_v26  ;;  %v13941_v58 = vsel %vm13813_vm4, %v21704_v55, %v13877_v53  ;;  %16767 = vmatpush3.bf16.msra.mxu1 %v18192_v20  ;;  %v18196_v10 = vld [vmem:[%s21463_s2 + $0x180] sm:$0xff]  }
0x25a5   :  { %v13711_v18 = vpop.f32.mrf.mxu0  ;;  %v13784_v14 = vpop.f32.mrf.mxu1  ;;  %v13878_v5 = vmul.f32 0.1, %v21728_v13  ;;  %vm13816_vm10 = vcmp.ge.f32.partialorder %v21738_v6, 0.0  ;;  %v13886_v27 = vmul.f32 0.1, %v13704_v35  ;;  %14608 = vmatprep.mubr.bf16.mxu0 %v14026_v59  ;;  %v13943_v61 = vsel %vm13815_vm8, %v13771_v34, %v13879_v60  ;;  %16768 = vmatprep.subr.bf16.mxu1 %v18194_v36 }
0x25a6   :  { %v13712_v4 = vadd.f32 %v13711_v18, %v21576_v54  ;;  %v13880_v2 = vmul.f32 0.1, %v21738_v6  ;;  %vm13822_vm11 = vcmp.ge.f32.partialorder %v13704_v35, 0.0  ;;  %14673 = vmatprep.mubr.bf16.mxu1 %v14028_v52  ;;  %14609 = vmatmul.mubr.bf16.gmra.mxu0 %v14025_v24  ;;  %v13708_v57 = vadd.f32 %v21720_v32, %v21576_v54 }
0x25a7   :  { %v13713_v30 = vpop.f32.mrf.mxu0  ;;  %v13786_v38 = vpop.f32.mrf.mxu1  ;;  %v14005_v28 = vpack.c.bf16 %v21755_v42, %v13941_v58  ;;  %v14007_v44 = vpack.c.bf16 %v21758_v0, %v13943_v61  ;;  %vm13824_vm12 = vcmp.ge.f32.partialorder %v21748_v3, 0.0  ;;  %14674 = vmatmul.mubr.bf16.gmra.mxu1 %v14027_v23  ;;  %v13781_v46 = vadd.f32 %v21722_v11, %v21579_v47  ;;  %16729 = vmatpush3.bf16.msra.mxu0 %v18195_v56 }
0x25a8   :  { %v13888_v37 = vmul.f32 0.1, %v21748_v3  ;;  %v21780_v8 = vadd.f32 %v13709_v63, %v21581_v7  ;;  %v13901_v22 = vmul.f32 0.1, %v13712_v4  ;;  %v13785_v33 = vadd.f32 %v13784_v14, %v21579_v47  ;;  %16769 = vmatpush3.bf16.msra.mxu1 %v18196_v10 }
0x25a9   :  { %v13717_v1 = vpop.f32.mrf.mxu0  ;;  %v13790_v50 = vpop.f32.mrf.mxu1  ;;  %v21785_v51 = vadd.f32 %v13782_v19, %v21587_v40  ;;  %vm13837_vm2 = vcmp.ge.f32.partialorder %v13712_v4, 0.0  ;;  %v13714_v9 = vadd.f32 %v13713_v30, %v21581_v7  ;;  %v13950_v43 = vsel %vm13822_vm11, %v13704_v35, %v13886_v27 }
0x25aa   :  { %vm13829_vm3 = vcmp.ge.f32.partialorder %v13708_v57, 0.0  ;;  %v13893_v48 = vmul.f32 0.1, %v13708_v57  ;;  %v13903_v32 = vmul.f32 0.1, %v13785_v33  ;;  %v13942_v11 = vsel %vm13814_vm9, %v21728_v13, %v13878_v5 }
0x25ab   :  { %v13719_v55 = vpop.f32.mrf.mxu0  ;;  %v13792_v39 = vpop.f32.mrf.mxu1  ;;  %vm13831_vm13 = vcmp.ge.f32.partialorder %v13781_v46, 0.0  ;;  %v13895_v24 = vmul.f32 0.1, %v13781_v46  ;;  %vm13839_vm14 = vcmp.ge.f32.partialorder %v13785_v33, 0.0  ;;  %v14006_v34 = vpack.c.bf16 %v13950_v43, %v13942_v11 }
0x25ac   :  { %v13965_v16 = vsel %vm13837_vm2, %v13712_v4, %v13901_v22  ;;  %v13787_v15 = vadd.f32 %v13786_v38, %v21587_v40  ;;  %v13944_v21 = vsel %vm13816_vm10, %v21738_v6, %v13880_v2  ;;  %v13952_v63 = vsel %vm13824_vm12, %v21748_v3, %v13888_v37 }
0x25ad   :  { %v13721_v17 = vpop.f32.mrf.mxu0  ;;  %v13794_v62 = vpop.f32.mrf.mxu1  ;;  %vm13830_vm15 = vcmp.ge.f32.partialorder %v21780_v8, 0.0  ;;  %v13894_v13 = vmul.f32 0.1, %v21780_v8  ;;  %v13902_v19 = vmul.f32 0.1, %v13714_v9  ;;  %14714 = vmatprep.mubr.bf16.mxu0 %v14006_v34  ;;  %v14008_v53 = vpack.c.bf16 %v13952_v63, %v13944_v21 }
0x25ae   :  { %v13957_v35 = vsel %vm13829_vm3, %v13708_v57, %v13893_v48  ;;  %v13967_v45 = vsel %vm13839_vm14, %v13785_v33, %v13903_v32  ;;  %vm13838_vm0 = vcmp.ge.f32.partialorder %v13714_v9, 0.0  ;;  %14715 = vmatmul.mubr.bf16.vlgmr.msra.gmra.mxu0 %v14005_v28  ;;  %v13718_v6 = vadd.f32 %v13717_v1, %v21576_v54 }
0x25af   :  { %v13723_v49 = vpop.f32.mrf.mxu0  ;;  %v13796_v23 = vpop.f32.mrf.mxu1  ;;  %v13959_v31 = vsel %vm13831_vm13, %v13781_v46, %v13895_v24  ;;  %vm13832_vm1 = vcmp.ge.f32.partialorder %v21785_v51, 0.0  ;;  %v13896_v18 = vmul.f32 0.1, %v21785_v51  ;;  %v14013_v14 = vpack.c.bf16 %v13965_v16, %v13957_v35  ;;  %14779 = vmatprep.mubr.bf16.mxu1 %v14008_v53 }
0x25b0   :  { %vm13840_vm5 = vcmp.ge.f32.partialorder %v13787_v15, 0.0  ;;  %14780 = vmatmul.mubr.bf16.vlgmr.msra.gmra.mxu1 %v14007_v44  ;;  %v13791_v60 = vadd.f32 %v13790_v50, %v21579_v47  ;;  %v13722_v41 = vadd.f32 %v13721_v17, %v21576_v54  ;;  %v13795_v3 = vadd.f32 %v13794_v62, %v21579_v47 }
0x25b1   :  { %v21801_v29 = vpop.f32.mrf.mxu0  ;;  %v21803_v25 = vpop.f32.mrf.mxu1  ;;  %v14015_v12 = vpack.c.bf16 %v13967_v45, %v13959_v31  ;;  %v13904_v30 = vmul.f32 0.1, %v13787_v15  ;;  %v13720_v38 = vadd.f32 %v13719_v55, %v21581_v7  ;;  %v13966_v42 = vsel %vm13838_vm0, %v13714_v9, %v13902_v19 }
0x25b2   :  { %vm13845_vm4 = vcmp.ge.f32.partialorder %v13718_v6, 0.0  ;;  %v13909_v0 = vmul.f32 0.1, %v13718_v6  ;;  %v13793_v52 = vadd.f32 %v13792_v39, %v21587_v40  ;;  %v13917_v20 = vmul.f32 0.1, %v13722_v41 }
0x25b3   :  { %v13729_v59 = vpop.f32.mrf.mxu0  ;;  %v13802_v26 = vpop.f32.mrf.mxu1  ;;  %vm13853_vm6 = vcmp.ge.f32.partialorder %v13722_v41, 0.0  ;;  %v13919_v4 = vmul.f32 0.1, %v13795_v3  ;;  %v13724_v56 = vadd.f32 %v13723_v49, %v21581_v7  ;;  %v13958_v58 = vsel %vm13830_vm15, %v21780_v8, %v13894_v13 }
0x25b4   :  { %vm13847_vm7 = vcmp.ge.f32.partialorder %v13791_v60, 0.0  ;;  %v13911_v5 = vmul.f32 0.1, %v13791_v60  ;;  %vm13855_vm8 = vcmp.ge.f32.partialorder %v13795_v3, 0.0  ;;  %v14014_v27 = vpack.c.bf16 %v13966_v42, %v13958_v58 }
0x25b5   :  { %v13731_v36 = vpop.f32.mrf.mxu0  ;;  %v13804_v1 = vpop.f32.mrf.mxu1  ;;  %vm13846_vm9 = vcmp.ge.f32.partialorder %v13720_v38, 0.0  ;;  %v13797_v50 = vadd.f32 %v13796_v23, %v21587_v40  ;;  %v13960_v61 = vsel %vm13832_vm1, %v21785_v51, %v13896_v18  ;;  %v13968_v2 = vsel %vm13840_vm5, %v13787_v15, %v13904_v30 }
0x25b6   :  { %v13910_v57 = vmul.f32 0.1, %v13720_v38  ;;  %v13981_v28 = vsel %vm13853_vm6, %v13722_v41, %v13917_v20  ;;  %14722 = vmatprep.mubr.bf16.mxu0 %v14014_v27  ;;  %v14016_v44 = vpack.c.bf16 %v13968_v2, %v13960_v61  ;;  %v13730_v46 = vadd.f32 %v13729_v59, %v21581_v7 }
0x25b7   :  { %vm13848_vm10 = vcmp.ge.f32.partialorder %v13793_v52, 0.0  ;;  %v13912_v55 = vmul.f32 0.1, %v13793_v52  ;;  %v13983_v39 = vsel %vm13855_vm8, %v13795_v3, %v13919_v4  ;;  %v13918_v37 = vmul.f32 0.1, %v13724_v56  ;;  %14723 = vmatmul.mubr.bf16.gmra.mxu0 %v14013_v14  ;;  %v13733_v10 = vpop.f32.mrf.mxu0  ;;  %v13806_v51 = vpop.f32.mrf.mxu1 }
0x25b8   :  { %v13973_v8 = vsel %vm13845_vm4, %v13718_v6, %v13909_v0  ;;  %v13975_v22 = vsel %vm13847_vm7, %v13791_v60, %v13911_v5  ;;  %vm13854_vm11 = vcmp.ge.f32.partialorder %v13724_v56, 0.0  ;;  %14787 = vmatprep.mubr.bf16.mxu1 %v14016_v44  ;;  %v13803_v33 = vadd.f32 %v13802_v26, %v21587_v40 }
0x25b9   :  { %v14021_v9 = vpack.c.bf16 %v13981_v28, %v13973_v8  ;;  %vm13856_vm12 = vcmp.ge.f32.partialorder %v13797_v50, 0.0  ;;  %v13920_v43 = vmul.f32 0.1, %v13797_v50  ;;  %14788 = vmatmul.mubr.bf16.gmra.mxu1 %v14015_v12  ;;  %v13732_v17 = vadd.f32 %v13731_v36, %v21576_v54 }
0x25ba   :  { %v14023_v62 = vpack.c.bf16 %v13983_v39, %v13975_v22  ;;  %v13728_v48 = vadd.f32 %v21801_v29, %v21576_v54  ;;  %v13801_v32 = vadd.f32 %v21803_v25, %v21579_v47  ;;  %v13926_v11 = vmul.f32 0.1, %v13730_v46 }
0x25bb   :  { %v13734_v24 = vadd.f32 %v13733_v10, %v21581_v7  ;;  %v13807_v34 = vadd.f32 %v13806_v51, %v21587_v40  ;;  %v13974_v49 = vsel %vm13846_vm9, %v13720_v38, %v13910_v57  ;;  %v13982_v23 = vsel %vm13854_vm11, %v13724_v56, %v13918_v37 }
0x25bc   :  { %vm13862_vm2 = vcmp.ge.f32.partialorder %v13730_v46, 0.0  ;;  %v13928_v16 = vmul.f32 0.1, %v13803_v33  ;;  %v13805_v15 = vadd.f32 %v13804_v1, %v21579_v47  ;;  %v14022_v21 = vpack.c.bf16 %v13982_v23, %v13974_v49 }
0x25bd   :  { %vm13864_vm3 = vcmp.ge.f32.partialorder %v13803_v33, 0.0  ;;  %v13933_v63 = vmul.f32 0.1, %v13732_v17  ;;  %vm13870_vm13 = vcmp.ge.f32.partialorder %v13734_v24, 0.0  ;;  %v13934_v54 = vmul.f32 0.1, %v13734_v24 }
0x25be   :  { %vm13872_vm14 = vcmp.ge.f32.partialorder %v13807_v34, 0.0  ;;  %v13936_v13 = vmul.f32 0.1, %v13807_v34  ;;  %14730 = vmatprep.mubr.bf16.mxu0 %v14022_v21  ;;  %v13976_v7 = vsel %vm13848_vm10, %v13793_v52, %v13912_v55  ;;  %v13984_v40 = vsel %vm13856_vm12, %v13797_v50, %v13920_v43 }
0x25bf   :  { %vm13869_vm15 = vcmp.ge.f32.partialorder %v13732_v17, 0.0  ;;  %v14024_v19 = vpack.c.bf16 %v13984_v40, %v13976_v7  ;;  %14731 = vmatmul.mubr.bf16.gmra.mxu0 %v14021_v9  ;;  %v13990_v53 = vsel %vm13862_vm2, %v13730_v46, %v13926_v11  ;;  %v13998_v29 = vsel %vm13870_vm13, %v13734_v24, %v13934_v54  ;;  %v21865_v9 = vld [vmem:[%s14920_s15] ss:$0 sm:$0xff] }
0x25c0   :  { %v13925_v25 = vmul.f32 0.1, %v13728_v48  ;;  %v14030_v47 = vpack.c.bf16 %v13998_v29, %v13990_v53  ;;  %v13992_v35 = vsel %vm13864_vm3, %v13803_v33, %v13928_v16  ;;  %v14000_v45 = vsel %vm13872_vm14, %v13807_v34, %v13936_v13 }
0x25c1   :  { %vm13861_vm0 = vcmp.ge.f32.partialorder %v13728_v48, 0.0  ;;  %v13935_v6 = vmul.f32 0.1, %v13805_v15  ;;  %14795 = vmatprep.mubr.bf16.mxu1 %v14024_v19  ;;  %v14032_v31 = vpack.c.bf16 %v14000_v45, %v13992_v35  ;;  %v13997_v18 = vsel %vm13869_vm15, %v13732_v17, %v13933_v63 }
0x25c2   :  { %vm13871_vm1 = vcmp.ge.f32.partialorder %v13805_v15, 0.0  ;;  %14796 = vmatmul.mubr.bf16.gmra.mxu1 %v14023_v62  ;;  %14738 = vmatprep.mubr.bf16.mxu0 %v14030_v47  ;;  %v13927_v14 = vmul.f32 0.1, %v13801_v32  ;;  %v13989_v60 = vsel %vm13861_vm0, %v13728_v48, %v13925_v25  ;;  %vm13863_vm5 = vcmp.ge.f32.partialorder %v13801_v32, 0.0 }
0x25c3   :  { %14803 = vmatprep.mubr.bf16.mxu1 %v14032_v31  ;;  %v14029_v41 = vpack.c.bf16 %v13997_v18, %v13989_v60  ;;  %v13999_v3 = vsel %vm13871_vm1, %v13805_v15, %v13935_v6 }
0x25c4   :  { %v13991_v59 = vsel %vm13863_vm5, %v13801_v32, %v13927_v14 }
0x25c5   :  { %v14031_v26 = vpack.c.bf16 %v13999_v3, %v13991_v59 }
0x25c7   :  { %14739 = vmatmul.mubr.bf16.gmra.mxu0 %v14029_v41 }
0x25ca   :  { %14804 = vmatmul.mubr.bf16.gmra.mxu1 %v14031_v26 }
0x2648   :  { %v16650_v12 = vpop.f32.mrf.mxu0 }
0x264a   :  { %v16651_v30 = vpop.f32.mrf.mxu0  ;;  %v16690_v38 = vpop.f32.mrf.mxu1 }
0x264b   :  { %v16652_v10 = vadd.f32 %v16651_v30, %v16650_v12 }
0x264c   :  { %v16653_v42 = vpop.f32.mrf.mxu0  ;;  %v16691_v0 = vpop.f32.mrf.mxu1 }
0x264d   :  { %v14587_v48 = vadd.f32 %v16652_v10, %v21865_v9  ;;  %v16692_v34 = vadd.f32 %v16691_v0, %v16690_v38 }
0x264e   :  { %v16654_v52 = vpop.f32.mrf.mxu0  ;;  %v16693_v20 = vpop.f32.mrf.mxu1 }
0x264f   :  { %v16655_v32 = vadd.f32 %v16654_v52, %v16653_v42  ;;  %v14652_v16 = vadd.f32 %v16692_v34, %v14587_v48 }
0x2650   :  { %v16694_v4 = vpop.f32.mrf.mxu1 }
0x2651   :  { %v14590_v15 = vadd.f32 %v16655_v32, %v21865_v9  ;;  %v16695_v7 = vadd.f32 %v16694_v4, %v16693_v20 }
0x2652   :  { %v16656_v56 = vpop.f32.mrf.mxu0 }
0x2653   :  { %v14655_v25 = vadd.f32 %v16695_v7, %v14590_v15 }
0x2654   :  { %v16696_v58 = vpop.f32.mrf.mxu1  ;;  %v16657_v5 = vpop.f32.mrf.mxu0 }
0x2655   :  { %v16658_v63 = vadd.f32 %v16657_v5, %v16656_v56 }
0x2656   :  { %v16697_v27 = vpop.f32.mrf.mxu1  ;;  %v16659_v36 = vpop.f32.mrf.mxu0 }
0x2657   :  { %v14595_v45 = vadd.f32 %v16658_v63, %v21865_v9  ;;  %v16698_v3 = vadd.f32 %v16697_v27, %v16696_v58 }
0x2658   :  { %v16699_v1 = vpop.f32.mrf.mxu1  ;;  %v16660_v50 = vpop.f32.mrf.mxu0 }
0x2659   :  { %v16661_v6 = vadd.f32 %v16660_v50, %v16659_v36  ;;  %v14660_v38 = vadd.f32 %v16698_v3, %v14595_v45 }
0x265a   :  { %v16700_v61 = vpop.f32.mrf.mxu1 }
0x265b   :  { %v16662_v2 = vpop.f32.mrf.mxu0  ;;  %v14598_v42 = vadd.f32 %v16661_v6, %v21865_v9  ;;  %v16701_v56 = vadd.f32 %v16700_v61, %v16699_v1 }
0x265d   :  { %v21844_v57 = vpop.f32.mrf.mxu1  ;;  %v16663_v28 = vpop.f32.mrf.mxu0 }
0x265e   :  { %v16664_v59 = vadd.f32 %v16663_v28, %v16662_v2  ;;  %v14663_v2 = vadd.f32 %v16701_v56, %v14598_v42 }
0x265f   :  { %v21846_v44 = vpop.f32.mrf.mxu1  ;;  %v21848_v46 = vpop.f32.mrf.mxu0 }
0x2660   :  { %v14603_v58 = vadd.f32 %v16664_v59, %v21865_v9  ;;  %v16704_v32 = vadd.f32 %v21846_v44, %v21844_v57 }
0x2661   :  { %v21850_v55 = vpop.f32.mrf.mxu1  ;;  %v16666_v39 = vpop.f32.mrf.mxu0 }
0x2662   :  { %v16667_v28 = vadd.f32 %v16666_v39, %v21848_v46 }
0x2663   :  { %v21855_v37 = vpop.f32.mrf.mxu1 }
0x2664   :  { %v14606_v15 = vadd.f32 %v16667_v28, %v21865_v9  ;;  %v16707_v44 = vadd.f32 %v21855_v37, %v21850_v55 }
0x2666   :  { %v21857_v8 = vpop.f32.mrf.mxu0 }
0x2667   :  { %v21859_v22 = vpop.f32.mrf.mxu1 }
0x2668   :  { %v21861_v33 = vpop.f32.mrf.mxu0 }
0x2669   :  { %v21863_v51 = vpop.f32.mrf.mxu1  ;;  %v16670_v46 = vadd.f32 %v21861_v33, %v21857_v8 }
0x266a   :  { %v21867_v43 = vpop.f32.mrf.mxu0  ;;  %v16710_v55 = vadd.f32 %v21863_v51, %v21859_v22 }
0x266b   :  { %v21869_v17 = vpop.f32.mrf.mxu1 }
0x266c   :  { %v21871_v62 = vpop.f32.mrf.mxu0 }
0x266d   :  { %v21874_v11 = vpop.f32.mrf.mxu1  ;;  %v16673_v8 = vadd.f32 %v21871_v62, %v21867_v43 }
0x266e   :  { %v16730_v24 = vpop.f32.mrf.mxu0 }
0x2670   :  { %v16770_v49 = vpop.f32.mrf.mxu1  ;;  %v16731_v23 = vpop.f32.mrf.mxu0 }
0x2671   :  { %v16732_v21 = vadd.f32 %v16731_v23, %v16730_v24  ;;  %v14668_v23 = vadd.f32 %v16704_v32, %v14603_v58 }
0x2672   :  { %v16771_v54 = vpop.f32.mrf.mxu1  ;;  %v16733_v13 = vpop.f32.mrf.mxu0 }
0x2673   :  { %v14717_v40 = vadd.f32 %v16732_v21, %v14652_v16  ;;  %v16772_v19 = vadd.f32 %v16771_v54, %v16770_v49 }
0x2674   :  { %v16773_v53 = vpop.f32.mrf.mxu1  ;;  %v16734_v29 = vpop.f32.mrf.mxu0 }
0x2675   :  { %v21877_v47 = vadd.f32 %v16772_v19, %v14717_v40  ;;  %v16735_v35 = vadd.f32 %v16734_v29, %v16733_v13  ;;  %v14611_v29 = vadd.f32 %v16670_v46, %v21865_v9 }
0x2676   :  { %v16774_v31 = vpop.f32.mrf.mxu1 }
0x2677   :  { %v14720_v18 = vadd.f32 %v16735_v35, %v14655_v25  ;;  %v16775_v14 = vadd.f32 %v16774_v31, %v16773_v53  ;;  %v16736_v60 = vpop.f32.mrf.mxu0  ;;  %v14812_v41 = vmul.f32 %v21877_v47, %v21877_v47  ;;  %v14671_v53 = vadd.f32 %v16707_v44, %v14606_v15 }
0x2679   :  { %v21882_v26 = vadd.f32 %v16775_v14, %v14720_v18  ;;  %v16776_v12 = vpop.f32.mrf.mxu1  ;;  %v16737_v30 = vpop.f32.mrf.mxu0  ;;  %14820 = vadd.xlane.f32.xlu0 %v14812_v41  ;;  %v14614_v41 = vadd.f32 %v16673_v8, %v21865_v9 }
0x267a   :  { %v16738_v0 = vadd.f32 %v16737_v30, %v16736_v60  ;;  %v14676_v60 = vadd.f32 %v16710_v55, %v14611_v29 }
0x267b   :  { %v16777_v52 = vpop.f32.mrf.mxu1  ;;  %v16739_v20 = vpop.f32.mrf.mxu0  ;;  %v14813_v4 = vmul.f32 %v21882_v26, %v21882_v26 }
0x267c   :  { %v14725_v5 = vadd.f32 %v16738_v0, %v14660_v38  ;;  %v16778_v36 = vadd.f32 %v16777_v52, %v16776_v12  ;;  %v16713_v12 = vadd.f32 %v21874_v11, %v21869_v17 }
0x267d   :  { %v16779_v27 = vpop.f32.mrf.mxu1  ;;  %v16740_v50 = vpop.f32.mrf.mxu0  ;;  %14822 = vadd.xlane.f32.xlu1 %v14813_v4 }
0x267e   :  { %v21889_v10 = vadd.f32 %v16778_v36, %v14725_v5  ;;  %v16741_v48 = vadd.f32 %v16740_v50, %v16739_v20  ;;  %v14679_v0 = vadd.f32 %v16713_v12, %v14614_v41 }
0x267f   :  { %v16780_v24 = vpop.f32.mrf.mxu1  ;;  %v16742_v34 = vpop.f32.mrf.mxu0 }
0x2680   :  { %v14728_v49 = vadd.f32 %v16741_v48, %v14663_v2  ;;  %v16781_v1 = vadd.f32 %v16780_v24, %v16779_v27  ;;  %v14814_v61 = vmul.f32 %v21889_v10, %v21889_v10 }
0x2681   :  { %v16743_v16 = vpop.f32.mrf.mxu0 }
0x2682   :  { %v21898_v39 = vadd.f32 %v16781_v1, %v14728_v49  ;;  %v16782_v21 = vpop.f32.mrf.mxu1  ;;  %v16744_v63 = vadd.f32 %v16743_v16, %v16742_v34  ;;  %14824 = vadd.xlane.f32.xlu0 %v14814_v61 }
0x2683   :  { %v16745_v57 = vpop.f32.mrf.mxu0 }
0x2684   :  { %v14733_v54 = vadd.f32 %v16744_v63, %v14668_v23  ;;  %v16783_v13 = vpop.f32.mrf.mxu1  ;;  %v14815_v7 = vmul.f32 %v21898_v39, %v21898_v39 }
0x2685   :  { %v16784_v40 = vadd.f32 %v16783_v13, %v16782_v21  ;;  %v16746_v19 = vpop.f32.mrf.mxu0 }
0x2686   :  { %v16785_v33 = vpop.f32.mrf.mxu1  ;;  %v16747_v25 = vadd.f32 %v16746_v19, %v16745_v57  ;;  %14826 = vadd.xlane.f32.xlu1 %v14815_v7 }
0x2687   :  { %v21907_v35 = vadd.f32 %v16784_v40, %v14733_v54  ;;  %v16748_v45 = vpop.f32.mrf.mxu0 }
0x2688   :  { %v14736_v37 = vadd.f32 %v16747_v25, %v14671_v53  ;;  %v16786_v6 = vpop.f32.mrf.mxu1 }
0x2689   :  { %v16787_v31 = vadd.f32 %v16786_v6, %v16785_v33  ;;  %v16749_v18 = vpop.f32.mrf.mxu0  ;;  %v14816_v14 = vmul.f32 %v21907_v35, %v21907_v35 }
0x268a   :  { %v16788_v43 = vpop.f32.mrf.mxu1  ;;  %v16750_v62 = vadd.f32 %v16749_v18, %v16748_v45 }
0x268b   :  { %v21914_v3 = vadd.f32 %v16787_v31, %v14736_v37  ;;  %14828 = vadd.xlane.f32.xlu0 %v14816_v14  ;;  %v16751_v59 = vpop.f32.mrf.mxu0 }
0x268c   :  { %v14741_v22 = vadd.f32 %v16750_v62, %v14676_v60  ;;  %v16789_v51 = vpop.f32.mrf.mxu1 }
0x268d   :  { %v16790_v30 = vadd.f32 %v16789_v51, %v16788_v43  ;;  %v16752_v38 = vpop.f32.mrf.mxu0  ;;  %v14817_v42 = vmul.f32 %v21914_v3, %v21914_v3 }
0x268e   :  { %v16791_v52 = vpop.f32.mrf.mxu1  ;;  %v16753_v20 = vadd.f32 %v16752_v38, %v16751_v59 }
0x268f   :  { %v14806_v9 = vadd.f32 %v16790_v30, %v14741_v22  ;;  %14830 = vadd.xlane.f32.xlu1 %v14817_v42 }
0x2690   :  { %v14744_v4 = vadd.f32 %v16753_v20, %v14679_v0  ;;  %v16792_v56 = vpop.f32.mrf.mxu1 }
0x2691   :  { %v16793_v5 = vadd.f32 %v16792_v56, %v16791_v52  ;;  %v14818_v36 = vmul.f32 %v14806_v9, %v14806_v9 }
0x2693   :  { %v14809_v58 = vadd.f32 %v16793_v5, %v14744_v4  ;;  %14832 = vadd.xlane.f32.xlu0 %v14818_v36 }
0x2695   :  { %v14819_v27 = vmul.f32 %v14809_v58, %v14809_v58 }
0x2697   :  { %14834 = vadd.xlane.f32.xlu1 %v14819_v27 }
0x2702   :  { %v14821_v17 = vpop.xlane.xlu0 %14820 }
0x2703   :  { %v14836_v11 = vmax.f32 %v14821_v17, 1e-24 }
0x2705   :  { %18437 = vrsqrt.f32 %v14836_v11 }
0x2706   :  { %v14823_v50 = vpop.xlane.xlu1 %14822 }
0x2707   :  { %v14837_v2 = vmax.f32 %v14823_v50, 1e-24 }
0x2709   :  { %18439 = vrsqrt.f32 %v14837_v2 }
0x270b   :  { %v14825_v28 = vpop.xlane.xlu0 %14824 }
0x270c   :  { %v14838_v48 = vmax.f32 %v14825_v28, 1e-24 }
0x270e   :  { %18441 = vrsqrt.f32 %v14838_v48 }
0x270f   :  { %v14827_v32 = vpop.xlane.xlu1 %14826 }
0x2710   :  { %v14839_v24 = vmax.f32 %v14827_v32, 1e-24 }
0x2712   :  { %v18438_v34 = vpop.eup %18437  ;;  %18443 = vrsqrt.f32 %v14839_v24 }
0x2713   :  { %v14852_v49 = vmul.f32 %v18438_v34, %v21877_v47 }
0x2714   :  { %v14829_v1 = vpop.xlane.xlu0 %14828 }
0x2715   :  { %14860 = vst [vmem:[%s21923_s17] sm:$0xff] %v14852_v49  ;;  %v14840_v61 = vmax.f32 %v14829_v1, 1e-24 }
0x2716   :  { %v18440_v23 = vpop.eup %18439 }
0x2717   :  { %v14853_v16 = vmul.f32 %v18440_v23, %v21882_v26  ;;  %18445 = vrsqrt.f32 %v14840_v61 }
0x2718   :  { %v14831_v15 = vpop.xlane.xlu1 %14830 }
0x2719   :  { %14861 = vst [vmem:[%s21923_s17 + $0x8] sm:$0xff] %v14853_v16  ;;  %v14841_v46 = vmax.f32 %v14831_v15, 1e-24 }
0x271b   :  { %v18442_v21 = vpop.eup %18441  ;;  %18447 = vrsqrt.f32 %v14841_v46 }
0x271c   :  { %v14854_v63 = vmul.f32 %v18442_v21, %v21889_v10  ;;  %v14833_v57 = vpop.xlane.xlu0 %14832 }
0x271d   :  { %v14842_v44 = vmax.f32 %v14833_v57, 1e-24 }
0x271e   :  { %14862 = vst [vmem:[%s21923_s17 + $0x10] sm:$0xff] %v14854_v63 }
0x271f   :  { %v18444_v47 = vpop.eup %18443  ;;  %18449 = vrsqrt.f32 %v14842_v44 }
0x2720   :  { %v14855_v54 = vmul.f32 %v18444_v47, %v21898_v39  ;;  %v14835_v26 = vpop.xlane.xlu1 %14834 }
0x2721   :  { %v14843_v13 = vmax.f32 %v14835_v26, 1e-24 }
0x2722   :  { %14863 = vst [vmem:[%s21923_s17 + $0x18] sm:$0xff] %v14855_v54 }
0x2723   :  { %18451 = vrsqrt.f32 %v14843_v13 }
0x2724   :  { %v18446_v7 = vpop.eup %18445 }
0x2725   :  { %v14856_v40 = vmul.f32 %v18446_v7, %v21907_v35 }
0x2727   :  { %14864 = vst [vmem:[%s21923_s17 + $0x20] sm:$0xff] %v14856_v40 }
0x2728   :  { %v18448_v19 = vpop.eup %18447 }
0x2729   :  { %v14857_v10 = vmul.f32 %v18448_v19, %v21914_v3 }
0x272b   :  { %14865 = vst [vmem:[%s21923_s17 + $0x28] sm:$0xff] %v14857_v10 }
0x272c   :  { %v18450_v53 = vpop.eup %18449 }
0x272d   :  { %v14858_v29 = vmul.f32 %v18450_v53, %v14806_v9 }
0x272f   :  { %14866 = vst [vmem:[%s21923_s17 + $0x30] sm:$0xff] %v14858_v29 }
0x2730   :  { %v18452_v8 = vpop.eup %18451 }
0x2731   :  { %v14859_v33 = vmul.f32 %v18452_v8, %v14809_v58 }
0x2733   :  { %14867 = vst [vmem:[%s21923_s17 + $0x38] sm:$0xff] %v14859_v33 }

</bundles_post_ra>
